<compile_context>
chip_gen: v6e
topology: v6e:2x2x1
jax: 0.10.0
libtpu: 0.0.40
codegen_flags: <defaults>
</compile_context>

<pallas_src>
import functools
import math

import numpy as np
import jax
import jax.numpy as jnp
from jax import lax
from jax.experimental import pallas as pl
from jax.experimental.pallas import tpu as pltpu


# ---------------------------------------------------------------------------
# Kernel 1: fused Conv2d(5x5, stride 2, pad 2) + folded BN + ReLU.
#
# The wrapper space-to-depths the zero-padded NHWC input (2x2 spatial parity
# folded into channels), turning the strided 5x5 conv into 9 dense tap-group
# matmuls over contiguous windows:
#   out[b, oh, ow, :] = sum_{qi,qj<3} xs2d[b, oh+qi, ow+qj, :] @ W9[qi*3+qj]
# where W9[t] has shape (4*Cin, Cout) with zero rows for taps 2*q + r >= 5.
# One grid step handles `tb` whole images; accumulation is in f32.
# ---------------------------------------------------------------------------
def _conv_s2d_kernel(x_ref, w_ref, b_ref, o_ref, *, ho, wo):
    tb = x_ref.shape[0]
    c4 = x_ref.shape[3]
    cout = o_ref.shape[-1]
    rows = tb * ho * wo
    acc = jnp.zeros((rows, cout), jnp.float32)
    for qi in range(3):
        for qj in range(3):
            xt = x_ref[:, qi:qi + ho, qj:qj + wo, :]     # (tb, ho, wo, 4C)
            xt = xt.reshape(rows, c4)                    # lane dim unchanged
            acc = acc + jnp.dot(xt, w_ref[qi * 3 + qj],
                                preferred_element_type=jnp.float32)
    o_ref[...] = jnp.maximum(acc + b_ref[...], 0.0).astype(o_ref.dtype)


def _pad_space_to_depth(x_nhwc, pad=2):
    """(N,H,W,C) -> (N, H/2+pad, W/2+pad, 4C).  Zero-pads spatially, then
    folds the 2x2 spatial parity into channels: out channel = (ri*2+rj)*C+c
    holds padded_input[2*hq+ri, 2*wq+rj, c]."""
    n, h, w, c = x_nhwc.shape
    xp = jnp.pad(x_nhwc, ((0, 0), (pad, pad), (pad, pad), (0, 0)))
    hp, wp = h + 2 * pad, w + 2 * pad
    xr = xp.reshape(n, hp // 2, 2, wp // 2, 2, c)
    xr = xr.transpose(0, 1, 3, 2, 4, 5)                  # (n,hq,wq,ri,rj,c)
    return xr.reshape(n, hp // 2, wp // 2, 4 * c)


def conv5x5s2_bn_relu(x_nhwc, w9, bias, *, tb_target):
    """x_nhwc (N,H,W,Cin) bf16, w9 (9, 4*Cin, Cout) bf16, bias (1, Cout) f32.
    Returns (N, H/2, W/2, Cout) bf16."""
    n, h, w, cin = x_nhwc.shape
    cout = w9.shape[-1]
    ho, wo = h // 2, w // 2
    # Keep the in-kernel window's sublane extent a multiple of 8 so the
    # (tb,ho,wo,4C)->(rows,4C) collapse is layout-trivial (conv3 only).
    wo_pad = wo if wo % 8 == 0 else -(-wo // 8) * 8

    xs = _pad_space_to_depth(x_nhwc)                     # (n, ho+2, wo+2, 4C)
    if wo_pad != wo:
        xs = jnp.pad(xs, ((0, 0), (0, 0), (0, wo_pad - wo), (0, 0)))
    hq, wq_dim = ho + 2, wo_pad + 2

    # >= 2 grid steps whenever n >= 2 (feeds both TensorCores on v7x).
    tb = max(1, min(tb_target, n // 2)) if n >= 2 else 1
    n_pad = -(-n // tb) * tb
    if n_pad != n:
        xs = jnp.pad(xs, ((0, n_pad - n), (0, 0), (0, 0), (0, 0)))

    rows_per_img = ho * wo_pad
    m_tile = tb * rows_per_img
    out = pl.pallas_call(
        functools.partial(_conv_s2d_kernel, ho=ho, wo=wo_pad),
        out_shape=jax.ShapeDtypeStruct((n_pad * rows_per_img, cout),
                                       jnp.bfloat16),
        grid=(n_pad // tb,),
        in_specs=[
            pl.BlockSpec((tb, hq, wq_dim, 4 * cin), lambda b: (b, 0, 0, 0)),
            pl.BlockSpec((9, 4 * cin, cout), lambda b: (0, 0, 0)),
            pl.BlockSpec((1, cout), lambda b: (0, 0)),
        ],
        out_specs=pl.BlockSpec((m_tile, cout), lambda b: (b, 0)),
        compiler_params=pltpu.CompilerParams(
            dimension_semantics=("parallel",)),
    )(xs, w9, bias)

    out = out.reshape(n_pad, ho, wo_pad, cout)
    if n_pad != n:
        out = out[:n]
    if wo_pad != wo:
        out = out[:, :, :wo, :]
    return out


# ---------------------------------------------------------------------------
# Kernel 2: fused fc1 -> ReLU -> fc2, with the fc1 contraction K-tiled so the
# weight stream pipelines with compute; hidden activation stays in VMEM.
# Grid = (M tiles ["parallel"], K tiles ["arbitrary", last]).
# ---------------------------------------------------------------------------
def _mlp_kernel(x_ref, w1_ref, b1_ref, w2_ref, b2_ref, o_ref, acc_ref):
    k = pl.program_id(1)

    @pl.when(k == 0)
    def _():
        acc_ref[...] = jnp.zeros_like(acc_ref)

    acc_ref[...] += jnp.dot(x_ref[...], w1_ref[...],
                            preferred_element_type=jnp.float32)

    @pl.when(k == pl.num_programs(1) - 1)
    def _():
        h = jnp.maximum(acc_ref[...] + b1_ref[...], 0.0)
        o = jnp.dot(h.astype(w2_ref.dtype), w2_ref[...],
                    preferred_element_type=jnp.float32)
        o_ref[...] = (o + b2_ref[...]).astype(o_ref.dtype)


def fused_mlp(x, w1, b1, w2, b2, *, tm_target=256):
    m, kdim = x.shape
    hdim = w1.shape[1]
    ndim = w2.shape[1]
    tk = 512 if kdim % 512 == 0 else kdim
    if m >= tm_target:
        tm = tm_target
    else:
        tm = max(8, -(-m // 8) * 8)
    m_pad = -(-m // tm) * tm
    if m_pad != m:
        x = jnp.pad(x, ((0, m_pad - m), (0, 0)))
    out = pl.pallas_call(
        _mlp_kernel,
        out_shape=jax.ShapeDtypeStruct((m_pad, ndim), jnp.float32),
        grid=(m_pad // tm, kdim // tk),
        in_specs=[
            pl.BlockSpec((tm, tk), lambda i, k: (i, k)),
            pl.BlockSpec((tk, hdim), lambda i, k: (k, 0)),
            pl.BlockSpec((1, hdim), lambda i, k: (0, 0)),
            pl.BlockSpec((hdim, ndim), lambda i, k: (0, 0)),
            pl.BlockSpec((1, ndim), lambda i, k: (0, 0)),
        ],
        out_specs=pl.BlockSpec((tm, ndim), lambda i, k: (i, 0)),
        scratch_shapes=[pltpu.VMEM((tm, hdim), jnp.float32)],
        compiler_params=pltpu.CompilerParams(
            dimension_semantics=("parallel", "arbitrary")),
    )(x, w1, b1, w2, b2)
    return out[:m] if m_pad != m else out


# ---------------------------------------------------------------------------
# One-time parameter prep (host side, numpy): BN folding into weights, tap
# regrouping for the space-to-depth kernel, fc1 column permutation, bf16 cast.
# ---------------------------------------------------------------------------
def prepare_params(p, eps=1e-5):
    def prep_conv(block):
        conv_w, conv_b, gamma, beta, rmean, rvar = (
            np.asarray(a, dtype=np.float32) for a in block)
        cout, cin, k, _ = conv_w.shape                     # k == 5
        scale = gamma / np.sqrt(rvar + eps)
        bias = (conv_b - rmean) * scale + beta             # conv bias + BN
        w_hwio = conv_w.transpose(2, 3, 1, 0) * scale      # BN scale folded
        # Group the 25 taps into 9 (qi,qj) blocks over the 4 spatial parities.
        wq = np.zeros((3, 3, 2, 2, cin, cout), np.float32)
        for qi in range(3):
            for qj in range(3):
                for ri in range(2):
                    for rj in range(2):
                        ki, kj = 2 * qi + ri, 2 * qj + rj
                        if ki < k and kj < k:
                            wq[qi, qj, ri, rj] = w_hwio[ki, kj]
        wq = wq.reshape(9, 4 * cin, cout)
        return {"w": jnp.asarray(wq, jnp.bfloat16),
                "b": jnp.asarray(bias.reshape(1, -1), jnp.float32)}

    q = {"conv1": prep_conv(p["conv1"]),
         "conv2": prep_conv(p["conv2"]),
         "conv3": prep_conv(p["conv3"])}
    # fc1 columns: NCHW-flatten order (c,h,w) -> NHWC-flatten order (h,w,c).
    fc1 = np.asarray(p["fc1_w"], dtype=np.float32)          # (512, 4096)
    w1 = fc1.reshape(512, 256, 4, 4).transpose(0, 2, 3, 1).reshape(512, 4096)
    q["fc1_w"] = jnp.asarray(w1.T, jnp.bfloat16)             # (4096, 512)
    q["fc1_b"] = jnp.asarray(np.asarray(p["fc1_b"]).reshape(1, -1), jnp.float32)
    q["fc2_w"] = jnp.asarray(np.asarray(p["fc2_w"]).T, jnp.bfloat16)  # (512,128)
    q["fc2_b"] = jnp.asarray(np.asarray(p["fc2_b"]).reshape(1, -1), jnp.float32)
    return q


# ---------------------------------------------------------------------------
# Forward pass (jitted): NCHW -> NHWC bf16 once, three fused conv kernels,
# then the fused K-tiled MLP.
# ---------------------------------------------------------------------------
def net_forward(x_nchw, q):
    n = x_nchw.shape[0]
    x = x_nchw.transpose(0, 2, 3, 1).astype(jnp.bfloat16)   # NHWC, bf16
    x = conv5x5s2_bn_relu(x, q["conv1"]["w"], q["conv1"]["b"], tb_target=4)
    x = conv5x5s2_bn_relu(x, q["conv2"]["w"], q["conv2"]["b"], tb_target=8)
    x = conv5x5s2_bn_relu(x, q["conv3"]["w"], q["conv3"]["b"], tb_target=16)
    flat = x.reshape(n, -1)                                  # NHWC flatten
    return fused_mlp(flat, q["fc1_w"], q["fc1_b"], q["fc2_w"], q["fc2_b"])


# ---------------------------------------------------------------------------
# Deterministic parameter init (shapes from Net.__init__, PyTorch layout)
# ---------------------------------------------------------------------------
def init_params(key):
    keys = iter(jax.random.split(key, 22))

    def uni(k, shape, bound):
        return jax.random.uniform(k, shape, jnp.float32, -bound, bound)

    def conv_block(cout, cin, ksz):
        bound = 1.0 / math.sqrt(cin * ksz * ksz)
        w = uni(next(keys), (cout, cin, ksz, ksz), bound)
        b = uni(next(keys), (cout,), bound)
        gamma = 1.0 + 0.1 * jax.random.normal(next(keys), (cout,), jnp.float32)
        beta = 0.05 * jax.random.normal(next(keys), (cout,), jnp.float32)
        rmean = 0.1 * jax.random.normal(next(keys), (cout,), jnp.float32)
        rvar = 1.0 + 0.1 * jax.random.uniform(next(keys), (cout,), jnp.float32)
        return (w, b, gamma, beta, rmean, rvar)

    p = {
        "conv1": conv_block(64, 3, 5),
        "conv2": conv_block(128, 64, 5),
        "conv3": conv_block(256, 128, 5),
    }
    b1 = 1.0 / math.sqrt(256 * 4 * 4)
    p["fc1_w"] = uni(next(keys), (512, 256 * 4 * 4), b1)
    p["fc1_b"] = uni(next(keys), (512,), b1)
    b2 = 1.0 / math.sqrt(512)
    p["fc2_w"] = uni(next(keys), (128, 512), b2)
    p["fc2_b"] = uni(next(keys), (128,), b2)
    return p


# ---------------------------------------------------------------------------
# Pure-JAX reference (f32, NCHW) for correctness check
# ---------------------------------------------------------------------------
def reference_forward(x, p, eps=1e-5):
    def block(x, w, b, gamma, beta, rmean, rvar):
        y = lax.conv_general_dilated(
            x, w, window_strides=(2, 2), padding=[(2, 2), (2, 2)],
            dimension_numbers=("NCHW", "OIHW", "NCHW"))
        y = y + b[None, :, None, None]
        y = (y - rmean[None, :, None, None]) / jnp.sqrt(
            rvar[None, :, None, None] + eps)
        y = y * gamma[None, :, None, None] + beta[None, :, None, None]
        return jnp.maximum(y, 0.0)

    x = block(x, *p["conv1"])
    x = block(x, *p["conv2"])
    x = block(x, *p["conv3"])
    flat = x.reshape(x.shape[0], -1)
    h = jnp.maximum(flat @ p["fc1_w"].T + p["fc1_b"], 0.0)
    return h @ p["fc2_w"].T + p["fc2_b"]


if __name__ == "__main__":
    key = jax.random.PRNGKey(0)
    kx, kp = jax.random.split(key)
    # Linear(256*4*4, ...) implies 32x32 spatial input (32 -> 16 -> 8 -> 4).
    x = jax.random.normal(kx, (2, 3, 32, 32), jnp.float32)
    params = init_params(kp)
    prepped = prepare_params(params)          # one-time, host-side

    fwd = jax.jit(net_forward)
    out = jax.block_until_ready(fwd(x, prepped))
    assert out.shape == (2, 128) and out.dtype == jnp.float32

    ref = jax.block_until_ready(reference_forward(x, params))
    max_err = float(jnp.max(jnp.abs(out - ref)))
    assert max_err < 5e-2, f"mismatch vs reference: {max_err}"

    print("KERNEL_OK")
</pallas_src>

<mosaic_0001>
module attributes {stable_mosaic.version = 11 : i64} {
  func.func @_conv_s2d_kernel(%arg0: i32, %arg1: memref<1x18x18x12xbf16, #tpu.memory_space<vmem>>, %arg2: memref<9x12x64xbf16, #tpu.memory_space<vmem>>, %arg3: memref<1x64xf32, #tpu.memory_space<vmem>>, %arg4: memref<256x64xbf16, #tpu.memory_space<vmem>>) attributes {dimension_semantics = [#tpu.dimension_semantics<parallel>], iteration_bounds = array<i64: 2>, scalar_prefetch = 0 : i64, scratch_operands = 0 : i64, tpu.core_type = #tpu.core_type<tc>, window_params = [{transform_indices = @transform_0, window_bounds = array<i64: 1, 18, 18, 12>}, {pipeline_mode = #tpu.pipeline_mode<synchronous>, transform_indices = @transform_1, window_bounds = array<i64: 9, 12, 64>}, {pipeline_mode = #tpu.pipeline_mode<synchronous>, transform_indices = @transform_2, window_bounds = array<i64: 1, 64>}, {transform_indices = @transform_3, window_bounds = array<i64: 256, 64>}]} {
    %cst = arith.constant 0.000000e+00 : f32
    %0 = vector.broadcast %cst : f32 to vector<256x64xf32>
    %c0 = arith.constant 0 : index
    %c0_0 = arith.constant 0 : index
    %c0_1 = arith.constant 0 : index
    %c0_2 = arith.constant 0 : index
    %1 = vector.load %arg1[%c0, %c0_0, %c0_1, %c0_2] : memref<1x18x18x12xbf16, #tpu.memory_space<vmem>>, vector<1x16x16x12xbf16>
    %2 = vector.shape_cast %1 : vector<1x16x16x12xbf16> to vector<256x12xbf16>
    %c0_3 = arith.constant 0 : index
    %c0_4 = arith.constant 0 : index
    %c0_5 = arith.constant 0 : index
    %3 = vector.load %arg2[%c0_3, %c0_4, %c0_5] : memref<9x12x64xbf16, #tpu.memory_space<vmem>>, vector<1x12x64xbf16>
    %4 = vector.shape_cast %3 : vector<1x12x64xbf16> to vector<12x64xbf16>
    %cst_6 = arith.constant dense<0.000000e+00> : vector<256x64xf32>
    %5 = tpu.matmul %2, %4, %cst_6 {dimension_numbers = #tpu.dot_dimension_numbers<[1], [0], [0], [1], [0, 0, 1, 1], [], []>} : vector<256x12xbf16>, vector<12x64xbf16>, vector<256x64xf32> -> vector<256x64xf32>
    %6 = arith.addf %0, %5 : vector<256x64xf32>
    %c0_7 = arith.constant 0 : index
    %c0_8 = arith.constant 0 : index
    %c1 = arith.constant 1 : index
    %c0_9 = arith.constant 0 : index
    %7 = vector.load %arg1[%c0_7, %c0_8, %c1, %c0_9] : memref<1x18x18x12xbf16, #tpu.memory_space<vmem>>, vector<1x16x16x12xbf16>
    %8 = vector.shape_cast %7 : vector<1x16x16x12xbf16> to vector<256x12xbf16>
    %c1_10 = arith.constant 1 : index
    %c0_11 = arith.constant 0 : index
    %c0_12 = arith.constant 0 : index
    %9 = vector.load %arg2[%c1_10, %c0_11, %c0_12] : memref<9x12x64xbf16, #tpu.memory_space<vmem>>, vector<1x12x64xbf16>
    %10 = vector.shape_cast %9 : vector<1x12x64xbf16> to vector<12x64xbf16>
    %cst_13 = arith.constant dense<0.000000e+00> : vector<256x64xf32>
    %11 = tpu.matmul %8, %10, %cst_13 {dimension_numbers = #tpu.dot_dimension_numbers<[1], [0], [0], [1], [0, 0, 1, 1], [], []>} : vector<256x12xbf16>, vector<12x64xbf16>, vector<256x64xf32> -> vector<256x64xf32>
    %12 = arith.addf %6, %11 : vector<256x64xf32>
    %c0_14 = arith.constant 0 : index
    %c0_15 = arith.constant 0 : index
    %c2 = arith.constant 2 : index
    %c0_16 = arith.constant 0 : index
    %13 = vector.load %arg1[%c0_14, %c0_15, %c2, %c0_16] : memref<1x18x18x12xbf16, #tpu.memory_space<vmem>>, vector<1x16x16x12xbf16>
    %14 = vector.shape_cast %13 : vector<1x16x16x12xbf16> to vector<256x12xbf16>
    %c2_17 = arith.constant 2 : index
    %c0_18 = arith.constant 0 : index
    %c0_19 = arith.constant 0 : index
    %15 = vector.load %arg2[%c2_17, %c0_18, %c0_19] : memref<9x12x64xbf16, #tpu.memory_space<vmem>>, vector<1x12x64xbf16>
    %16 = vector.shape_cast %15 : vector<1x12x64xbf16> to vector<12x64xbf16>
    %cst_20 = arith.constant dense<0.000000e+00> : vector<256x64xf32>
    %17 = tpu.matmul %14, %16, %cst_20 {dimension_numbers = #tpu.dot_dimension_numbers<[1], [0], [0], [1], [0, 0, 1, 1], [], []>} : vector<256x12xbf16>, vector<12x64xbf16>, vector<256x64xf32> -> vector<256x64xf32>
    %18 = arith.addf %12, %17 : vector<256x64xf32>
    %c0_21 = arith.constant 0 : index
    %c1_22 = arith.constant 1 : index
    %c0_23 = arith.constant 0 : index
    %c0_24 = arith.constant 0 : index
    %19 = vector.load %arg1[%c0_21, %c1_22, %c0_23, %c0_24] : memref<1x18x18x12xbf16, #tpu.memory_space<vmem>>, vector<1x16x16x12xbf16>
    %20 = vector.shape_cast %19 : vector<1x16x16x12xbf16> to vector<256x12xbf16>
    %c3 = arith.constant 3 : index
    %c0_25 = arith.constant 0 : index
    %c0_26 = arith.constant 0 : index
    %21 = vector.load %arg2[%c3, %c0_25, %c0_26] : memref<9x12x64xbf16, #tpu.memory_space<vmem>>, vector<1x12x64xbf16>
    %22 = vector.shape_cast %21 : vector<1x12x64xbf16> to vector<12x64xbf16>
    %cst_27 = arith.constant dense<0.000000e+00> : vector<256x64xf32>
    %23 = tpu.matmul %20, %22, %cst_27 {dimension_numbers = #tpu.dot_dimension_numbers<[1], [0], [0], [1], [0, 0, 1, 1], [], []>} : vector<256x12xbf16>, vector<12x64xbf16>, vector<256x64xf32> -> vector<256x64xf32>
    %24 = arith.addf %18, %23 : vector<256x64xf32>
    %c0_28 = arith.constant 0 : index
    %c1_29 = arith.constant 1 : index
    %c1_30 = arith.constant 1 : index
    %c0_31 = arith.constant 0 : index
    %25 = vector.load %arg1[%c0_28, %c1_29, %c1_30, %c0_31] : memref<1x18x18x12xbf16, #tpu.memory_space<vmem>>, vector<1x16x16x12xbf16>
    %26 = vector.shape_cast %25 : vector<1x16x16x12xbf16> to vector<256x12xbf16>
    %c4 = arith.constant 4 : index
    %c0_32 = arith.constant 0 : index
    %c0_33 = arith.constant 0 : index
    %27 = vector.load %arg2[%c4, %c0_32, %c0_33] : memref<9x12x64xbf16, #tpu.memory_space<vmem>>, vector<1x12x64xbf16>
    %28 = vector.shape_cast %27 : vector<1x12x64xbf16> to vector<12x64xbf16>
    %cst_34 = arith.constant dense<0.000000e+00> : vector<256x64xf32>
    %29 = tpu.matmul %26, %28, %cst_34 {dimension_numbers = #tpu.dot_dimension_numbers<[1], [0], [0], [1], [0, 0, 1, 1], [], []>} : vector<256x12xbf16>, vector<12x64xbf16>, vector<256x64xf32> -> vector<256x64xf32>
    %30 = arith.addf %24, %29 : vector<256x64xf32>
    %c0_35 = arith.constant 0 : index
    %c1_36 = arith.constant 1 : index
    %c2_37 = arith.constant 2 : index
    %c0_38 = arith.constant 0 : index
    %31 = vector.load %arg1[%c0_35, %c1_36, %c2_37, %c0_38] : memref<1x18x18x12xbf16, #tpu.memory_space<vmem>>, vector<1x16x16x12xbf16>
    %32 = vector.shape_cast %31 : vector<1x16x16x12xbf16> to vector<256x12xbf16>
    %c5 = arith.constant 5 : index
    %c0_39 = arith.constant 0 : index
    %c0_40 = arith.constant 0 : index
    %33 = vector.load %arg2[%c5, %c0_39, %c0_40] : memref<9x12x64xbf16, #tpu.memory_space<vmem>>, vector<1x12x64xbf16>
    %34 = vector.shape_cast %33 : vector<1x12x64xbf16> to vector<12x64xbf16>
    %cst_41 = arith.constant dense<0.000000e+00> : vector<256x64xf32>
    %35 = tpu.matmul %32, %34, %cst_41 {dimension_numbers = #tpu.dot_dimension_numbers<[1], [0], [0], [1], [0, 0, 1, 1], [], []>} : vector<256x12xbf16>, vector<12x64xbf16>, vector<256x64xf32> -> vector<256x64xf32>
    %36 = arith.addf %30, %35 : vector<256x64xf32>
    %c0_42 = arith.constant 0 : index
    %c2_43 = arith.constant 2 : index
    %c0_44 = arith.constant 0 : index
    %c0_45 = arith.constant 0 : index
    %37 = vector.load %arg1[%c0_42, %c2_43, %c0_44, %c0_45] : memref<1x18x18x12xbf16, #tpu.memory_space<vmem>>, vector<1x16x16x12xbf16>
    %38 = vector.shape_cast %37 : vector<1x16x16x12xbf16> to vector<256x12xbf16>
    %c6 = arith.constant 6 : index
    %c0_46 = arith.constant 0 : index
    %c0_47 = arith.constant 0 : index
    %39 = vector.load %arg2[%c6, %c0_46, %c0_47] : memref<9x12x64xbf16, #tpu.memory_space<vmem>>, vector<1x12x64xbf16>
    %40 = vector.shape_cast %39 : vector<1x12x64xbf16> to vector<12x64xbf16>
    %cst_48 = arith.constant dense<0.000000e+00> : vector<256x64xf32>
    %41 = tpu.matmul %38, %40, %cst_48 {dimension_numbers = #tpu.dot_dimension_numbers<[1], [0], [0], [1], [0, 0, 1, 1], [], []>} : vector<256x12xbf16>, vector<12x64xbf16>, vector<256x64xf32> -> vector<256x64xf32>
    %42 = arith.addf %36, %41 : vector<256x64xf32>
    %c0_49 = arith.constant 0 : index
    %c2_50 = arith.constant 2 : index
    %c1_51 = arith.constant 1 : index
    %c0_52 = arith.constant 0 : index
    %43 = vector.load %arg1[%c0_49, %c2_50, %c1_51, %c0_52] : memref<1x18x18x12xbf16, #tpu.memory_space<vmem>>, vector<1x16x16x12xbf16>
    %44 = vector.shape_cast %43 : vector<1x16x16x12xbf16> to vector<256x12xbf16>
    %c7 = arith.constant 7 : index
    %c0_53 = arith.constant 0 : index
    %c0_54 = arith.constant 0 : index
    %45 = vector.load %arg2[%c7, %c0_53, %c0_54] : memref<9x12x64xbf16, #tpu.memory_space<vmem>>, vector<1x12x64xbf16>
    %46 = vector.shape_cast %45 : vector<1x12x64xbf16> to vector<12x64xbf16>
    %cst_55 = arith.constant dense<0.000000e+00> : vector<256x64xf32>
    %47 = tpu.matmul %44, %46, %cst_55 {dimension_numbers = #tpu.dot_dimension_numbers<[1], [0], [0], [1], [0, 0, 1, 1], [], []>} : vector<256x12xbf16>, vector<12x64xbf16>, vector<256x64xf32> -> vector<256x64xf32>
    %48 = arith.addf %42, %47 : vector<256x64xf32>
    %c0_56 = arith.constant 0 : index
    %c2_57 = arith.constant 2 : index
    %c2_58 = arith.constant 2 : index
    %c0_59 = arith.constant 0 : index
    %49 = vector.load %arg1[%c0_56, %c2_57, %c2_58, %c0_59] : memref<1x18x18x12xbf16, #tpu.memory_space<vmem>>, vector<1x16x16x12xbf16>
    %50 = vector.shape_cast %49 : vector<1x16x16x12xbf16> to vector<256x12xbf16>
    %c8 = arith.constant 8 : index
    %c0_60 = arith.constant 0 : index
    %c0_61 = arith.constant 0 : index
    %51 = vector.load %arg2[%c8, %c0_60, %c0_61] : memref<9x12x64xbf16, #tpu.memory_space<vmem>>, vector<1x12x64xbf16>
    %52 = vector.shape_cast %51 : vector<1x12x64xbf16> to vector<12x64xbf16>
    %cst_62 = arith.constant dense<0.000000e+00> : vector<256x64xf32>
    %53 = tpu.matmul %50, %52, %cst_62 {dimension_numbers = #tpu.dot_dimension_numbers<[1], [0], [0], [1], [0, 0, 1, 1], [], []>} : vector<256x12xbf16>, vector<12x64xbf16>, vector<256x64xf32> -> vector<256x64xf32>
    %54 = arith.addf %48, %53 : vector<256x64xf32>
    %c0_63 = arith.constant 0 : index
    %c0_64 = arith.constant 0 : index
    %55 = vector.load %arg3[%c0_63, %c0_64] : memref<1x64xf32, #tpu.memory_space<vmem>>, vector<1x64xf32>
    %56 = vector.broadcast %55 : vector<1x64xf32> to vector<256x64xf32>
    %57 = arith.addf %54, %56 : vector<256x64xf32>
    %cst_65 = arith.constant 0.000000e+00 : f32
    %58 = vector.broadcast %cst_65 : f32 to vector<256x64xf32>
    %59 = arith.maximumf %57, %58 : vector<256x64xf32>
    %60 = arith.truncf %59 : vector<256x64xf32> to vector<256x64xbf16>
    %c0_66 = arith.constant 0 : index
    %c0_67 = arith.constant 0 : index
    %61 = vector.load %arg4[%c0_66, %c0_67] : memref<256x64xbf16, #tpu.memory_space<vmem>>, vector<256x64xbf16>
    tpu.vector_store %arg4[%c0_66, %c0_67], %60 {strides = array<i32>} : memref<256x64xbf16, #tpu.memory_space<vmem>>, vector<256x64xbf16>,
    return
  }
  func.func @transform_0(%arg0: i32) -> (i32, i32, i32, i32) {
    %c0_i32 = arith.constant 0 : i32
    %c0_i32_0 = arith.constant 0 : i32
    %c0_i32_1 = arith.constant 0 : i32
    %c0_i32_2 = arith.constant 0 : i32
    return %arg0, %c0_i32, %c0_i32_0, %c0_i32_1 : i32, i32, i32, i32
  }
  func.func @transform_1(%arg0: i32) -> (i32, i32, i32) {
    %c0_i32 = arith.constant 0 : i32
    %c0_i32_0 = arith.constant 0 : i32
    %c0_i32_1 = arith.constant 0 : i32
    %c0_i32_2 = arith.constant 0 : i32
    return %c0_i32, %c0_i32_0, %c0_i32_1 : i32, i32, i32
  }
  func.func @transform_2(%arg0: i32) -> (i32, i32) {
    %c0_i32 = arith.constant 0 : i32
    %c0_i32_0 = arith.constant 0 : i32
    %c0_i32_1 = arith.constant 0 : i32
    return %c0_i32, %c0_i32_0 : i32, i32
  }
  func.func @transform_3(%arg0: i32) -> (i32, i32) {
    %c0_i32 = arith.constant 0 : i32
    %c0_i32_0 = arith.constant 0 : i32
    return %arg0, %c0_i32 : i32, i32
  }
}

module attributes {stable_mosaic.version = 11 : i64} {
  func.func @_conv_s2d_kernel(%arg0: i32, %arg1: memref<1x10x10x256xbf16, #tpu.memory_space<vmem>>, %arg2: memref<9x256x128xbf16, #tpu.memory_space<vmem>>, %arg3: memref<1x128xf32, #tpu.memory_space<vmem>>, %arg4: memref<64x128xbf16, #tpu.memory_space<vmem>>) attributes {dimension_semantics = [#tpu.dimension_semantics<parallel>], iteration_bounds = array<i64: 2>, scalar_prefetch = 0 : i64, scratch_operands = 0 : i64, tpu.core_type = #tpu.core_type<tc>, window_params = [{transform_indices = @transform_0, window_bounds = array<i64: 1, 10, 10, 256>}, {pipeline_mode = #tpu.pipeline_mode<synchronous>, transform_indices = @transform_1, window_bounds = array<i64: 9, 256, 128>}, {pipeline_mode = #tpu.pipeline_mode<synchronous>, transform_indices = @transform_2, window_bounds = array<i64: 1, 128>}, {transform_indices = @transform_3, window_bounds = array<i64: 64, 128>}]} {
    %cst = arith.constant 0.000000e+00 : f32
    %0 = vector.broadcast %cst : f32 to vector<64x128xf32>
    %c0 = arith.constant 0 : index
    %c0_0 = arith.constant 0 : index
    %c0_1 = arith.constant 0 : index
    %c0_2 = arith.constant 0 : index
    %1 = vector.load %arg1[%c0, %c0_0, %c0_1, %c0_2] : memref<1x10x10x256xbf16, #tpu.memory_space<vmem>>, vector<1x8x8x256xbf16>
    %2 = vector.shape_cast %1 : vector<1x8x8x256xbf16> to vector<64x256xbf16>
    %c0_3 = arith.constant 0 : index
    %c0_4 = arith.constant 0 : index
    %c0_5 = arith.constant 0 : index
    %3 = vector.load %arg2[%c0_3, %c0_4, %c0_5] : memref<9x256x128xbf16, #tpu.memory_space<vmem>>, vector<1x256x128xbf16>
    %4 = vector.shape_cast %3 : vector<1x256x128xbf16> to vector<256x128xbf16>
    %cst_6 = arith.constant dense<0.000000e+00> : vector<64x128xf32>
    %5 = tpu.matmul %2, %4, %cst_6 {dimension_numbers = #tpu.dot_dimension_numbers<[1], [0], [0], [1], [0, 0, 1, 1], [], []>} : vector<64x256xbf16>, vector<256x128xbf16>, vector<64x128xf32> -> vector<64x128xf32>
    %6 = arith.addf %0, %5 : vector<64x128xf32>
    %c0_7 = arith.constant 0 : index
    %c0_8 = arith.constant 0 : index
    %c1 = arith.constant 1 : index
    %c0_9 = arith.constant 0 : index
    %7 = vector.load %arg1[%c0_7, %c0_8, %c1, %c0_9] : memref<1x10x10x256xbf16, #tpu.memory_space<vmem>>, vector<1x8x8x256xbf16>
    %8 = vector.shape_cast %7 : vector<1x8x8x256xbf16> to vector<64x256xbf16>
    %c1_10 = arith.constant 1 : index
    %c0_11 = arith.constant 0 : index
    %c0_12 = arith.constant 0 : index
    %9 = vector.load %arg2[%c1_10, %c0_11, %c0_12] : memref<9x256x128xbf16, #tpu.memory_space<vmem>>, vector<1x256x128xbf16>
    %10 = vector.shape_cast %9 : vector<1x256x128xbf16> to vector<256x128xbf16>
    %cst_13 = arith.constant dense<0.000000e+00> : vector<64x128xf32>
    %11 = tpu.matmul %8, %10, %cst_13 {dimension_numbers = #tpu.dot_dimension_numbers<[1], [0], [0], [1], [0, 0, 1, 1], [], []>} : vector<64x256xbf16>, vector<256x128xbf16>, vector<64x128xf32> -> vector<64x128xf32>
    %12 = arith.addf %6, %11 : vector<64x128xf32>
    %c0_14 = arith.constant 0 : index
    %c0_15 = arith.constant 0 : index
    %c2 = arith.constant 2 : index
    %c0_16 = arith.constant 0 : index
    %13 = vector.load %arg1[%c0_14, %c0_15, %c2, %c0_16] : memref<1x10x10x256xbf16, #tpu.memory_space<vmem>>, vector<1x8x8x256xbf16>
    %14 = vector.shape_cast %13 : vector<1x8x8x256xbf16> to vector<64x256xbf16>
    %c2_17 = arith.constant 2 : index
    %c0_18 = arith.constant 0 : index
    %c0_19 = arith.constant 0 : index
    %15 = vector.load %arg2[%c2_17, %c0_18, %c0_19] : memref<9x256x128xbf16, #tpu.memory_space<vmem>>, vector<1x256x128xbf16>
    %16 = vector.shape_cast %15 : vector<1x256x128xbf16> to vector<256x128xbf16>
    %cst_20 = arith.constant dense<0.000000e+00> : vector<64x128xf32>
    %17 = tpu.matmul %14, %16, %cst_20 {dimension_numbers = #tpu.dot_dimension_numbers<[1], [0], [0], [1], [0, 0, 1, 1], [], []>} : vector<64x256xbf16>, vector<256x128xbf16>, vector<64x128xf32> -> vector<64x128xf32>
    %18 = arith.addf %12, %17 : vector<64x128xf32>
    %c0_21 = arith.constant 0 : index
    %c1_22 = arith.constant 1 : index
    %c0_23 = arith.constant 0 : index
    %c0_24 = arith.constant 0 : index
    %19 = vector.load %arg1[%c0_21, %c1_22, %c0_23, %c0_24] : memref<1x10x10x256xbf16, #tpu.memory_space<vmem>>, vector<1x8x8x256xbf16>
    %20 = vector.shape_cast %19 : vector<1x8x8x256xbf16> to vector<64x256xbf16>
    %c3 = arith.constant 3 : index
    %c0_25 = arith.constant 0 : index
    %c0_26 = arith.constant 0 : index
    %21 = vector.load %arg2[%c3, %c0_25, %c0_26] : memref<9x256x128xbf16, #tpu.memory_space<vmem>>, vector<1x256x128xbf16>
    %22 = vector.shape_cast %21 : vector<1x256x128xbf16> to vector<256x128xbf16>
    %cst_27 = arith.constant dense<0.000000e+00> : vector<64x128xf32>
    %23 = tpu.matmul %20, %22, %cst_27 {dimension_numbers = #tpu.dot_dimension_numbers<[1], [0], [0], [1], [0, 0, 1, 1], [], []>} : vector<64x256xbf16>, vector<256x128xbf16>, vector<64x128xf32> -> vector<64x128xf32>
    %24 = arith.addf %18, %23 : vector<64x128xf32>
    %c0_28 = arith.constant 0 : index
    %c1_29 = arith.constant 1 : index
    %c1_30 = arith.constant 1 : index
    %c0_31 = arith.constant 0 : index
    %25 = vector.load %arg1[%c0_28, %c1_29, %c1_30, %c0_31] : memref<1x10x10x256xbf16, #tpu.memory_space<vmem>>, vector<1x8x8x256xbf16>
    %26 = vector.shape_cast %25 : vector<1x8x8x256xbf16> to vector<64x256xbf16>
    %c4 = arith.constant 4 : index
    %c0_32 = arith.constant 0 : index
    %c0_33 = arith.constant 0 : index
    %27 = vector.load %arg2[%c4, %c0_32, %c0_33] : memref<9x256x128xbf16, #tpu.memory_space<vmem>>, vector<1x256x128xbf16>
    %28 = vector.shape_cast %27 : vector<1x256x128xbf16> to vector<256x128xbf16>
    %cst_34 = arith.constant dense<0.000000e+00> : vector<64x128xf32>
    %29 = tpu.matmul %26, %28, %cst_34 {dimension_numbers = #tpu.dot_dimension_numbers<[1], [0], [0], [1], [0, 0, 1, 1], [], []>} : vector<64x256xbf16>, vector<256x128xbf16>, vector<64x128xf32> -> vector<64x128xf32>
    %30 = arith.addf %24, %29 : vector<64x128xf32>
    %c0_35 = arith.constant 0 : index
    %c1_36 = arith.constant 1 : index
    %c2_37 = arith.constant 2 : index
    %c0_38 = arith.constant 0 : index
    %31 = vector.load %arg1[%c0_35, %c1_36, %c2_37, %c0_38] : memref<1x10x10x256xbf16, #tpu.memory_space<vmem>>, vector<1x8x8x256xbf16>
    %32 = vector.shape_cast %31 : vector<1x8x8x256xbf16> to vector<64x256xbf16>
    %c5 = arith.constant 5 : index
    %c0_39 = arith.constant 0 : index
    %c0_40 = arith.constant 0 : index
    %33 = vector.load %arg2[%c5, %c0_39, %c0_40] : memref<9x256x128xbf16, #tpu.memory_space<vmem>>, vector<1x256x128xbf16>
    %34 = vector.shape_cast %33 : vector<1x256x128xbf16> to vector<256x128xbf16>
    %cst_41 = arith.constant dense<0.000000e+00> : vector<64x128xf32>
    %35 = tpu.matmul %32, %34, %cst_41 {dimension_numbers = #tpu.dot_dimension_numbers<[1], [0], [0], [1], [0, 0, 1, 1], [], []>} : vector<64x256xbf16>, vector<256x128xbf16>, vector<64x128xf32> -> vector<64x128xf32>
    %36 = arith.addf %30, %35 : vector<64x128xf32>
    %c0_42 = arith.constant 0 : index
    %c2_43 = arith.constant 2 : index
    %c0_44 = arith.constant 0 : index
    %c0_45 = arith.constant 0 : index
    %37 = vector.load %arg1[%c0_42, %c2_43, %c0_44, %c0_45] : memref<1x10x10x256xbf16, #tpu.memory_space<vmem>>, vector<1x8x8x256xbf16>
    %38 = vector.shape_cast %37 : vector<1x8x8x256xbf16> to vector<64x256xbf16>
    %c6 = arith.constant 6 : index
    %c0_46 = arith.constant 0 : index
    %c0_47 = arith.constant 0 : index
    %39 = vector.load %arg2[%c6, %c0_46, %c0_47] : memref<9x256x128xbf16, #tpu.memory_space<vmem>>, vector<1x256x128xbf16>
    %40 = vector.shape_cast %39 : vector<1x256x128xbf16> to vector<256x128xbf16>
    %cst_48 = arith.constant dense<0.000000e+00> : vector<64x128xf32>
    %41 = tpu.matmul %38, %40, %cst_48 {dimension_numbers = #tpu.dot_dimension_numbers<[1], [0], [0], [1], [0, 0, 1, 1], [], []>} : vector<64x256xbf16>, vector<256x128xbf16>, vector<64x128xf32> -> vector<64x128xf32>
    %42 = arith.addf %36, %41 : vector<64x128xf32>
    %c0_49 = arith.constant 0 : index
    %c2_50 = arith.constant 2 : index
    %c1_51 = arith.constant 1 : index
    %c0_52 = arith.constant 0 : index
    %43 = vector.load %arg1[%c0_49, %c2_50, %c1_51, %c0_52] : memref<1x10x10x256xbf16, #tpu.memory_space<vmem>>, vector<1x8x8x256xbf16>
    %44 = vector.shape_cast %43 : vector<1x8x8x256xbf16> to vector<64x256xbf16>
    %c7 = arith.constant 7 : index
    %c0_53 = arith.constant 0 : index
    %c0_54 = arith.constant 0 : index
    %45 = vector.load %arg2[%c7, %c0_53, %c0_54] : memref<9x256x128xbf16, #tpu.memory_space<vmem>>, vector<1x256x128xbf16>
    %46 = vector.shape_cast %45 : vector<1x256x128xbf16> to vector<256x128xbf16>
    %cst_55 = arith.constant dense<0.000000e+00> : vector<64x128xf32>
    %47 = tpu.matmul %44, %46, %cst_55 {dimension_numbers = #tpu.dot_dimension_numbers<[1], [0], [0], [1], [0, 0, 1, 1], [], []>} : vector<64x256xbf16>, vector<256x128xbf16>, vector<64x128xf32> -> vector<64x128xf32>
    %48 = arith.addf %42, %47 : vector<64x128xf32>
    %c0_56 = arith.constant 0 : index
    %c2_57 = arith.constant 2 : index
    %c2_58 = arith.constant 2 : index
    %c0_59 = arith.constant 0 : index
    %49 = vector.load %arg1[%c0_56, %c2_57, %c2_58, %c0_59] : memref<1x10x10x256xbf16, #tpu.memory_space<vmem>>, vector<1x8x8x256xbf16>
    %50 = vector.shape_cast %49 : vector<1x8x8x256xbf16> to vector<64x256xbf16>
    %c8 = arith.constant 8 : index
    %c0_60 = arith.constant 0 : index
    %c0_61 = arith.constant 0 : index
    %51 = vector.load %arg2[%c8, %c0_60, %c0_61] : memref<9x256x128xbf16, #tpu.memory_space<vmem>>, vector<1x256x128xbf16>
    %52 = vector.shape_cast %51 : vector<1x256x128xbf16> to vector<256x128xbf16>
    %cst_62 = arith.constant dense<0.000000e+00> : vector<64x128xf32>
    %53 = tpu.matmul %50, %52, %cst_62 {dimension_numbers = #tpu.dot_dimension_numbers<[1], [0], [0], [1], [0, 0, 1, 1], [], []>} : vector<64x256xbf16>, vector<256x128xbf16>, vector<64x128xf32> -> vector<64x128xf32>
    %54 = arith.addf %48, %53 : vector<64x128xf32>
    %c0_63 = arith.constant 0 : index
    %c0_64 = arith.constant 0 : index
    %55 = vector.load %arg3[%c0_63, %c0_64] : memref<1x128xf32, #tpu.memory_space<vmem>>, vector<1x128xf32>
    %56 = vector.broadcast %55 : vector<1x128xf32> to vector<64x128xf32>
    %57 = arith.addf %54, %56 : vector<64x128xf32>
    %cst_65 = arith.constant 0.000000e+00 : f32
    %58 = vector.broadcast %cst_65 : f32 to vector<64x128xf32>
    %59 = arith.maximumf %57, %58 : vector<64x128xf32>
    %60 = arith.truncf %59 : vector<64x128xf32> to vector<64x128xbf16>
    %c0_66 = arith.constant 0 : index
    %c0_67 = arith.constant 0 : index
    %61 = vector.load %arg4[%c0_66, %c0_67] : memref<64x128xbf16, #tpu.memory_space<vmem>>, vector<64x128xbf16>
    tpu.vector_store %arg4[%c0_66, %c0_67], %60 {strides = array<i32>} : memref<64x128xbf16, #tpu.memory_space<vmem>>, vector<64x128xbf16>,
    return
  }
  func.func @transform_0(%arg0: i32) -> (i32, i32, i32, i32) {
    %c0_i32 = arith.constant 0 : i32
    %c0_i32_0 = arith.constant 0 : i32
    %c0_i32_1 = arith.constant 0 : i32
    %c0_i32_2 = arith.constant 0 : i32
    return %arg0, %c0_i32, %c0_i32_0, %c0_i32_1 : i32, i32, i32, i32
  }
  func.func @transform_1(%arg0: i32) -> (i32, i32, i32) {
    %c0_i32 = arith.constant 0 : i32
    %c0_i32_0 = arith.constant 0 : i32
    %c0_i32_1 = arith.constant 0 : i32
    %c0_i32_2 = arith.constant 0 : i32
    return %c0_i32, %c0_i32_0, %c0_i32_1 : i32, i32, i32
  }
  func.func @transform_2(%arg0: i32) -> (i32, i32) {
    %c0_i32 = arith.constant 0 : i32
    %c0_i32_0 = arith.constant 0 : i32
    %c0_i32_1 = arith.constant 0 : i32
    return %c0_i32, %c0_i32_0 : i32, i32
  }
  func.func @transform_3(%arg0: i32) -> (i32, i32) {
    %c0_i32 = arith.constant 0 : i32
    %c0_i32_0 = arith.constant 0 : i32
    return %arg0, %c0_i32 : i32, i32
  }
}

module attributes {stable_mosaic.version = 11 : i64} {
  func.func @_conv_s2d_kernel(%arg0: i32, %arg1: memref<1x6x10x512xbf16, #tpu.memory_space<vmem>>, %arg2: memref<9x512x256xbf16, #tpu.memory_space<vmem>>, %arg3: memref<1x256xf32, #tpu.memory_space<vmem>>, %arg4: memref<32x256xbf16, #tpu.memory_space<vmem>>) attributes {dimension_semantics = [#tpu.dimension_semantics<parallel>], iteration_bounds = array<i64: 2>, scalar_prefetch = 0 : i64, scratch_operands = 0 : i64, tpu.core_type = #tpu.core_type<tc>, window_params = [{transform_indices = @transform_0, window_bounds = array<i64: 1, 6, 10, 512>}, {pipeline_mode = #tpu.pipeline_mode<synchronous>, transform_indices = @transform_1, window_bounds = array<i64: 9, 512, 256>}, {pipeline_mode = #tpu.pipeline_mode<synchronous>, transform_indices = @transform_2, window_bounds = array<i64: 1, 256>}, {transform_indices = @transform_3, window_bounds = array<i64: 32, 256>}]} {
    %cst = arith.constant 0.000000e+00 : f32
    %0 = vector.broadcast %cst : f32 to vector<32x256xf32>
    %c0 = arith.constant 0 : index
    %c0_0 = arith.constant 0 : index
    %c0_1 = arith.constant 0 : index
    %c0_2 = arith.constant 0 : index
    %1 = vector.load %arg1[%c0, %c0_0, %c0_1, %c0_2] : memref<1x6x10x512xbf16, #tpu.memory_space<vmem>>, vector<1x4x8x512xbf16>
    %2 = vector.shape_cast %1 : vector<1x4x8x512xbf16> to vector<32x512xbf16>
    %c0_3 = arith.constant 0 : index
    %c0_4 = arith.constant 0 : index
    %c0_5 = arith.constant 0 : index
    %3 = vector.load %arg2[%c0_3, %c0_4, %c0_5] : memref<9x512x256xbf16, #tpu.memory_space<vmem>>, vector<1x512x256xbf16>
    %4 = vector.shape_cast %3 : vector<1x512x256xbf16> to vector<512x256xbf16>
    %cst_6 = arith.constant dense<0.000000e+00> : vector<32x256xf32>
    %5 = tpu.matmul %2, %4, %cst_6 {dimension_numbers = #tpu.dot_dimension_numbers<[1], [0], [0], [1], [0, 0, 1, 1], [], []>} : vector<32x512xbf16>, vector<512x256xbf16>, vector<32x256xf32> -> vector<32x256xf32>
    %6 = arith.addf %0, %5 : vector<32x256xf32>
    %c0_7 = arith.constant 0 : index
    %c0_8 = arith.constant 0 : index
    %c1 = arith.constant 1 : index
    %c0_9 = arith.constant 0 : index
    %7 = vector.load %arg1[%c0_7, %c0_8, %c1, %c0_9] : memref<1x6x10x512xbf16, #tpu.memory_space<vmem>>, vector<1x4x8x512xbf16>
    %8 = vector.shape_cast %7 : vector<1x4x8x512xbf16> to vector<32x512xbf16>
    %c1_10 = arith.constant 1 : index
    %c0_11 = arith.constant 0 : index
    %c0_12 = arith.constant 0 : index
    %9 = vector.load %arg2[%c1_10, %c0_11, %c0_12] : memref<9x512x256xbf16, #tpu.memory_space<vmem>>, vector<1x512x256xbf16>
    %10 = vector.shape_cast %9 : vector<1x512x256xbf16> to vector<512x256xbf16>
    %cst_13 = arith.constant dense<0.000000e+00> : vector<32x256xf32>
    %11 = tpu.matmul %8, %10, %cst_13 {dimension_numbers = #tpu.dot_dimension_numbers<[1], [0], [0], [1], [0, 0, 1, 1], [], []>} : vector<32x512xbf16>, vector<512x256xbf16>, vector<32x256xf32> -> vector<32x256xf32>
    %12 = arith.addf %6, %11 : vector<32x256xf32>
    %c0_14 = arith.constant 0 : index
    %c0_15 = arith.constant 0 : index
    %c2 = arith.constant 2 : index
    %c0_16 = arith.constant 0 : index
    %13 = vector.load %arg1[%c0_14, %c0_15, %c2, %c0_16] : memref<1x6x10x512xbf16, #tpu.memory_space<vmem>>, vector<1x4x8x512xbf16>
    %14 = vector.shape_cast %13 : vector<1x4x8x512xbf16> to vector<32x512xbf16>
    %c2_17 = arith.constant 2 : index
    %c0_18 = arith.constant 0 : index
    %c0_19 = arith.constant 0 : index
    %15 = vector.load %arg2[%c2_17, %c0_18, %c0_19] : memref<9x512x256xbf16, #tpu.memory_space<vmem>>, vector<1x512x256xbf16>
    %16 = vector.shape_cast %15 : vector<1x512x256xbf16> to vector<512x256xbf16>
    %cst_20 = arith.constant dense<0.000000e+00> : vector<32x256xf32>
    %17 = tpu.matmul %14, %16, %cst_20 {dimension_numbers = #tpu.dot_dimension_numbers<[1], [0], [0], [1], [0, 0, 1, 1], [], []>} : vector<32x512xbf16>, vector<512x256xbf16>, vector<32x256xf32> -> vector<32x256xf32>
    %18 = arith.addf %12, %17 : vector<32x256xf32>
    %c0_21 = arith.constant 0 : index
    %c1_22 = arith.constant 1 : index
    %c0_23 = arith.constant 0 : index
    %c0_24 = arith.constant 0 : index
    %19 = vector.load %arg1[%c0_21, %c1_22, %c0_23, %c0_24] : memref<1x6x10x512xbf16, #tpu.memory_space<vmem>>, vector<1x4x8x512xbf16>
    %20 = vector.shape_cast %19 : vector<1x4x8x512xbf16> to vector<32x512xbf16>
    %c3 = arith.constant 3 : index
    %c0_25 = arith.constant 0 : index
    %c0_26 = arith.constant 0 : index
    %21 = vector.load %arg2[%c3, %c0_25, %c0_26] : memref<9x512x256xbf16, #tpu.memory_space<vmem>>, vector<1x512x256xbf16>
    %22 = vector.shape_cast %21 : vector<1x512x256xbf16> to vector<512x256xbf16>
    %cst_27 = arith.constant dense<0.000000e+00> : vector<32x256xf32>
    %23 = tpu.matmul %20, %22, %cst_27 {dimension_numbers = #tpu.dot_dimension_numbers<[1], [0], [0], [1], [0, 0, 1, 1], [], []>} : vector<32x512xbf16>, vector<512x256xbf16>, vector<32x256xf32> -> vector<32x256xf32>
    %24 = arith.addf %18, %23 : vector<32x256xf32>
    %c0_28 = arith.constant 0 : index
    %c1_29 = arith.constant 1 : index
    %c1_30 = arith.constant 1 : index
    %c0_31 = arith.constant 0 : index
    %25 = vector.load %arg1[%c0_28, %c1_29, %c1_30, %c0_31] : memref<1x6x10x512xbf16, #tpu.memory_space<vmem>>, vector<1x4x8x512xbf16>
    %26 = vector.shape_cast %25 : vector<1x4x8x512xbf16> to vector<32x512xbf16>
    %c4 = arith.constant 4 : index
    %c0_32 = arith.constant 0 : index
    %c0_33 = arith.constant 0 : index
    %27 = vector.load %arg2[%c4, %c0_32, %c0_33] : memref<9x512x256xbf16, #tpu.memory_space<vmem>>, vector<1x512x256xbf16>
    %28 = vector.shape_cast %27 : vector<1x512x256xbf16> to vector<512x256xbf16>
    %cst_34 = arith.constant dense<0.000000e+00> : vector<32x256xf32>
    %29 = tpu.matmul %26, %28, %cst_34 {dimension_numbers = #tpu.dot_dimension_numbers<[1], [0], [0], [1], [0, 0, 1, 1], [], []>} : vector<32x512xbf16>, vector<512x256xbf16>, vector<32x256xf32> -> vector<32x256xf32>
    %30 = arith.addf %24, %29 : vector<32x256xf32>
    %c0_35 = arith.constant 0 : index
    %c1_36 = arith.constant 1 : index
    %c2_37 = arith.constant 2 : index
    %c0_38 = arith.constant 0 : index
    %31 = vector.load %arg1[%c0_35, %c1_36, %c2_37, %c0_38] : memref<1x6x10x512xbf16, #tpu.memory_space<vmem>>, vector<1x4x8x512xbf16>
    %32 = vector.shape_cast %31 : vector<1x4x8x512xbf16> to vector<32x512xbf16>
    %c5 = arith.constant 5 : index
    %c0_39 = arith.constant 0 : index
    %c0_40 = arith.constant 0 : index
    %33 = vector.load %arg2[%c5, %c0_39, %c0_40] : memref<9x512x256xbf16, #tpu.memory_space<vmem>>, vector<1x512x256xbf16>
    %34 = vector.shape_cast %33 : vector<1x512x256xbf16> to vector<512x256xbf16>
    %cst_41 = arith.constant dense<0.000000e+00> : vector<32x256xf32>
    %35 = tpu.matmul %32, %34, %cst_41 {dimension_numbers = #tpu.dot_dimension_numbers<[1], [0], [0], [1], [0, 0, 1, 1], [], []>} : vector<32x512xbf16>, vector<512x256xbf16>, vector<32x256xf32> -> vector<32x256xf32>
    %36 = arith.addf %30, %35 : vector<32x256xf32>
    %c0_42 = arith.constant 0 : index
    %c2_43 = arith.constant 2 : index
    %c0_44 = arith.constant 0 : index
    %c0_45 = arith.constant 0 : index
    %37 = vector.load %arg1[%c0_42, %c2_43, %c0_44, %c0_45] : memref<1x6x10x512xbf16, #tpu.memory_space<vmem>>, vector<1x4x8x512xbf16>
    %38 = vector.shape_cast %37 : vector<1x4x8x512xbf16> to vector<32x512xbf16>
    %c6 = arith.constant 6 : index
    %c0_46 = arith.constant 0 : index
    %c0_47 = arith.constant 0 : index
    %39 = vector.load %arg2[%c6, %c0_46, %c0_47] : memref<9x512x256xbf16, #tpu.memory_space<vmem>>, vector<1x512x256xbf16>
    %40 = vector.shape_cast %39 : vector<1x512x256xbf16> to vector<512x256xbf16>
    %cst_48 = arith.constant dense<0.000000e+00> : vector<32x256xf32>
    %41 = tpu.matmul %38, %40, %cst_48 {dimension_numbers = #tpu.dot_dimension_numbers<[1], [0], [0], [1], [0, 0, 1, 1], [], []>} : vector<32x512xbf16>, vector<512x256xbf16>, vector<32x256xf32> -> vector<32x256xf32>
    %42 = arith.addf %36, %41 : vector<32x256xf32>
    %c0_49 = arith.constant 0 : index
    %c2_50 = arith.constant 2 : index
    %c1_51 = arith.constant 1 : index
    %c0_52 = arith.constant 0 : index
    %43 = vector.load %arg1[%c0_49, %c2_50, %c1_51, %c0_52] : memref<1x6x10x512xbf16, #tpu.memory_space<vmem>>, vector<1x4x8x512xbf16>
    %44 = vector.shape_cast %43 : vector<1x4x8x512xbf16> to vector<32x512xbf16>
    %c7 = arith.constant 7 : index
    %c0_53 = arith.constant 0 : index
    %c0_54 = arith.constant 0 : index
    %45 = vector.load %arg2[%c7, %c0_53, %c0_54] : memref<9x512x256xbf16, #tpu.memory_space<vmem>>, vector<1x512x256xbf16>
    %46 = vector.shape_cast %45 : vector<1x512x256xbf16> to vector<512x256xbf16>
    %cst_55 = arith.constant dense<0.000000e+00> : vector<32x256xf32>
    %47 = tpu.matmul %44, %46, %cst_55 {dimension_numbers = #tpu.dot_dimension_numbers<[1], [0], [0], [1], [0, 0, 1, 1], [], []>} : vector<32x512xbf16>, vector<512x256xbf16>, vector<32x256xf32> -> vector<32x256xf32>
    %48 = arith.addf %42, %47 : vector<32x256xf32>
    %c0_56 = arith.constant 0 : index
    %c2_57 = arith.constant 2 : index
    %c2_58 = arith.constant 2 : index
    %c0_59 = arith.constant 0 : index
    %49 = vector.load %arg1[%c0_56, %c2_57, %c2_58, %c0_59] : memref<1x6x10x512xbf16, #tpu.memory_space<vmem>>, vector<1x4x8x512xbf16>
    %50 = vector.shape_cast %49 : vector<1x4x8x512xbf16> to vector<32x512xbf16>
    %c8 = arith.constant 8 : index
    %c0_60 = arith.constant 0 : index
    %c0_61 = arith.constant 0 : index
    %51 = vector.load %arg2[%c8, %c0_60, %c0_61] : memref<9x512x256xbf16, #tpu.memory_space<vmem>>, vector<1x512x256xbf16>
    %52 = vector.shape_cast %51 : vector<1x512x256xbf16> to vector<512x256xbf16>
    %cst_62 = arith.constant dense<0.000000e+00> : vector<32x256xf32>
    %53 = tpu.matmul %50, %52, %cst_62 {dimension_numbers = #tpu.dot_dimension_numbers<[1], [0], [0], [1], [0, 0, 1, 1], [], []>} : vector<32x512xbf16>, vector<512x256xbf16>, vector<32x256xf32> -> vector<32x256xf32>
    %54 = arith.addf %48, %53 : vector<32x256xf32>
    %c0_63 = arith.constant 0 : index
    %c0_64 = arith.constant 0 : index
    %55 = vector.load %arg3[%c0_63, %c0_64] : memref<1x256xf32, #tpu.memory_space<vmem>>, vector<1x256xf32>
    %56 = vector.broadcast %55 : vector<1x256xf32> to vector<32x256xf32>
    %57 = arith.addf %54, %56 : vector<32x256xf32>
    %cst_65 = arith.constant 0.000000e+00 : f32
    %58 = vector.broadcast %cst_65 : f32 to vector<32x256xf32>
    %59 = arith.maximumf %57, %58 : vector<32x256xf32>
    %60 = arith.truncf %59 : vector<32x256xf32> to vector<32x256xbf16>
    %c0_66 = arith.constant 0 : index
    %c0_67 = arith.constant 0 : index
    %61 = vector.load %arg4[%c0_66, %c0_67] : memref<32x256xbf16, #tpu.memory_space<vmem>>, vector<32x256xbf16>
    tpu.vector_store %arg4[%c0_66, %c0_67], %60 {strides = array<i32>} : memref<32x256xbf16, #tpu.memory_space<vmem>>, vector<32x256xbf16>,
    return
  }
  func.func @transform_0(%arg0: i32) -> (i32, i32, i32, i32) {
    %c0_i32 = arith.constant 0 : i32
    %c0_i32_0 = arith.constant 0 : i32
    %c0_i32_1 = arith.constant 0 : i32
    %c0_i32_2 = arith.constant 0 : i32
    return %arg0, %c0_i32, %c0_i32_0, %c0_i32_1 : i32, i32, i32, i32
  }
  func.func @transform_1(%arg0: i32) -> (i32, i32, i32) {
    %c0_i32 = arith.constant 0 : i32
    %c0_i32_0 = arith.constant 0 : i32
    %c0_i32_1 = arith.constant 0 : i32
    %c0_i32_2 = arith.constant 0 : i32
    return %c0_i32, %c0_i32_0, %c0_i32_1 : i32, i32, i32
  }
  func.func @transform_2(%arg0: i32) -> (i32, i32) {
    %c0_i32 = arith.constant 0 : i32
    %c0_i32_0 = arith.constant 0 : i32
    %c0_i32_1 = arith.constant 0 : i32
    return %c0_i32, %c0_i32_0 : i32, i32
  }
  func.func @transform_3(%arg0: i32) -> (i32, i32) {
    %c0_i32 = arith.constant 0 : i32
    %c0_i32_0 = arith.constant 0 : i32
    return %arg0, %c0_i32 : i32, i32
  }
}

module attributes {stable_mosaic.version = 11 : i64} {
  func.func @_mlp_kernel(%arg0: i32, %arg1: i32, %arg2: memref<8x512xbf16, #tpu.memory_space<vmem>>, %arg3: memref<512x512xbf16, #tpu.memory_space<vmem>>, %arg4: memref<1x512xf32, #tpu.memory_space<vmem>>, %arg5: memref<512x128xbf16, #tpu.memory_space<vmem>>, %arg6: memref<1x128xf32, #tpu.memory_space<vmem>>, %arg7: memref<8x128xf32, #tpu.memory_space<vmem>>, %arg8: memref<8x512xf32, #tpu.memory_space<vmem>>) attributes {dimension_semantics = [#tpu.dimension_semantics<parallel>, #tpu.dimension_semantics<arbitrary>], iteration_bounds = array<i64: 1, 8>, scalar_prefetch = 0 : i64, scratch_operands = 1 : i64, tpu.core_type = #tpu.core_type<tc>, window_params = [{transform_indices = @transform_0, window_bounds = array<i64: 8, 512>}, {transform_indices = @transform_1, window_bounds = array<i64: 512, 512>}, {pipeline_mode = #tpu.pipeline_mode<synchronous>, transform_indices = @transform_2, window_bounds = array<i64: 1, 512>}, {pipeline_mode = #tpu.pipeline_mode<synchronous>, transform_indices = @transform_3, window_bounds = array<i64: 512, 128>}, {pipeline_mode = #tpu.pipeline_mode<synchronous>, transform_indices = @transform_4, window_bounds = array<i64: 1, 128>}, {transform_indices = @transform_5, window_bounds = array<i64: 8, 128>}]} {
    %c0_i32 = arith.constant 0 : i32
    %0 = arith.cmpi eq, %arg1, %c0_i32 : i32
    %1 = arith.extui %0 : i1 to i32
    %c0_i32_0 = arith.constant 0 : i32
    %2 = arith.cmpi ne, %1, %c0_i32_0 : i32
    scf.if %2 {
      %cst_9 = arith.constant 0.000000e+00 : f32
      %12 = vector.broadcast %cst_9 : f32 to vector<8x512xf32>
      %c0_10 = arith.constant 0 : index
      %c0_11 = arith.constant 0 : index
      %13 = vector.load %arg8[%c0_10, %c0_11] : memref<8x512xf32, #tpu.memory_space<vmem>>, vector<8x512xf32>
      tpu.vector_store %arg8[%c0_10, %c0_11], %12 {strides = array<i32>} : memref<8x512xf32, #tpu.memory_space<vmem>>, vector<8x512xf32>,
    } else {
    }
    %c0 = arith.constant 0 : index
    %c0_1 = arith.constant 0 : index
    %3 = vector.load %arg8[%c0, %c0_1] : memref<8x512xf32, #tpu.memory_space<vmem>>, vector<8x512xf32>
    %c0_2 = arith.constant 0 : index
    %c0_3 = arith.constant 0 : index
    %4 = vector.load %arg2[%c0_2, %c0_3] : memref<8x512xbf16, #tpu.memory_space<vmem>>, vector<8x512xbf16>
    %c0_4 = arith.constant 0 : index
    %c0_5 = arith.constant 0 : index
    %5 = vector.load %arg3[%c0_4, %c0_5] : memref<512x512xbf16, #tpu.memory_space<vmem>>, vector<512x512xbf16>
    %cst = arith.constant dense<0.000000e+00> : vector<8x512xf32>
    %6 = tpu.matmul %4, %5, %cst {dimension_numbers = #tpu.dot_dimension_numbers<[1], [0], [0], [1], [0, 0, 1, 1], [], []>} : vector<8x512xbf16>, vector<512x512xbf16>, vector<8x512xf32> -> vector<8x512xf32>
    %7 = arith.addf %3, %6 : vector<8x512xf32>
    %c0_6 = arith.constant 0 : index
    %c0_7 = arith.constant 0 : index
    %8 = vector.load %arg8[%c0_6, %c0_7] : memref<8x512xf32, #tpu.memory_space<vmem>>, vector<8x512xf32>
    tpu.vector_store %arg8[%c0_6, %c0_7], %7 {strides = array<i32>} : memref<8x512xf32, #tpu.memory_space<vmem>>, vector<8x512xf32>,
    %c7_i32 = arith.constant 7 : i32
    %9 = arith.cmpi eq, %arg1, %c7_i32 : i32
    %10 = arith.extui %9 : i1 to i32
    %c0_i32_8 = arith.constant 0 : i32
    %11 = arith.cmpi ne, %10, %c0_i32_8 : i32
    scf.if %11 {
      %c0_9 = arith.constant 0 : index
      %c0_10 = arith.constant 0 : index
      %12 = vector.load %arg8[%c0_9, %c0_10] : memref<8x512xf32, #tpu.memory_space<vmem>>, vector<8x512xf32>
      %c0_11 = arith.constant 0 : index
      %c0_12 = arith.constant 0 : index
      %13 = vector.load %arg4[%c0_11, %c0_12] : memref<1x512xf32, #tpu.memory_space<vmem>>, vector<1x512xf32>
      %14 = vector.broadcast %13 : vector<1x512xf32> to vector<8x512xf32>
      %15 = arith.addf %12, %14 : vector<8x512xf32>
      %cst_13 = arith.constant 0.000000e+00 : f32
      %16 = vector.broadcast %cst_13 : f32 to vector<8x512xf32>
      %17 = arith.maximumf %15, %16 : vector<8x512xf32>
      %18 = arith.truncf %17 : vector<8x512xf32> to vector<8x512xbf16>
      %c0_14 = arith.constant 0 : index
      %c0_15 = arith.constant 0 : index
      %19 = vector.load %arg5[%c0_14, %c0_15] : memref<512x128xbf16, #tpu.memory_space<vmem>>, vector<512x128xbf16>
      %cst_16 = arith.constant dense<0.000000e+00> : vector<8x128xf32>
      %20 = tpu.matmul %18, %19, %cst_16 {dimension_numbers = #tpu.dot_dimension_numbers<[1], [0], [0], [1], [0, 0, 1, 1], [], []>} : vector<8x512xbf16>, vector<512x128xbf16>, vector<8x128xf32> -> vector<8x128xf32>
      %c0_17 = arith.constant 0 : index
      %c0_18 = arith.constant 0 : index
      %21 = vector.load %arg6[%c0_17, %c0_18] : memref<1x128xf32, #tpu.memory_space<vmem>>, vector<1x128xf32>
      %22 = vector.broadcast %21 : vector<1x128xf32> to vector<8x128xf32>
      %23 = arith.addf %20, %22 : vector<8x128xf32>
      %c0_19 = arith.constant 0 : index
      %c0_20 = arith.constant 0 : index
      %24 = vector.load %arg7[%c0_19, %c0_20] : memref<8x128xf32, #tpu.memory_space<vmem>>, vector<8x128xf32>
      tpu.vector_store %arg7[%c0_19, %c0_20], %23 {strides = array<i32>} : memref<8x128xf32, #tpu.memory_space<vmem>>, vector<8x128xf32>,
    } else {
    }
    return
  }
  func.func @transform_0(%arg0: i32, %arg1: i32) -> (i32, i32) {
    %c0_i32 = arith.constant 0 : i32
    return %arg0, %arg1 : i32, i32
  }
  func.func @transform_1(%arg0: i32, %arg1: i32) -> (i32, i32) {
    %c0_i32 = arith.constant 0 : i32
    %c0_i32_0 = arith.constant 0 : i32
    return %arg1, %c0_i32 : i32, i32
  }
  func.func @transform_2(%arg0: i32, %arg1: i32) -> (i32, i32) {
    %c0_i32 = arith.constant 0 : i32
    %c0_i32_0 = arith.constant 0 : i32
    %c0_i32_1 = arith.constant 0 : i32
    return %c0_i32, %c0_i32_0 : i32, i32
  }
  func.func @transform_3(%arg0: i32, %arg1: i32) -> (i32, i32) {
    %c0_i32 = arith.constant 0 : i32
    %c0_i32_0 = arith.constant 0 : i32
    %c0_i32_1 = arith.constant 0 : i32
    return %c0_i32, %c0_i32_0 : i32, i32
  }
  func.func @transform_4(%arg0: i32, %arg1: i32) -> (i32, i32) {
    %c0_i32 = arith.constant 0 : i32
    %c0_i32_0 = arith.constant 0 : i32
    %c0_i32_1 = arith.constant 0 : i32
    return %c0_i32, %c0_i32_0 : i32, i32
  }
  func.func @transform_5(%arg0: i32, %arg1: i32) -> (i32, i32) {
    %c0_i32 = arith.constant 0 : i32
    %c0_i32_0 = arith.constant 0 : i32
    return %arg0, %c0_i32 : i32, i32
  }
}

</mosaic_0001>

<bundles_post_ra>
// kernel: net_forward.4
= control target key start
LH: loop header
LB: loop body
LE: loop exit
PB: predicated region body
PF: predicated region fallthrough
CT: control target
= control target key end

     0   :  { %8 = vsyncpa [#allocation3], 0  ;;  %s9070_s0 = inlined_call_operand.vmem [shape: bf16[2,18,18,12], index: 0, kind: input, shape index: {}]   ;;  %s9071_s1 = inlined_call_operand.hbm [shape: bf16[9,12,64], index: 1, kind: input, shape index: {}]   ;;  %s9072_s2 = inlined_call_operand.hbm [shape: f32[1,64], index: 2, kind: input, shape index: {}]   ;;  %s9073_s3 = inlined_call_operand.vmem [shape: bf16[512,64], index: 3, kind: output, shape index: {}]  }
   0x1   :  { %9 = vsyncpa [#allocation5], 0  ;;  %s6393_s12 = smov 0  }
   0x2 LB: > { %s6399_s13 = sadd.s32 4294967295, %s6367_s12   ;;  %p5126_p0 = scmp.ge.s32.totalorder %s6367_s12, 1  ;;  %s6367_s12 = sphi %s6393_s12, %s15_s12  }
   0x3   : > { %p114_p1 = scmp.lt.s32.totalorder %s6367_s12, 3  ;;  %s6369_s14 = smov [#allocation2]  }
   0x4   : > { %s126_s15 = sshll.u32 %s6369_s14, 4  ;;  %p6227_p3 = scmp.eq.s32.totalorder %s6399_s13, 0  ;;  %s127_s15 = int_to_ptr.vmem [resolvable:$true] %s126_s15 }
   0x5   : > { %p6403_p2 = pnand %p5126_p0, %p114_p1  ;;  %s6370_s17 = smov [#allocation4]  }
   0x6   : > { %s140_s18 = sshll.u32 %s6370_s17, 4  ;;  %s6312_s20 = scalar_lea.vmem %s127_s15, 1152  ;;  %s141_s18 = int_to_ptr.vmem [resolvable:$true] %s140_s18 }
   0x7   : > { %p6220_p4 = pneg %p6403_p2  ;;  %p6313_p7 = scmp.ne.s32.totalorder %s127_s15, %s6312_s20 }
   0x8   : > { %p6320_p10 = scmp.lt.s32.totalorder %s127_s15, %s127_s15  ;;  %p6321_p11 = scmp.lt.s32.totalorder %s6312_s20, %s6312_s20 }
   0x9   : > { %p6412_p5 = pnand %p6227_p3, %p6220_p4 }
   0xa   : > { %p6322_p12 = por %p6321_p11, %p6320_p10 }
   0xb   : > { %p6303_p6 = pneg %p6412_p5 }
   0xd   : > { %p6315_p8 = pnand %p6313_p7, %p6303_p6 }
   0xf   : > { %p6316_p9 = pneg %p6315_p8 }
  0x11   : > { %p6323_p13 = pnand %p6322_p12, %p6316_p9 }
  0x13   : > { %6326 = shalt.err (!%p6323_p13)
}
  0x14   : > { %s6371_s21 = smov 64   ;;  %s6372_s22 = smov 4  }
  0x15   : > { %6223 = dma.hbm_to_vmem [thread:$0]  (!%p6412_p5), %s9071_s1, 1152, %s127_s15, [#allocation3], %s6371_s21, %s6371_s21, %s6372_s22  }
  0x16   : > { %s6338_s25 = scalar_lea.vmem %s141_s18, 16  ;;  %s6345_s26 = scalar_lea.vmem %s141_s18, 32 }
  0x17   : > { %p6339_p0 = scmp.ne.s32.totalorder %s141_s18, %s6338_s25  ;;  %p6346_p7 = scmp.lt.s32.totalorder %s141_s18, %s141_s18 }
  0x18   : > { %p6347_p8 = scmp.lt.s32.totalorder %s6345_s26, %s6338_s25 }
  0x19   : > { %p6341_p1 = pnand %p6339_p0, %p6303_p6 }
  0x1a   : > { %p6348_p9 = por %p6347_p8, %p6346_p7 }
  0x1b   : > { %p6342_p4 = pneg %p6341_p1 }
  0x1d   : > { %p6349_p10 = pnand %p6348_p9, %p6342_p4 }
  0x1f   : > { %6352 = shalt.err (!%p6349_p10)
}
  0x20   : > { %6226 = dma.hbm_to_vmem [thread:$0]  (!%p6412_p5), %s9072_s2, 16, %s141_s18, [#allocation5]  }
  0x21   : > { %161 = sbr.rel (%p6403_p2) target bundleno = 590 (0x24e), region = 32 }
  0x26   : > { %6358 = dma.done.wait (%p6227_p3), [#allocation3], 1152  }
  0x27   : > { %6360 = vsyncadd (%p6227_p3), [#allocation3], 4294966144 }
  0x28   : > { %6362 = dma.done.wait (%p6227_p3), [#allocation5], 16  }
  0x29   : > { %6364 = vsyncadd (%p6227_p3), [#allocation5], 4294967280  ;;  %p189_p6 = scmp.lt.s32.totalorder %s6399_s13, 1  ;;  %vm743_vm0 = vcmask 1045504   ;;  %vm251_vm1 = vsmask.f32 3328 }
  0x2a   : > { %vm252_vm2 = vsmask.f32 7440  ;;  %v6243_v0 = vld [vmem:[#allocation2 + $0x8] sm:$0x3f]   ;;  %vm694_vm3 = vcmask 97280   ;;  %vm1253_vm5 = vcmask 1042432  }
  0x2b   : > { %s190_s29 = scalar_select %p189_p6, %s6399_s13, 1  ;;  %6202 = vmatprep.subr.msk.bf16.mxu1 %vm743_vm0, %v6243_v0  ;;  %6201 = vmatprep.subr.msk.bf16.mxu0 %vm743_vm0, %v6243_v0  ;;  %v745_v4 = vsel %vm743_vm0, %v6243_v0, 0  ;;  %vm6485_vm4 = vmor %vm251_vm1, %vm252_vm2  ;;  %v6244_v30 = vld [vmem:[#allocation2] sm:$0x3f]   ;;  %v6245_v60 = vld [vmem:[#allocation2 + $0x10] sm:$0x3f]  }
  0x2c   : > { %6200 = vmatpush3.bf16.msra.mxu1 %v745_v4  ;;  %5894 = vmatpush3.bf16.msra.mxu0 %v745_v4  ;;  %vm1254_vm6 = vcmask 1046532   ;;  %s5134_s7 = sshll.u32 %s6399_s13, 5  ;;  %vm5013_vm8 = vcmask 519168  }
  0x2d   : > { %s6211_s30 = smul.u32 216, %s190_s29  ;;  %6203 = vmatprep.subr.msk.bf16.mxu1 %vm743_vm0, %v6244_v30  ;;  %6204 = vmatprep.subr.msk.bf16.mxu0 %vm743_vm0, %v6245_v60  ;;  %vm6772_vm7 = vmor %vm1253_vm5, %vm1254_vm6  ;;  %p195_p2 = scmp.lt.s32.totalorder %s5134_s7, 63 }
  0x2f   : > { %s6449_s6 = scalar_lea.vmem %s9070_s0, %s6211_s30  ;;  %s9340_s7 = smov (!%p195_p2, %s5134_s7), 63 }
  0x30   : > { %v6452_v1 = vld [vmem:[%s6449_s6] sm:$0xf]  ;;  %v6455_v2 = vld [vmem:[%s6449_s6 + $0x4] sm:$0xf]  ;;  %v6458_v3 = vld [vmem:[%s6449_s6 + $0x8] sm:$0x1] }
  0x31   : > { %v255_v5 = vshrl.u32 %v6452_v1, 16  ;;  %v258_v6 = vshll.u32 %v6452_v1, 16  ;;  %v264_v7 = vshll.u32 %v6455_v2, 16  ;;  %v6467_v8 = vld [vmem:[%s6449_s6 + $0x60] sm:$0xf]  ;;  %v268_v9 = vshrl.u32 %v6455_v2, 16 }
  0x32   : > { %v274_v10 = vshll.u32 %v6458_v3, 16  ;;  %v6472_v11 = vld [vmem:[%s6449_s6 + $0x64] sm:$0xf]  ;;  %v447_v12 = vshrl.u32 %v6467_v8, 16  ;;  %v6476_v16 = vld [vmem:[%s6449_s6 + $0x68] sm:$0x1] }
  0x33   : > { %v257_v13 = vrot.slane %v255_v5, 4  ;;  %v260_v14 = vrot.slane %v258_v6, 5  ;;  %v266_v15 = vrot.slane %v264_v7, 5  ;;  %v450_v17 = vshll.u32 %v6467_v8, 16  ;;  %v6490_v31 = vld [vmem:[%s6449_s6 + $0xc] sm:$0xf] }
  0x34   : > { %v270_v18 = vrot.slane %v268_v9, 4  ;;  %v449_v20 = vrot.slane %v447_v12, 4  ;;  %v456_v21 = vshll.u32 %v6472_v11, 16  ;;  %v460_v24 = vshrl.u32 %v6472_v11, 16  ;;  %v6493_v36 = vld [vmem:[%s6449_s6 + $0x10] sm:$0xf] }
  0x35   : > { %v261_v22 = vor.u32 %v260_v14, %v257_v13  ;;  %v452_v23 = vrot.slane %v450_v17, 5  ;;  %v466_v25 = vshll.u32 %v6476_v16, 16  ;;  %v276_v28 = vrot.slane %v274_v10, 5  ;;  %v6502_v44 = vld [vmem:[%s6449_s6 + $0x14] sm:$0x1]  ;;  %s5135_s8 = sshll.u32 %s9340_s7, 2 }
  0x36   : > { %v271_v27 = vor.u32 %v270_v18, %v266_v15  ;;  %v458_v29 = vrot.slane %v456_v21, 5  ;;  %v462_v34 = vrot.slane %v460_v24, 4  ;;  %v279_v38 = vshrl.u32 %v6490_v31, 16  ;;  %v6506_v46 = vld [vmem:[%s6449_s6 + $0x6c] sm:$0xf]  ;;  %s8897_s11 = scalar_lea.vmem %s9073_s3, %s5135_s8 }
  0x37   : > { %v262_v32 = vrot.slane %v261_v22, 4  ;;  %v453_v33 = vor.u32 %v452_v23, %v449_v20  ;;  %v468_v35 = vrot.slane %v466_v25, 5  ;;  %v282_v39 = vshll.u32 %v6490_v31, 16  ;;  %v6511_v51 = vld [vmem:[%s6449_s6 + $0x70] sm:$0xf] }
  0x38   : > { %v272_v37 = vrot.slane %v271_v27, 4  ;;  %v288_v40 = vshll.u32 %v6493_v36, 16  ;;  %v463_v43 = vor.u32 %v462_v34, %v458_v29  ;;  %v292_v45 = vshrl.u32 %v6493_v36, 16  ;;  %v6522_v63 = vld [vmem:[%s6449_s6 + $0x74] sm:$0x1] }
  0x39   : > { %v267_v41 = vsel %vm6485_vm4, %v262_v32, %v266_v15  ;;  %v454_v42 = vrot.slane %v453_v33, 4  ;;  %v281_v48 = vrot.slane %v279_v38, 4  ;;  %v284_v49 = vrot.slane %v282_v39, 5  ;;  %v6530_v15 = vld [vmem:[%s6449_s6 + $0x18] sm:$0xf] }
  0x3a   : > { %v277_v47 = vsel %vm6485_vm4, %v272_v37, %v276_v28  ;;  %v290_v50 = vrot.slane %v288_v40, 5  ;;  %v464_v54 = vrot.slane %v463_v43, 4  ;;  %v294_v55 = vrot.slane %v292_v45, 4  ;;  %v6538_v22 = vld [vmem:[%s6449_s6 + $0x1c] sm:$0xf] }
  0x3b   : > { %v5136_v52 = vcombine.low %v267_v41, %v277_v47  ;;  %v459_v53 = vsel %vm6485_vm4, %v454_v42, %v458_v29  ;;  %v285_v56 = vor.u32 %v284_v49, %v281_v48  ;;  %v298_v57 = vshll.u32 %v6502_v44, 16  ;;  %v6544_v28 = vld [vmem:[%s6449_s6 + $0x20] sm:$0x1]  ;;  %v6547_v29 = vld [vmem:[%s6449_s6 + $0x78] sm:$0xf] }
  0x3c   : > { %v469_v61 = vsel %vm6485_vm4, %v464_v54, %v468_v35  ;;  %v295_v62 = vor.u32 %v294_v55, %v290_v50  ;;  %v471_v0 = vshrl.u32 %v6506_v46, 16  ;;  %v474_v4 = vshll.u32 %v6506_v46, 16  ;;  %9109 = vst [vmem:[#allocation8_spill] sm:$0xff] %v6547_v29  ;;  %v6556_v43 = vld [vmem:[%s6449_s6 + $0x7c] sm:$0xf] }
  0x3d   : > { %5895 = vmatprep.mubr.msk.bf16.mxu0 %vm694_vm3, %v5136_v52  ;;  %v5144_v5 = vcombine.low %v459_v53, %v469_v61  ;;  %v286_v6 = vrot.slane %v285_v56, 4  ;;  %v300_v7 = vrot.slane %v298_v57, 5  ;;  %v480_v9 = vshll.u32 %v6511_v51, 16  ;;  %9110 = vst [vmem:[#allocation9_spill] sm:$0xff] %v6556_v43  ;;  %v6562_v52 = vld [vmem:[%s6449_s6 + $0x80] sm:$0x1] }
  0x3e   : > { %v296_v10 = vrot.slane %v295_v62, 4  ;;  %v473_v12 = vrot.slane %v471_v0, 4  ;;  %v476_v13 = vrot.slane %v474_v4, 5  ;;  %v484_v14 = vshrl.u32 %v6511_v51, 16  ;;  %9111 = vst [vmem:[#allocation10_spill] sm:$0xff] %v6562_v52 }
  0x3f   : > { %5911 = vmatprep.mubr.msk.bf16.mxu1 %vm694_vm3, %v5144_v5  ;;  %v291_v17 = vsel %vm6485_vm4, %v286_v6, %v290_v50  ;;  %v482_v18 = vrot.slane %v480_v9, 5  ;;  %v490_v20 = vshll.u32 %v6522_v63, 16  ;;  %v1042_v21 = vsel %vm743_vm0, %v6244_v30, 0  ;;  %v6566_v57 = vld [vmem:[%s6449_s6 + $0x24] sm:$0xf] }
  0x40   : > { %v301_v23 = vsel %vm6485_vm4, %v296_v10, %v300_v7  ;;  %v477_v24 = vor.u32 %v476_v13, %v473_v12  ;;  %v486_v25 = vrot.slane %v484_v14, 4  ;;  %v1473_v27 = vsel %vm743_vm0, %v6245_v60, 0  ;;  %v6574_v9 = vld [vmem:[%s6449_s6 + $0x28] sm:$0xf] }
  0x41   : > { %v5137_v32 = vcombine.low %v291_v17, %v301_v23  ;;  %v492_v33 = vrot.slane %v490_v20, 5  ;;  %v303_v34 = vshrl.u32 %v6530_v15, 16  ;;  %v306_v30 = vshll.u32 %v6530_v15, 16  ;;  %v6581_v23 = vld [vmem:[%s6449_s6 + $0x2c] sm:$0x1] }
  0x42   : > { %v478_v35 = vrot.slane %v477_v24, 4  ;;  %v487_v37 = vor.u32 %v486_v25, %v482_v18  ;;  %v312_v38 = vshll.u32 %v6538_v22, 16  ;;  %v316_v39 = vshrl.u32 %v6538_v22, 16  ;;  %v6585_v25 = vld [vmem:[%s6449_s6 + $0x84] sm:$0xf] }
  0x43   : > { %5896 = vmatmul.mubr.msk.bf16.vlgmr.msra.gmra.mxu0 %vm694_vm3, %v5137_v32  ;;  %v305_v40 = vrot.slane %v303_v34, 4  ;;  %v308_v41 = vrot.slane %v306_v30, 5  ;;  %v322_v42 = vshll.u32 %v6544_v28, 16  ;;  %v495_v45 = vshrl.u32 %v6547_v29, 16 }
  0x44   : > { %v483_v47 = vsel %vm6485_vm4, %v478_v35, %v482_v18  ;;  %v488_v48 = vrot.slane %v487_v37, 4  ;;  %5962 = vmatpush3.bf16.msra.mxu0 %v1473_v27  ;;  %v314_v49 = vrot.slane %v312_v38, 5  ;;  %v318_v50 = vrot.slane %v316_v39, 4  ;;  %v6592_v39 = vld [vmem:[%s6449_s6 + $0x88] sm:$0xf] }
  0x45   : > { %v309_v53 = vor.u32 %v308_v41, %v305_v40  ;;  %v324_v54 = vrot.slane %v322_v42, 5  ;;  %v497_v55 = vrot.slane %v495_v45, 4  ;;  %v498_v56 = vshll.u32 %v6547_v29, 16 }
  0x46   : > { %v493_v60 = vsel %vm6485_vm4, %v488_v48, %v492_v33  ;;  %v319_v61 = vor.u32 %v318_v50, %v314_v49  ;;  %v504_v62 = vshll.u32 %v6556_v43, 16  ;;  %v508_v0 = vshrl.u32 %v6556_v43, 16 }
  0x47   : > { %v5145_v4 = vcombine.low %v483_v47, %v493_v60  ;;  %v310_v5 = vrot.slane %v309_v53, 4  ;;  %v500_v6 = vrot.slane %v498_v56, 5  ;;  %v514_v7 = vshll.u32 %v6562_v52, 16  ;;  %v6604_v53 = vld [vmem:[%s6449_s6 + $0x30] sm:$0xf] }
  0x48   : > { %v320_v10 = vrot.slane %v319_v61, 4  ;;  %v506_v12 = vrot.slane %v504_v62, 5  ;;  %v510_v13 = vrot.slane %v508_v0, 4  ;;  %v327_v14 = vshrl.u32 %v6566_v57, 16  ;;  %v6737_v52 = vld [vmem:[%s6449_s6 + $0x5c] sm:$0x1] }
  0x49   : > { %5912 = vmatmul.mubr.msk.bf16.vlgmr.msra.gmra.mxu1 %vm694_vm3, %v5145_v4  ;;  %v315_v17 = vsel %vm6485_vm4, %v310_v5, %v314_v49  ;;  %v501_v18 = vor.u32 %v500_v6, %v497_v55  ;;  %v516_v20 = vrot.slane %v514_v7, 5  ;;  %v330_v24 = vshll.u32 %v6566_v57, 16  ;;  %v6600_v49 = vld [vmem:[%s6449_s6 + $0x8c] sm:$0x1]  ;;  %v6610_v5 = vld [vmem:[%s6449_s6 + $0x34] sm:$0xf] }
  0x4a   : > { %5928 = vmatpush3.bf16.msra.mxu1 %v1042_v21  ;;  %v325_v27 = vsel %vm6485_vm4, %v320_v10, %v324_v54  ;;  %v511_v32 = vor.u32 %v510_v13, %v506_v12  ;;  %v329_v33 = vrot.slane %v327_v14, 4  ;;  %v336_v34 = vshll.u32 %v6574_v9, 16 }
  0x4b   : > { %v5138_v30 = vcombine.low %v315_v17, %v325_v27  ;;  %v502_v35 = vrot.slane %v501_v18, 4  ;;  %v332_v37 = vrot.slane %v330_v24, 5  ;;  %v340_v38 = vshrl.u32 %v6574_v9, 16  ;;  %v6619_v18 = vld [vmem:[%s6449_s6 + $0x38] sm:$0x1] }
  0x4c   : > { %v512_v40 = vrot.slane %v511_v32, 4  ;;  %v338_v41 = vrot.slane %v336_v34, 5  ;;  %v346_v21 = vshll.u32 %v6581_v23, 16  ;;  %v519_v42 = vshrl.u32 %v6585_v25, 16  ;;  %v6624_v34 = vld [vmem:[%s6449_s6 + $0x90] sm:$0xf] }
  0x4d   : > { %5899 = vmatprep.mubr.msk.bf16.mxu0 %vm694_vm3, %v5138_v30  ;;  %v507_v45 = vsel %vm6485_vm4, %v502_v35, %v506_v12  ;;  %v333_v47 = vor.u32 %v332_v37, %v329_v33  ;;  %v342_v48 = vrot.slane %v340_v38, 4  ;;  %v522_v50 = vshll.u32 %v6585_v25, 16  ;;  %9112 = vst [vmem:[#allocation11_spill] sm:$0xff] %v6624_v34 }
  0x4e   : > { %v517_v54 = vsel %vm6485_vm4, %v512_v40, %v516_v20  ;;  %v348_v55 = vrot.slane %v346_v21, 5  ;;  %v521_v56 = vrot.slane %v519_v42, 4  ;;  %v528_v60 = vshll.u32 %v6592_v39, 16  ;;  %v6630_v40 = vld [vmem:[%s6449_s6 + $0x94] sm:$0xf] }
  0x4f   : > { %v5146_v61 = vcombine.low %v507_v45, %v517_v54  ;;  %v334_v62 = vrot.slane %v333_v47, 4  ;;  %v343_v0 = vor.u32 %v342_v48, %v338_v41  ;;  %v524_v4 = vrot.slane %v522_v50, 5  ;;  %v6636_v54 = vld [vmem:[%s6449_s6 + $0x98] sm:$0x1] }
  0x50   : > { %v530_v6 = vrot.slane %v528_v60, 5  ;;  %v532_v7 = vshrl.u32 %v6592_v39, 16  ;;  %v538_v10 = vshll.u32 %v6600_v49, 16  ;;  %v351_v12 = vshrl.u32 %v6604_v53, 16  ;;  %9113 = vst [vmem:[#allocation12_spill] sm:$0xff] %v6636_v54 }
  0x51   : > { %5915 = vmatprep.mubr.msk.bf16.mxu1 %vm694_vm3, %v5146_v61  ;;  %v339_v13 = vsel %vm6485_vm4, %v334_v62, %v338_v41  ;;  %v344_v14 = vrot.slane %v343_v0, 4  ;;  %v525_v17 = vor.u32 %v524_v4, %v521_v56  ;;  %v354_v20 = vshll.u32 %v6604_v53, 16  ;;  %v6640_v56 = vld [vmem:[%s6449_s6 + $0x3c] sm:$0xf]  ;;  %v6646_v4 = vld [vmem:[%s6449_s6 + $0x40] sm:$0xf] }
  0x52   : > { %v534_v24 = vrot.slane %v532_v7, 4  ;;  %v540_v27 = vrot.slane %v538_v10, 5  ;;  %v353_v32 = vrot.slane %v351_v12, 4  ;;  %v360_v33 = vshll.u32 %v6610_v5, 16 }
  0x53   : > { %v349_v30 = vsel %vm6485_vm4, %v344_v14, %v348_v55  ;;  %v526_v35 = vrot.slane %v525_v17, 4  ;;  %v356_v37 = vrot.slane %v354_v20, 5  ;;  %v364_v38 = vshrl.u32 %v6610_v5, 16 }
  0x54   : > { %v5139_v41 = vcombine.low %v339_v13, %v349_v30  ;;  %v535_v21 = vor.u32 %v534_v24, %v530_v6  ;;  %v362_v42 = vrot.slane %v360_v33, 5  ;;  %v370_v45 = vshll.u32 %v6619_v18, 16  ;;  %v6653_v24 = vld [vmem:[%s6449_s6 + $0x44] sm:$0x1] }
  0x55   : > { %v531_v47 = vsel %vm6485_vm4, %v526_v35, %v530_v6  ;;  %v357_v48 = vor.u32 %v356_v37, %v353_v32  ;;  %v366_v50 = vrot.slane %v364_v38, 4  ;;  %v543_v55 = vshrl.u32 %v6624_v34, 16  ;;  %v6658_v37 = vld [vmem:[%s6449_s6 + $0x9c] sm:$0xf] }
  0x56   : > { %5900 = vmatmul.mubr.msk.bf16.gmra.mxu0 %vm694_vm3, %v5139_v41  ;;  %v536_v60 = vrot.slane %v535_v21, 4  ;;  %v372_v61 = vrot.slane %v370_v45, 5  ;;  %v546_v62 = vshll.u32 %v6624_v34, 16  ;;  %v552_v0 = vshll.u32 %v6630_v40, 16  ;;  %9114 = vst [vmem:[#allocation13_spill] sm:$0xff] %v6658_v37 }
  0x57   : > { %v358_v6 = vrot.slane %v357_v48, 4  ;;  %v367_v7 = vor.u32 %v366_v50, %v362_v42  ;;  %v545_v10 = vrot.slane %v543_v55, 4  ;;  %v556_v12 = vshrl.u32 %v6630_v40, 16  ;;  %v6660_v38 = vld [vmem:[#allocation2 + $0x18] sm:$0x3f]  }
  0x58   : > { %v541_v13 = vsel %vm6485_vm4, %v536_v60, %v540_v27  ;;  %v548_v14 = vrot.slane %v546_v62, 5  ;;  %v554_v17 = vrot.slane %v552_v0, 5  ;;  %v562_v20 = vshll.u32 %v6636_v54, 16  ;;  %6205 = vmatprep.subr.msk.bf16.mxu1 %vm743_vm0, %v6660_v38  ;;  %v6671_v55 = vld [vmem:[#allocation2 + $0x20] sm:$0x3f]  }
  0x59   : > { %v5147_v32 = vcombine.low %v531_v47, %v541_v13  ;;  %v363_v33 = vsel %vm6485_vm4, %v358_v6, %v362_v42  ;;  %v368_v30 = vrot.slane %v367_v7, 4  ;;  %v558_v35 = vrot.slane %v556_v12, 4  ;;  %v6674_v7 = vld [vmem:[%s6449_s6 + $0xa0] sm:$0xf]  ;;  %6206 = vmatprep.subr.msk.bf16.mxu0 %vm743_vm0, %v6671_v55 }
  0x5a   : > { %v549_v41 = vor.u32 %v548_v14, %v545_v10  ;;  %v564_v21 = vrot.slane %v562_v20, 5  ;;  %v375_v27 = vshrl.u32 %v6640_v56, 16  ;;  %v378_v45 = vshll.u32 %v6640_v56, 16  ;;  %9115 = vst [vmem:[#allocation14_spill] sm:$0xff] %v6674_v7  ;;  %v1205_v34 = vld [vmem:[%s6449_s6] sm:$0xe] }
  0x5b   : > { %5916 = vmatmul.mubr.msk.bf16.gmra.mxu1 %vm694_vm3, %v5147_v32  ;;  %v373_v47 = vsel %vm6485_vm4, %v368_v30, %v372_v61  ;;  %v559_v48 = vor.u32 %v558_v35, %v554_v17  ;;  %v384_v42 = vshll.u32 %v6646_v4, 16  ;;  %v388_v50 = vshrl.u32 %v6646_v4, 16  ;;  %v6683_v32 = vld [vmem:[%s6449_s6 + $0xa4] sm:$0x1] }
  0x5c   : > { %v5140_v60 = vcombine.low %v363_v33, %v373_v47  ;;  %v550_v62 = vrot.slane %v549_v41, 4  ;;  %v377_v0 = vrot.slane %v375_v27, 4  ;;  %v380_v6 = vrot.slane %v378_v45, 5  ;;  %9116 = vst [vmem:[#allocation15_spill] sm:$0xff] %v6683_v32  ;;  %v6691_v47 = vld [vmem:[%s6449_s6 + $0x48] sm:$0xf] }
  0x5d   : > { %v560_v10 = vrot.slane %v559_v48, 4  ;;  %v386_v61 = vrot.slane %v384_v42, 5  ;;  %v390_v12 = vrot.slane %v388_v50, 4  ;;  %v394_v13 = vshll.u32 %v6653_v24, 16 }
  0x5e   : > { %5903 = vmatprep.mubr.msk.bf16.mxu0 %vm694_vm3, %v5140_v60  ;;  %v555_v14 = vsel %vm6485_vm4, %v550_v62, %v554_v17  ;;  %v381_v20 = vor.u32 %v380_v6, %v377_v0  ;;  %v567_v33 = vshrl.u32 %v6658_v37, 16  ;;  %v570_v30 = vshll.u32 %v6658_v37, 16  ;;  %v6694_v60 = vld [vmem:[%s6449_s6 + $0x4c] sm:$0xf] }
  0x5f   : > { %v565_v35 = vsel %vm6485_vm4, %v560_v10, %v564_v21  ;;  %v391_v41 = vor.u32 %v390_v12, %v386_v61  ;;  %v396_v27 = vrot.slane %v394_v13, 5  ;;  %v576_v45 = vshll.u32 %v6674_v7, 16  ;;  %v6702_v13 = vld [vmem:[%s6449_s6 + $0x50] sm:$0x1] }
  0x60   : > { %v5148_v48 = vcombine.low %v555_v14, %v565_v35  ;;  %v382_v42 = vrot.slane %v381_v20, 4  ;;  %v569_v17 = vrot.slane %v567_v33, 4  ;;  %v572_v50 = vrot.slane %v570_v30, 5 }
  0x61   : > { %v392_v62 = vrot.slane %v391_v41, 4  ;;  %v578_v0 = vrot.slane %v576_v45, 5  ;;  %v580_v6 = vshrl.u32 %v6674_v7, 16  ;;  %v586_v21 = vshll.u32 %v6683_v32, 16  ;;  %v6710_v45 = vld [vmem:[%s6449_s6 + $0xa8] sm:$0xf] }
  0x62   : > { %5919 = vmatprep.mubr.msk.bf16.mxu1 %vm694_vm3, %v5148_v48  ;;  %v387_v10 = vsel %vm6485_vm4, %v382_v42, %v386_v61  ;;  %v573_v12 = vor.u32 %v572_v50, %v569_v17  ;;  %v399_v14 = vshrl.u32 %v6691_v47, 16  ;;  %v402_v20 = vshll.u32 %v6691_v47, 16  ;;  %9117 = vst [vmem:[#allocation16_spill] sm:$0xff] %v6710_v45  ;;  %v6713_v17 = vld [vmem:[%s6449_s6 + $0xac] sm:$0xf] }
  0x63   : > { %v397_v33 = vsel %vm6485_vm4, %v392_v62, %v396_v27  ;;  %v582_v30 = vrot.slane %v580_v6, 4  ;;  %v588_v35 = vrot.slane %v586_v21, 5  ;;  %v408_v41 = vshll.u32 %v6694_v60, 16  ;;  %9118 = vst [vmem:[#allocation17_spill] sm:$0xff] %v6713_v17  ;;  %v6721_v6 = vld [vmem:[%s6449_s6 + $0xb0] sm:$0x1] }
  0x64   : > { %v5141_v48 = vcombine.low %v387_v10, %v397_v33  ;;  %v574_v59 = vrot.slane %v573_v12, 4  ;;  %v401_v61 = vrot.slane %v399_v14, 4  ;;  %v404_v42 = vrot.slane %v402_v20, 5  ;;  %9119 = vst [vmem:[#allocation18_spill] sm:$0xff] %v6721_v6 }
  0x65   : > { %v583_v50 = vor.u32 %v582_v30, %v578_v0  ;;  %v410_v19 = vrot.slane %v408_v41, 5  ;;  %v412_v58 = vshrl.u32 %v6694_v60, 16  ;;  %v418_v29 = vshll.u32 %v6702_v13, 16 }
  0x66   : > { %5904 = vmatmul.mubr.msk.bf16.gmra.mxu0 %vm694_vm3, %v5141_v48  ;;  %v579_v27 = vsel %vm6485_vm4, %v574_v59, %v578_v0  ;;  %v405_v62 = vor.u32 %v404_v42, %v401_v61  ;;  %v591_v21 = vshrl.u32 %v6710_v45, 16  ;;  %v594_v10 = vshll.u32 %v6710_v45, 16  ;;  %v6728_v48 = vld [vmem:[%s6449_s6 + $0x54] sm:$0xf] }
  0x67   : > { %v584_v12 = vrot.slane %v583_v50, 4  ;;  %v414_v14 = vrot.slane %v412_v58, 4  ;;  %v420_v20 = vrot.slane %v418_v29, 5  ;;  %v600_v33 = vshll.u32 %v6713_v17, 16  ;;  %v6734_v29 = vld [vmem:[%s6449_s6 + $0x58] sm:$0xf] }
  0x68   : > { %v406_v30 = vrot.slane %v405_v62, 4  ;;  %v593_v41 = vrot.slane %v591_v21, 4  ;;  %v596_v59 = vrot.slane %v594_v10, 5  ;;  %v604_v0 = vshrl.u32 %v6713_v17, 16  ;;  %v6742_v17 = vld [vmem:[%s6449_s6 + $0xb4] sm:$0xf] }
  0x69   : > { %v589_v61 = vsel %vm6485_vm4, %v584_v12, %v588_v35  ;;  %v415_v42 = vor.u32 %v414_v14, %v410_v19  ;;  %v602_v50 = vrot.slane %v600_v33, 5  ;;  %v610_v58 = vshll.u32 %v6721_v6, 16  ;;  %v6747_v14 = vld [vmem:[%s6449_s6 + $0xb8] sm:$0xf] }
  0x6a   : > { %v5149_v45 = vcombine.low %v579_v27, %v589_v61  ;;  %v411_v62 = vsel %vm6485_vm4, %v406_v30, %v410_v19  ;;  %v597_v21 = vor.u32 %v596_v59, %v593_v41  ;;  %v606_v10 = vrot.slane %v604_v0, 4 }
  0x6b   : > { %v416_v32 = vrot.slane %v415_v42, 4  ;;  %v612_v37 = vrot.slane %v610_v58, 5  ;;  %v423_v35 = vshrl.u32 %v6728_v48, 16  ;;  %v426_v12 = vshll.u32 %v6728_v48, 16 }
  0x6c   : > { %5920 = vmatmul.mubr.msk.bf16.gmra.mxu1 %vm694_vm3, %v5149_v45  ;;  %v598_v33 = vrot.slane %v597_v21, 4  ;;  %v607_v27 = vor.u32 %v606_v10, %v602_v50  ;;  %v432_v19 = vshll.u32 %v6734_v29, 16  ;;  %v436_v30 = vshrl.u32 %v6734_v29, 16  ;;  %v6758_v21 = vld [vmem:[%s6449_s6 + $0xbc] sm:$0x1] }
  0x6d   : > { %v421_v41 = vsel %vm6485_vm4, %v416_v32, %v420_v20  ;;  %v425_v59 = vrot.slane %v423_v35, 4  ;;  %v428_v0 = vrot.slane %v426_v12, 5  ;;  %v442_v61 = vshll.u32 %v6737_v52, 16 }
  0x6e   : > { %v5142_v42 = vcombine.low %v411_v62, %v421_v41  ;;  %v603_v58 = vsel %vm6485_vm4, %v598_v33, %v602_v50  ;;  %v608_v6 = vrot.slane %v607_v27, 4  ;;  %v434_v45 = vrot.slane %v432_v19, 5  ;;  %v1206_v19 = vld [vmem:[%s6449_s6 + $0xc] sm:$0xe] }
  0x6f   : > { %v429_v10 = vor.u32 %v428_v0, %v425_v59  ;;  %v438_v7 = vrot.slane %v436_v30, 4  ;;  %v444_v54 = vrot.slane %v442_v61, 5  ;;  %v615_v43 = vshrl.u32 %v6742_v17, 16 }
  0x70   : > { %5907 = vmatprep.mubr.msk.bf16.mxu0 %vm694_vm3, %v5142_v42  ;;  %v613_v32 = vsel %vm6485_vm4, %v608_v6, %v612_v37  ;;  %v618_v20 = vshll.u32 %v6742_v17, 16  ;;  %v624_v50 = vshll.u32 %v6747_v14, 16  ;;  %v628_v62 = vshrl.u32 %v6747_v14, 16 }
  0x71   : > { %v5150_v35 = vcombine.low %v603_v58, %v613_v32  ;;  %v430_v12 = vrot.slane %v429_v10, 4  ;;  %v439_v33 = vor.u32 %v438_v7, %v434_v45  ;;  %v617_v27 = vrot.slane %v615_v43, 4 }
  0x72   : > { %v620_v30 = vrot.slane %v618_v20, 5  ;;  %v626_v41 = vrot.slane %v624_v50, 5  ;;  %v630_v59 = vrot.slane %v628_v62, 4  ;;  %v634_v0 = vshll.u32 %v6758_v21, 16 }
  0x73   : > { %5923 = vmatprep.mubr.msk.bf16.mxu1 %vm694_vm3, %v5150_v35  ;;  %v435_v6 = vsel %vm6485_vm4, %v430_v12, %v434_v45  ;;  %v440_v7 = vrot.slane %v439_v33, 4  ;;  %v5202_v43 = vrot.slane %v1205_v34, 9  ;;  %v1258_v61 = vrot.slane %v6455_v2, 5  ;;  %v1207_v45 = vld [vmem:[%s6449_s6 + $0x18] sm:$0xe] }
  0x74   : > { %v621_v42 = vor.u32 %v620_v30, %v617_v27  ;;  %v631_v58 = vor.u32 %v630_v59, %v626_v41  ;;  %v636_v10 = vrot.slane %v634_v0, 5  ;;  %v5170_v32 = vcombine.low %v6490_v31, %v6493_v36 }
  0x75   : > { %v445_v20 = vsel %vm6485_vm4, %v440_v7, %v444_v54  ;;  %v1259_v50 = vsel %vm6772_vm7, %v5202_v43, %v1258_v61  ;;  %v1260_v62 = vrot.slane %v1258_v61, 4  ;;  %v5203_v35 = vrot.slane %v1206_v19, 9  ;;  %v1208_v61 = vld [vmem:[%s6449_s6 + $0x24] sm:$0xe] }
  0x76   : > { %v5143_v12 = vcombine.low %v435_v6, %v445_v20  ;;  %v622_v34 = vrot.slane %v621_v42, 4  ;;  %v632_v33 = vrot.slane %v631_v58, 4  ;;  %v9122_v27 = vrot.slane %v6493_v36, 5 }
  0x77   : > { %v5169_v59 = vcombine.low %v6452_v1, %v6455_v2  ;;  %v9123_v0 = vrot.slane %v6458_v3, 5  ;;  %v9125_v2 = vrot.slane %v6502_v44, 5  ;;  %v5171_v58 = vcombine.low %v6530_v15, %v6538_v22 }
  0x78   : > { %v1267_v30 = vrot.slane %v9122_v27, 4  ;;  %v9124_v7 = vmov %v9122_v27  ;;  %5908 = vmatmul.mubr.msk.bf16.gmra.mxu0 %vm694_vm3, %v5143_v12  ;;  %v627_v6 = vsel %vm6485_vm4, %v622_v34, %v626_v41  ;;  %v637_v43 = vsel %vm6485_vm4, %v632_v33, %v636_v10  ;;  %v1210_v12 = vld [vmem:[%s6449_s6 + $0x3c] sm:$0xe] }
  0x79   : > { %v1262_v54 = vsel %vm6772_vm7, %v1260_v62, %v9123_v0  ;;  %v1266_v19 = vsel %vm6772_vm7, %v5203_v35, %v9124_v7  ;;  %v5151_v42 = vcombine.low %v627_v6, %v637_v43  ;;  %v5204_v20 = vrot.slane %v1207_v45, 9  ;;  %v1209_v62 = vld [vmem:[%s6449_s6 + $0x30] sm:$0xe]  ;;  %v1211_v43 = vld [vmem:[%s6449_s6 + $0x48] sm:$0xe] }
  0x7a   : > { %v5218_v1 = vcombine.low %v1259_v50, %v1262_v54  ;;  %v1269_v3 = vsel %vm6772_vm7, %v1267_v30, %v9125_v2  ;;  %v1272_v41 = vrot.slane %v6538_v22, 5  ;;  %v1275_v35 = vrot.slane %v6544_v28, 5  ;;  %v6825_v30 = vld [vmem:[#allocation2 + $0x30] sm:$0x3f]  }
  0x7b   : > { %5924 = vmatmul.mubr.msk.bf16.gmra.mxu1 %vm694_vm3, %v5151_v42  ;;  %v5219_v10 = vcombine.low %v1266_v19, %v1269_v3  ;;  %v5205_v44 = vrot.slane %v1208_v61, 9  ;;  %v1279_v50 = vrot.slane %v6574_v9, 5  ;;  %v5206_v34 = vrot.slane %v1209_v62, 9  ;;  %v1212_v3 = vld [vmem:[%s6449_s6 + $0x54] sm:$0xe] }
  0x7c   : > { %5963 = vmatprep.mubr.msk.bf16.mxu0 %vm694_vm3, %v5218_v1  ;;  %5929 = vmatprep.mubr.msk.bf16.mxu1 %vm694_vm3, %v5169_v59  ;;  %v1273_v15 = vsel %vm6772_vm7, %v5204_v20, %v1272_v41  ;;  %v1274_v45 = vrot.slane %v1272_v41, 4  ;;  %v1286_v33 = vrot.slane %v6610_v5, 5  ;;  %v2570_v22 = vsel %vm743_vm0, %v6671_v55, 0 }
  0x7d   : > { %v1281_v28 = vrot.slane %v1279_v50, 4  ;;  %v1282_v27 = vrot.slane %v6581_v23, 5  ;;  %v1289_v54 = vrot.slane %v6619_v18, 5  ;;  %v1293_v7 = vrot.slane %v6646_v4, 5  ;;  %v6841_v18 = vld [vmem:[#allocation2 + $0x28] sm:$0x3f]  }
  0x7e   : > { %v1276_v0 = vsel %vm6772_vm7, %v1274_v45, %v1275_v35  ;;  %v1288_v59 = vrot.slane %v1286_v33, 4  ;;  %v1317_v19 = vrot.slane %v6476_v16, 5  ;;  %v1838_v55 = vsel %vm743_vm0, %v6660_v38, 0 }
  0x7f   : > { %v5220_v6 = vcombine.low %v1273_v15, %v1276_v0  ;;  %v1280_v23 = vsel %vm6772_vm7, %v5205_v44, %v1279_v50  ;;  %v1287_v1 = vsel %vm6772_vm7, %v5206_v34, %v1286_v33  ;;  %v5207_v2 = vrot.slane %v1210_v12, 9  ;;  %v1213_v15 = vld [vmem:[%s6449_s6 + $0x60] sm:$0xe]  ;;  %v6873_v34 = vld [vmem:[%s6449_s6 + $0x6c] sm:$0xe] }
  0x80   : > { %5964 = vmatmul.mubr.msk.bf16.vlgmr.msra.gmra.mxu0 %vm694_vm3, %v5219_v10  ;;  %v1283_v61 = vsel %vm6772_vm7, %v1281_v28, %v1282_v27  ;;  %v1295_v42 = vrot.slane %v1293_v7, 4  ;;  %v1296_v38 = vrot.slane %v6653_v24, 5  ;;  %v1300_v20 = vrot.slane %v6694_v60, 5 }
  0x81   : > { %6030 = vmatpush3.bf16.msra.mxu0 %v2570_v22  ;;  %5967 = vmatprep.mubr.msk.bf16.mxu0 %vm694_vm3, %v5220_v6  ;;  %v1290_v62 = vsel %vm6772_vm7, %v1288_v59, %v1289_v54  ;;  %v5208_v41 = vrot.slane %v1211_v43, 9  ;;  %v1303_v35 = vrot.slane %v6702_v13, 5  ;;  %v1307_v10 = vrot.slane %v6734_v29, 5  ;;  %v1216_v22 = vld [vmem:[%s6449_s6 + $0x84] sm:$0xe] }
  0x82   : > { %6208 = vmatprep.subr.msk.bf16.mxu0 %vm743_vm0, %v6825_v30  ;;  %v5172_v24 = vcombine.low %v6566_v57, %v6574_v9  ;;  %v1302_v44 = vrot.slane %v1300_v20, 4  ;;  %v5209_v50 = vrot.slane %v1212_v3, 9  ;;  %v1310_v12 = vrot.slane %v6737_v52, 5 }
  0x83   : > { %5930 = vmatmul.mubr.msk.bf16.vlgmr.msra.gmra.mxu1 %vm694_vm3, %v5170_v32  ;;  %v5221_v13 = vcombine.low %v1280_v23, %v1283_v61  ;;  %v5173_v45 = vcombine.low %v6604_v53, %v6610_v5  ;;  %v5174_v31 = vcombine.low %v6640_v56, %v6646_v4  ;;  %v1309_v36 = vrot.slane %v1307_v10, 4  ;;  %v1217_v61 = vld [vmem:[%s6449_s6 + $0x90] sm:$0xe]  ;;  %v7000_v4 = vld [vmem:[%s6449_s6 + $0x14] sm:$0x1] }
  0x84   : > { %5996 = vmatpush3.bf16.msra.mxu1 %v1838_v55  ;;  %5933 = vmatprep.mubr.msk.bf16.mxu1 %vm694_vm3, %v5171_v58  ;;  %v5222_v32 = vcombine.low %v1287_v1, %v1290_v62  ;;  %v1294_v57 = vsel %vm6772_vm7, %v5207_v2, %v1293_v7  ;;  %v1297_v52 = vsel %vm6772_vm7, %v1295_v42, %v1296_v38  ;;  %v1314_v9 = vrot.slane %v6472_v11, 5  ;;  %v6902_v55 = vld [vmem:[%s6449_s6 + $0x78] sm:$0xe] }
  0x85   : > { %6207 = vmatprep.subr.msk.bf16.mxu1 %vm743_vm0, %v6841_v18  ;;  %v1301_v53 = vsel %vm6772_vm7, %v5208_v41, %v1300_v20  ;;  %v1304_v5 = vsel %vm6772_vm7, %v1302_v44, %v1303_v35  ;;  %v5210_v58 = vrot.slane %v1213_v15, 9  ;;  %v1321_v33 = vrot.slane %v6511_v51, 5  ;;  %v1218_v41 = vld [vmem:[%s6449_s6 + $0x9c] sm:$0xe]  ;;  %v1219_v15 = vld [vmem:[%s6449_s6 + $0xa8] sm:$0xe] }
  0x86   : > { %v5175_v28 = vcombine.low %v6691_v47, %v6694_v60  ;;  %v5176_v27 = vcombine.low %v6728_v48, %v6734_v29  ;;  %v6889_v0 = vsel %vm6772_vm7, %v5209_v50, %v1307_v10  ;;  %v6893_v59 = vsel %vm6772_vm7, %v1309_v36, %v1310_v12  ;;  %v9126_v50 = vld [vmem:[#allocation11_spill] sm:$0xff]  ;;  %v1220_v60 = vld [vmem:[%s6449_s6 + $0xb4] sm:$0xe]  ;;  %v7054_v29 = vld [vmem:[%s6449_s6 + $0x2c] sm:$0x1] }
  0x87   : > { %v5223_v54 = vcombine.low %v1294_v57, %v1297_v52  ;;  %v5177_v7 = vcombine.low %v6467_v8, %v6472_v11  ;;  %v5178_v6 = vcombine.low %v6506_v46, %v6511_v51  ;;  %v5211_v43 = vrot.slane %v6873_v34, 9  ;;  %v9128_v57 = vld [vmem:[#allocation12_spill] sm:$0xff]  ;;  %v9129_v34 = vld [vmem:[#allocation14_spill] sm:$0xff] }
  0x88   : > { %5968 = vmatmul.mubr.msk.bf16.gmra.mxu0 %vm694_vm3, %v5221_v13  ;;  %v5224_v23 = vcombine.low %v1301_v53, %v1304_v5  ;;  %v1316_v1 = vrot.slane %v1314_v9, 4  ;;  %v5213_v3 = vrot.slane %v1216_v22, 9  ;;  %v5225_v42 = vcombine.low %v6889_v0, %v6893_v59  ;;  %v9127_v13 = vld [vmem:[#allocation9_spill] sm:$0xff]  ;;  %v7039_v0 = vld [vmem:[%s6449_s6 + $0x28] sm:$0xf] }
  0x89   : > { %5971 = vmatprep.mubr.msk.bf16.mxu0 %vm694_vm3, %v5222_v32  ;;  %v6912_v38 = vsel %vm6772_vm7, %v5210_v58, %v1314_v9  ;;  %v1323_v20 = vrot.slane %v1321_v33, 4  ;;  %v1324_v62 = vrot.slane %v6522_v63, 5  ;;  %v5212_v35 = vrot.slane %v6902_v55, 9  ;;  %v9131_v55 = vld [vmem:[#allocation15_spill] sm:$0xff] }
  0x8a   : > { %v1335_v10 = vrot.slane %v6592_v39, 5  ;;  %v1338_v44 = vrot.slane %v6600_v49, 5  ;;  %v1328_v36 = vrot.slane %v9127_v13, 5  ;;  %v5214_v32 = vrot.slane %v1217_v61, 9  ;;  %v9133_v61 = vld [vmem:[#allocation16_spill] sm:$0xff] }
  0x8b   : > { %5934 = vmatmul.mubr.msk.bf16.gmra.mxu1 %vm694_vm3, %v5172_v24  ;;  %v1342_v63 = vrot.slane %v6630_v40, 5  ;;  %v1345_v52 = vrot.slane %v9128_v57, 5  ;;  %v1318_v24 = vsel %vm6772_vm7, %v1316_v1, %v1317_v19  ;;  %v5215_v22 = vrot.slane %v1218_v41, 9 }
  0x8c   : > { %5937 = vmatprep.mubr.msk.bf16.mxu1 %vm694_vm3, %v5173_v45  ;;  %v6933_v49 = vsel %vm6772_vm7, %v5213_v3, %v1335_v10  ;;  %v1337_v9 = vrot.slane %v1335_v10, 4  ;;  %v9130_v45 = vld [vmem:[#allocation13_spill] sm:$0xff]  ;;  %v1349_v16 = vrot.slane %v9129_v34, 5  ;;  %v1352_v1 = vrot.slane %v9131_v55, 5  ;;  %v9134_v55 = vld [vmem:[#allocation18_spill] sm:$0xff] }
  0x8d   : > { %v6939_v5 = vsel %vm6772_vm7, %v5214_v32, %v1342_v63  ;;  %v1344_v58 = vrot.slane %v1342_v63, 4  ;;  %v9132_v3 = vld [vmem:[#allocation17_spill] sm:$0xff]  ;;  %v5216_v57 = vrot.slane %v1219_v15, 9  ;;  %v1359_v10 = vrot.slane %v9134_v55, 5 }
  0x8e   : > { %v6944_v19 = vsel %vm6772_vm7, %v1337_v9, %v1338_v44  ;;  %v6958_v63 = vsel %vm6772_vm7, %v5215_v22, %v1349_v16  ;;  %v1351_v44 = vrot.slane %v1349_v16, 4  ;;  %v5316_v9 = vld [vmem:[%s6449_s6 + $0xc] sm:$0xf]  ;;  %v6973_v22 = vsel %vm6772_vm7, %v5211_v43, %v1321_v33 }
  0x8f   : > { %v5229_v32 = vcombine.low %v6933_v49, %v6944_v19  ;;  %v6954_v41 = vsel %vm6772_vm7, %v1344_v58, %v1345_v52  ;;  %v6969_v58 = vld [vmem:[%s6449_s6 + $0x10] sm:$0xf]  ;;  %v1330_v16 = vrot.slane %v1328_v36, 4  ;;  %v6997_v56 = vsel %vm6772_vm7, %v1323_v20, %v1324_v62  ;;  %v7015_v20 = vld [vmem:[%s6449_s6 + $0x1c] sm:$0xf] }
  0x90   : > { %5972 = vmatmul.mubr.msk.bf16.gmra.mxu0 %vm694_vm3, %v5223_v54  ;;  %v1356_v54 = vrot.slane %v9132_v3, 5  ;;  %v6978_v12 = vsel %vm6772_vm7, %v1351_v44, %v1352_v1  ;;  %v5226_v1 = vcombine.low %v6912_v38, %v1318_v24  ;;  %v5319_v44 = vld [vmem:[%s6449_s6 + $0x18] sm:$0xf]  ;;  %v2095_v38 = vshrl.u32 %v6969_v58, 16 }
  0x91   : > { %5975 = vmatprep.mubr.msk.bf16.mxu0 %vm694_vm3, %v5224_v23  ;;  %v9135_v23 = vld [vmem:[#allocation10_spill] sm:$0xff]  ;;  %v2106_v52 = vshrl.u32 %v5319_v44, 16  ;;  %v2115_v24 = vshll.u32 %v7015_v20, 16  ;;  %v5217_v59 = vrot.slane %v1220_v60, 9 }
  0x92   : > { %v1331_v53 = vrot.slane %v9135_v23, 5  ;;  %v6988_v33 = vsel %vm6772_vm7, %v5216_v57, %v1356_v54  ;;  %v1358_v43 = vrot.slane %v1356_v54, 4  ;;  %v2082_v23 = vshrl.u32 %v5316_v9, 16 }
  0x93   : > { %5938 = vmatmul.mubr.msk.bf16.gmra.mxu1 %vm694_vm3, %v5174_v31  ;;  %v2085_v31 = vshll.u32 %v5316_v9, 16  ;;  %v2091_v57 = vshll.u32 %v6969_v58, 16  ;;  %v7006_v54 = vsel %vm6772_vm7, %v5212_v35, %v1328_v36  ;;  %v1363_v36 = vrot.slane %v6747_v14, 5 }
  0x94   : > { %5941 = vmatprep.mubr.msk.bf16.mxu1 %vm694_vm3, %v5175_v28  ;;  %v7010_v47 = vsel %vm6772_vm7, %v1358_v43, %v1359_v10  ;;  %v2084_v28 = vrot.slane %v2082_v23, 4  ;;  %v1332_v62 = vsel %vm6772_vm7, %v1330_v16, %v1331_v53  ;;  %v2097_v10 = vrot.slane %v2095_v38, 4  ;;  %v5321_v23 = vld [vmem:[%s6449_s6 + $0x20] sm:$0x1] }
  0x95   : > { %v2087_v9 = vrot.slane %v2085_v31, 5  ;;  %v7021_v35 = vrot.slane %v2091_v57, 5  ;;  %v2101_v43 = vshll.u32 %v7000_v4, 16  ;;  %v2109_v16 = vshll.u32 %v5319_v44, 16  ;;  %v5322_v57 = vld [vmem:[%s6449_s6 + $0x24] sm:$0xf] }
  0x96   : > { %v2119_v31 = vshrl.u32 %v7015_v20, 16  ;;  %v5227_v38 = vcombine.low %v6973_v22, %v6997_v56  ;;  %v5228_v55 = vcombine.low %v7006_v54, %v1332_v62  ;;  %v2108_v15 = vrot.slane %v2106_v52, 4 }
  0x97   : > { %v2088_v53 = vor.u32 %v2087_v9, %v2084_v28  ;;  %v2098_v2 = vor.u32 %v2097_v10, %v7021_v35  ;;  %v7041_v44 = vrot.slane %v2115_v24, 5  ;;  %v1365_v22 = vrot.slane %v1363_v36, 4  ;;  %v5325_v9 = vld [vmem:[%s6449_s6 + $0x30] sm:$0xf] }
  0x98   : > { %5976 = vmatmul.mubr.msk.bf16.gmra.mxu0 %vm694_vm3, %v5225_v42  ;;  %v2111_v42 = vrot.slane %v2109_v16, 5  ;;  %v2121_v28 = vrot.slane %v2119_v31, 4  ;;  %v2125_v56 = vshll.u32 %v5321_v23, 16  ;;  %v2130_v54 = vshrl.u32 %v5322_v57, 16  ;;  %v9136_v23 = vld [vmem:[#allocation8_spill] sm:$0xff] }
  0x99   : > { %5979 = vmatprep.mubr.msk.bf16.mxu0 %vm694_vm3, %v5226_v1  ;;  %v1366_v1 = vrot.slane %v6758_v21, 5  ;;  %v2089_v52 = vrot.slane %v2088_v53, 4  ;;  %v2099_v60 = vrot.slane %v2098_v2, 4  ;;  %v2103_v62 = vrot.slane %v2101_v43, 5  ;;  %v7066_v43 = vld [vmem:[%s6449_s6 + $0x34] sm:$0xf] }
  0x9a   : > { %v2133_v24 = vshll.u32 %v5322_v57, 16  ;;  %v2112_v48 = vor.u32 %v2111_v42, %v2108_v15  ;;  %v2139_v21 = vshll.u32 %v7039_v0, 16  ;;  %v2143_v10 = vshrl.u32 %v7039_v0, 16  ;;  %v5328_v15 = vld [vmem:[%s6449_s6 + $0x3c] sm:$0xf] }
  0x9b   : > { %5942 = vmatmul.mubr.msk.bf16.gmra.mxu1 %vm694_vm3, %v5176_v27  ;;  %v2132_v27 = vrot.slane %v2130_v54, 4  ;;  %v5179_v8 = vcombine.low %v9136_v23, %v9127_v13  ;;  %v7062_v11 = vsel %vm6772_vm7, %v5217_v59, %v1363_v36  ;;  %v7071_v53 = vsel %vm6772_vm7, %v1365_v22, %v1366_v1  ;;  %v7095_v1 = vld [vmem:[%s6449_s6 + $0x38] sm:$0x1] }
  0x9c   : > { %5945 = vmatprep.mubr.msk.bf16.mxu1 %vm694_vm3, %v5177_v7  ;;  %v2122_v7 = vor.u32 %v2121_v28, %v7041_v44  ;;  %v2135_v2 = vrot.slane %v2133_v24, 5  ;;  %v7073_v16 = vrot.slane %v2125_v56, 5  ;;  %v7077_v13 = vsel %vm743_vm0, %v6841_v18, 0  ;;  %v7098_v56 = vld [vmem:[%s6449_s6 + $0x40] sm:$0xf] }
  0x9d   : > { %v2154_v36 = vshrl.u32 %v5325_v9, 16  ;;  %v2094_v31 = vsel %vm6485_vm4, %v2089_v52, %v7021_v35  ;;  %v2104_v57 = vsel %vm6485_vm4, %v2099_v60, %v2103_v62  ;;  %v7087_v59 = vsel %vm743_vm0, %v6825_v30, 0  ;;  %v5331_v60 = vld [vmem:[%s6449_s6 + $0x48] sm:$0xf] }
  0x9e   : > { %v2157_v42 = vshll.u32 %v5325_v9, 16  ;;  %v7090_v18 = vrot.slane %v2112_v48, 4  ;;  %v2136_v28 = vor.u32 %v2135_v2, %v2132_v27  ;;  %v7092_v22 = vrot.slane %v2139_v21, 5  ;;  %v7146_v48 = vld [vmem:[%s6449_s6 + $0x50] sm:$0x1] }
  0x9f   : > { %v7100_v35 = vrot.slane %v2122_v7, 4  ;;  %v2149_v54 = vshll.u32 %v7054_v29, 16  ;;  %v2163_v30 = vshll.u32 %v7066_v43, 16  ;;  %v2167_v52 = vshrl.u32 %v7066_v43, 16 }
  0xa0   : > { %5980 = vmatmul.mubr.msk.bf16.gmra.mxu0 %vm694_vm3, %v5227_v38  ;;  %v2145_v38 = vrot.slane %v2143_v10, 4  ;;  %v2159_v62 = vrot.slane %v2157_v42, 5  ;;  %v2178_v24 = vshrl.u32 %v5328_v15, 16  ;;  %v2181_v9 = vshll.u32 %v5328_v15, 16  ;;  %v7130_v15 = vld [vmem:[%s6449_s6 + $0x44] sm:$0x1] }
  0xa1   : > { %5983 = vmatprep.mubr.msk.bf16.mxu0 %vm694_vm3, %v5228_v55  ;;  %v2156_v55 = vrot.slane %v2154_v36, 4  ;;  %v7113_v27 = vcombine.low %v2094_v31, %v2104_v57  ;;  %v7115_v21 = vrot.slane %v2163_v30, 5  ;;  %v2169_v10 = vrot.slane %v2167_v52, 4  ;;  %v7134_v31 = vld [vmem:[%s6449_s6 + $0x4c] sm:$0xf] }
  0xa2   : > { %v7117_v46 = vrot.slane %v2136_v28, 4  ;;  %v2146_v51 = vor.u32 %v2145_v38, %v7092_v22  ;;  %v2183_v23 = vrot.slane %v2181_v9, 5  ;;  %v2128_v7 = vsel %vm6485_vm4, %v7100_v35, %v7073_v16  ;;  %v5334_v30 = vld [vmem:[%s6449_s6 + $0x54] sm:$0xf] }
  0xa3   : > { %5946 = vmatmul.mubr.msk.bf16.gmra.mxu1 %vm694_vm3, %v5178_v6  ;;  %v2180_v6 = vrot.slane %v2178_v24, 4  ;;  %v2173_v2 = vshll.u32 %v7095_v1, 16  ;;  %v2187_v36 = vshll.u32 %v7098_v56, 16  ;;  %v2160_v57 = vor.u32 %v2159_v62, %v2156_v55 }
  0xa4   : > { %5949 = vmatprep.mubr.msk.bf16.mxu1 %vm694_vm3, %v5179_v8  ;;  %v2170_v42 = vor.u32 %v2169_v10, %v7115_v21  ;;  %v2191_v28 = vshrl.u32 %v7098_v56, 16  ;;  %v2202_v38 = vshrl.u32 %v5331_v60, 16  ;;  %v2151_v52 = vrot.slane %v2149_v54, 5  ;;  %v7157_v54 = vld [vmem:[%s6449_s6 + $0x58] sm:$0xf] }
  0xa5   : > { %v2184_v24 = vor.u32 %v2183_v23, %v2180_v6  ;;  %v7143_v9 = vrot.slane %v2187_v36, 5  ;;  %v2205_v8 = vshll.u32 %v5331_v60, 16  ;;  %v9137_v55 = vcombine.low %v6939_v5, %v6954_v41 }
  0xa6   : > { %v2142_v62 = vsel %vm6485_vm4, %v7117_v46, %v7092_v22  ;;  %v2147_v49 = vrot.slane %v2146_v51, 4  ;;  %v2193_v19 = vrot.slane %v2191_v28, 4  ;;  %v2197_v10 = vshll.u32 %v7130_v15, 16 }
  0xa7   : > { %v2207_v6 = vrot.slane %v2205_v8, 5  ;;  %v2211_v60 = vshll.u32 %v7134_v31, 16  ;;  %v2215_v23 = vshrl.u32 %v7134_v31, 16  ;;  %v9138_v5 = vcombine.low %v6585_v25, %v6592_v39 }
  0xa8   : > { %5984 = vmatmul.mubr.msk.bf16.gmra.mxu0 %vm694_vm3, %v5229_v32  ;;  %v2204_v32 = vrot.slane %v2202_v38, 4  ;;  %v2161_v41 = vrot.slane %v2160_v57, 4  ;;  %v2171_v22 = vrot.slane %v2170_v42, 4  ;;  %v2175_v46 = vrot.slane %v2173_v2, 5 }
  0xa9   : > { %5987 = vmatprep.mubr.msk.bf16.mxu0 %vm694_vm3, %v9137_v55  ;;  %v2194_v51 = vor.u32 %v2193_v19, %v7143_v9  ;;  %v9139_v36 = vcombine.low %v9126_v50, %v6630_v40  ;;  %v2185_v8 = vrot.slane %v2184_v24, 4  ;;  %v7171_v28 = vrot.slane %v2211_v60, 5  ;;  %v7177_v40 = vld [vmem:[%s6449_s6 + $0x5c] sm:$0x1]  ;;  %v5337_v24 = vld [vmem:[%s6449_s6 + $0x60] sm:$0xf] }
  0xaa   : > { %v2217_v38 = vrot.slane %v2215_v23, 4  ;;  %v2226_v25 = vshrl.u32 %v5334_v30, 16  ;;  %v2208_v39 = vor.u32 %v2207_v6, %v2204_v32  ;;  %v2221_v57 = vshll.u32 %v7146_v48, 16  ;;  %v7187_v23 = vld [vmem:[%s6449_s6 + $0x64] sm:$0xf] }
  0xab   : > { %5950 = vmatmul.mubr.msk.bf16.gmra.mxu1 %vm694_vm3, %v9138_v5  ;;  %v2229_v55 = vshll.u32 %v5334_v30, 16  ;;  %v2235_v2 = vshll.u32 %v7157_v54, 16  ;;  %v2195_v42 = vrot.slane %v2194_v51, 4  ;;  %v2199_v19 = vrot.slane %v2197_v10, 5 }
  0xac   : > { %5953 = vmatprep.mubr.msk.bf16.mxu1 %vm694_vm3, %v9139_v36  ;;  %v2218_v5 = vor.u32 %v2217_v38, %v7171_v28  ;;  %v2239_v50 = vshrl.u32 %v7157_v54, 16  ;;  %v2152_v60 = vsel %vm6485_vm4, %v2147_v49, %v2151_v52  ;;  %v2166_v32 = vsel %vm6485_vm4, %v2161_v41, %v7115_v21  ;;  %v5340_v21 = vld [vmem:[%s6449_s6 + $0x6c] sm:$0xf] }
  0xad   : > { %v2228_v30 = vrot.slane %v2226_v25, 4  ;;  %v2231_v6 = vrot.slane %v2229_v55, 5  ;;  %v9140_v10 = vcombine.low %v6958_v63, %v6978_v12  ;;  %v2176_v51 = vsel %vm6485_vm4, %v2171_v22, %v2175_v46 }
  0xae   : > { %v2190_v52 = vsel %vm6485_vm4, %v2185_v8, %v7143_v9  ;;  %v7198_v49 = vrot.slane %v2235_v2, 5  ;;  %v2241_v36 = vrot.slane %v2239_v50, 4  ;;  %v9141_v41 = vcombine.low %v6988_v33, %v7010_v47 }
  0xaf   : > { %v2209_v12 = vrot.slane %v2208_v39, 4  ;;  %v2223_v63 = vrot.slane %v2221_v57, 5  ;;  %v2250_v38 = vshrl.u32 %v5337_v24, 16  ;;  %v2253_v25 = vshll.u32 %v5337_v24, 16 }
  0xb0   : > { %5988 = vmatmul.mubr.msk.bf16.gmra.mxu0 %vm694_vm3, %v9140_v10  ;;  %v2200_v22 = vsel %vm6485_vm4, %v2195_v42, %v2199_v19  ;;  %v2219_v9 = vrot.slane %v2218_v5, 4  ;;  %v2259_v46 = vshll.u32 %v7187_v23, 16  ;;  %v2263_v8 = vshrl.u32 %v7187_v23, 16  ;;  %v7248_v5 = vld [vmem:[%s6449_s6 + $0x7c] sm:$0xf] }
  0xb1   : > { %5991 = vmatprep.mubr.msk.bf16.mxu0 %vm694_vm3, %v9141_v41  ;;  %v9142_v55 = vcombine.low %v9130_v45, %v9129_v34  ;;  %v9143_v33 = vsel %vm6485_vm4, %v7090_v18, %v7041_v44  ;;  %v7225_v39 = vcombine.low %v2142_v62, %v2152_v60  ;;  %v2232_v57 = vor.u32 %v2231_v6, %v2228_v30  ;;  %v7229_v45 = vld [vmem:[%s6449_s6 + $0x70] sm:$0xf]  ;;  %v7239_v18 = vld [vmem:[%s6449_s6 + $0x68] sm:$0x1]  ;;  %v5343_v62 = vld [vmem:[%s6449_s6 + $0x78] sm:$0xf] }
  0xb2   : > { %v7223_v47 = vcombine.low %v9143_v33, %v2128_v7  ;;  %v2245_v34 = vshll.u32 %v7177_v40, 16  ;;  %v9144_v2 = vcombine.low %v9133_v61, %v9132_v3  ;;  %v7235_v16 = vcombine.low %v2166_v32, %v2176_v51  ;;  %v7255_v32 = vld [vmem:[%s6449_s6 + $0x74] sm:$0x1] }
  0xb3   : > { %5954 = vmatmul.mubr.msk.bf16.gmra.mxu1 %vm694_vm3, %v9142_v55  ;;  %v2242_v44 = vor.u32 %v2241_v36, %v7198_v49  ;;  %v2252_v35 = vrot.slane %v2250_v38, 4  ;;  %v2255_v7 = vrot.slane %v2253_v25, 5  ;;  %v7242_v42 = vcombine.low %v2190_v52, %v2200_v22  ;;  %v6264_v36 = vld [vmem:[%s6449_s6 + $0xc] sm:$0xff]   ;;  %v5346_v55 = vld [vmem:[%s6449_s6 + $0x84] sm:$0xf] }
  0xb4   : > { %5957 = vmatprep.mubr.msk.bf16.mxu1 %vm694_vm3, %v9144_v2  ;;  %v2214_v19 = vsel %vm6485_vm4, %v2209_v12, %v7171_v28  ;;  %v2274_v3 = vshrl.u32 %v5340_v21, 16  ;;  %v2277_v61 = vshll.u32 %v5340_v21, 16  ;;  %v2224_v50 = vsel %vm6485_vm4, %v2219_v9, %v2223_v63 }
  0xb5   : > { %v7252_v24 = vrot.slane %v2259_v46, 5  ;;  %v2265_v60 = vrot.slane %v2263_v8, 4  ;;  %v2283_v30 = vshll.u32 %v7229_v45, 16  ;;  %v2233_v6 = vrot.slane %v2232_v57, 4 }
  0xb6   : > { %v2247_v10 = vrot.slane %v2245_v34, 5  ;;  %v2276_v51 = vrot.slane %v2274_v3, 4  ;;  %v2279_v52 = vrot.slane %v2277_v61, 5  ;;  %v9145_v28 = vcombine.low %v7062_v11, %v7071_v53 }
  0xb7   : > { %v2243_v21 = vrot.slane %v2242_v44, 4  ;;  %v2256_v41 = vor.u32 %v2255_v7, %v2252_v35  ;;  %v7263_v12 = vrot.slane %v2283_v30, 5  ;;  %v2287_v63 = vshrl.u32 %v7229_v45, 16  ;;  %v7283_v44 = vld [vmem:[%s6449_s6 + $0x88] sm:$0xf] }
  0xb8   : > { %5992 = vmatmul.mubr.msk.bf16.gmra.mxu0 %vm694_vm3, %v9145_v28  ;;  %v7268_v38 = vcombine.low %v2214_v19, %v2224_v50  ;;  %v2269_v25 = vshll.u32 %v7239_v18, 16  ;;  %v2298_v22 = vshrl.u32 %v5343_v62, 16  ;;  %v2301_v11 = vshll.u32 %v5343_v62, 16  ;;  %9147 = vst [vmem:[#allocation11_spill] sm:$0xff] %v7283_v44  ;;  %v7290_v7 = vld [vmem:[%s6449_s6 + $0x80] sm:$0x1] }
  0xb9   : > { %6031 = vmatprep.mubr.msk.bf16.mxu0 %vm694_vm3, %v7113_v27  ;;  %v2266_v53 = vor.u32 %v2265_v60, %v7252_v24  ;;  %v2280_v9 = vor.u32 %v2279_v52, %v2276_v51  ;;  %v2289_v46 = vrot.slane %v2287_v63, 4  ;;  %v2307_v8 = vshll.u32 %v7248_v5, 16  ;;  %v7293_v62 = vld [vmem:[#allocation2 + $0x40] sm:$0x3f]   ;;  %v6266_v19 = vld [vmem:[%s6449_s6 + $0x18] sm:$0xff]  }
  0xba   : > { %v9146_v33 = vcombine.low %v6742_v17, %v6747_v14  ;;  %v2238_v27 = vsel %vm6485_vm4, %v2233_v6, %v7198_v49  ;;  %v2293_v57 = vshll.u32 %v7255_v32, 16  ;;  %v2300_v34 = vrot.slane %v2298_v22, 4  ;;  %9148 = vst [vmem:[#allocation9_spill] sm:$0xff] %v7293_v62  ;;  %v5349_v30 = vld [vmem:[%s6449_s6 + $0x90] sm:$0xf] }
  0xbb   : > { %v2303_v2 = vrot.slane %v2301_v11, 5  ;;  %v2248_v35 = vsel %vm6485_vm4, %v2243_v21, %v2247_v10  ;;  %v2257_v17 = vrot.slane %v2256_v41, 4  ;;  %v2290_v14 = vor.u32 %v2289_v46, %v7263_v12  ;;  %v7301_v28 = vld [vmem:[%s6449_s6 + $0x94] sm:$0xf]  ;;  %v7305_v22 = vld [vmem:[%s6449_s6 + $0x8c] sm:$0x1] }
  0xbc   : > { %5958 = vmatmul.mubr.msk.bf16.gmra.mxu1 %vm694_vm3, %v9146_v33  ;;  %v2311_v49 = vshrl.u32 %v7248_v5, 16  ;;  %v2271_v3 = vrot.slane %v2269_v25, 5  ;;  %v7296_v61 = vrot.slane %v2307_v8, 5  ;;  %v2322_v50 = vshrl.u32 %v5346_v55, 16  ;;  %9149 = vst [vmem:[#allocation12_spill] sm:$0xff] %v7301_v28  ;;  %9150 = vst [vmem:[#allocation14_spill] sm:$0xff] %v7305_v22 }
  0xbd   : > { %5997 = vmatprep.mubr.msk.bf16.mxu1 %vm694_vm3, %v6264_v36  ;;  %v2325_v60 = vshll.u32 %v5346_v55, 16  ;;  %v2267_v6 = vrot.slane %v2266_v53, 4  ;;  %v2281_v10 = vrot.slane %v2280_v9, 4  ;;  %v2331_v52 = vshll.u32 %v7283_v44, 16  ;;  %v6268_v36 = vld [vmem:[%s6449_s6 + $0x24] sm:$0xff]  }
  0xbe   : > { %v2313_v51 = vrot.slane %v2311_v49, 4  ;;  %v2291_v21 = vrot.slane %v2290_v14, 4  ;;  %v2295_v41 = vrot.slane %v2293_v57, 5  ;;  %v2304_v63 = vor.u32 %v2303_v2, %v2300_v34  ;;  %v7315_v8 = vld [vmem:[#allocation2 + $0x38] sm:$0x3f]  }
  0xbf   : > { %v2335_v25 = vshrl.u32 %v7283_v44, 16  ;;  %v7310_v11 = vcombine.low %v2238_v27, %v2248_v35  ;;  %v2262_v53 = vsel %vm6485_vm4, %v2257_v17, %v7252_v24  ;;  %v2324_v9 = vrot.slane %v2322_v50, 4  ;;  %9151 = vst [vmem:[#allocation13_spill] sm:$0xff] %v7315_v8  ;;  %v5352_v2 = vld [vmem:[%s6449_s6 + $0x9c] sm:$0xf] }
  0xc0   : > { %6032 = vmatmul.mubr.msk.bf16.vlgmr.msra.gmra.mxu0 %vm694_vm3, %v7223_v47  ;;  %v2327_v46 = vrot.slane %v2325_v60, 5  ;;  %v2314_v55 = vor.u32 %v2313_v51, %v7296_v61  ;;  %v2317_v47 = vshll.u32 %v7290_v7, 16  ;;  %v7322_v33 = vrot.slane %v2331_v52, 5  ;;  %v7343_v50 = vld [vmem:[%s6449_s6 + $0xa0] sm:$0xf]  ;;  %v6269_v60 = vld [vmem:[%s6449_s6 + $0x30] sm:$0xff]  }
  0xc1   : > { %6098 = vmatpush3.bf16.msra.mxu0 %v7087_v59  ;;  %6035 = vmatprep.mubr.msk.bf16.mxu0 %vm694_vm3, %v7225_v39  ;;  %v2337_v27 = vrot.slane %v2335_v25, 4  ;;  %v2272_v57 = vsel %vm6485_vm4, %v2267_v6, %v2271_v3  ;;  %v2286_v24 = vsel %vm6485_vm4, %v2281_v10, %v7263_v12  ;;  %v2346_v34 = vshrl.u32 %v5349_v30, 16  ;;  %9152 = vst [vmem:[#allocation15_spill] sm:$0xff] %v7343_v50  ;;  %v7358_v52 = vld [vmem:[%s6449_s6 + $0x98] sm:$0x1] }
  0xc2   : > { %v2349_v59 = vshll.u32 %v5349_v30, 16  ;;  %6210 = vmatprep.subr.msk.bf16.mxu0 %vm743_vm0, %v7293_v62  ;;  %v2296_v39 = vsel %vm6485_vm4, %v2291_v21, %v2295_v41  ;;  %v7335_v35 = vrot.slane %v2304_v63, 4  ;;  %v2355_v17 = vshll.u32 %v7301_v28, 16  ;;  %9153 = vst [vmem:[#allocation17_spill] sm:$0xff] %v7358_v52  ;;  %v7363_v41 = vld [vmem:[%s6449_s6 + $0xa4] sm:$0x1] }
  0xc3   : > { %v2359_v12 = vshrl.u32 %v7301_v28, 16  ;;  %v2328_v14 = vor.u32 %v2327_v46, %v2324_v9  ;;  %v2341_v49 = vshll.u32 %v7305_v22, 16  ;;  %v2348_v3 = vrot.slane %v2346_v34, 4  ;;  %9154 = vst [vmem:[#allocation16_spill] sm:$0xff] %v7363_v41  ;;  %v6271_v62 = vld [vmem:[%s6449_s6 + $0x48] sm:$0xff]  }
  0xc4   : > { %5998 = vmatmul.mubr.msk.bf16.vlgmr.msra.gmra.mxu1 %vm694_vm3, %v6266_v19  ;;  %v2351_v19 = vrot.slane %v2349_v59, 5  ;;  %v7346_v30 = vcombine.low %v2262_v53, %v2272_v57  ;;  %v7348_v6 = vrot.slane %v2314_v55, 4  ;;  %v7350_v10 = vrot.slane %v2317_v47, 5  ;;  %v5355_v55 = vld [vmem:[%s6449_s6 + $0xa8] sm:$0xf]  ;;  %v6270_v47 = vld [vmem:[%s6449_s6 + $0x3c] sm:$0xff]  }
  0xc5   : > { %6064 = vmatpush3.bf16.msra.mxu1 %v7077_v13  ;;  %6001 = vmatprep.mubr.msk.bf16.mxu1 %vm694_vm3, %v6268_v36  ;;  %v2338_v13 = vor.u32 %v2337_v27, %v7322_v33  ;;  %v7355_v51 = vcombine.low %v2286_v24, %v2296_v39  ;;  %v7360_v21 = vrot.slane %v2355_v17, 5  ;;  %v2370_v63 = vshrl.u32 %v5352_v2, 16  ;;  %v7380_v59 = vld [vmem:[%s6449_s6 + $0xac] sm:$0xf]  ;;  %v5358_v27 = vld [vmem:[%s6449_s6 + $0xb4] sm:$0xf] }
  0xc6   : > { %6209 = vmatprep.subr.msk.bf16.mxu1 %vm743_vm0, %v7315_v8  ;;  %v2352_v36 = vor.u32 %v2351_v19, %v2348_v3  ;;  %v2361_v25 = vrot.slane %v2359_v12, 4  ;;  %v2373_v53 = vshll.u32 %v5352_v2, 16  ;;  %v2379_v9 = vshll.u32 %v7343_v50, 16  ;;  %9155 = vst [vmem:[#allocation18_spill] sm:$0xff] %v7380_v59  ;;  %v7422_v8 = vld [vmem:[%s6449_s6 + $0xbc] sm:$0x1] }
  0xc7   : > { %v2383_v46 = vshrl.u32 %v7343_v50, 16  ;;  %v7375_v57 = vrot.slane %v2328_v14, 4  ;;  %v7377_v24 = vrot.slane %v2341_v49, 5  ;;  %v2372_v34 = vrot.slane %v2370_v63, 4  ;;  %9158 = vst [vmem:[#allocation19_spill] sm:$0xff] %v7422_v8 }
  0xc8   : > { %6036 = vmatmul.mubr.msk.bf16.gmra.mxu0 %vm694_vm3, %v7235_v16  ;;  %v7388_v2 = vrot.slane %v2338_v13, 4  ;;  %v2365_v39 = vshll.u32 %v7358_v52, 16  ;;  %v2375_v17 = vrot.slane %v2373_v53, 5  ;;  %v7391_v12 = vrot.slane %v2379_v9, 5  ;;  %v7403_v16 = vld [vmem:[%s6449_s6 + $0xb8] sm:$0xf] }
  0xc9   : > { %6039 = vmatprep.mubr.msk.bf16.mxu0 %vm694_vm3, %v7242_v42  ;;  %v2385_v14 = vrot.slane %v2383_v46, 4  ;;  %v2394_v49 = vshrl.u32 %v5355_v55, 16  ;;  %v2397_v3 = vshll.u32 %v5355_v55, 16  ;;  %v7394_v42 = vrot.slane %v2352_v36, 4  ;;  %9156 = vst [vmem:[#allocation10_spill] sm:$0xff] %v7403_v16 }
  0xca   : > { %v2362_v19 = vor.u32 %v2361_v25, %v7360_v21  ;;  %v2389_v63 = vshll.u32 %v7363_v41, 16  ;;  %v2403_v13 = vshll.u32 %v7380_v59, 16  ;;  %v2376_v53 = vor.u32 %v2375_v17, %v2372_v34  ;;  %v7437_v52 = vld [vmem:[%s6449_s6 + $0xc4] sm:$0xf] }
  0xcb   : > { %v2396_v9 = vrot.slane %v2394_v49, 4  ;;  %v2399_v46 = vrot.slane %v2397_v3, 5  ;;  %v2407_v55 = vshrl.u32 %v7380_v59, 16  ;;  %v7413_v25 = vrot.slane %v2365_v39, 5 }
  0xcc   : > { %6002 = vmatmul.mubr.msk.bf16.gmra.mxu1 %vm694_vm3, %v6269_v60  ;;  %v7418_v34 = vrot.slane %v2403_v13, 5  ;;  %v2386_v17 = vor.u32 %v2385_v14, %v7391_v12  ;;  %v2418_v60 = vshrl.u32 %v5358_v27, 16  ;;  %v2358_v36 = vsel %vm6485_vm4, %v7394_v42, %v7360_v21  ;;  %v5361_v13 = vld [vmem:[%s6449_s6 + $0xc0] sm:$0xf]  ;;  %v6272_v14 = vld [vmem:[%s6449_s6 + $0x54] sm:$0xff]  }
  0xcd   : > { %6005 = vmatprep.mubr.msk.bf16.mxu1 %vm694_vm3, %v6270_v47  ;;  %v7416_v47 = vld [vmem:[%s6449_s6 + $0xb0] sm:$0x1]  ;;  %v2400_v49 = vor.u32 %v2399_v46, %v2396_v9  ;;  %v2409_v3 = vrot.slane %v2407_v55, 4  ;;  %v2363_v39 = vrot.slane %v2362_v19, 4  ;;  %v2421_v59 = vshll.u32 %v5358_v27, 16 }
  0xce   : > { %9157 = vst [vmem:[#allocation8_spill] sm:$0xff] %v7416_v47  ;;  %v2427_v41 = vshll.u32 %v7403_v16, 16  ;;  %v2377_v9 = vrot.slane %v2376_v53, 4  ;;  %v2391_v46 = vrot.slane %v2389_v63, 5  ;;  %v2413_v50 = vshll.u32 %v7416_v47, 16 }
  0xcf   : > { %v2410_v55 = vor.u32 %v2409_v3, %v7418_v34  ;;  %v2420_v21 = vrot.slane %v2418_v60, 4  ;;  %v2423_v27 = vrot.slane %v2421_v59, 5  ;;  %v2431_v19 = vshrl.u32 %v7403_v16, 16 }
  0xd0   : > { %6040 = vmatmul.mubr.msk.bf16.gmra.mxu0 %vm694_vm3, %v7268_v38  ;;  %v2429_v42 = vrot.slane %v2427_v41, 5  ;;  %v2387_v28 = vrot.slane %v2386_v17, 4  ;;  %v2401_v38 = vrot.slane %v2400_v49, 4  ;;  %v2437_v53 = vshll.u32 %v7422_v8, 16  ;;  %v7447_v41 = vld [vmem:[%s6449_s6 + $0xc8] sm:$0x1] }
  0xd1   : > { %6043 = vmatprep.mubr.msk.bf16.mxu0 %vm694_vm3, %v7310_v11  ;;  %v2442_v63 = vshrl.u32 %v5361_v13, 16  ;;  %v2424_v3 = vor.u32 %v2423_v27, %v2420_v21  ;;  %v2433_v47 = vrot.slane %v2431_v19, 4  ;;  %v2445_v22 = vshll.u32 %v5361_v13, 16  ;;  %v6273_v21 = vld [vmem:[%s6449_s6 + $0x60] sm:$0xff]  }
  0xd2   : > { %v2451_v44 = vshll.u32 %v7437_v52, 16  ;;  %v2411_v11 = vrot.slane %v2410_v55, 4  ;;  %v2415_v59 = vrot.slane %v2413_v50, 5  ;;  %v2455_v17 = vshrl.u32 %v7437_v52, 16 }
  0xd3   : > { %v2444_v60 = vrot.slane %v2442_v63, 4  ;;  %v2425_v49 = vrot.slane %v2424_v3, 4  ;;  %v2434_v8 = vor.u32 %v2433_v47, %v2429_v42  ;;  %v2439_v16 = vrot.slane %v2437_v53, 5 }
  0xd4   : > { %6006 = vmatmul.mubr.msk.bf16.gmra.mxu1 %vm694_vm3, %v6271_v62  ;;  %v2447_v62 = vrot.slane %v2445_v22, 5  ;;  %v2368_v13 = vsel %vm6485_vm4, %v2363_v39, %v7413_v25  ;;  %v7456_v55 = vrot.slane %v2451_v44, 5  ;;  %v2457_v50 = vrot.slane %v2455_v17, 4  ;;  %v6274_v25 = vld [vmem:[%s6449_s6 + $0x6c] sm:$0xff]  }
  0xd5   : > { %6009 = vmatprep.mubr.msk.bf16.mxu1 %vm694_vm3, %v6272_v14  ;;  %v2382_v14 = vsel %vm6485_vm4, %v2377_v9, %v7391_v12  ;;  %v2392_v27 = vsel %vm6485_vm4, %v2387_v28, %v2391_v46  ;;  %v2435_v19 = vrot.slane %v2434_v8, 4  ;;  %v2461_v22 = vshll.u32 %v7447_v41, 16  ;;  %v7479_v9 = vld [vmem:[%s6449_s6 + $0xc] sm:$0xe] }
  0xd6   : > { %v2448_v47 = vor.u32 %v2447_v62, %v2444_v60  ;;  %v2406_v44 = vsel %vm6485_vm4, %v2401_v38, %v7418_v34  ;;  %v2416_v12 = vsel %vm6485_vm4, %v2411_v11, %v2415_v59  ;;  %v2458_v39 = vor.u32 %v2457_v50, %v7456_v55  ;;  %v5401_v11 = vld [vmem:[%s6449_s6 + $0x3c] sm:$0xe] }
  0xd7   : > { %v2831_v28 = vrot.slane %v6969_v58, 5  ;;  %v2430_v8 = vsel %vm6485_vm4, %v2425_v49, %v2429_v42  ;;  %v9159_v34 = vsel %vm6485_vm4, %v7348_v6, %v7350_v10  ;;  %v9160_v46 = vsel %vm6485_vm4, %v7335_v35, %v7296_v61  ;;  %v5399_v10 = vld [vmem:[%s6449_s6 + $0x24] sm:$0xe] }
  0xd8   : > { %6044 = vmatmul.mubr.msk.bf16.gmra.mxu0 %vm694_vm3, %v7346_v30  ;;  %v2440_v30 = vsel %vm6485_vm4, %v2435_v19, %v2439_v16  ;;  %v5373_v38 = vcombine.low %v9160_v46, %v9159_v34  ;;  %v9162_v16 = vsel %vm6485_vm4, %v7375_v57, %v7322_v33  ;;  %v7501_v53 = vcombine.low %v2358_v36, %v2368_v13  ;;  %v5404_v46 = vld [vmem:[%s6449_s6 + $0x60] sm:$0xe] }
  0xd9   : > { %6047 = vmatprep.mubr.msk.bf16.mxu0 %vm694_vm3, %v7355_v51  ;;  %v9161_v51 = vsel %vm6485_vm4, %v7388_v2, %v7377_v24  ;;  %v7503_v6 = vrot.slane %v2448_v47, 4  ;;  %v7507_v61 = vcombine.low %v2382_v14, %v2392_v27  ;;  %v7509_v35 = vcombine.low %v2406_v44, %v2416_v12  ;;  %v5400_v2 = vld [vmem:[%s6449_s6 + $0x30] sm:$0xe]  ;;  %v6275_v27 = vld [vmem:[%s6449_s6 + $0x78] sm:$0xff]   ;;  %v5403_v12 = vld [vmem:[%s6449_s6 + $0x54] sm:$0xe] }
  0xda   : > { %v5374_v42 = vcombine.low %v9162_v16, %v9161_v51  ;;  %v7511_v63 = vrot.slane %v2458_v39, 4  ;;  %v7513_v24 = vrot.slane %v2461_v22, 5  ;;  %v7517_v33 = vcombine.low %v2430_v8, %v2440_v30  ;;  %v6276_v22 = vld [vmem:[%s6449_s6 + $0x84] sm:$0xff]  }
  0xdb   : > { %v5413_v57 = vrot.slane %v7479_v9, 9  ;;  %v7522_v36 = vrot.slane %v2831_v28, 4  ;;  %v2834_v3 = vrot.slane %v7000_v4, 5  ;;  %v2838_v59 = vrot.slane %v7015_v20, 5  ;;  %v6281_v9 = vld [vmem:[%s6449_s6 + $0xc0] sm:$0xff]  }
  0xdc   : > { %6010 = vmatmul.mubr.msk.bf16.gmra.mxu1 %vm694_vm3, %v6273_v21  ;;  %v5415_v60 = vrot.slane %v5399_v10, 9  ;;  %v2845_v17 = vrot.slane %v7039_v0, 5  ;;  %v2848_v49 = vrot.slane %v7054_v29, 5  ;;  %v2454_v62 = vsel %vm6485_vm4, %v7503_v6, %v7456_v55  ;;  %v5402_v21 = vld [vmem:[%s6449_s6 + $0x48] sm:$0xe]  ;;  %v6282_v6 = vld [vmem:[%s6449_s6 + $0x18] sm:$0xff]  }
  0xdd   : > { %6013 = vmatprep.mubr.msk.bf16.mxu1 %vm694_vm3, %v6274_v25  ;;  %v5416_v13 = vrot.slane %v5400_v2, 9  ;;  %v2852_v14 = vrot.slane %v7066_v43, 5  ;;  %v2855_v50 = vrot.slane %v7095_v1, 5  ;;  %v2464_v0 = vsel %vm6485_vm4, %v7511_v63, %v7513_v24  ;;  %v5405_v10 = vld [vmem:[%s6449_s6 + $0x6c] sm:$0xe] }
  0xde   : > { %v7543_v29 = vsel %vm6772_vm7, %v5415_v60, %v2845_v17  ;;  %v2847_v19 = vrot.slane %v2845_v17, 4  ;;  %v5417_v47 = vrot.slane %v5401_v11, 9  ;;  %v2859_v25 = vrot.slane %v7098_v56, 5 }
  0xdf   : > { %v7549_v43 = vsel %vm6772_vm7, %v5416_v13, %v2852_v14  ;;  %v2854_v1 = vrot.slane %v2852_v14, 4  ;;  %v2862_v44 = vrot.slane %v7130_v15, 5  ;;  %v5418_v8 = vrot.slane %v5402_v21, 9  ;;  %v5406_v21 = vld [vmem:[%s6449_s6 + $0x78] sm:$0xe] }
  0xe0   : > { %6048 = vmatmul.mubr.msk.bf16.gmra.mxu0 %vm694_vm3, %v5373_v38  ;;  %v7557_v39 = vsel %vm6772_vm7, %v2847_v19, %v2848_v49  ;;  %v2866_v30 = vrot.slane %v7134_v31, 5  ;;  %v2869_v34 = vrot.slane %v7146_v48, 5  ;;  %v7570_v15 = vsel %vm6772_vm7, %v5417_v47, %v2859_v25  ;;  %v6277_v47 = vld [vmem:[%s6449_s6 + $0x90] sm:$0xff]  }
  0xe1   : > { %6051 = vmatprep.mubr.msk.bf16.mxu0 %vm694_vm3, %v5374_v42  ;;  %v5431_v38 = vcombine.low %v7543_v29, %v7557_v39  ;;  %v7566_v56 = vsel %vm6772_vm7, %v2854_v1, %v2855_v50  ;;  %v2861_v51 = vrot.slane %v2859_v25, 4  ;;  %v5419_v42 = vrot.slane %v5403_v12, 9  ;;  %v5407_v25 = vld [vmem:[%s6449_s6 + $0x84] sm:$0xe]  ;;  %v7807_v29 = vld [vmem:[%s6449_s6 + $0x2c] sm:$0x1] }
  0xe2   : > { %v5432_v31 = vcombine.low %v7549_v43, %v7566_v56  ;;  %v7577_v48 = vsel %vm6772_vm7, %v5418_v8, %v2866_v30  ;;  %v2868_v16 = vrot.slane %v2866_v30, 4  ;;  %v2873_v11 = vrot.slane %v7157_v54, 5 }
  0xe3   : > { %v7583_v2 = vsel %vm6772_vm7, %v2861_v51, %v2862_v44  ;;  %v2876_v60 = vrot.slane %v7177_v40, 5  ;;  %v5420_v17 = vrot.slane %v5404_v46, 9  ;;  %v2880_v14 = vrot.slane %v7187_v23, 5  ;;  %v6278_v44 = vld [vmem:[%s6449_s6 + $0x9c] sm:$0xff]   ;;  %v5408_v46 = vld [vmem:[%s6449_s6 + $0x90] sm:$0xe] }
  0xe4   : > { %6014 = vmatmul.mubr.msk.bf16.gmra.mxu1 %vm694_vm3, %v6275_v27  ;;  %v5433_v49 = vcombine.low %v7570_v15, %v7583_v2  ;;  %v7591_v13 = vsel %vm6772_vm7, %v2868_v16, %v2869_v34  ;;  %v2883_v50 = vrot.slane %v7239_v18, 5  ;;  %v7600_v40 = vsel %vm6772_vm7, %v5419_v42, %v2873_v11  ;;  %v5409_v42 = vld [vmem:[%s6449_s6 + $0x9c] sm:$0xe]  ;;  %v7843_v15 = vld [vmem:[%s6449_s6 + $0x40] sm:$0xf] }
  0xe5   : > { %6017 = vmatprep.mubr.msk.bf16.mxu1 %vm694_vm3, %v6276_v22  ;;  %v5434_v54 = vcombine.low %v7577_v48, %v7591_v13  ;;  %v2875_v27 = vrot.slane %v2873_v11, 4  ;;  %v5421_v19 = vrot.slane %v5405_v10, 9  ;;  %v7605_v22 = vsel %vm6772_vm7, %v5420_v17, %v2880_v14  ;;  %v9163_v11 = vld [vmem:[#allocation11_spill] sm:$0xff]  ;;  %v9164_v17 = vld [vmem:[#allocation14_spill] sm:$0xff]  ;;  %v6291_v13 = vld [vmem:[%s6449_s6 + $0x6c] sm:$0xff]  }
  0xe6   : > { %v2882_v1 = vrot.slane %v2880_v14, 4  ;;  %v2887_v23 = vrot.slane %v7229_v45, 5  ;;  %v2890_v18 = vrot.slane %v7255_v32, 5  ;;  %v5422_v8 = vrot.slane %v5406_v21, 9  ;;  %v5412_v45 = vld [vmem:[%s6449_s6 + $0xc0] sm:$0xe] }
  0xe7   : > { %v7615_v12 = vsel %vm6772_vm7, %v2875_v27, %v2876_v60  ;;  %v2894_v30 = vrot.slane %v7248_v5, 5  ;;  %v2897_v34 = vrot.slane %v7290_v7, 5  ;;  %v5423_v16 = vrot.slane %v5407_v25, 9 }
  0xe8   : > { %6052 = vmatmul.mubr.msk.bf16.gmra.mxu0 %vm694_vm3, %v7501_v53  ;;  %v7626_v32 = vsel %vm6772_vm7, %v2882_v1, %v2883_v50  ;;  %v7630_v53 = vsel %vm6772_vm7, %v5421_v19, %v2887_v23  ;;  %v2889_v51 = vrot.slane %v2887_v23, 4  ;;  %v2901_v60 = vrot.slane %v9163_v11, 5  ;;  %v9165_v19 = vld [vmem:[#allocation12_spill] sm:$0xff]  ;;  %v9166_v1 = vld [vmem:[#allocation17_spill] sm:$0xff] }
  0xe9   : > { %6055 = vmatprep.mubr.msk.bf16.mxu0 %vm694_vm3, %v7507_v61  ;;  %v7636_v7 = vsel %vm6772_vm7, %v5422_v8, %v2894_v30  ;;  %v2896_v61 = vrot.slane %v2894_v30, 4  ;;  %v2904_v14 = vrot.slane %v9164_v17, 5  ;;  %v5424_v50 = vrot.slane %v5408_v46, 9  ;;  %v9168_v11 = vld [vmem:[#allocation16_spill] sm:$0xff] }
  0xea   : > { %v7642_v10 = vsel %vm6772_vm7, %v2889_v51, %v2890_v18  ;;  %v2911_v23 = vrot.slane %v9166_v1, 5  ;;  %v5410_v18 = vld [vmem:[%s6449_s6 + $0xa8] sm:$0xe]  ;;  %v2903_v8 = vrot.slane %v2901_v60, 4  ;;  %v5425_v30 = vrot.slane %v5409_v42, 9 }
  0xeb   : > { %v7651_v27 = vsel %vm6772_vm7, %v2896_v61, %v2897_v34  ;;  %v9167_v51 = vld [vmem:[#allocation15_spill] sm:$0xff]  ;;  %v2918_v17 = vrot.slane %v9168_v11, 5  ;;  %v5426_v21 = vrot.slane %v5410_v18, 9  ;;  %v2832_v63 = vsel %vm6772_vm7, %v5413_v57, %v2831_v28 }
  0xec   : > { %6018 = vmatmul.mubr.msk.bf16.gmra.mxu1 %vm694_vm3, %v6277_v47  ;;  %v2908_v47 = vrot.slane %v9165_v19, 5  ;;  %v2915_v61 = vrot.slane %v9167_v51, 5  ;;  %v5411_v19 = vld [vmem:[%s6449_s6 + $0xb4] sm:$0xe]  ;;  %v6279_v1 = vld [vmem:[%s6449_s6 + $0xa8] sm:$0xff]   ;;  %v7672_v25 = vsel %vm6772_vm7, %v2903_v8, %v2904_v14  ;;  %v2835_v55 = vsel %vm6772_vm7, %v7522_v36, %v2834_v3 }
  0xed   : > { %6021 = vmatprep.mubr.msk.bf16.mxu1 %vm694_vm3, %v6278_v44  ;;  %v7660_v44 = vsel %vm6772_vm7, %v5423_v16, %v2901_v60  ;;  %v9169_v16 = vld [vmem:[#allocation18_spill] sm:$0xff]  ;;  %v9170_v60 = vld [vmem:[#allocation8_spill] sm:$0xff]  ;;  %v5429_v36 = vcombine.low %v2832_v63, %v2835_v55  ;;  %v2840_v3 = vrot.slane %v2838_v59, 4  ;;  %v9177_v48 = vcombine.low %v7600_v40, %v7615_v12 }
  0xee   : > { %v7664_v34 = vsel %vm6772_vm7, %v5424_v50, %v2908_v47  ;;  %v2910_v46 = vrot.slane %v2908_v47, 4  ;;  %v2922_v5 = vrot.slane %v9169_v16, 5  ;;  %v2925_v42 = vrot.slane %v9170_v60, 5  ;;  %v6280_v50 = vld [vmem:[%s6449_s6 + $0xb4] sm:$0xff]   ;;  %v7789_v55 = vld [vmem:[%s6449_s6 + $0x28] sm:$0xf] }
  0xef   : > { %v7688_v14 = vsel %vm6772_vm7, %v5425_v30, %v2915_v61  ;;  %v2917_v18 = vrot.slane %v2915_v61, 4  ;;  %v5427_v16 = vrot.slane %v5411_v19, 9  ;;  %v9171_v30 = vld [vmem:[#allocation10_spill] sm:$0xff]  ;;  %v9172_v61 = vld [vmem:[#allocation19_spill] sm:$0xff] }
  0xf0   : > { %6056 = vmatmul.mubr.msk.bf16.gmra.mxu0 %vm694_vm3, %v7509_v35  ;;  %v7684_v51 = vsel %vm6772_vm7, %v2910_v46, %v2911_v23  ;;  %v7696_v8 = vsel %vm6772_vm7, %v5426_v21, %v2922_v5  ;;  %v2924_v11 = vrot.slane %v2922_v5, 4  ;;  %v2929_v46 = vrot.slane %v9171_v30, 5  ;;  %v5398_v19 = vld [vmem:[%s6449_s6 + $0x18] sm:$0xe]  ;;  %v6286_v30 = vld [vmem:[%s6449_s6 + $0x30] sm:$0xff]  }
  0xf1   : > { %6059 = vmatprep.mubr.msk.bf16.mxu0 %vm694_vm3, %v7517_v33  ;;  %v7700_v23 = vsel %vm6772_vm7, %v2917_v18, %v2918_v17  ;;  %v2932_v60 = vrot.slane %v9172_v61, 5  ;;  %v5428_v33 = vrot.slane %v5412_v45, 9  ;;  %v2936_v21 = vrot.slane %v7437_v52, 5  ;;  %v9173_v61 = vld [vmem:[#allocation9_spill] sm:$0xff] }
  0xf2   : > { %v7709_v5 = vsel %vm6772_vm7, %v2924_v11, %v2925_v42  ;;  %v2939_v17 = vrot.slane %v7447_v41, 5  ;;  %v5379_v45 = vcombine.low %v2454_v62, %v2464_v0  ;;  %v7729_v52 = vsel %vm6772_vm7, %v5427_v16, %v2929_v46  ;;  %v6300_v0 = vld [vmem:[%s6449_s6 + $0x20] sm:$0x1]  ;;  %v6284_v16 = vld [vmem:[%s6449_s6 + $0x24] sm:$0xff]   ;;  %v6292_v12 = vld [vmem:[%s6449_s6 + $0x78] sm:$0xff]  }
  0xf3   : > { %v2931_v41 = vrot.slane %v2929_v46, 4  ;;  %v7745_v24 = vsel %vm6772_vm7, %v5428_v33, %v2936_v21  ;;  %v2938_v62 = vrot.slane %v2936_v21, 4  ;;  %v5414_v28 = vrot.slane %v5398_v19, 9  ;;  %v5527_v46 = vld [vmem:[%s6449_s6 + $0x18] sm:$0xf] }
  0xf4   : > { %6022 = vmatmul.mubr.msk.bf16.gmra.mxu1 %vm694_vm3, %v6279_v1  ;;  %v2841_v42 = vrot.slane %v6300_v0, 5  ;;  %v7779_v33 = vld [vmem:[%s6449_s6 + $0x1c] sm:$0xf]  ;;  %v3655_v20 = vshrl.u32 %v5527_v46, 16  ;;  %v3688_v0 = vshll.u32 %v7789_v55, 16 }
  0xf5   : > { %6025 = vmatprep.mubr.msk.bf16.mxu1 %vm694_vm3, %v6280_v50  ;;  %v7749_v58 = vsel %vm6772_vm7, %v2931_v41, %v2932_v60  ;;  %v7756_v57 = vsel %vm6772_vm7, %v2938_v62, %v2939_v17  ;;  %v2839_v18 = vsel %vm6772_vm7, %v5414_v28, %v2838_v59  ;;  %v4619_v60 = vsel %vm743_vm0, %v9173_v61, 0  ;;  %v5530_v59 = vld [vmem:[%s6449_s6 + $0x24] sm:$0xf]  ;;  %v7798_v28 = vld [vmem:[%s6449_s6 + $0x20] sm:$0x1] }
  0xf6   : > { %v2842_v11 = vsel %vm6772_vm7, %v2840_v3, %v2841_v42  ;;  %v3658_v17 = vshll.u32 %v5527_v46, 16  ;;  %v3664_v41 = vshll.u32 %v7779_v33, 16  ;;  %v3668_v63 = vshrl.u32 %v7779_v33, 16 }
  0xf7   : > { %v5430_v21 = vcombine.low %v2839_v18, %v2842_v11  ;;  %v3679_v62 = vshrl.u32 %v5530_v59, 16  ;;  %v3692_v42 = vshrl.u32 %v7789_v55, 16  ;;  %v6288_v18 = vld [vmem:[%s6449_s6 + $0x48] sm:$0xff]   ;;  %v4407_v56 = vrot.slane %v7798_v28, 5 }
  0xf8   : > { %6060 = vmatmul.mubr.msk.bf16.gmra.mxu0 %vm694_vm3, %v5379_v45  ;;  %v9174_v45 = vld [vmem:[#allocation13_spill] sm:$0xff]  ;;  %v3660_v3 = vrot.slane %v3658_v17, 5  ;;  %v7803_v11 = vrot.slane %v3664_v41, 5 }
  0xf9   : > { %6099 = vmatprep.mubr.msk.bf16.mxu0 %vm694_vm3, %v6282_v6  ;;  %v4143_v19 = vsel %vm743_vm0, %v9174_v45, 0  ;;  %v6287_v6 = vld [vmem:[%s6449_s6 + $0x3c] sm:$0xff]   ;;  %v3681_v39 = vrot.slane %v3679_v62, 4  ;;  %v6289_v45 = vld [vmem:[%s6449_s6 + $0x54] sm:$0xff]   ;;  %v5533_v41 = vld [vmem:[%s6449_s6 + $0x30] sm:$0xf] }
  0xfc   : > { %6026 = vmatmul.mubr.msk.bf16.gmra.mxu1 %vm694_vm3, %v6281_v9  ;;  %v3682_v9 = vshll.u32 %v5530_v59, 16  ;;  %v4404_v59 = vrot.slane %v7779_v33, 5  ;;  %v6290_v33 = vld [vmem:[%s6449_s6 + $0x60] sm:$0xff]  }
  0xfd   : > { %6065 = vmatprep.mubr.msk.bf16.mxu1 %vm694_vm3, %v5429_v36  ;;  %v3657_v36 = vrot.slane %v3655_v20, 4  ;;  %v3694_v20 = vrot.slane %v3692_v42, 4  ;;  %v4411_v42 = vrot.slane %v7789_v55, 5 }
  0xff   : > { %v3661_v61 = vor.u32 %v3660_v3, %v3657_v36  ;;  %v7827_v36 = vld [vmem:[%s6449_s6 + $0x34] sm:$0xf]  ;;  %v4413_v1 = vrot.slane %v4411_v42, 4 }
 0x100   : > { %6100 = vmatmul.mubr.msk.bf16.vlgmr.msra.gmra.mxu0 %vm694_vm3, %v6284_v16  ;;  %v3670_v16 = vrot.slane %v3668_v63, 4  ;;  %v3716_v50 = vshrl.u32 %v7827_v36, 16 }
 0x101   : > { %6166 = vmatpush3.bf16.msra.mxu0 %v4619_v60  ;;  %6103 = vmatprep.mubr.msk.bf16.mxu0 %vm694_vm3, %v6286_v30  ;;  %v3674_v30 = vshll.u32 %v7798_v28, 16  ;;  %v5608_v60 = vld [vmem:[%s6449_s6 + $0x18] sm:$0xe]  ;;  %v3662_v43 = vrot.slane %v3661_v61, 4  ;;  %v4414_v28 = vrot.slane %v7807_v29, 5 }
 0x102   : > { %v3671_v17 = vor.u32 %v3670_v16, %v7803_v11  ;;  %v3718_v47 = vrot.slane %v3716_v50, 4 }
 0x103   : > { %v7810_v46 = vpop.f32.mrf.mxu0  ;;  %v3676_v63 = vrot.slane %v3674_v30, 5  ;;  %v4406_v30 = vrot.slane %v4404_v59, 4 }
 0x104   : > { %6066 = vmatmul.mubr.msk.bf16.vlgmr.msra.gmra.mxu1 %vm694_vm3, %v5430_v21  ;;  %v7813_v21 = vrot.slane %v3688_v0, 5  ;;  %v3672_v16 = vrot.slane %v3671_v17, 4 }
 0x105   : > { %6132 = vmatpush3.bf16.msra.mxu1 %v4143_v19  ;;  %6069 = vmatprep.mubr.msk.bf16.mxu1 %vm694_vm3, %v5431_v38  ;;  %v3684_v38 = vrot.slane %v3682_v9, 5  ;;  %v3698_v19 = vshll.u32 %v7807_v29, 16  ;;  %v5609_v9 = vld [vmem:[%s6449_s6 + $0x24] sm:$0xe]  ;;  %v7836_v0 = vpop.f32.mrf.mxu0  ;;  %v3667_v29 = vsel %vm6485_vm4, %v3662_v43, %v7803_v11  ;;  %v7867_v35 = vsel %vm6772_vm7, %v4406_v30, %v4407_v56 }
 0x107   : > { %v3685_v62 = vor.u32 %v3684_v38, %v3681_v39  ;;  %v3703_v39 = vshrl.u32 %v5533_v41, 16  ;;  %v3706_v38 = vshll.u32 %v5533_v41, 16  ;;  %v3700_v2 = vrot.slane %v3698_v19, 5  ;;  %v7851_v17 = vpop.f32.mrf.mxu0 }
 0x108   : > { %6104 = vmatmul.mubr.msk.bf16.gmra.mxu0 %vm694_vm3, %v6287_v6  ;;  %v5624_v6 = vrot.slane %v5608_v60, 9  ;;  %v3712_v60 = vshll.u32 %v7827_v36, 16  ;;  %v3736_v19 = vshll.u32 %v7843_v15, 16 }
 0x109   : > { %6107 = vmatprep.mubr.msk.bf16.mxu0 %vm694_vm3, %v6288_v18  ;;  %v7834_v3 = vpop.f32.mrf.mxu1  ;;  %v5536_v18 = vld [vmem:[%s6449_s6 + $0x3c] sm:$0xf]  ;;  %v3686_v61 = vrot.slane %v3685_v62, 4  ;;  %v3705_v62 = vrot.slane %v3703_v39, 4 }
 0x10a   : > { %9175 = vst [vmem:[#allocation11_spill] sm:$0xff] %v7834_v3  ;;  %v3727_v4 = vshrl.u32 %v5536_v18, 16 }
 0x10b   : > { %v7849_v55 = vpop.f32.mrf.mxu1  ;;  %v3691_v11 = vsel %vm6485_vm4, %v3686_v61, %v7813_v21  ;;  %v4418_v61 = vrot.slane %v7827_v36, 5  ;;  %v5611_v36 = vld [vmem:[%s6449_s6 + $0x3c] sm:$0xe] }
 0x10c   : > { %6070 = vmatmul.mubr.msk.bf16.gmra.mxu1 %vm694_vm3, %v5432_v31  ;;  %v3695_v31 = vor.u32 %v3694_v20, %v7813_v21  ;;  %v3730_v20 = vshll.u32 %v5536_v18, 16  ;;  %9176 = vst [vmem:[#allocation14_spill] sm:$0xff] %v7849_v55  ;;  %v3677_v18 = vsel %vm6485_vm4, %v3672_v16, %v3676_v63  ;;  %v7883_v63 = vld [vmem:[%s6449_s6 + $0x38] sm:$0x1]  ;;  %v3729_v43 = vrot.slane %v3727_v4, 4  ;;  %v7893_v21 = vpop.f32.mrf.mxu0 }
 0x10d   : > { %6073 = vmatprep.mubr.msk.bf16.mxu1 %vm694_vm3, %v5433_v49  ;;  %v5625_v49 = vrot.slane %v5609_v9, 9  ;;  %v3740_v9 = vshrl.u32 %v7843_v15, 16  ;;  %9179 = vst [vmem:[#allocation17_spill] sm:$0xff] %v7893_v21  ;;  %v7902_v4 = vld [vmem:[%s6449_s6 + $0x44] sm:$0x1]  ;;  %v7904_v16 = vrot.slane %v3736_v19, 5  ;;  %v7907_v30 = vcombine.low %v3667_v29, %v3677_v18 }
 0x10e   : > { %v3696_v41 = vrot.slane %v3695_v31, 4  ;;  %v3708_v31 = vrot.slane %v3706_v38, 5  ;;  %v3732_v50 = vrot.slane %v3730_v20, 5  ;;  %v4428_v39 = vrot.slane %v7902_v4, 5  ;;  %v5615_v21 = vld [vmem:[%s6449_s6 + $0x6c] sm:$0xe] }
 0x10f   : > { %v3742_v40 = vrot.slane %v3740_v9, 4  ;;  %v3746_v9 = vshll.u32 %v7902_v4, 16 }
 0x110   : > { %6108 = vmatmul.mubr.msk.bf16.gmra.mxu0 %vm694_vm3, %v6289_v45  ;;  %v7861_v45 = vsel %vm6772_vm7, %v5624_v6, %v4404_v59  ;;  %v7880_v59 = vsel %vm6772_vm7, %v5625_v49, %v4411_v42  ;;  %v5610_v6 = vld [vmem:[%s6449_s6 + $0x30] sm:$0xe]  ;;  %v3701_v56 = vsel %vm6485_vm4, %v3696_v41, %v3700_v2  ;;  %v7899_v42 = vsel %vm6772_vm7, %v4413_v1, %v4414_v28  ;;  %v5539_v49 = vld [vmem:[%s6449_s6 + $0x48] sm:$0xf]  ;;  %v7916_v28 = vld [vmem:[%s6449_s6 + $0x4c] sm:$0xf] }
 0x111   : > { %6111 = vmatprep.mubr.msk.bf16.mxu0 %vm694_vm3, %v6290_v33  ;;  %v7869_v33 = vrot.slane %v3712_v60, 5  ;;  %v3709_v38 = vor.u32 %v3708_v31, %v3705_v62  ;;  %v3722_v60 = vshll.u32 %v7883_v63, 16  ;;  %v5626_v1 = vrot.slane %v5610_v6, 9 }
 0x112   : > { %v7918_v20 = vcombine.low %v3691_v11, %v3701_v56  ;;  %v3733_v19 = vor.u32 %v3732_v50, %v3729_v43  ;;  %v3743_v62 = vor.u32 %v3742_v40, %v7904_v16  ;;  %v4425_v31 = vrot.slane %v7843_v15, 5 }
 0x113   : > { %v3719_v2 = vor.u32 %v3718_v47, %v7869_v33  ;;  %v3751_v18 = vshrl.u32 %v5539_v49, 16  ;;  %v3754_v11 = vshll.u32 %v5539_v49, 16  ;;  %v3710_v6 = vrot.slane %v3709_v38, 4 }
 0x114   : > { %6074 = vmatmul.mubr.msk.bf16.gmra.mxu1 %vm694_vm3, %v5434_v54  ;;  %v7891_v54 = vpop.f32.mrf.mxu1  ;;  %v4421_v43 = vrot.slane %v7883_v63, 5  ;;  %v3760_v50 = vshll.u32 %v7916_v28, 16  ;;  %v3724_v41 = vrot.slane %v3722_v60, 5  ;;  %v7938_v40 = vsel %vm6772_vm7, %v5626_v1, %v4418_v61 }
 0x115   : > { %6077 = vmatprep.mubr.msk.bf16.mxu1 %vm694_vm3, %v9177_v48  ;;  %9178 = vst [vmem:[#allocation12_spill] sm:$0xff] %v7891_v54  ;;  %v3764_v48 = vshrl.u32 %v7916_v28, 16  ;;  %v3720_v56 = vrot.slane %v3719_v2, 4  ;;  %v4420_v15 = vrot.slane %v4418_v61, 4  ;;  %v3734_v63 = vrot.slane %v3733_v19, 4 }
 0x116   : > { %v7924_v29 = vpop.f32.mrf.mxu1  ;;  %v7926_v47 = vpop.f32.mrf.mxu0  ;;  %v3748_v38 = vrot.slane %v3746_v9, 5  ;;  %v5627_v49 = vrot.slane %v5611_v36, 9  ;;  %v5542_v2 = vld [vmem:[%s6449_s6 + $0x54] sm:$0xf]  ;;  %v9183_v60 = vcombine.low %v7630_v53, %v7642_v10  ;;  %v7955_v19 = vld [vmem:[%s6449_s6 + $0x58] sm:$0xf]  ;;  %v3715_v4 = vsel %vm6485_vm4, %v3710_v6, %v7869_v33 }
 0x117   : > { %9180 = vst [vmem:[#allocation15_spill] sm:$0xff] %v7924_v29  ;;  %9181 = vst [vmem:[#allocation16_spill] sm:$0xff] %v7926_v47  ;;  %v3756_v29 = vrot.slane %v3754_v11, 5  ;;  %v6294_v9 = vld [vmem:[%s6449_s6 + $0x90] sm:$0xff]   ;;  %v7962_v53 = vrot.slane %v3760_v50, 5  ;;  %v3766_v10 = vrot.slane %v3764_v48, 4  ;;  %v3739_v33 = vsel %vm6485_vm4, %v3734_v63, %v7904_v16 }
 0x118   : > { %6112 = vmatmul.mubr.msk.bf16.gmra.mxu0 %vm694_vm3, %v6291_v13  ;;  %v6293_v13 = vld [vmem:[%s6449_s6 + $0x84] sm:$0xff]   ;;  %v7952_v61 = vpop.f32.mrf.mxu0  ;;  %v5541_v36 = vld [vmem:[%s6449_s6 + $0x50] sm:$0x1]  ;;  %v3775_v11 = vshrl.u32 %v5542_v2, 16  ;;  %v3778_v54 = vshll.u32 %v5542_v2, 16  ;;  %v7977_v6 = vsel %vm6772_vm7, %v5627_v49, %v4425_v31 }
 0x119   : > { %6115 = vmatprep.mubr.msk.bf16.mxu0 %vm694_vm3, %v6292_v12  ;;  %v9182_v12 = vcombine.low %v7605_v22, %v7626_v32  ;;  %9185 = vst [vmem:[#allocation8_spill] sm:$0xff] %v7952_v61  ;;  %v3744_v22 = vrot.slane %v3743_v62, 4  ;;  %v4427_v32 = vrot.slane %v4425_v31, 4  ;;  %v7969_v62 = vsel %vm6772_vm7, %v4420_v15, %v4421_v43  ;;  %v5545_v2 = vld [vmem:[%s6449_s6 + $0x60] sm:$0xf] }
 0x11a   : > { %v7984_v50 = vpop.f32.mrf.mxu0  ;;  %v3767_v15 = vor.u32 %v3766_v10, %v7962_v53  ;;  %v4435_v49 = vrot.slane %v5541_v36, 5  ;;  %v8015_v10 = vld [vmem:[%s6449_s6 + $0x64] sm:$0xf] }
 0x11b   : > { %v7950_v1 = vpop.f32.mrf.mxu1  ;;  %9187 = vst [vmem:[#allocation19_spill] sm:$0xff] %v7984_v50  ;;  %v3749_v16 = vsel %vm6485_vm4, %v3744_v22, %v3748_v38  ;;  %v7990_v48 = vsel %vm6772_vm7, %v4427_v32, %v4428_v39  ;;  %v8001_v39 = vld [vmem:[%s6449_s6 + $0x5c] sm:$0x1]  ;;  %v3780_v22 = vrot.slane %v3778_v54, 5  ;;  %v9188_v32 = vcombine.low %v7636_v7, %v7651_v27  ;;  %v5614_v50 = vld [vmem:[%s6449_s6 + $0x60] sm:$0xe] }
 0x11c   : > { %6078 = vmatmul.mubr.msk.bf16.gmra.mxu1 %vm694_vm3, %v9182_v12  ;;  %9184 = vst [vmem:[#allocation18_spill] sm:$0xff] %v7950_v1  ;;  %v3753_v12 = vrot.slane %v3751_v18, 4  ;;  %v3725_v1 = vsel %vm6485_vm4, %v3720_v56, %v3724_v41  ;;  %v5612_v18 = vld [vmem:[%s6449_s6 + $0x48] sm:$0xe]  ;;  %v3788_v41 = vshrl.u32 %v7955_v19, 16  ;;  %v3770_v56 = vshll.u32 %v5541_v36, 16  ;;  %v8023_v27 = vpop.f32.mrf.mxu0 }
 0x11d   : > { %6081 = vmatprep.mubr.msk.bf16.mxu1 %vm694_vm3, %v9183_v60  ;;  %v4432_v60 = vrot.slane %v7916_v28, 5  ;;  %v3784_v28 = vshll.u32 %v7955_v19, 16  ;;  %v7982_v43 = vpop.f32.mrf.mxu1  ;;  %v7996_v55 = vcombine.low %v3715_v4, %v3725_v1  ;;  %v5613_v36 = vld [vmem:[%s6449_s6 + $0x54] sm:$0xe]  ;;  %v9190_v54 = vcombine.low %v7660_v44, %v7672_v25  ;;  %9192 = vst [vmem:[#allocation20_spill] sm:$0xff] %v8023_v27 }
 0x11e   : > { %9186 = vst [vmem:[#allocation10_spill] sm:$0xff] %v7982_v43  ;;  %v3757_v31 = vor.u32 %v3756_v29, %v3753_v12  ;;  %v6295_v43 = vld [vmem:[%s6449_s6 + $0x9c] sm:$0xff]   ;;  %v3777_v29 = vrot.slane %v3775_v11, 4  ;;  %v8007_v12 = vcombine.low %v3739_v33, %v3749_v16  ;;  %v3790_v4 = vrot.slane %v3788_v41, 4  ;;  %v5548_v41 = vld [vmem:[%s6449_s6 + $0x6c] sm:$0xf] }
 0x11f   : > { %v4434_v63 = vrot.slane %v4432_v60, 4  ;;  %v8021_v7 = vpop.f32.mrf.mxu1  ;;  %v8027_v11 = vrot.slane %v3770_v56, 5  ;;  %v3799_v33 = vshrl.u32 %v5545_v2, 16  ;;  %v6296_v16 = vld [vmem:[%s6449_s6 + $0xa8] sm:$0xff]   ;;  %v3794_v44 = vshll.u32 %v8001_v39, 16 }
 0x120   : > { %6116 = vmatmul.mubr.msk.bf16.gmra.mxu0 %vm694_vm3, %v6293_v13  ;;  %v5628_v13 = vrot.slane %v5612_v18, 9  ;;  %9189 = vst [vmem:[#allocation9_spill] sm:$0xff] %v8007_v12  ;;  %9191 = vst [vmem:[#allocation13_spill] sm:$0xff] %v8021_v7  ;;  %v8025_v18 = vrot.slane %v3757_v31, 4  ;;  %v8043_v31 = vld [vmem:[%s6449_s6 + $0x70] sm:$0xf]  ;;  %v3781_v56 = vor.u32 %v3780_v22, %v3777_v29 }
 0x121   : > { %6119 = vmatprep.mubr.msk.bf16.mxu0 %vm694_vm3, %v6294_v9  ;;  %v8011_v9 = vrot.slane %v3784_v28, 5  ;;  %v3802_v28 = vshll.u32 %v5545_v2, 16  ;;  %v8039_v25 = vsel %vm6772_vm7, %v4434_v63, %v4435_v49  ;;  %v3808_v2 = vshll.u32 %v8015_v10, 16  ;;  %v8050_v63 = vpop.f32.mrf.mxu1  ;;  %v8079_v27 = vld [vmem:[%s6449_s6 + $0x7c] sm:$0xf] }
 0x122   : > { %v8035_v1 = vsel %vm6772_vm7, %v5628_v13, %v4432_v60  ;;  %9194 = vst [vmem:[#allocation22_spill] sm:$0xff] %v8039_v25  ;;  %v3812_v38 = vshrl.u32 %v8015_v10, 16  ;;  %v4439_v60 = vrot.slane %v7955_v19, 5  ;;  %v3823_v13 = vshrl.u32 %v5548_v41, 16  ;;  %9195 = vst [vmem:[#allocation23_spill] sm:$0xff] %v8050_v63 }
 0x123   : > { %9193 = vst [vmem:[#allocation21_spill] sm:$0xff] %v8035_v1  ;;  %v3826_v7 = vshll.u32 %v5548_v41, 16  ;;  %v3801_v29 = vrot.slane %v3799_v33, 4  ;;  %v3804_v22 = vrot.slane %v3802_v28, 5  ;;  %v3836_v3 = vshrl.u32 %v8043_v31, 16 }
 0x124   : > { %6082 = vmatmul.mubr.msk.bf16.gmra.mxu1 %vm694_vm3, %v9188_v32  ;;  %v8031_v32 = vrot.slane %v3767_v15, 4  ;;  %v3791_v15 = vor.u32 %v3790_v4, %v8011_v9  ;;  %v8067_v33 = vrot.slane %v3794_v44, 5  ;;  %v8070_v28 = vld [vmem:[%s6449_s6 + $0x68] sm:$0x1]  ;;  %v5551_v41 = vld [vmem:[%s6449_s6 + $0x78] sm:$0xf] }
 0x125   : > { %6085 = vmatprep.mubr.msk.bf16.mxu1 %vm694_vm3, %v9190_v54  ;;  %v5629_v54 = vrot.slane %v5613_v36, 9  ;;  %v3832_v36 = vshll.u32 %v8043_v31, 16  ;;  %v4442_v63 = vrot.slane %v8001_v39, 5  ;;  %v8076_v19 = vrot.slane %v3808_v2, 5  ;;  %v6297_v2 = vld [vmem:[%s6449_s6 + $0xb4] sm:$0xff]  }
 0x126   : > { %v8052_v49 = vpop.f32.mrf.mxu0  ;;  %v8085_v44 = vrot.slane %v3791_v15, 4  ;;  %v4441_v4 = vrot.slane %v4439_v60, 4  ;;  %v3825_v61 = vrot.slane %v3823_v13, 4  ;;  %v9198_v39 = vcombine.low %v7688_v14, %v7700_v23 }
 0x127   : > { %9196 = vst [vmem:[#allocation24_spill] sm:$0xff] %v8052_v49  ;;  %v3814_v49 = vrot.slane %v3812_v38, 4  ;;  %v3805_v15 = vor.u32 %v3804_v22, %v3801_v29  ;;  %v3838_v13 = vrot.slane %v3836_v3, 4  ;;  %v3847_v12 = vshrl.u32 %v5551_v41, 16 }
 0x128   : > { %6120 = vmatmul.mubr.msk.bf16.gmra.mxu0 %vm694_vm3, %v6295_v43  ;;  %v9197_v43 = vcombine.low %v7664_v34, %v7684_v51  ;;  %v8095_v47 = vpop.f32.mrf.mxu0  ;;  %v6298_v34 = vld [vmem:[%s6449_s6 + $0xc0] sm:$0xff]   ;;  %v8100_v51 = vsel %vm6772_vm7, %v5629_v54, %v4439_v60  ;;  %v3850_v14 = vshll.u32 %v5551_v41, 16  ;;  %v3856_v23 = vshll.u32 %v8079_v27, 16 }
 0x129   : > { %6123 = vmatprep.mubr.msk.bf16.mxu0 %vm694_vm3, %v6296_v16  ;;  %v8073_v16 = vrot.slane %v3781_v56, 4  ;;  %v3828_v56 = vrot.slane %v3826_v7, 5  ;;  %9200 = vst [vmem:[#allocation26_spill] sm:$0xff] %v8095_v47  ;;  %v8105_v7 = vld [vmem:[%s6449_s6 + $0x74] sm:$0x1]  ;;  %v3815_v54 = vor.u32 %v3814_v49, %v8076_v19  ;;  %v3818_v60 = vshll.u32 %v8070_v28, 16 }
 0x12a   : > { %v5630_v3 = vrot.slane %v5614_v50, 9  ;;  %v4446_v41 = vrot.slane %v8015_v10, 5  ;;  %v8127_v49 = vpop.f32.mrf.mxu0  ;;  %v8129_v50 = vrot.slane %v3805_v15, 4  ;;  %v3842_v47 = vshll.u32 %v8105_v7, 16 }
 0x12b   : > { %9202 = vst [vmem:[#allocation28_spill] sm:$0xff] %v8127_v49  ;;  %v4453_v22 = vrot.slane %v8043_v31, 5  ;;  %v3852_v10 = vrot.slane %v3850_v14, 5  ;;  %v3820_v15 = vrot.slane %v3818_v60, 5  ;;  %v4449_v49 = vrot.slane %v8070_v28, 5 }
 0x12c   : > { %6086 = vmatmul.mubr.msk.bf16.gmra.mxu1 %vm694_vm3, %v9197_v43  ;;  %v8092_v38 = vpop.f32.mrf.mxu1  ;;  %v8102_v43 = vrot.slane %v3832_v36, 5  ;;  %v8123_v36 = vsel %vm6772_vm7, %v4441_v4, %v4442_v63  ;;  %v8137_v63 = vld [vmem:[%s6449_s6 + $0x80] sm:$0x1]  ;;  %v8139_v4 = vrot.slane %v3856_v23, 5  ;;  %v5554_v31 = vld [vmem:[%s6449_s6 + $0x84] sm:$0xf]  ;;  %v9206_v28 = vcombine.low %v7729_v52, %v7749_v58 }
 0x12d   : > { %6089 = vmatprep.mubr.msk.bf16.mxu1 %vm694_vm3, %v9198_v39  ;;  %9199 = vst [vmem:[#allocation25_spill] sm:$0xff] %v8092_v38  ;;  %v3860_v39 = vshrl.u32 %v8079_v27, 16  ;;  %v3829_v38 = vor.u32 %v3828_v56, %v3825_v61  ;;  %v3849_v61 = vrot.slane %v3847_v12, 4  ;;  %v4448_v14 = vrot.slane %v4446_v41, 4  ;;  %v8155_v60 = vld [vmem:[%s6449_s6 + $0x88] sm:$0xf] }
 0x12e   : > { %v8115_v29 = vpop.f32.mrf.mxu1  ;;  %v4455_v25 = vrot.slane %v4453_v22, 4  ;;  %v3871_v52 = vshrl.u32 %v5554_v31, 16  ;;  %v3874_v58 = vshll.u32 %v5554_v31, 16 }
 0x12f   : > { %9201 = vst [vmem:[#allocation27_spill] sm:$0xff] %v8115_v29  ;;  %v3839_v29 = vor.u32 %v3838_v13, %v8102_v43  ;;  %v3862_v56 = vrot.slane %v3860_v39, 4  ;;  %v8143_v13 = vsel %vm6772_vm7, %v5630_v3, %v4446_v41  ;;  %v3830_v23 = vrot.slane %v3829_v38, 4  ;;  %v8157_v3 = vpop.f32.mrf.mxu0  ;;  %v5616_v41 = vld [vmem:[%s6449_s6 + $0x78] sm:$0xe] }
 0x130   : > { %6124 = vmatmul.mubr.msk.bf16.gmra.mxu0 %vm694_vm3, %v6297_v2  ;;  %v3816_v2 = vrot.slane %v3815_v54, 4  ;;  %v8151_v12 = vpop.f32.mrf.mxu1  ;;  %v5631_v39 = vrot.slane %v5615_v21, 9  ;;  %v4456_v54 = vrot.slane %v8105_v7, 5  ;;  %9205 = vst [vmem:[#allocation30_spill] sm:$0xff] %v8157_v3  ;;  %v3811_v21 = vsel %vm6485_vm4, %v8129_v50, %v8076_v19 }
 0x131   : > { %6127 = vmatprep.mubr.msk.bf16.mxu0 %vm694_vm3, %v6298_v34  ;;  %v9203_v34 = vcombine.low %v7696_v8, %v7709_v5  ;;  %9204 = vst [vmem:[#allocation29_spill] sm:$0xff] %v8151_v12  ;;  %v6299_v8 = vld [vmem:[%s6449_s6 + $0xcc] sm:$0xff]   ;;  %v3840_v5 = vrot.slane %v3839_v29, 4  ;;  %v3866_v12 = vshll.u32 %v8137_v63, 16  ;;  %v3853_v38 = vor.u32 %v3852_v10, %v3849_v61 }
 0x132   : > { %v3863_v7 = vor.u32 %v3862_v56, %v8139_v4  ;;  %v4460_v3 = vrot.slane %v8079_v27, 5  ;;  %v8174_v29 = vpop.f32.mrf.mxu1  ;;  %v3821_v1 = vsel %vm6485_vm4, %v3816_v2, %v3820_v15  ;;  %v8180_v19 = vsel %vm6772_vm7, %v4448_v14, %v4449_v49 }
 0x133   : > { %v3835_v50 = vsel %vm6485_vm4, %v3830_v23, %v8102_v43  ;;  %v8187_v27 = vsel %vm6772_vm7, %v5631_v39, %v4453_v22  ;;  %v8196_v56 = vsel %vm6772_vm7, %v4455_v25, %v4456_v54  ;;  %v3868_v49 = vrot.slane %v3866_v12, 5 }
 0x134   : > { %6090 = vmatmul.mubr.msk.bf16.gmra.mxu1 %vm694_vm3, %v9203_v34  ;;  %v3844_v34 = vrot.slane %v3842_v47, 5  ;;  %v3884_v47 = vshrl.u32 %v8155_v60, 16  ;;  %v5632_v2 = vrot.slane %v5616_v41, 9  ;;  %v9207_v43 = vcombine.low %v7861_v45, %v7867_v35 }
 0x135   : > { %6093 = vmatprep.mubr.msk.bf16.mxu1 %vm694_vm3, %v9206_v28  ;;  %v3880_v28 = vshll.u32 %v8155_v60, 16  ;;  %v3854_v22 = vrot.slane %v3853_v38, 4  ;;  %v3864_v15 = vrot.slane %v3863_v7, 4  ;;  %v4462_v31 = vrot.slane %v4460_v3, 4  ;;  %v5557_v7 = vld [vmem:[%s6449_s6 + $0x90] sm:$0xf] }
 0x136   : > { %v3845_v10 = vsel %vm6485_vm4, %v3840_v5, %v3844_v34  ;;  %v4463_v14 = vrot.slane %v8137_v63, 5  ;;  %v3873_v39 = vrot.slane %v3871_v52, 4  ;;  %v3886_v12 = vrot.slane %v3884_v47, 4  ;;  %v8271_v52 = vld [vmem:[%s6449_s6 + $0x94] sm:$0xf] }
 0x137   : > { %v8205_v25 = vrot.slane %v3880_v28, 5  ;;  %v9208_v35 = vcombine.low %v7745_v24, %v7756_v57  ;;  %v9209_v45 = vsel %vm6485_vm4, %v8031_v32, %v8027_v11  ;;  %v9210_v63 = vsel %vm6485_vm4, %v8025_v18, %v7962_v53  ;;  %v5556_v32 = vld [vmem:[%s6449_s6 + $0x8c] sm:$0x1]  ;;  %v5617_v53 = vld [vmem:[%s6449_s6 + $0x84] sm:$0xe] }
 0x138   : > { %v8189_v61 = vpop.f32.mrf.mxu0  ;;  %6128 = vmatmul.mubr.msk.bf16.gmra.mxu0 %vm694_vm3, %v6299_v8  ;;  %v3876_v8 = vrot.slane %v3874_v58, 5  ;;  %v8223_v5 = vcombine.low %v9210_v63, %v9209_v45  ;;  %v9211_v34 = vsel %vm6485_vm4, %v8085_v44, %v8067_v33  ;;  %v9212_v24 = vsel %vm6485_vm4, %v8073_v16, %v8011_v9 }
 0x139   : > { %6167 = vmatprep.mubr.msk.bf16.mxu0 %vm694_vm3, %v9207_v43  ;;  %v8235_v57 = vcombine.low %v9212_v24, %v9211_v34  ;;  %v4467_v18 = vrot.slane %v8155_v60, 5  ;;  %v8246_v33 = vcombine.low %v3811_v21, %v3821_v1  ;;  %v8250_v16 = vcombine.low %v3835_v50, %v3845_v10  ;;  %v5560_v10 = vld [vmem:[%s6449_s6 + $0x9c] sm:$0xf] }
 0x13a   : > { %v8203_v23 = vpop.f32.mrf.mxu0  ;;  %v3859_v60 = vsel %vm6485_vm4, %v3854_v22, %v8139_v4  ;;  %v8264_v1 = vsel %vm6772_vm7, %v5632_v2, %v4460_v3  ;;  %v8268_v21 = vsel %vm6772_vm7, %v4462_v31, %v4463_v14  ;;  %v3877_v28 = vor.u32 %v3876_v8, %v3873_v39  ;;  %v5618_v8 = vld [vmem:[%s6449_s6 + $0x90] sm:$0xe] }
 0x13b   : > { %v8207_v54 = vpop.f32.mrf.mxu1  ;;  %v3887_v47 = vor.u32 %v3886_v12, %v8205_v25  ;;  %v3890_v4 = vshll.u32 %v5556_v32, 16  ;;  %v5633_v50 = vrot.slane %v5617_v53, 9  ;;  %v4469_v3 = vrot.slane %v4467_v18, 4  ;;  %v8291_v12 = vld [vmem:[%s6449_s6 + $0x98] sm:$0x1] }
 0x13c   : > { %6094 = vmatmul.mubr.msk.bf16.gmra.mxu1 %vm694_vm3, %v9208_v35  ;;  %v8242_v38 = vpop.f32.mrf.mxu0  ;;  %v4470_v2 = vrot.slane %v5556_v32, 5  ;;  %v3895_v22 = vshrl.u32 %v5557_v7, 16  ;;  %v9213_v14 = vcombine.low %v7880_v59, %v7899_v42  ;;  %v3904_v35 = vshll.u32 %v8271_v52, 16 }
 0x13d   : > { %6133 = vmatprep.mubr.msk.bf16.mxu1 %vm694_vm3, %v7907_v30  ;;  %v8255_v41 = vpop.f32.mrf.mxu1  ;;  %v3869_v30 = vsel %vm6485_vm4, %v3864_v15, %v3868_v49  ;;  %v8278_v49 = vld [vmem:[%s6449_s6 + $0xa0] sm:$0xf]  ;;  %v3898_v15 = vshll.u32 %v5557_v7, 16  ;;  %v3908_v45 = vshrl.u32 %v8271_v52, 16  ;;  %v9214_v34 = vcombine.low %v7938_v40, %v7969_v62 }
 0x13e   : > { %v8273_v58 = vpop.f32.mrf.mxu0  ;;  %v8286_v39 = vcombine.low %v3859_v60, %v3869_v30  ;;  %v3919_v59 = vshrl.u32 %v5560_v10, 16  ;;  %v3922_v42 = vshll.u32 %v5560_v10, 16  ;;  %v3928_v24 = vshll.u32 %v8278_v49, 16 }
 0x13f   : > { %v8280_v43 = vpop.f32.mrf.mxu1  ;;  %v3932_v32 = vshrl.u32 %v8278_v49, 16  ;;  %v8303_v7 = vrot.slane %v3877_v28, 4  ;;  %v8305_v60 = vrot.slane %v3887_v47, 4  ;;  %v8307_v30 = vrot.slane %v3890_v4, 5 }
 0x140   : > { %v5965_v31 = vpop.f32.mrf.mxu0  ;;  %6168 = vmatmul.mubr.msk.bf16.vlgmr.msra.gmra.mxu0 %vm694_vm3, %v9213_v14  ;;  %v8311_v14 = vsel %vm6772_vm7, %v5633_v50, %v4467_v18  ;;  %v8317_v62 = vsel %vm6772_vm7, %v4469_v3, %v4470_v2  ;;  %v3897_v10 = vrot.slane %v3895_v22, 4  ;;  %v3914_v28 = vshll.u32 %v8291_v12, 16 }
 0x141   : > { %v8295_v63 = vpop.f32.mrf.mxu1  ;;  %6171 = vmatprep.mubr.msk.bf16.mxu0 %vm694_vm3, %v9214_v34  ;;  %v3900_v34 = vrot.slane %v3898_v15, 5  ;;  %v8323_v18 = vrot.slane %v3904_v35, 5  ;;  %v3910_v50 = vrot.slane %v3908_v45, 4  ;;  %v3921_v3 = vrot.slane %v3919_v59, 4  ;;  %v8341_v35 = vld [vmem:[%s6449_s6 + $0xa4] sm:$0x1] }
 0x142   : > { %v1509_v53 = vpop.f32.mrf.mxu0  ;;  %v3924_v2 = vrot.slane %v3922_v42, 5  ;;  %v8327_v22 = vrot.slane %v3928_v24, 5  ;;  %v3934_v15 = vrot.slane %v3932_v32, 4  ;;  %v5563_v42 = vld [vmem:[%s6449_s6 + $0xa8] sm:$0xf] }
 0x143   : > { %v5931_v40 = vpop.f32.mrf.mxu1  ;;  %v3901_v59 = vor.u32 %v3900_v34, %v3897_v10  ;;  %v9219_v34 = vld [vmem:[#allocation22_spill] sm:$0xff]  ;;  %v3946_v11 = vshll.u32 %v5563_v42, 16 }
 0x144   : > { %6134 = vmatmul.mubr.msk.bf16.vlgmr.msra.gmra.mxu1 %vm694_vm3, %v7918_v20  ;;  %v1087_v47 = vadd.f32 %v5931_v40, %v7810_v46  ;;  %v5966_v4 = vpop.f32.mrf.mxu0  ;;  %v4474_v20 = vrot.slane %v8271_v52, 5  ;;  %v3893_v52 = vsel %vm6485_vm4, %v8305_v60, %v8307_v30  ;;  %v3911_v60 = vor.u32 %v3910_v50, %v8323_v18 }
 0x145   : > { %6137 = vmatprep.mubr.msk.bf16.mxu1 %vm694_vm3, %v7996_v55  ;;  %v1078_v44 = vpop.f32.mrf.mxu1  ;;  %v3883_v55 = vsel %vm6485_vm4, %v8303_v7, %v8205_v25  ;;  %v9217_v7 = vcombine.low %v7977_v6, %v7990_v48  ;;  %v9222_v48 = vld [vmem:[#allocation17_spill] sm:$0xff] }
 0x146   : > { %v8329_v9 = vadd.f32 %v5965_v31, %v1087_v47  ;;  %v1079_v46 = vadd.f32 %v1078_v44, %v7836_v0  ;;  %v1512_v40 = vpop.f32.mrf.mxu0  ;;  %v5634_v0 = vrot.slane %v5618_v8, 9  ;;  %v4477_v44 = vrot.slane %v8291_v12, 5  ;;  %v8356_v47 = vld [vmem:[%s6449_s6 + $0xac] sm:$0xf]  ;;  %v9218_v8 = vld [vmem:[#allocation21_spill] sm:$0xff] }
 0x147   : > { %v5932_v45 = vpop.f32.mrf.mxu1  ;;  %v4476_v30 = vrot.slane %v4474_v20, 4  ;;  %v9220_v12 = vcombine.low %v9218_v8, %v9219_v34  ;;  %v3943_v31 = vshrl.u32 %v5563_v42, 16  ;;  %v3902_v8 = vrot.slane %v3901_v59, 4 }
 0x148   : > { %9215 = vst [vmem:[#allocation31_spill] sm:$0xff] %v8329_v9  ;;  %v8347_v24 = vadd.f32 %v1509_v53, %v1079_v46  ;;  %v1090_v25 = vadd.f32 %v5932_v45, %v7851_v17  ;;  %v5969_v32 = vpop.f32.mrf.mxu0  ;;  %6172 = vmatmul.mubr.msk.bf16.gmra.mxu0 %vm694_vm3, %v9217_v7  ;;  %v3916_v53 = vrot.slane %v3914_v28, 5  ;;  %v3925_v46 = vor.u32 %v3924_v2, %v3921_v3  ;;  %v9223_v9 = vld [vmem:[#allocation9_spill] sm:$0xff] }
 0x149   : > { %v1081_v10 = vpop.f32.mrf.mxu1  ;;  %6175 = vmatprep.mubr.msk.bf16.mxu0 %vm694_vm3, %v9220_v12  ;;  %v3935_v17 = vor.u32 %v3934_v15, %v8327_v22  ;;  %v3938_v45 = vshll.u32 %v8341_v35, 16  ;;  %v8371_v28 = vsel %vm6772_vm7, %v5634_v0, %v4474_v20  ;;  %v3952_v3 = vshll.u32 %v8356_v47, 16  ;;  %v9225_v15 = vld [vmem:[#allocation16_spill] sm:$0xff]  ;;  %v5619_v12 = vld [vmem:[%s6449_s6 + $0x9c] sm:$0xe] }
 0x14a   : > { %9216 = vst [vmem:[#allocation32_spill] sm:$0xff] %v8347_v24  ;;  %v8364_v6 = vadd.f32 %v5966_v4, %v1090_v25  ;;  %v1082_v7 = vadd.f32 %v1081_v10, %v9222_v48  ;;  %v1525_v50 = vpop.f32.mrf.mxu0  ;;  %v3956_v4 = vshrl.u32 %v8356_v47, 16  ;;  %v3912_v42 = vrot.slane %v3911_v60, 4 }
 0x14b   : > { %v5935_v24 = vpop.f32.mrf.mxu1  ;;  %v3926_v20 = vrot.slane %v3925_v46, 4  ;;  %v3936_v0 = vrot.slane %v3935_v17, 4  ;;  %v3940_v34 = vrot.slane %v3938_v45, 5  ;;  %v4481_v48 = vrot.slane %v8278_v49, 5 }
 0x14c   : > { %9221 = vst [vmem:[#allocation21_spill] sm:$0xff] %v8364_v6  ;;  %6138 = vmatmul.mubr.msk.bf16.gmra.mxu1 %vm694_vm3, %v9223_v9  ;;  %v8375_v2 = vadd.f32 %v1512_v40, %v1082_v7  ;;  %v1103_v25 = vadd.f32 %v5935_v24, %v9225_v15  ;;  %v5970_v10 = vpop.f32.mrf.mxu0  ;;  %v8382_v9 = vsel %vm6772_vm7, %v4476_v30, %v4477_v44  ;;  %v9226_v7 = vld [vmem:[#allocation8_spill] sm:$0xff]  ;;  %v8394_v30 = vrot.slane %v3952_v3, 5  ;;  %v5566_v3 = vld [vmem:[%s6449_s6 + $0xb4] sm:$0xf] }
 0x14d   : > { %6141 = vmatprep.mubr.msk.bf16.mxu1 %vm694_vm3, %v8223_v5  ;;  %v1094_v59 = vpop.f32.mrf.mxu1  ;;  %v3948_v5 = vrot.slane %v3946_v11, 5  ;;  %v8389_v6 = vcombine.low %v3883_v55, %v3893_v52  ;;  %v3907_v44 = vsel %vm6485_vm4, %v3902_v8, %v8323_v18  ;;  %v3958_v46 = vrot.slane %v3956_v4, 4  ;;  %v8406_v18 = vld [vmem:[%s6449_s6 + $0xb0] sm:$0x1] }
 0x14e   : > { %9224 = vst [vmem:[#allocation22_spill] sm:$0xff] %v8375_v2  ;;  %v8386_v40 = vadd.f32 %v5969_v32, %v1103_v25  ;;  %v1095_v24 = vadd.f32 %v1094_v59, %v9226_v7  ;;  %v1528_v15 = vpop.f32.mrf.mxu0  ;;  %v3945_v2 = vrot.slane %v3943_v31, 4  ;;  %v9227_v32 = vld [vmem:[#allocation19_spill] sm:$0xff]  ;;  %v9228_v31 = vcombine.low %v8100_v51, %v8123_v36  ;;  %v9230_v25 = vld [vmem:[#allocation20_spill] sm:$0xff] }
 0x14f   : > { %v5936_v60 = vpop.f32.mrf.mxu1  ;;  %v3917_v11 = vsel %vm6485_vm4, %v3912_v42, %v3916_v53  ;;  %v5635_v55 = vrot.slane %v5619_v12, 9  ;;  %v5650_v8 = vcombine.low %v8371_v28, %v8382_v9  ;;  %v3931_v51 = vsel %vm6485_vm4, %v3926_v20, %v8327_v22  ;;  %v5620_v12 = vld [vmem:[%s6449_s6 + $0xa8] sm:$0xe]  ;;  %v5622_v28 = vld [vmem:[%s6449_s6 + $0xc0] sm:$0xe] }
 0x150   : > { %v8396_v49 = vadd.f32 %v1525_v50, %v1095_v24  ;;  %v1106_v17 = vadd.f32 %v5936_v60, %v9227_v32  ;;  %v5973_v45 = vpop.f32.mrf.mxu0  ;;  %6176 = vmatmul.mubr.msk.bf16.gmra.mxu0 %vm694_vm3, %v9228_v31  ;;  %v9229_v50 = vcombine.low %v8143_v13, %v8180_v19  ;;  %v4483_v36 = vrot.slane %v4481_v48, 4  ;;  %v8433_v24 = vld [vmem:[%s6449_s6 + $0xb8] sm:$0xf]  ;;  %v9231_v32 = vld [vmem:[#allocation24_spill] sm:$0xff] }
 0x151   : > { %v1097_v52 = vpop.f32.mrf.mxu1  ;;  %v4484_v53 = vrot.slane %v8341_v35, 5  ;;  %v3941_v13 = vsel %vm6485_vm4, %v3936_v0, %v3940_v34  ;;  %v3949_v19 = vor.u32 %v3948_v5, %v3945_v2  ;;  %v8427_v22 = vcombine.low %v3907_v44, %v3917_v11  ;;  %v9232_v31 = vld [vmem:[#allocation26_spill] sm:$0xff] }
 0x152   : > { %6179 = vmatprep.mubr.msk.bf16.mxu0 %vm694_vm3, %v9229_v50  ;;  %v8419_v4 = vadd.f32 %v5970_v10, %v1106_v17  ;;  %v1098_v42 = vadd.f32 %v1097_v52, %v9230_v25  ;;  %v1541_v59 = vpop.f32.mrf.mxu0  ;;  %v3959_v20 = vor.u32 %v3958_v46, %v8394_v30  ;;  %v3962_v35 = vshll.u32 %v8406_v18, 16 }
 0x153   : > { %v5939_v7 = vpop.f32.mrf.mxu1  ;;  %v4488_v10 = vrot.slane %v8356_v47, 5  ;;  %v3970_v34 = vshll.u32 %v5566_v3, 16  ;;  %v8440_v44 = vcombine.low %v3931_v51, %v3941_v13  ;;  %v8444_v46 = vsel %vm6772_vm7, %v5635_v55, %v4481_v48  ;;  %v5569_v51 = vld [vmem:[%s6449_s6 + $0xc0] sm:$0xf] }
 0x154   : > { %6142 = vmatmul.mubr.msk.bf16.gmra.mxu1 %vm694_vm3, %v8235_v57  ;;  %v8435_v60 = vadd.f32 %v1528_v15, %v1098_v42  ;;  %v1119_v2 = vadd.f32 %v5939_v7, %v9231_v32  ;;  %v5974_v0 = vpop.f32.mrf.mxu0  ;;  %v3967_v57 = vshrl.u32 %v5566_v3, 16  ;;  %v8448_v47 = vsel %vm6772_vm7, %v4483_v36, %v4484_v53  ;;  %v9233_v53 = vld [vmem:[#allocation28_spill] sm:$0xff]  ;;  %v8464_v32 = vld [vmem:[%s6449_s6 + $0xc4] sm:$0xf] }
 0x155   : > { %6145 = vmatprep.mubr.msk.bf16.mxu1 %vm694_vm3, %v8246_v33  ;;  %v1110_v5 = vpop.f32.mrf.mxu1  ;;  %v5636_v15 = vrot.slane %v5620_v12, 9  ;;  %v3950_v52 = vrot.slane %v3949_v19, 4  ;;  %v3976_v50 = vshll.u32 %v8433_v24, 16  ;;  %v3960_v25 = vrot.slane %v3959_v20, 4 }
 0x156   : > { %v8450_v17 = vadd.f32 %v5973_v45, %v1119_v2  ;;  %v1111_v11 = vadd.f32 %v1110_v5, %v9232_v31  ;;  %v1544_v33 = vpop.f32.mrf.mxu0  ;;  %v3964_v48 = vrot.slane %v3962_v35, 5  ;;  %v4490_v55 = vrot.slane %v4488_v10, 4 }
 0x157   : > { %v5940_v3 = vpop.f32.mrf.mxu1  ;;  %v4491_v42 = vrot.slane %v8406_v18, 5  ;;  %v9234_v12 = vcombine.low %v8187_v27, %v8196_v56  ;;  %v3969_v19 = vrot.slane %v3967_v57, 4  ;;  %v3972_v7 = vrot.slane %v3970_v34, 5  ;;  %v9236_v34 = vld [vmem:[#allocation30_spill] sm:$0xff] }
 0x158   : > { %v8456_v36 = vadd.f32 %v1541_v59, %v1111_v11  ;;  %v1122_v45 = vadd.f32 %v5940_v3, %v9233_v53  ;;  %v5977_v13 = vpop.f32.mrf.mxu0  ;;  %v9235_v20 = vcombine.low %v8264_v1, %v8268_v21  ;;  %v8472_v18 = vsel %vm6772_vm7, %v5636_v15, %v4488_v10  ;;  %v8475_v59 = vld [vmem:[%s6449_s6 + $0xbc] sm:$0x1]  ;;  %v5621_v15 = vld [vmem:[%s6449_s6 + $0xb4] sm:$0xe] }
 0x159   : > { %6180 = vmatmul.mubr.msk.bf16.gmra.mxu0 %vm694_vm3, %v9234_v12  ;;  %v1113_v2 = vpop.f32.mrf.mxu1  ;;  %v3980_v27 = vshrl.u32 %v8433_v24, 16  ;;  %v3991_v56 = vshrl.u32 %v5569_v51, 16  ;;  %v3994_v35 = vshll.u32 %v5569_v51, 16  ;;  %v3955_v1 = vsel %vm6485_vm4, %v3950_v52, %v8394_v30 }
 0x15a   : > { %6183 = vmatprep.mubr.msk.bf16.mxu0 %vm694_vm3, %v9235_v20  ;;  %v8478_v57 = vadd.f32 %v5974_v0, %v1122_v45  ;;  %v1114_v5 = vadd.f32 %v1113_v2, %v9236_v34  ;;  %v1557_v31 = vpop.f32.mrf.mxu0  ;;  %v8484_v21 = vrot.slane %v3976_v50, 5  ;;  %v3965_v10 = vsel %vm6485_vm4, %v3960_v25, %v3964_v48  ;;  %v5572_v34 = vld [vmem:[%s6449_s6 + $0xcc] sm:$0xf] }
 0x15b   : > { %v5943_v11 = vpop.f32.mrf.mxu1  ;;  %v8492_v0 = vsel %vm6772_vm7, %v4490_v55, %v4491_v42  ;;  %v4000_v51 = vshll.u32 %v8464_v32, 16  ;;  %v4004_v3 = vshrl.u32 %v8464_v32, 16  ;;  %v3986_v50 = vshll.u32 %v8475_v59, 16 }
 0x15c   : > { %6146 = vmatmul.mubr.msk.bf16.gmra.mxu1 %vm694_vm3, %v8250_v16  ;;  %v8497_v53 = vadd.f32 %v1544_v33, %v1114_v5  ;;  %v1135_v30 = vadd.f32 %v5943_v11, %v8189_v61  ;;  %v5978_v52 = vpop.f32.mrf.mxu0  ;;  %v3973_v16 = vor.u32 %v3972_v7, %v3969_v19  ;;  %v3982_v48 = vrot.slane %v3980_v27, 4 }
 0x15d   : > { %6149 = vmatprep.mubr.msk.bf16.mxu1 %vm694_vm3, %v8286_v39  ;;  %v1126_v25 = vpop.f32.mrf.mxu1  ;;  %v4495_v55 = vrot.slane %v8433_v24, 5  ;;  %v3993_v42 = vrot.slane %v3991_v56, 4  ;;  %v3996_v45 = vrot.slane %v3994_v35, 5  ;;  %v5651_v2 = vcombine.low %v8444_v46, %v8448_v47 }
 0x15e   : > { %v8504_v12 = vadd.f32 %v5977_v13, %v1135_v30  ;;  %v1127_v33 = vadd.f32 %v1126_v25, %v8203_v23  ;;  %v1560_v61 = vpop.f32.mrf.mxu0  ;;  %v5637_v39 = vrot.slane %v5621_v15, 9  ;;  %v8509_v7 = vcombine.low %v3955_v1, %v3965_v10  ;;  %v8535_v1 = vld [vmem:[%s6449_s6 + $0xd0] sm:$0xf] }
 0x15f   : > { %v5944_v19 = vpop.f32.mrf.mxu1  ;;  %v5652_v20 = vcombine.low %v8472_v18, %v8492_v0  ;;  %v8513_v24 = vrot.slane %v4000_v51, 5  ;;  %v4006_v13 = vrot.slane %v4004_v3, 4  ;;  %v9237_v35 = vcombine.low %v8311_v14, %v8317_v62  ;;  %v5571_v18 = vld [vmem:[%s6449_s6 + $0xc8] sm:$0x1] }
 0x160   : > { %v8515_v27 = vadd.f32 %v1557_v31, %v1127_v33  ;;  %v1138_v23 = vadd.f32 %v5944_v19, %v8242_v38  ;;  %v5981_v56 = vpop.f32.mrf.mxu0  ;;  %v8522_v46 = vrot.slane %v3986_v50, 5  ;;  %v4498_v47 = vrot.slane %v8475_v59, 5 }
 0x161   : > { %6184 = vmatmul.mubr.msk.bf16.gmra.mxu0 %vm694_vm3, %v9237_v35  ;;  %v1129_v5 = vpop.f32.mrf.mxu1  ;;  %v8531_v38 = vrot.slane %v3973_v16, 4  ;;  %v3983_v31 = vor.u32 %v3982_v48, %v8484_v21  ;;  %v4497_v14 = vrot.slane %v4495_v55, 4  ;;  %v3997_v62 = vor.u32 %v3996_v45, %v3993_v42 }
 0x162   : > { %6187 = vmatprep.mubr.msk.bf16.mxu0 %vm694_vm3, %v5650_v8  ;;  %v8537_v11 = vadd.f32 %v5978_v52, %v1138_v23  ;;  %v1130_v59 = vadd.f32 %v1129_v5, %v8273_v58  ;;  %v1573_v10 = vpop.f32.mrf.mxu0  ;;  %v8542_v0 = vsel %vm6772_vm7, %v5637_v39, %v4495_v55  ;;  %v4502_v9 = vrot.slane %v8464_v32, 5  ;;  %v9238_v58 = vld [vmem:[#allocation11_spill] sm:$0xff] }
 0x163   : > { %v5947_v8 = vpop.f32.mrf.mxu1  ;;  %v4007_v15 = vor.u32 %v4006_v13, %v8513_v24  ;;  %v4010_v51 = vshll.u32 %v5571_v18, 16  ;;  %v4015_v3 = vshrl.u32 %v5572_v34, 16  ;;  %v4018_v30 = vshll.u32 %v5572_v34, 16 }
 0x164   : > { %6150 = vmatmul.mubr.msk.bf16.gmra.mxu1 %vm694_vm3, %v8389_v6  ;;  %v8549_v52 = vadd.f32 %v1560_v61, %v1130_v59  ;;  %v1151_v16 = vadd.f32 %v5947_v8, %v9238_v58  ;;  %v5982_v50 = vpop.f32.mrf.mxu0  ;;  %v4024_v25 = vshll.u32 %v8535_v1, 16  ;;  %v4028_v32 = vshrl.u32 %v8535_v1, 16  ;;  %v9239_v61 = vld [vmem:[#allocation14_spill] sm:$0xff] }
 0x165   : > { %6153 = vmatprep.mubr.msk.bf16.mxu1 %vm694_vm3, %v8427_v22  ;;  %v1142_v48 = vpop.f32.mrf.mxu1  ;;  %v3984_v55 = vrot.slane %v3983_v31, 4  ;;  %v4499_v6 = vsel %vm6772_vm7, %v4497_v14, %v4498_v47  ;;  %v3998_v42 = vrot.slane %v3997_v62, 4  ;;  %v5638_v45 = vrot.slane %v5622_v28, 9  ;;  %v9240_v31 = vld [vmem:[#allocation12_spill] sm:$0xff]  ;;  %v5574_v28 = vld [vmem:[%s6449_s6 + $0xd4] sm:$0x1] }
 0x166   : > { %v8558_v33 = vadd.f32 %v5981_v56, %v1151_v16  ;;  %v1143_v39 = vadd.f32 %v1142_v48, %v9239_v61  ;;  %v1576_v19 = vpop.f32.mrf.mxu0  ;;  %v4504_v13 = vrot.slane %v4502_v9, 4  ;;  %v4505_v23 = vrot.slane %v5571_v18, 5 }
 0x167   : > { %v5948_v22 = vpop.f32.mrf.mxu1  ;;  %v4008_v35 = vrot.slane %v4007_v15, 4  ;;  %v4012_v34 = vrot.slane %v4010_v51, 5  ;;  %v4017_v5 = vrot.slane %v4015_v3, 4  ;;  %v4020_v59 = vrot.slane %v4018_v30, 5 }
 0x168   : > { %v8561_v8 = vadd.f32 %v1573_v10, %v1143_v39  ;;  %v1154_v58 = vadd.f32 %v5948_v22, %v9240_v31  ;;  %v5985_v47 = vpop.f32.mrf.mxu0  ;;  %v8565_v56 = vrot.slane %v4024_v25, 5  ;;  %v4030_v14 = vrot.slane %v4028_v32, 4  ;;  %v5623_v25 = vld [vmem:[%s6449_s6 + $0xcc] sm:$0xe] }
 0x169   : > { %6188 = vmatmul.mubr.msk.bf16.gmra.mxu0 %vm694_vm3, %v5651_v2  ;;  %v1145_v62 = vpop.f32.mrf.mxu1  ;;  %v3979_v18 = vsel %vm6485_vm4, %v8531_v38, %v8484_v21  ;;  %v3989_v10 = vsel %vm6485_vm4, %v3984_v55, %v8522_v46  ;;  %v4509_v15 = vrot.slane %v8535_v1, 5  ;;  %v9241_v2 = vld [vmem:[#allocation15_spill] sm:$0xff]  ;;  %v4506_v16 = vsel %vm6772_vm7, %v4504_v13, %v4505_v23  ;;  %v9243_v13 = vld [vmem:[#allocation10_spill] sm:$0xff] }
 0x16a   : > { %6191 = vmatprep.mubr.msk.bf16.mxu0 %vm694_vm3, %v5652_v20  ;;  %v8577_v51 = vadd.f32 %v5982_v50, %v1154_v58  ;;  %v1146_v3 = vadd.f32 %v1145_v62, %v9241_v2  ;;  %v1589_v30 = vpop.f32.mrf.mxu0  ;;  %v4503_v20 = vsel %vm6772_vm7, %v5638_v45, %v4502_v9  ;;  %v5653_v46 = vcombine.low %v8542_v0, %v4499_v6  ;;  %v9242_v9 = vld [vmem:[#allocation18_spill] sm:$0xff] }
 0x16b   : > { %v5951_v21 = vpop.f32.mrf.mxu1  ;;  %v4003_v38 = vsel %vm6485_vm4, %v3998_v42, %v8513_v24  ;;  %v4013_v1 = vsel %vm6485_vm4, %v4008_v35, %v4012_v34  ;;  %v4021_v50 = vor.u32 %v4020_v59, %v4017_v5  ;;  %v4034_v45 = vshll.u32 %v5574_v28, 16 }
 0x16c   : > { %6154 = vmatmul.mubr.msk.bf16.gmra.mxu1 %vm694_vm3, %v8440_v44  ;;  %v8593_v32 = vadd.f32 %v1576_v19, %v1146_v3  ;;  %v1167_v48 = vadd.f32 %v5951_v21, %v9242_v9  ;;  %v5986_v55 = vpop.f32.mrf.mxu0  ;;  %v4031_v44 = vor.u32 %v4030_v14, %v8565_v56  ;;  %v5654_v6 = vcombine.low %v4503_v20, %v4506_v16  ;;  %v9246_v21 = vld [vmem:[#allocation25_spill] sm:$0xff]  ;;  %v9247_v9 = vld [vmem:[#allocation27_spill] sm:$0xff] }
 0x16d   : > { %6157 = vmatprep.mubr.msk.bf16.mxu1 %vm694_vm3, %v8509_v7  ;;  %v1158_v0 = vpop.f32.mrf.mxu1  ;;  %v5639_v61 = vrot.slane %v5623_v25, 9  ;;  %v4511_v39 = vrot.slane %v4509_v15, 4  ;;  %v4512_v24 = vrot.slane %v5574_v28, 5  ;;  %v5588_v35 = vcombine.low %v3979_v18, %v3989_v10  ;;  %v9244_v7 = vld [vmem:[#allocation13_spill] sm:$0xff]  ;;  %v9245_v28 = vld [vmem:[#allocation23_spill] sm:$0xff] }
 0x16e   : > { %v8599_v42 = vadd.f32 %v5985_v47, %v1167_v48  ;;  %v1159_v23 = vadd.f32 %v1158_v0, %v9243_v13  ;;  %v1592_v19 = vpop.f32.mrf.mxu0  ;;  %v5589_v34 = vcombine.low %v4003_v38, %v4013_v1  ;;  %v4022_v5 = vrot.slane %v4021_v50, 4  ;;  %v9248_v0 = vld [vmem:[#allocation29_spill] sm:$0xff] }
 0x16f   : > { %v5952_v22 = vpop.f32.mrf.mxu1  ;;  %v4032_v14 = vrot.slane %v4031_v44, 4  ;;  %v4036_v62 = vrot.slane %v4034_v45, 5  ;;  %v4510_v47 = vsel %vm6772_vm7, %v5639_v61, %v4509_v15  ;;  %v4513_v18 = vsel %vm6772_vm7, %v4511_v39, %v4512_v24 }
 0x170   : > { %v8602_v59 = vadd.f32 %v1589_v30, %v1159_v23  ;;  %v1170_v31 = vadd.f32 %v5952_v22, %v9244_v7  ;;  %v5989_v58 = vpop.f32.mrf.mxu0  ;;  %v4027_v16 = vsel %vm6485_vm4, %v4022_v5, %v8565_v56  ;;  %v5655_v38 = vcombine.low %v4510_v47, %v4513_v18 }
 0x171   : > { %6192 = vmatmul.mubr.msk.bf16.gmra.mxu0 %vm694_vm3, %v5653_v46  ;;  %v1161_v2 = vpop.f32.mrf.mxu1  ;;  %v4037_v37 = vsel %vm6485_vm4, %v4032_v14, %v4036_v62 }
 0x172   : > { %6195 = vmatprep.mubr.msk.bf16.mxu0 %vm694_vm3, %v5654_v6  ;;  %v8611_v10 = vadd.f32 %v5986_v55, %v1170_v31  ;;  %v1162_v3 = vadd.f32 %v1161_v2, %v9245_v28  ;;  %v1605_v30 = vpop.f32.mrf.mxu0  ;;  %v5590_v45 = vcombine.low %v4027_v16, %v4037_v37 }
 0x173   : > { %v5955_v20 = vpop.f32.mrf.mxu1 }
 0x174   : > { %6158 = vmatmul.mubr.msk.bf16.gmra.mxu1 %vm694_vm3, %v5588_v35  ;;  %v8618_v25 = vadd.f32 %v1592_v19, %v1162_v3  ;;  %v1183_v46 = vadd.f32 %v5955_v20, %v9246_v21  ;;  %v5990_v15 = vpop.f32.mrf.mxu0 }
 0x175   : > { %6161 = vmatprep.mubr.msk.bf16.mxu1 %vm694_vm3, %v5589_v34  ;;  %v1174_v1 = vpop.f32.mrf.mxu1 }
 0x176   : > { %v8624_v50 = vadd.f32 %v5989_v58, %v1183_v46  ;;  %v1175_v48 = vadd.f32 %v1174_v1, %v9247_v9  ;;  %v1608_v55 = vpop.f32.mrf.mxu0  ;;  %v9250_v46 = vld [vmem:[#allocation32_spill] sm:$0xff]  ;;  %v9251_v1 = vld [vmem:[#allocation21_spill] sm:$0xff] }
 0x177   : > { %v5956_v44 = vpop.f32.mrf.mxu1 }
 0x178   : > { %v8627_v56 = vadd.f32 %v1605_v30, %v1175_v48  ;;  %v1186_v6 = vadd.f32 %v5956_v44, %v9248_v0  ;;  %v5993_v61 = vpop.f32.mrf.mxu0  ;;  %v9249_v30 = vld [vmem:[#allocation31_spill] sm:$0xff]  ;;  %v9252_v44 = vld [vmem:[#allocation22_spill] sm:$0xff] }
 0x179   : > { %6196 = vmatmul.mubr.msk.bf16.gmra.mxu0 %vm694_vm3, %v5655_v38  ;;  %v1177_v39 = vpop.f32.mrf.mxu1 }
 0x17a   : > { %v8631_v24 = vadd.f32 %v5990_v15, %v1186_v6  ;;  %v1178_v26 = vadd.f32 %v1177_v39, %v8174_v29  ;;  %v1621_v13 = vpop.f32.mrf.mxu0 }
 0x17c   : > { %v5959_v23 = vpop.f32.mrf.mxu1  ;;  %6162 = vmatmul.mubr.msk.bf16.gmra.mxu1 %vm694_vm3, %v5590_v45  ;;  %v8635_v19 = vadd.f32 %v1608_v55, %v1178_v26  ;;  %v5994_v35 = vpop.f32.mrf.mxu0 }
 0x17d   : > { %v1199_v22 = vadd.f32 %v5959_v23, %v8207_v54 }
 0x17e   : > { %v1190_v34 = vpop.f32.mrf.mxu1  ;;  %v1624_v31 = vpop.f32.mrf.mxu0 }
 0x17f   : > { %v8638_v5 = vadd.f32 %v5993_v61, %v1199_v22  ;;  %v1191_v7 = vadd.f32 %v1190_v34, %v8255_v41 }
 0x180   : > { %v5960_v58 = vpop.f32.mrf.mxu1  ;;  %v6033_v62 = vpop.f32.mrf.mxu0 }
 0x181   : > { %v8641_v14 = vadd.f32 %v1621_v13, %v1191_v7  ;;  %v1202_v29 = vadd.f32 %v5960_v58, %v8280_v43 }
 0x182   : > { %v1193_v2 = vpop.f32.mrf.mxu1  ;;  %v2606_v28 = vpop.f32.mrf.mxu0 }
 0x183   : > { %v8644_v47 = vadd.f32 %v5994_v35, %v1202_v29  ;;  %v1194_v18 = vadd.f32 %v1193_v2, %v8295_v63 }
 0x184   : > { %v5999_v54 = vpop.f32.mrf.mxu1  ;;  %v6034_v16 = vpop.f32.mrf.mxu0 }
 0x185   : > { %v8647_v3 = vadd.f32 %v1624_v31, %v1194_v18  ;;  %v2003_v20 = vadd.f32 %v5999_v54, %v9249_v30 }
 0x186   : > { %v1874_v41 = vpop.f32.mrf.mxu1  ;;  %v2609_v37 = vpop.f32.mrf.mxu0 }
 0x187   : > { %v8650_v21 = vadd.f32 %v6033_v62, %v2003_v20  ;;  %v2001_v15 = vadd.f32 %v1874_v41, %v9250_v46 }
 0x188   : > { %v6000_v43 = vpop.f32.mrf.mxu1  ;;  %v6037_v48 = vpop.f32.mrf.mxu0 }
 0x189   : > { %v8653_v38 = vadd.f32 %v2606_v28, %v2001_v15  ;;  %v2004_v9 = vadd.f32 %v6000_v43, %v9251_v1 }
 0x18a   : > { %v1877_v63 = vpop.f32.mrf.mxu1  ;;  %v2622_v0 = vpop.f32.mrf.mxu0 }
 0x18b   : > { %v8656_v55 = vadd.f32 %v6034_v16, %v2004_v9  ;;  %v2002_v45 = vadd.f32 %v1877_v63, %v9252_v44 }
 0x18c   : > { %v6003_v6 = vpop.f32.mrf.mxu1  ;;  %v6038_v26 = vpop.f32.mrf.mxu0 }
 0x18d   : > { %v8659_v61 = vadd.f32 %v2609_v37, %v2002_v45  ;;  %v2007_v39 = vadd.f32 %v6003_v6, %v8386_v40 }
 0x18e   : > { %v1890_v13 = vpop.f32.mrf.mxu1  ;;  %v2625_v35 = vpop.f32.mrf.mxu0 }
 0x18f   : > { %v8662_v23 = vadd.f32 %v6037_v48, %v2007_v39  ;;  %v2005_v22 = vadd.f32 %v1890_v13, %v8396_v49 }
 0x190   : > { %v6004_v34 = vpop.f32.mrf.mxu1  ;;  %v6041_v58 = vpop.f32.mrf.mxu0 }
 0x191   : > { %v8665_v7 = vadd.f32 %v2622_v0, %v2005_v22  ;;  %v2008_v31 = vadd.f32 %v6004_v34, %v8419_v4 }
 0x192   : > { %v1893_v29 = vpop.f32.mrf.mxu1  ;;  %v2638_v18 = vpop.f32.mrf.mxu0 }
 0x193   : > { %v8668_v62 = vadd.f32 %v6038_v26, %v2008_v31  ;;  %v2006_v2 = vadd.f32 %v1893_v29, %v8435_v60 }
 0x194   : > { %v6007_v40 = vpop.f32.mrf.mxu1  ;;  %v6042_v30 = vpop.f32.mrf.mxu0 }
 0x195   : > { %v8671_v28 = vadd.f32 %v2625_v35, %v2006_v2  ;;  %v2011_v54 = vadd.f32 %v6007_v40, %v8450_v17 }
 0x196   : > { %v1906_v49 = vpop.f32.mrf.mxu1  ;;  %v2641_v41 = vpop.f32.mrf.mxu0 }
 0x197   : > { %v8674_v20 = vadd.f32 %v6041_v58, %v2011_v54  ;;  %v2009_v16 = vadd.f32 %v1906_v49, %v8456_v36 }
 0x198   : > { %v6008_v4 = vpop.f32.mrf.mxu1  ;;  %v6045_v37 = vpop.f32.mrf.mxu0 }
 0x199   : > { %v8677_v46 = vadd.f32 %v2638_v18, %v2009_v16  ;;  %v2012_v15 = vadd.f32 %v6008_v4, %v8478_v57 }
 0x19a   : > { %v1909_v60 = vpop.f32.mrf.mxu1  ;;  %v2654_v9 = vpop.f32.mrf.mxu0 }
 0x19b   : > { %v8680_v43 = vadd.f32 %v6042_v30, %v2012_v15  ;;  %v2010_v1 = vadd.f32 %v1909_v60, %v8497_v53 }
 0x19c   : > { %v6011_v17 = vpop.f32.mrf.mxu1  ;;  %v6046_v44 = vpop.f32.mrf.mxu0 }
 0x19d   : > { %v8683_v48 = vadd.f32 %v2641_v41, %v2010_v1  ;;  %v2015_v63 = vadd.f32 %v6011_v17, %v8504_v12 }
 0x19e   : > { %v1922_v36 = vpop.f32.mrf.mxu1  ;;  %v2657_v6 = vpop.f32.mrf.mxu0 }
 0x19f   : > { %v8686_v45 = vadd.f32 %v6045_v37, %v2015_v63  ;;  %v2013_v0 = vadd.f32 %v1922_v36, %v8515_v27 }
 0x1a0   : > { %v6012_v57 = vpop.f32.mrf.mxu1  ;;  %v6049_v13 = vpop.f32.mrf.mxu0 }
 0x1a1   : > { %v8689_v39 = vadd.f32 %v2654_v9, %v2013_v0  ;;  %v2016_v26 = vadd.f32 %v6012_v57, %v8537_v11 }
 0x1a2   : > { %v1925_v53 = vpop.f32.mrf.mxu1  ;;  %v2670_v34 = vpop.f32.mrf.mxu0 }
 0x1a3   : > { %v8692_v22 = vadd.f32 %v6046_v44, %v2016_v26  ;;  %v2014_v35 = vadd.f32 %v1925_v53, %v8549_v52 }
 0x1a4   : > { %v6015_v12 = vpop.f32.mrf.mxu1  ;;  %v6050_v29 = vpop.f32.mrf.mxu0 }
 0x1a5   : > { %v8695_v31 = vadd.f32 %v2657_v6, %v2014_v35  ;;  %v2019_v58 = vadd.f32 %v6015_v12, %v8558_v33 }
 0x1a6   : > { %v1938_v27 = vpop.f32.mrf.mxu1  ;;  %v2673_v40 = vpop.f32.mrf.mxu0 }
 0x1a7   : > { %v8698_v2 = vadd.f32 %v6049_v13, %v2019_v58  ;;  %v2017_v18 = vadd.f32 %v1938_v27, %v8561_v8 }
 0x1a8   : > { %v6016_v11 = vpop.f32.mrf.mxu1  ;;  %v6053_v49 = vpop.f32.mrf.mxu0 }
 0x1a9   : > { %v8701_v54 = vadd.f32 %v2670_v34, %v2017_v18  ;;  %v2020_v30 = vadd.f32 %v6016_v11, %v8577_v51 }
 0x1aa   : > { %v1941_v52 = vpop.f32.mrf.mxu1  ;;  %v2686_v4 = vpop.f32.mrf.mxu0 }
 0x1ab   : > { %v8704_v16 = vadd.f32 %v6050_v29, %v2020_v30  ;;  %v2018_v41 = vadd.f32 %v1941_v52, %v8593_v32 }
 0x1ac   : > { %v6019_v33 = vpop.f32.mrf.mxu1  ;;  %v6054_v60 = vpop.f32.mrf.mxu0 }
 0x1ad   : > { %9253 = vst [vmem:[#allocation17_spill] sm:$0xff] %v8704_v16  ;;  %v8707_v15 = vadd.f32 %v2673_v40, %v2018_v41  ;;  %v2023_v37 = vadd.f32 %v6019_v33, %v8599_v42 }
 0x1ae   : > { %v1954_v8 = vpop.f32.mrf.mxu1  ;;  %v2689_v17 = vpop.f32.mrf.mxu0 }
 0x1af   : > { %9254 = vst [vmem:[#allocation9_spill] sm:$0xff] %v8707_v15  ;;  %v8710_v1 = vadd.f32 %v6053_v49, %v2023_v37  ;;  %v2021_v9 = vadd.f32 %v1954_v8, %v8602_v59 }
 0x1b0   : > { %v6020_v51 = vpop.f32.mrf.mxu1  ;;  %v6057_v36 = vpop.f32.mrf.mxu0 }
 0x1b1   : > { %9255 = vst [vmem:[#allocation16_spill] sm:$0xff] %v8710_v1  ;;  %v8713_v63 = vadd.f32 %v2686_v4, %v2021_v9  ;;  %v2024_v44 = vadd.f32 %v6020_v51, %v8611_v10 }
 0x1b2   : > { %v1957_v32 = vpop.f32.mrf.mxu1  ;;  %v2702_v57 = vpop.f32.mrf.mxu0 }
 0x1b3   : > { %9256 = vst [vmem:[#allocation8_spill] sm:$0xff] %v8713_v63  ;;  %v8716_v0 = vadd.f32 %v6054_v60, %v2024_v44  ;;  %v2022_v6 = vadd.f32 %v1957_v32, %v8618_v25 }
 0x1b4   : > { %v6023_v42 = vpop.f32.mrf.mxu1  ;;  %v6058_v53 = vpop.f32.mrf.mxu0 }
 0x1b5   : > { %9257 = vst [vmem:[#allocation19_spill] sm:$0xff] %v8716_v0  ;;  %v8719_v26 = vadd.f32 %v2689_v17, %v2022_v6  ;;  %v2027_v13 = vadd.f32 %v6023_v42, %v8624_v50 }
 0x1b6   : > { %v1970_v59 = vpop.f32.mrf.mxu1  ;;  %v2705_v12 = vpop.f32.mrf.mxu0 }
 0x1b7   : > { %9258 = vst [vmem:[#allocation20_spill] sm:$0xff] %v8719_v26  ;;  %v8722_v35 = vadd.f32 %v6057_v36, %v2027_v13  ;;  %v2025_v34 = vadd.f32 %v1970_v59, %v8627_v56 }
 0x1b8   : > { %v6024_v10 = vpop.f32.mrf.mxu1  ;;  %v6061_v27 = vpop.f32.mrf.mxu0 }
 0x1b9   : > { %9259 = vst [vmem:[#allocation24_spill] sm:$0xff] %v8722_v35  ;;  %v8725_v58 = vadd.f32 %v2702_v57, %v2025_v34  ;;  %v2028_v29 = vadd.f32 %v6024_v10, %v8631_v24 }
 0x1ba   : > { %v1973_v25 = vpop.f32.mrf.mxu1  ;;  %v2718_v11 = vpop.f32.mrf.mxu0 }
 0x1bb   : > { %9260 = vst [vmem:[#allocation26_spill] sm:$0xff] %v8725_v58  ;;  %v8728_v18 = vadd.f32 %v6058_v53, %v2028_v29  ;;  %v2026_v40 = vadd.f32 %v1973_v25, %v8635_v19 }
 0x1bc   : > { %v6027_v50 = vpop.f32.mrf.mxu1  ;;  %v6062_v52 = vpop.f32.mrf.mxu0 }
 0x1bd   : > { %9261 = vst [vmem:[#allocation28_spill] sm:$0xff] %v8728_v18  ;;  %v8731_v30 = vadd.f32 %v2705_v12, %v2026_v40  ;;  %v2031_v49 = vadd.f32 %v6027_v50, %v8638_v5 }
 0x1be   : > { %v1986_v56 = vpop.f32.mrf.mxu1  ;;  %v2721_v33 = vpop.f32.mrf.mxu0 }
 0x1bf   : > { %9262 = vst [vmem:[#allocation30_spill] sm:$0xff] %v8731_v30  ;;  %v8734_v41 = vadd.f32 %v6061_v27, %v2031_v49  ;;  %v2029_v4 = vadd.f32 %v1986_v56, %v8641_v14 }
 0x1c0   : > { %v6028_v24 = vpop.f32.mrf.mxu1  ;;  %v8740_v8 = vpop.f32.mrf.mxu0 }
 0x1c1   : > { %9263 = vst [vmem:[#allocation11_spill] sm:$0xff] %v8734_v41  ;;  %v8737_v37 = vadd.f32 %v2718_v11, %v2029_v4  ;;  %v2032_v60 = vadd.f32 %v6028_v24, %v8644_v47 }
 0x1c2   : > { %v1989_v19 = vpop.f32.mrf.mxu1  ;;  %v8745_v5 = vpop.f32.mrf.mxu0 }
 0x1c3   : > { %9264 = vst [vmem:[#allocation14_spill] sm:$0xff] %v8737_v37  ;;  %v8742_v9 = vadd.f32 %v6062_v52, %v2032_v60  ;;  %v2030_v17 = vadd.f32 %v1989_v19, %v8647_v3 }
 0x1c4   : > { %v6067_v51 = vpop.f32.mrf.mxu1  ;;  %v8749_v36 = vpop.f32.mrf.mxu0 }
 0x1c5   : > { %9265 = vst [vmem:[#allocation12_spill] sm:$0xff] %v8742_v9  ;;  %v8747_v44 = vadd.f32 %v2721_v33, %v2030_v17 }
 0x1c6   : > { %v3082_v14 = vpop.f32.mrf.mxu1  ;;  %v8751_v32 = vpop.f32.mrf.mxu0 }
 0x1c7   : > { %9266 = vst [vmem:[#allocation15_spill] sm:$0xff] %v8747_v44 }
 0x1c8   : > { %v8753_v6 = vpop.f32.mrf.mxu1  ;;  %v8755_v47 = vpop.f32.mrf.mxu0 }
 0x1ca   : > { %v8757_v57 = vpop.f32.mrf.mxu1  ;;  %v8759_v42 = vpop.f32.mrf.mxu0 }
 0x1cc   : > { %v8761_v13 = vpop.f32.mrf.mxu1  ;;  %v8763_v3 = vpop.f32.mrf.mxu0 }
 0x1ce   : > { %v8765_v53 = vpop.f32.mrf.mxu1  ;;  %v8767_v59 = vpop.f32.mrf.mxu0 }
 0x1d0   : > { %v8769_v34 = vpop.f32.mrf.mxu1  ;;  %v8771_v12 = vpop.f32.mrf.mxu0 }
 0x1d2   : > { %v8773_v10 = vpop.f32.mrf.mxu1  ;;  %v8775_v29 = vpop.f32.mrf.mxu0 }
 0x1d4   : > { %v8777_v27 = vpop.f32.mrf.mxu1  ;;  %v8779_v25 = vpop.f32.mrf.mxu0 }
 0x1d6   : > { %v8781_v40 = vpop.f32.mrf.mxu1  ;;  %v8783_v11 = vpop.f32.mrf.mxu0 }
 0x1d8   : > { %v8785_v50 = vpop.f32.mrf.mxu1  ;;  %v8787_v49 = vpop.f32.mrf.mxu0 }
 0x1da   : > { %v8789_v52 = vpop.f32.mrf.mxu1  ;;  %v8791_v56 = vpop.f32.mrf.mxu0 }
 0x1dc   : > { %v8793_v4 = vpop.f32.mrf.mxu1  ;;  %v8795_v33 = vpop.f32.mrf.mxu0 }
 0x1de   : > { %v8797_v24 = vpop.f32.mrf.mxu1  ;;  %v8799_v60 = vpop.f32.mrf.mxu0 }
 0x1e0   : > { %v8801_v19 = vpop.f32.mrf.mxu1  ;;  %v8803_v17 = vpop.f32.mrf.mxu0 }
 0x1e2   : > { %v8805_v44 = vpop.f32.mrf.mxu1  ;;  %v8807_v9 = vpop.f32.mrf.mxu0 }
 0x1e3   : > { %9267 = vst [vmem:[#allocation18_spill] sm:$0xff] %v8807_v9 }
 0x1e4   : > { %v8809_v37 = vpop.f32.mrf.mxu1  ;;  %v8811_v41 = vpop.f32.mrf.mxu0 }
 0x1e5   : > { %9268 = vst [vmem:[#allocation10_spill] sm:$0xff] %v8811_v41 }
 0x1e6   : > { %v8813_v30 = vpop.f32.mrf.mxu1  ;;  %v8815_v18 = vpop.f32.mrf.mxu0 }
 0x1e7   : > { %9269 = vst [vmem:[#allocation13_spill] sm:$0xff] %v8815_v18 }
 0x1e8   : > { %v8817_v58 = vpop.f32.mrf.mxu1  ;;  %v8819_v35 = vpop.f32.mrf.mxu0 }
 0x1e9   : > { %9270 = vst [vmem:[#allocation23_spill] sm:$0xff] %v8817_v58  ;;  %9271 = vst [vmem:[#allocation25_spill] sm:$0xff] %v8819_v35 }
 0x1ea   : > { %v8821_v26 = vpop.f32.mrf.mxu1  ;;  %v8823_v0 = vpop.f32.mrf.mxu0 }
 0x1eb   : > { %9272 = vst [vmem:[#allocation27_spill] sm:$0xff] %v8821_v26  ;;  %9273 = vst [vmem:[#allocation29_spill] sm:$0xff] %v8823_v0 }
 0x1ec   : > { %v8825_v63 = vpop.f32.mrf.mxu1  ;;  %v8827_v1 = vpop.f32.mrf.mxu0 }
 0x1ed   : > { %9274 = vst [vmem:[#allocation31_spill] sm:$0xff] %v8825_v63  ;;  %9275 = vst [vmem:[#allocation32_spill] sm:$0xff] %v8827_v1 }
 0x1ee   : > { %v8829_v15 = vpop.f32.mrf.mxu1  ;;  %v8831_v9 = vpop.f32.mrf.mxu0 }
 0x1ef   : > { %9276 = vst [vmem:[#allocation21_spill] sm:$0xff] %v8829_v15  ;;  %9277 = vst [vmem:[#allocation22_spill] sm:$0xff] %v8831_v9 }
 0x1f0   : > { %v8833_v41 = vpop.f32.mrf.mxu1  ;;  %v8835_v18 = vpop.f32.mrf.mxu0 }
 0x1f1   : > { %9278 = vst [vmem:[#allocation33_spill] sm:$0xff] %v8833_v41  ;;  %9279 = vst [vmem:[#allocation34_spill] sm:$0xff] %v8835_v18 }
 0x1f2   : > { %v8837_v58 = vpop.f32.mrf.mxu1  ;;  %v8839_v35 = vpop.f32.mrf.mxu0 }
 0x1f3   : > { %9280 = vst [vmem:[#allocation35_spill] sm:$0xff] %v8837_v58  ;;  %9281 = vst [vmem:[#allocation36_spill] sm:$0xff] %v8839_v35 }
 0x1f4   : > { %v8841_v26 = vpop.f32.mrf.mxu1  ;;  %v8843_v0 = vpop.f32.mrf.mxu0 }
 0x1f5   : > { %9282 = vst [vmem:[#allocation37_spill] sm:$0xff] %v8841_v26  ;;  %9283 = vst [vmem:[#allocation38_spill] sm:$0xff] %v8843_v0  ;;  %v3211_v0 = vadd.f32 %v6067_v51, %v8650_v21  ;;  %v3210_v21 = vadd.f32 %v8757_v57, %v8659_v61 }
 0x1f6   : > { %v8845_v63 = vpop.f32.mrf.mxu1  ;;  %v8847_v1 = vpop.f32.mrf.mxu0 }
 0x1f7   : > { %9284 = vst [vmem:[#allocation39_spill] sm:$0xff] %v8845_v63  ;;  %9285 = vst [vmem:[#allocation40_spill] sm:$0xff] %v8847_v1  ;;  %v3575_v61 = vadd.f32 %v8751_v32, %v3210_v21 }
 0x1f8   : > { %v8849_v15 = vpop.f32.mrf.mxu1  ;;  %v8851_v9 = vpop.f32.mrf.mxu0 }
 0x1f9   : > { %9286 = vst [vmem:[#allocation41_spill] sm:$0xff] %v8849_v15  ;;  %9287 = vst [vmem:[#allocation42_spill] sm:$0xff] %v8851_v9  ;;  %v3209_v15 = vadd.f32 %v3082_v14, %v8653_v38  ;;  %v8878_v38 = vld [vmem:[#allocation4] ss:$0 sm:$0xff] }
 0x1fa   : > { %v8853_v16 = vpop.f32.mrf.mxu1  ;;  %v8855_v41 = vpop.f32.mrf.mxu0 }
 0x1fb   : > { %9288 = vst [vmem:[#allocation43_spill] sm:$0xff] %v8853_v16  ;;  %9289 = vst [vmem:[#allocation44_spill] sm:$0xff] %v8855_v41  ;;  %v3576_v41 = vadd.f32 %v8740_v8, %v3211_v0  ;;  %v3574_v26 = vadd.f32 %v8745_v5, %v3209_v15  ;;  %v3213_v15 = vadd.f32 %v8765_v53, %v8665_v7 }
 0x1fc   : > { %v8857_v18 = vpop.f32.mrf.mxu1  ;;  %v8859_v58 = vpop.f32.mrf.mxu0 }
 0x1fd   : > { %9290 = vst [vmem:[#allocation45_spill] sm:$0xff] %v8857_v18  ;;  %9291 = vst [vmem:[#allocation46_spill] sm:$0xff] %v8859_v58  ;;  %v3212_v58 = vadd.f32 %v8753_v6, %v8656_v55  ;;  %v3215_v55 = vadd.f32 %v8761_v13, %v8662_v23  ;;  %v3578_v32 = vadd.f32 %v8759_v42, %v3213_v15 }
 0x1fe   : > { %v8861_v35 = vpop.f32.mrf.mxu1  ;;  %v8865_v63 = vpop.f32.mrf.mxu0 }
 0x1ff   : > { %9292 = vst [vmem:[#allocation47_spill] sm:$0xff] %v8861_v35  ;;  %9293 = vst [vmem:[#allocation48_spill] sm:$0xff] %v8865_v63  ;;  %v3580_v7 = vadd.f32 %v8755_v47, %v3215_v55 }
 0x200   : > { %v8867_v1 = vpop.f32.mrf.mxu1  ;;  %v6169_v9 = vpop.f32.mrf.mxu0 }
 0x201   : > { %9294 = vst [vmem:[#allocation49_spill] sm:$0xff] %v8867_v1 }
 0x202   : > { %v8870_v16 = vpop.f32.mrf.mxu1  ;;  %v4655_v18 = vpop.f32.mrf.mxu0 }
 0x203   : > { %9295 = vst [vmem:[#allocation50_spill] sm:$0xff] %v8870_v16  ;;  %v3577_v16 = vadd.f32 %v8749_v36, %v3212_v58  ;;  %v3216_v58 = vadd.f32 %v8769_v34, %v8668_v62 }
 0x204   : > { %v6135_v35 = vpop.f32.mrf.mxu1  ;;  %v6170_v63 = vpop.f32.mrf.mxu0 }
 0x205   : > { %v4308_v51 = vadd.f32 %v6135_v35, %v3576_v41  ;;  %v3581_v42 = vadd.f32 %v8763_v3, %v3216_v58  ;;  %v3217_v58 = vadd.f32 %v8781_v40, %v8677_v46 }
 0x206   : > { %v4179_v14 = vpop.f32.mrf.mxu1  ;;  %v4658_v8 = vpop.f32.mrf.mxu0 }
 0x207   : > { %v4784_v1 = vadd.f32 %v6169_v9, %v4308_v51  ;;  %v4306_v0 = vadd.f32 %v4179_v14, %v3574_v26 }
 0x208   : > { %v6136_v5 = vpop.f32.mrf.mxu1  ;;  %v6173_v57 = vpop.f32.mrf.mxu0 }
 0x209   : > { %v4823_v35 = vadd.f32 %v8878_v38, %v4784_v1  ;;  %v4782_v41 = vadd.f32 %v4655_v18, %v4306_v0  ;;  %v4309_v6 = vadd.f32 %v6136_v5, %v3577_v16  ;;  %v3214_v1 = vadd.f32 %v8773_v10, %v8671_v28 }
 0x20a   : > { %v4182_v26 = vpop.f32.mrf.mxu1  ;;  %v4671_v51 = vpop.f32.mrf.mxu0  ;;  %v3219_v28 = vadd.f32 %v8777_v27, %v8674_v20 }
 0x20b   : > { %v4855_v9 = vmax.f32 %v4823_v35, 0.0  ;;  %v4821_v36 = vadd.f32 %v8878_v38, %v4782_v41  ;;  %v4785_v23 = vadd.f32 %v6170_v63, %v4309_v6  ;;  %v4307_v13 = vadd.f32 %v4182_v26, %v3575_v61 }
 0x20c   : > { %v6139_v62 = vpop.f32.mrf.mxu1  ;;  %v6174_v47 = vpop.f32.mrf.mxu0  ;;  %v3579_v5 = vadd.f32 %v8767_v59, %v3214_v1  ;;  %v3584_v6 = vadd.f32 %v8771_v12, %v3219_v28  ;;  %v3220_v26 = vadd.f32 %v8785_v50, %v8680_v43  ;;  %v3218_v12 = vadd.f32 %v8789_v52, %v8683_v48 }
 0x20d   : > { %v5710_v16 = vpack.c.bf16 %v4855_v9, %v4855_v9  ;;  %v4853_v18 = vmax.f32 %v4821_v36, 0.0  ;;  %v4824_v63 = vadd.f32 %v8878_v38, %v4785_v23  ;;  %v4783_v53 = vadd.f32 %v4658_v8, %v4307_v13 }
 0x20e   : > { %v4312_v34 = vadd.f32 %v6139_v62, %v3580_v7  ;;  %v4195_v10 = vpop.f32.mrf.mxu1  ;;  %v4674_v15 = vpop.f32.mrf.mxu0  ;;  %v3582_v62 = vadd.f32 %v8775_v29, %v3217_v58 }
 0x20f   : > { %5016 = vst.msk [vmem:[%s8897_s11 + $0x8] sm:$0xf] %vm5013_vm8, %v5710_v16  ;;  %v5708_v21 = vpack.c.bf16 %v4853_v18, %v4853_v18  ;;  %v4856_v14 = vmax.f32 %v4824_v63, 0.0  ;;  %v4822_v0 = vadd.f32 %v8878_v38, %v4783_v53  ;;  %v4310_v55 = vadd.f32 %v4195_v10, %v3578_v32 }
 0x210   : > { %v4788_v8 = vadd.f32 %v6173_v57, %v4312_v34  ;;  %v6140_v61 = vpop.f32.mrf.mxu1  ;;  %v6177_v41 = vpop.f32.mrf.mxu0  ;;  %v3585_v16 = vadd.f32 %v8779_v25, %v3220_v26  ;;  %v3223_v18 = vadd.f32 %v8793_v4, %v8686_v45  ;;  %v3583_v34 = vadd.f32 %v8783_v11, %v3218_v12 }
 0x211   : > { %5014 = vst.msk [vmem:[%s8897_s11] sm:$0xf] %vm5013_vm8, %v5708_v21  ;;  %v5711_v3 = vpack.c.bf16 %v4856_v14, %v4856_v14  ;;  %v4854_v35 = vmax.f32 %v4822_v0, 0.0  ;;  %v4786_v20 = vadd.f32 %v4671_v51, %v4310_v55  ;;  %v4313_v27 = vadd.f32 %v6140_v61, %v3581_v42 }
 0x212   : > { %v4827_v59 = vadd.f32 %v8878_v38, %v4788_v8  ;;  %v4198_v57 = vpop.f32.mrf.mxu1  ;;  %v4687_v51 = vpop.f32.mrf.mxu0  ;;  %v3221_v10 = vadd.f32 %v8797_v24, %v8689_v39  ;;  %v3588_v55 = vadd.f32 %v8787_v49, %v3223_v18 }
 0x213   : > { %5017 = vst.msk [vmem:[%s8897_s11 + $0xc] sm:$0xf] %vm5013_vm8, %v5711_v3  ;;  %v5709_v9 = vpack.c.bf16 %v4854_v35, %v4854_v35  ;;  %v4825_v36 = vadd.f32 %v8878_v38, %v4786_v20  ;;  %v4789_v23 = vadd.f32 %v6174_v47, %v4313_v27  ;;  %v4311_v13 = vadd.f32 %v4198_v57, %v3579_v5 }
 0x214   : > { %v4859_v7 = vmax.f32 %v4827_v59, 0.0  ;;  %v6143_v32 = vpop.f32.mrf.mxu1  ;;  %v6178_v1 = vpop.f32.mrf.mxu0  ;;  %v3586_v3 = vadd.f32 %v8791_v56, %v3221_v10  ;;  %v3224_v35 = vadd.f32 %v8801_v19, %v8692_v22  ;;  %v3222_v20 = vadd.f32 %v8805_v44, %v8695_v31 }
 0x215   : > { %5015 = vst.msk [vmem:[%s8897_s11 + $0x4] sm:$0xf] %vm5013_vm8, %v5709_v9  ;;  %v4857_v46 = vmax.f32 %v4825_v36, 0.0  ;;  %v4828_v43 = vadd.f32 %v8878_v38, %v4789_v23  ;;  %v4787_v40 = vadd.f32 %v4674_v15, %v4311_v13  ;;  %v4316_v50 = vadd.f32 %v6143_v32, %v3584_v6 }
 0x216   : > { %v5714_v48 = vpack.c.bf16 %v4859_v7, %v4859_v7  ;;  %v4211_v52 = vpop.f32.mrf.mxu1  ;;  %v4690_v28 = vpop.f32.mrf.mxu0  ;;  %v3227_v56 = vadd.f32 %v8809_v37, %v8698_v2  ;;  %v3589_v23 = vadd.f32 %v8795_v33, %v3224_v35  ;;  %v3587_v13 = vadd.f32 %v8799_v60, %v3222_v20  ;;  %v9305_v35 = vld [vmem:[#allocation21_spill] sm:$0xff] }
 0x217   : > { %v5712_v63 = vpack.c.bf16 %v4857_v46, %v4857_v46  ;;  %v4860_v53 = vmax.f32 %v4828_v43, 0.0  ;;  %v4826_v47 = vadd.f32 %v8878_v38, %v4787_v40  ;;  %v4792_v42 = vadd.f32 %v6177_v41, %v4316_v50  ;;  %v9296_v50 = vld [vmem:[#allocation17_spill] sm:$0xff] }
 0x218   : > { %5020 = vst.msk [vmem:[%s8897_s11 + $0x18] sm:$0xf] %vm5013_vm8, %v5714_v48  ;;  %v4314_v29 = vadd.f32 %v4211_v52, %v3582_v62  ;;  %v6144_v25 = vpop.f32.mrf.mxu1  ;;  %v3592_v40 = vadd.f32 %v8803_v17, %v3227_v56  ;;  %v9298_v52 = vld [vmem:[#allocation18_spill] sm:$0xff]  ;;  %v9306_v56 = vld [vmem:[#allocation13_spill] sm:$0xff] }
 0x219   : > { %5018 = vst.msk [vmem:[%s8897_s11 + $0x10] sm:$0xf] %vm5013_vm8, %v5712_v63  ;;  %v5715_v45 = vpack.c.bf16 %v4860_v53, %v4860_v53  ;;  %v4858_v4 = vmax.f32 %v4826_v47, 0.0  ;;  %v4831_v21 = vadd.f32 %v8878_v38, %v4792_v42  ;;  %v4317_v14 = vadd.f32 %v6144_v25, %v3585_v16  ;;  %v6181_v0 = vpop.f32.mrf.mxu0 }
 0x21a   : > { %v4790_v15 = vadd.f32 %v4687_v51, %v4314_v29  ;;  %v4214_v11 = vpop.f32.mrf.mxu1  ;;  %v3225_v51 = vadd.f32 %v8813_v30, %v8701_v54  ;;  %v9299_v29 = vld [vmem:[#allocation10_spill] sm:$0xff] }
 0x21b   : > { %5021 = vst.msk [vmem:[%s8897_s11 + $0x1c] sm:$0xf] %vm5013_vm8, %v5715_v45  ;;  %v5713_v39 = vpack.c.bf16 %v4858_v4, %v4858_v4  ;;  %v4863_v24 = vmax.f32 %v4831_v21, 0.0  ;;  %v4793_v5 = vadd.f32 %v6178_v1, %v4317_v14  ;;  %v4315_v8 = vadd.f32 %v4214_v11, %v3583_v34  ;;  %v4703_v61 = vpop.f32.mrf.mxu0  ;;  %v9297_v1 = vld [vmem:[#allocation23_spill] sm:$0xff]  ;;  %v9300_v45 = vld [vmem:[#allocation9_spill] sm:$0xff]  ;;  %v9302_v14 = vld [vmem:[#allocation16_spill] sm:$0xff] }
 0x21c   : > { %v4829_v49 = vadd.f32 %v8878_v38, %v4790_v15  ;;  %v6147_v27 = vpop.f32.mrf.mxu1  ;;  %v3228_v62 = vadd.f32 %v9297_v1, %v9296_v50  ;;  %v3590_v63 = vadd.f32 %v9298_v52, %v3225_v51  ;;  %v9301_v4 = vld [vmem:[#allocation27_spill] sm:$0xff] }
 0x21d   : > { %5019 = vst.msk [vmem:[%s8897_s11 + $0x14] sm:$0xf] %vm5013_vm8, %v5713_v39  ;;  %v5718_v41 = vpack.c.bf16 %v4863_v24, %v4863_v24  ;;  %v4832_v6 = vadd.f32 %v8878_v38, %v4793_v5  ;;  %v4791_v58 = vadd.f32 %v4690_v28, %v4315_v8  ;;  %v4320_v26 = vadd.f32 %v6147_v27, %v3588_v55  ;;  %v6182_v59 = vpop.f32.mrf.mxu0 }
 0x21e   : > { %v4861_v57 = vmax.f32 %v4829_v49, 0.0  ;;  %v4227_v9 = vpop.f32.mrf.mxu1  ;;  %v3593_v25 = vadd.f32 %v9299_v29, %v3228_v62  ;;  %v3226_v21 = vadd.f32 %v9301_v4, %v9300_v45  ;;  %v9316_v29 = vld [vmem:[#allocation37_spill] sm:$0xff]  ;;  %v9317_v45 = vld [vmem:[#allocation26_spill] sm:$0xff]  ;;  %v9318_v4 = vld [vmem:[#allocation39_spill] sm:$0xff] }
 0x21f   : > { %5024 = vst.msk [vmem:[%s8897_s11 + $0x28] sm:$0xf] %vm5013_vm8, %v5718_v41  ;;  %v4864_v22 = vmax.f32 %v4832_v6, 0.0  ;;  %v4830_v31 = vadd.f32 %v8878_v38, %v4791_v58  ;;  %v4796_v44 = vadd.f32 %v6181_v0, %v4320_v26  ;;  %v4318_v19 = vadd.f32 %v4227_v9, %v3586_v3  ;;  %v4706_v36 = vpop.f32.mrf.mxu0  ;;  %v9303_v0 = vld [vmem:[#allocation31_spill] sm:$0xff]  ;;  %v9304_v3 = vld [vmem:[#allocation8_spill] sm:$0xff]  ;;  %v9307_v9 = vld [vmem:[#allocation25_spill] sm:$0xff] }
 0x220   : > { %v5716_v2 = vpack.c.bf16 %v4861_v57, %v4861_v57  ;;  %v6148_v37 = vpop.f32.mrf.mxu1  ;;  %v3231_v55 = vadd.f32 %v9303_v0, %v9302_v14  ;;  %v3229_v20 = vadd.f32 %v9305_v35, %v9304_v3  ;;  %v3591_v57 = vadd.f32 %v9306_v56, %v3226_v21 }
 0x221   : > { %v5719_v12 = vpack.c.bf16 %v4864_v22, %v4864_v22  ;;  %v4862_v7 = vmax.f32 %v4830_v31, 0.0  ;;  %v4835_v32 = vadd.f32 %v8878_v38, %v4796_v44  ;;  %v4794_v46 = vadd.f32 %v4703_v61, %v4318_v19  ;;  %v6185_v43 = vpop.f32.mrf.mxu0  ;;  %v9308_v31 = vld [vmem:[#allocation19_spill] sm:$0xff]  ;;  %v9309_v44 = vld [vmem:[#allocation33_spill] sm:$0xff] }
 0x222   : > { %5022 = vst.msk [vmem:[%s8897_s11 + $0x20] sm:$0xf] %vm5013_vm8, %v5716_v2  ;;  %v4321_v33 = vadd.f32 %v6148_v37, %v3589_v23  ;;  %v4230_v60 = vpop.f32.mrf.mxu1  ;;  %v3596_v22 = vadd.f32 %v9307_v9, %v3231_v55  ;;  %v3232_v19 = vadd.f32 %v9309_v44, %v9308_v31  ;;  %v3233_v21 = vadd.f32 %v9318_v4, %v9317_v45  ;;  %v9324_v9 = vld [vmem:[#allocation43_spill] sm:$0xff] }
 0x223   : > { %5025 = vst.msk [vmem:[%s8897_s11 + $0x2c] sm:$0xf] %vm5013_vm8, %v5719_v12  ;;  %v5717_v54 = vpack.c.bf16 %v4862_v7, %v4862_v7  ;;  %v4867_v30 = vmax.f32 %v4835_v32, 0.0  ;;  %v4833_v16 = vadd.f32 %v8878_v38, %v4794_v46  ;;  %v4319_v18 = vadd.f32 %v4230_v60, %v3587_v13  ;;  %v4719_v48 = vpop.f32.mrf.mxu0  ;;  %v9310_v7 = vld [vmem:[#allocation29_spill] sm:$0xff]  ;;  %v9311_v46 = vld [vmem:[#allocation20_spill] sm:$0xff] }
 0x224   : > { %v4797_v53 = vadd.f32 %v6182_v59, %v4321_v33  ;;  %v6151_v17 = vpop.f32.mrf.mxu1  ;;  %v3594_v32 = vadd.f32 %v9310_v7, %v3229_v20  ;;  %v9327_v7 = vld [vmem:[#allocation45_spill] sm:$0xff] }
 0x225   : > { %5023 = vst.msk [vmem:[%s8897_s11 + $0x24] sm:$0xf] %vm5013_vm8, %v5717_v54  ;;  %v5722_v47 = vpack.c.bf16 %v4867_v30, %v4867_v30  ;;  %v4865_v42 = vmax.f32 %v4833_v16, 0.0  ;;  %v4795_v28 = vadd.f32 %v4706_v36, %v4319_v18  ;;  %v4324_v34 = vadd.f32 %v6151_v17, %v3592_v40  ;;  %v6186_v10 = vpop.f32.mrf.mxu0  ;;  %v9313_v16 = vld [vmem:[#allocation32_spill] sm:$0xff] }
 0x226   : > { %v4836_v15 = vadd.f32 %v8878_v38, %v4797_v53  ;;  %v4243_v11 = vpop.f32.mrf.mxu1  ;;  %v3597_v18 = vadd.f32 %v9313_v16, %v3232_v19 }
 0x227   : > { %5028 = vst.msk [vmem:[%s8897_s11 + $0x38] sm:$0xf] %vm5013_vm8, %v5722_v47  ;;  %v5720_v39 = vpack.c.bf16 %v4865_v42, %v4865_v42  ;;  %v4834_v24 = vadd.f32 %v8878_v38, %v4795_v28  ;;  %v4800_v5 = vadd.f32 %v6185_v43, %v4324_v34  ;;  %v4322_v8 = vadd.f32 %v4243_v11, %v3590_v63  ;;  %v4722_v61 = vpop.f32.mrf.mxu0  ;;  %v9312_v43 = vld [vmem:[#allocation35_spill] sm:$0xff]  ;;  %v9314_v28 = vld [vmem:[#allocation22_spill] sm:$0xff] }
 0x228   : > { %v4868_v49 = vmax.f32 %v4836_v15, 0.0  ;;  %v6152_v27 = vpop.f32.mrf.mxu1  ;;  %v3230_v40 = vadd.f32 %v9312_v43, %v9311_v46 }
 0x229   : > { %5026 = vst.msk [vmem:[%s8897_s11 + $0x30] sm:$0xf] %vm5013_vm8, %v5720_v39  ;;  %v4866_v41 = vmax.f32 %v4834_v24, 0.0  ;;  %v4839_v6 = vadd.f32 %v8878_v38, %v4800_v5  ;;  %v4798_v58 = vadd.f32 %v4719_v48, %v4322_v8  ;;  %v4325_v26 = vadd.f32 %v6152_v27, %v3593_v25  ;;  %v6189_v59 = vpop.f32.mrf.mxu0  ;;  %v9319_v5 = vld [vmem:[#allocation28_spill] sm:$0xff]  ;;  %v9320_v8 = vld [vmem:[#allocation41_spill] sm:$0xff] }
 0x22a   : > { %v5723_v36 = vpack.c.bf16 %v4868_v49, %v4868_v49  ;;  %v4246_v23 = vpop.f32.mrf.mxu1  ;;  %v3595_v34 = vadd.f32 %v9314_v28, %v3230_v40  ;;  %v9331_v28 = vld [vmem:[#allocation47_spill] sm:$0xff] }
 0x22b   : > { %v5721_v13 = vpack.c.bf16 %v4866_v41, %v4866_v41  ;;  %v4871_v51 = vmax.f32 %v4839_v6, 0.0  ;;  %v4837_v2 = vadd.f32 %v8878_v38, %v4798_v58  ;;  %v4801_v37 = vadd.f32 %v6186_v10, %v4325_v26  ;;  %v4735_v12 = vpop.f32.mrf.mxu0  ;;  %v9315_v10 = vld [vmem:[#allocation24_spill] sm:$0xff]  ;;  %v9321_v58 = vld [vmem:[#allocation34_spill] sm:$0xff] }
 0x22c   : > { %5029 = vst.msk [vmem:[%s8897_s11 + $0x3c] sm:$0xf] %vm5013_vm8, %v5723_v36  ;;  %v4323_v50 = vadd.f32 %v4246_v23, %v3591_v57  ;;  %v6155_v1 = vpop.f32.mrf.mxu1  ;;  %v3235_v25 = vadd.f32 %v9316_v29, %v9315_v10  ;;  %v9323_v57 = vld [vmem:[#allocation30_spill] sm:$0xff]  ;;  %v9332_v10 = vld [vmem:[#allocation12_spill] sm:$0xff]  ;;  %v9333_v29 = vld [vmem:[#allocation49_spill] sm:$0xff] }
 0x22d   : > { %5027 = vst.msk [vmem:[%s8897_s11 + $0x34] sm:$0xf] %vm5013_vm8, %v5721_v13  ;;  %v5726_v62 = vpack.c.bf16 %v4871_v51, %v4871_v51  ;;  %v4869_v33 = vmax.f32 %v4837_v2, 0.0  ;;  %v4840_v60 = vadd.f32 %v8878_v38, %v4801_v37  ;;  %v4328_v54 = vadd.f32 %v6155_v1, %v3596_v22  ;;  %v6190_v30 = vpop.f32.mrf.mxu0  ;;  %v9325_v2 = vld [vmem:[#allocation38_spill] sm:$0xff] }
 0x22e   : > { %v4799_v48 = vadd.f32 %v4722_v61, %v4323_v50  ;;  %v4259_v52 = vpop.f32.mrf.mxu1  ;;  %v3236_v61 = vadd.f32 %v9320_v8, %v9319_v5  ;;  %v3600_v26 = vadd.f32 %v9321_v58, %v3235_v25  ;;  %v3234_v22 = vadd.f32 %v9324_v9, %v9323_v57 }
 0x22f   : > { %5032 = vst.msk [vmem:[%s8897_s11 + $0x48] sm:$0xf] %vm5013_vm8, %v5726_v62  ;;  %v5724_v63 = vpack.c.bf16 %v4869_v33, %v4869_v33  ;;  %v4872_v53 = vmax.f32 %v4840_v60, 0.0  ;;  %v4804_v17 = vadd.f32 %v6189_v59, %v4328_v54  ;;  %v4326_v47 = vadd.f32 %v4259_v52, %v3594_v32  ;;  %v4738_v42 = vpop.f32.mrf.mxu0  ;;  %v9322_v59 = vld [vmem:[#allocation36_spill] sm:$0xff] }
 0x230   : > { %v4838_v14 = vadd.f32 %v8878_v38, %v4799_v48  ;;  %v6156_v0 = vpop.f32.mrf.mxu1  ;;  %v3598_v56 = vadd.f32 %v9322_v59, %v3233_v21  ;;  %v3601_v37 = vadd.f32 %v9325_v2, %v3236_v61  ;;  %v9328_v60 = vld [vmem:[#allocation40_spill] sm:$0xff]  ;;  %v3240_v25 = vadd.f32 %v9333_v29, %v9332_v10 }
 0x231   : > { %5030 = vst.msk [vmem:[%s8897_s11 + $0x40] sm:$0xf] %vm5013_vm8, %v5724_v63  ;;  %v5727_v55 = vpack.c.bf16 %v4872_v53, %v4872_v53  ;;  %v4843_v15 = vadd.f32 %v8878_v38, %v4804_v17  ;;  %v4802_v11 = vadd.f32 %v4735_v12, %v4326_v47  ;;  %v4329_v39 = vadd.f32 %v6156_v0, %v3597_v18  ;;  %v6193_v24 = vpop.f32.mrf.mxu0  ;;  %v9326_v12 = vld [vmem:[#allocation11_spill] sm:$0xff]  ;;  %v9329_v17 = vld [vmem:[#allocation42_spill] sm:$0xff] }
 0x232   : > { %v4870_v3 = vmax.f32 %v4838_v14, 0.0  ;;  %v4262_v35 = vpop.f32.mrf.mxu1  ;;  %v3239_v32 = vadd.f32 %v9327_v7, %v9326_v12  ;;  %v3599_v54 = vadd.f32 %v9328_v60, %v3234_v22  ;;  %v9338_v22 = vld [vmem:[#allocation48_spill] sm:$0xff] }
 0x233   : > { %5033 = vst.msk [vmem:[%s8897_s11 + $0x4c] sm:$0xf] %vm5013_vm8, %v5727_v55  ;;  %v4875_v20 = vmax.f32 %v4843_v15, 0.0  ;;  %v4841_v49 = vadd.f32 %v8878_v38, %v4802_v11  ;;  %v4805_v27 = vadd.f32 %v6190_v30, %v4329_v39  ;;  %v4327_v41 = vadd.f32 %v4262_v35, %v3595_v34  ;;  %v4751_v6 = vpop.f32.mrf.mxu0  ;;  %v9334_v15 = vld [vmem:[#allocation15_spill] sm:$0xff]  ;;  %v9335_v11 = vld [vmem:[#allocation50_spill] sm:$0xff] }
 0x234   : > { %v5725_v31 = vpack.c.bf16 %v4870_v3, %v4870_v3  ;;  %v6159_v44 = vpop.f32.mrf.mxu1  ;;  %v3604_v47 = vadd.f32 %v9329_v17, %v3239_v32  ;;  %v3238_v39 = vadd.f32 %v9335_v11, %v9334_v15 }
 0x235   : > { %v5730_v19 = vpack.c.bf16 %v4875_v20, %v4875_v20  ;;  %v4873_v36 = vmax.f32 %v4841_v49, 0.0  ;;  %v4844_v23 = vadd.f32 %v8878_v38, %v4805_v27  ;;  %v4803_v13 = vadd.f32 %v4738_v42, %v4327_v41  ;;  %v6194_v51 = vpop.f32.mrf.mxu0  ;;  %v9330_v42 = vld [vmem:[#allocation14_spill] sm:$0xff]  ;;  %v9336_v49 = vld [vmem:[#allocation44_spill] sm:$0xff] }
 0x236   : > { %5031 = vst.msk [vmem:[%s8897_s11 + $0x44] sm:$0xf] %vm5013_vm8, %v5725_v31  ;;  %v4332_v46 = vadd.f32 %v6159_v44, %v3600_v26  ;;  %v4275_v43 = vpop.f32.mrf.mxu1  ;;  %v3237_v34 = vadd.f32 %v9331_v28, %v9330_v42  ;;  %v9337_v41 = vld [vmem:[#allocation46_spill] sm:$0xff]  ;;  %v3603_v31 = vadd.f32 %v9338_v22, %v3238_v39 }
 0x237   : > { %5036 = vst.msk [vmem:[%s8897_s11 + $0x58] sm:$0xf] %vm5013_vm8, %v5730_v19  ;;  %v5728_v40 = vpack.c.bf16 %v4873_v36, %v4873_v36  ;;  %v4876_v50 = vmax.f32 %v4844_v23, 0.0  ;;  %v4842_v1 = vadd.f32 %v8878_v38, %v4803_v13  ;;  %v4330_v62 = vadd.f32 %v4275_v43, %v3598_v56  ;;  %v4754_v33 = vpop.f32.mrf.mxu0 }
 0x238   : > { %v4808_v30 = vadd.f32 %v6193_v24, %v4332_v46  ;;  %v6160_v16 = vpop.f32.mrf.mxu1  ;;  %v3602_v27 = vadd.f32 %v9336_v49, %v3237_v34 }
 0x239   : > { %5034 = vst.msk [vmem:[%s8897_s11 + $0x50] sm:$0xf] %vm5013_vm8, %v5728_v40  ;;  %v5731_v18 = vpack.c.bf16 %v4876_v50, %v4876_v50  ;;  %v4874_v48 = vmax.f32 %v4842_v1, 0.0  ;;  %v4806_v52 = vadd.f32 %v4751_v6, %v4330_v62  ;;  %v4333_v63 = vadd.f32 %v6160_v16, %v3601_v37  ;;  %v6197_v53 = vpop.f32.mrf.mxu0 }
 0x23a   : > { %v4847_v45 = vadd.f32 %v8878_v38, %v4808_v30  ;;  %v4278_v4 = vpop.f32.mrf.mxu1  ;;  %v3605_v6 = vadd.f32 %v9337_v41, %v3240_v25 }
 0x23b   : > { %5037 = vst.msk [vmem:[%s8897_s11 + $0x5c] sm:$0xf] %vm5013_vm8, %v5731_v18  ;;  %v5729_v21 = vpack.c.bf16 %v4874_v48, %v4874_v48  ;;  %v4845_v14 = vadd.f32 %v8878_v38, %v4806_v52  ;;  %v4809_v0 = vadd.f32 %v6194_v51, %v4333_v63  ;;  %v4331_v55 = vadd.f32 %v4278_v4, %v3599_v54  ;;  %v4767_v8 = vpop.f32.mrf.mxu0 }
 0x23c   : > { %v4879_v24 = vmax.f32 %v4847_v45, 0.0  ;;  %v6163_v5 = vpop.f32.mrf.mxu1 }
 0x23d   : > { %5035 = vst.msk [vmem:[%s8897_s11 + $0x54] sm:$0xf] %vm5013_vm8, %v5729_v21  ;;  %v4877_v61 = vmax.f32 %v4845_v14, 0.0  ;;  %v4848_v3 = vadd.f32 %v8878_v38, %v4809_v0  ;;  %v4807_v35 = vadd.f32 %v4754_v33, %v4331_v55  ;;  %v4336_v20 = vadd.f32 %v6163_v5, %v3604_v47  ;;  %v6198_v36 = vpop.f32.mrf.mxu0 }
 0x23e   : > { %v5734_v58 = vpack.c.bf16 %v4879_v24, %v4879_v24  ;;  %v4291_v26 = vpop.f32.mrf.mxu1 }
 0x23f   : > { %v5732_v59 = vpack.c.bf16 %v4877_v61, %v4877_v61  ;;  %v4880_v56 = vmax.f32 %v4848_v3, 0.0  ;;  %v4846_v57 = vadd.f32 %v8878_v38, %v4807_v35  ;;  %v4812_v9 = vadd.f32 %v6197_v53, %v4336_v20  ;;  %v4770_v50 = vpop.f32.mrf.mxu0 }
 0x240   : > { %5040 = vst.msk [vmem:[%s8897_s11 + $0x68] sm:$0xf] %vm5013_vm8, %v5734_v58  ;;  %v4334_v44 = vadd.f32 %v4291_v26, %v3602_v27  ;;  %v6164_v19 = vpop.f32.mrf.mxu1 }
 0x241   : > { %5038 = vst.msk [vmem:[%s8897_s11 + $0x60] sm:$0xf] %vm5013_vm8, %v5732_v59  ;;  %v5735_v23 = vpack.c.bf16 %v4880_v56, %v4880_v56  ;;  %v4878_v13 = vmax.f32 %v4846_v57, 0.0  ;;  %v4851_v51 = vadd.f32 %v8878_v38, %v4812_v9  ;;  %v4337_v2 = vadd.f32 %v6164_v19, %v3605_v6 }
 0x242   : > { %v4810_v37 = vadd.f32 %v4767_v8, %v4334_v44  ;;  %v4294_v12 = vpop.f32.mrf.mxu1 }
 0x243   : > { %5041 = vst.msk [vmem:[%s8897_s11 + $0x6c] sm:$0xf] %vm5013_vm8, %v5735_v23  ;;  %v5733_v7 = vpack.c.bf16 %v4878_v13, %v4878_v13  ;;  %v4883_v32 = vmax.f32 %v4851_v51, 0.0  ;;  %v4813_v46 = vadd.f32 %v6198_v36, %v4337_v2  ;;  %v4335_v43 = vadd.f32 %v4294_v12, %v3603_v31 }
 0x244   : > { %v4849_v40 = vadd.f32 %v8878_v38, %v4810_v37 }
 0x245   : > { %5039 = vst.msk [vmem:[%s8897_s11 + $0x64] sm:$0xf] %vm5013_vm8, %v5733_v7  ;;  %v5738_v1 = vpack.c.bf16 %v4883_v32, %v4883_v32  ;;  %v4852_v62 = vadd.f32 %v8878_v38, %v4813_v46  ;;  %v4811_v33 = vadd.f32 %v4770_v50, %v4335_v43 }
 0x246   : > { %v4881_v60 = vmax.f32 %v4849_v40, 0.0 }
 0x247   : > { %5044 = vst.msk [vmem:[%s8897_s11 + $0x78] sm:$0xf] %vm5013_vm8, %v5738_v1  ;;  %v4884_v54 = vmax.f32 %v4852_v62, 0.0  ;;  %v4850_v30 = vadd.f32 %v8878_v38, %v4811_v33 }
 0x248   : > { %v5736_v16 = vpack.c.bf16 %v4881_v60, %v4881_v60 }
 0x249   : > { %v5739_v18 = vpack.c.bf16 %v4884_v54, %v4884_v54  ;;  %v4882_v48 = vmax.f32 %v4850_v30, 0.0 }
 0x24a   : > { %5042 = vst.msk [vmem:[%s8897_s11 + $0x70] sm:$0xf] %vm5013_vm8, %v5736_v16 }
 0x24b   : > { %5045 = vst.msk [vmem:[%s8897_s11 + $0x7c] sm:$0xf] %vm5013_vm8, %v5739_v18  ;;  %v5737_v52 = vpack.c.bf16 %v4882_v48, %v4882_v48 }
 0x24d   : > { %5043 = vst.msk [vmem:[%s8897_s11 + $0x74] sm:$0xf] %vm5013_vm8, %v5737_v52 }
 0x24e PF: > { %s15_s12 = sadd.s32 1, %s6367_s12  }
 0x24f   : > { %p12_p3 = scmp.ge.s32.totalorder %s15_s12, 4  }
 0x251   :  { %14 = sbr.rel (!%p12_p3) target bundleno = 2 (0x2), region = 81 }
 0x256   :  { %5068 = vsyncpa [#allocation3], 1 }
 0x257   :  { %5070 = vsyncpa [#allocation3 + $0x1], 1 }
 0x258   :  { %5071 = vsyncpa [#allocation5], 1 }

// kernel: net_forward.5
= control target key start
LH: loop header
LB: loop body
LE: loop exit
PB: predicated region body
PF: predicated region fallthrough
CT: control target
= control target key end

     0   :  { %s4172_s12 = smov 0   ;;  %s5154_s0 = inlined_call_operand.vmem [shape: bf16[2,10,10,256], index: 0, kind: input, shape index: {}]   ;;  %s5155_s1 = inlined_call_operand.vmem [shape: bf16[9,256,128], index: 1, kind: input, shape index: {}]   ;;  %s5156_s2 = inlined_call_operand.vmem [shape: f32[1,128], index: 2, kind: input, shape index: {}]   ;;  %s5157_s3 = inlined_call_operand.vmem [shape: bf16[128,128], index: 3, kind: output, shape index: {}]  }
   0x1 LB: > { %s4178_s13 = sadd.s32 4294967295, %s4150_s12   ;;  %p2985_p0 = scmp.ge.s32.totalorder %s4150_s12, 1  ;;  %s4150_s12 = sphi %s4172_s12, %s13_s12  }
   0x2   : > { %p137_p1 = scmp.lt.s32.totalorder %s4150_s12, 3 }
   0x4   : > { %p138_p2 = pnand %p2985_p0, %p137_p1 }
   0x6   : > { %141 = sbr.rel (%p138_p2) target bundleno = 398 (0x18e), region = 32 }
   0xb   : > { %v3976_v0 = vld [vmem:[%s5155_s1 + $0xf8] sm:$0xff]   ;;  %v3980_v4 = vld [vmem:[%s5155_s1 + $0xf0] sm:$0xff]   ;;  %v3984_v8 = vld [vmem:[%s5155_s1 + $0xe8] sm:$0xff]   ;;  %p161_p3 = scmp.lt.s32.totalorder %s4178_s13, 1  ;;  %vm221_vm0 = vsmask.f32 3328 }
   0xc   : > { %v3977_v1 = vld [vmem:[%s5155_s1 + $0x78] sm:$0xff]   ;;  %3591 = vmatprep.subr.bf16.mxu0 %v3976_v0  ;;  %v3981_v5 = vld [vmem:[%s5155_s1 + $0x70] sm:$0xff]   ;;  %v3985_v9 = vld [vmem:[%s5155_s1 + $0x68] sm:$0xff]   ;;  %vm222_vm1 = vsmask.f32 7440  ;;  %vm787_vm3 = vcmask 1042432  }
   0xd   : > { %v3978_v2 = vld [vmem:[%s5155_s1 + $0xb8] sm:$0xff]   ;;  %3631 = vmatprep.subr.bf16.mxu1 %v3977_v1  ;;  %v3982_v6 = vld [vmem:[%s5155_s1 + $0xb0] sm:$0xff]   ;;  %v3986_v10 = vld [vmem:[%s5155_s1 + $0xa8] sm:$0xff]   ;;  %s162_s6 = scalar_select %p161_p3, %s4178_s13, 1  ;;  %vm788_vm4 = vcmask 1046532  }
   0xe   : > { %v3979_v3 = vld [vmem:[%s5155_s1 + $0x38] sm:$0xff]   ;;  %3592 = vmatpush3.bf16.msra.mxu0 %v3978_v2  ;;  %v3983_v7 = vld [vmem:[%s5155_s1 + $0x30] sm:$0xff]   ;;  %v3987_v11 = vld [vmem:[%s5155_s1 + $0x28] sm:$0xff]  }
   0xf   : > { %3632 = vmatpush3.bf16.msra.mxu1 %v3979_v3  ;;  %3593 = vmatprep.subr.bf16.mxu0 %v3980_v4  ;;  %v3988_v12 = vld [vmem:[%s5155_s1 + $0xe0] sm:$0xff]   ;;  %v3992_v16 = vld [vmem:[%s5155_s1 + $0xd8] sm:$0xff]   ;;  %v3996_v20 = vld [vmem:[%s5155_s1 + $0xd0] sm:$0xff]   ;;  %s3967_s17 = smul.u32 160, %s162_s6 }
  0x10   : > { %3633 = vmatprep.subr.bf16.mxu1 %v3981_v5  ;;  %v3989_v13 = vld [vmem:[%s5155_s1 + $0x60] sm:$0xff]   ;;  %v3993_v17 = vld [vmem:[%s5155_s1 + $0x58] sm:$0xff]   ;;  %v3997_v21 = vld [vmem:[%s5155_s1 + $0x50] sm:$0xff]  }
  0x11   : > { %v3990_v14 = vld [vmem:[%s5155_s1 + $0xa0] sm:$0xff]   ;;  %v3994_v18 = vld [vmem:[%s5155_s1 + $0x98] sm:$0xff]   ;;  %v3998_v22 = vld [vmem:[%s5155_s1 + $0x90] sm:$0xff]   ;;  %s4277_s28 = scalar_lea.vmem %s5154_s0, %s3967_s17 }
  0x12   : > { %3594 = vmatpush3.bf16.msra.mxu0 %v3982_v6  ;;  %v3991_v15 = vld [vmem:[%s5155_s1 + $0x20] sm:$0xff]   ;;  %v3995_v19 = vld [vmem:[%s5155_s1 + $0x18] sm:$0xff]   ;;  %v3999_v23 = vld [vmem:[%s5155_s1 + $0x10] sm:$0xff]  }
  0x13   : > { %3634 = vmatpush3.bf16.msra.mxu1 %v3983_v7  ;;  %3595 = vmatprep.subr.bf16.mxu0 %v3984_v8  ;;  %v4000_v24 = vld [vmem:[%s5155_s1 + $0xc8] sm:$0xff]   ;;  %v4004_v28 = vld [vmem:[%s5155_s1 + $0xc0] sm:$0xff]   ;;  %v4287_v33 = vld [vmem:[%s4277_s28 + $0x10] sm:$0xff] }
  0x14   : > { %3635 = vmatprep.subr.bf16.mxu1 %v3985_v9  ;;  %v4001_v25 = vld [vmem:[%s5155_s1 + $0x48] sm:$0xff]   ;;  %v4005_v29 = vld [vmem:[%s5155_s1 + $0x40] sm:$0xff]   ;;  %v4293_v35 = vld [vmem:[%s4277_s28 + $0x18] sm:$0x11]  ;;  %v239_v40 = vshrl.u32 %v4287_v33, 16  ;;  %v242_v41 = vshll.u32 %v4287_v33, 16 }
  0x15   : > { %v4002_v26 = vld [vmem:[%s5155_s1 + $0x88] sm:$0xff]   ;;  %v4006_v30 = vld [vmem:[%s5155_s1 + $0x80] sm:$0xff]   ;;  %v248_v42 = vshll.u32 %v4293_v35, 16  ;;  %v4010_v48 = vld [vmem:[%s5155_s1 + $0x178] sm:$0xff]  }
  0x16   : > { %3596 = vmatpush3.bf16.msra.mxu0 %v3986_v10  ;;  %v4003_v27 = vld [vmem:[%s5155_s1 + $0x8] sm:$0xff]   ;;  %v4007_v31 = vld [vmem:[%s5155_s1] sm:$0xff]   ;;  %v241_v46 = vrot.slane %v239_v40, 4  ;;  %v244_v47 = vrot.slane %v242_v41, 5  ;;  %v4011_v49 = vld [vmem:[%s5155_s1 + $0x1f8] sm:$0xff]  }
  0x17   : > { %3636 = vmatpush3.bf16.msra.mxu1 %v3987_v11  ;;  %3597 = vmatprep.subr.bf16.mxu0 %v3988_v12  ;;  %v173_v32 = vld [vmem:[%s4277_s28] sm:$0xff]  ;;  %v4290_v34 = vld [vmem:[%s4277_s28 + $0x8] sm:$0x11]  ;;  %vm4308_vm2 = vmor %vm221_vm0, %vm222_vm1  ;;  %v250_v54 = vrot.slane %v248_v42, 5 }
  0x18   : > { %3637 = vmatprep.subr.bf16.mxu1 %v3989_v13  ;;  %v225_v36 = vshrl.u32 %v173_v32, 16  ;;  %v228_v37 = vshll.u32 %v173_v32, 16  ;;  %v3046_v38 = vcombine.high %v173_v32, %v4287_v33  ;;  %v234_v39 = vshll.u32 %v4290_v34, 16  ;;  %v4013_v56 = vld [vmem:[%s5155_s1 + $0x1b8] sm:$0xff]   ;;  %v4015_v60 = vld [vmem:[%s5155_s1 + $0x1f0] sm:$0xff]   ;;  %v4335_v2 = vld [vmem:[%s4277_s28 + $0x20] sm:$0xff] }
  0x19   : > { %v3045_v51 = vcombine.low %v173_v32, %v4287_v33  ;;  %v245_v53 = vor.u32 %v244_v47, %v241_v46  ;;  %v4012_v59 = vld [vmem:[%s5155_s1 + $0x138] sm:$0xff]   ;;  %v4014_v62 = vld [vmem:[%s5155_s1 + $0x170] sm:$0xff]   ;;  %v4341_v4 = vld [vmem:[%s4277_s28 + $0x28] sm:$0x11]  ;;  %v253_v6 = vshrl.u32 %v4335_v2, 16  ;;  %v256_v7 = vshll.u32 %v4335_v2, 16 }
  0x1a   : > { %3598 = vmatpush3.bf16.msra.mxu0 %v3990_v14  ;;  %v227_v43 = vrot.slane %v225_v36, 4  ;;  %v230_v44 = vrot.slane %v228_v37, 5  ;;  %730 = vmatprep.mubr.bf16.mxu1 %v3046_v38  ;;  %v236_v45 = vrot.slane %v234_v39, 5  ;;  %v4017_v1 = vld [vmem:[%s5155_s1 + $0x1b0] sm:$0xff]   ;;  %v4344_v5 = vld [vmem:[%s4277_s28 + $0x38] sm:$0x11]  ;;  %vm4481_vm5 = vmor %vm787_vm3, %vm788_vm4 }
  0x1b   : > { %3638 = vmatpush3.bf16.msra.mxu1 %v3991_v15  ;;  %3599 = vmatprep.subr.bf16.mxu0 %v3992_v16  ;;  %v4315_v57 = vrot.slane %v245_v53, 4  ;;  %v4338_v3 = vld [vmem:[%s4277_s28 + $0x30] sm:$0xff]  ;;  %v262_v8 = vshll.u32 %v4341_v4, 16  ;;  %v255_v12 = vrot.slane %v253_v6, 4  ;;  %v276_v13 = vshll.u32 %v4344_v5, 16  ;;  %v4021_v16 = vld [vmem:[%s5155_s1 + $0x1e8] sm:$0xff]  }
  0x1c   : > { %3639 = vmatprep.subr.bf16.mxu1 %v3993_v17  ;;  %v231_v50 = vor.u32 %v230_v44, %v227_v43  ;;  %v267_v9 = vshrl.u32 %v4338_v3, 16  ;;  %v270_v10 = vshll.u32 %v4338_v3, 16  ;;  %v4016_v11 = vld [vmem:[%s5155_s1 + $0x130] sm:$0xff]   ;;  %v3048_v14 = vcombine.high %v4335_v2, %v4338_v3  ;;  %v4026_v36 = vld [vmem:[%s5155_s1 + $0x120] sm:$0xff]   ;;  %v4400_v42 = vld [vmem:[%s4277_s28 + $0x48] sm:$0x11] }
  0x1d   : > { %v251_v61 = vsel %vm4308_vm2, %v4315_v57, %v250_v54  ;;  %v3047_v15 = vcombine.low %v4335_v2, %v4338_v3  ;;  %v258_v17 = vrot.slane %v256_v7, 5  ;;  %v4027_v39 = vld [vmem:[%s5155_s1 + $0x1a0] sm:$0xff]   ;;  %v4397_v41 = vld [vmem:[%s4277_s28 + $0x50] sm:$0xff]  ;;  %v4403_v43 = vld [vmem:[%s4277_s28 + $0x58] sm:$0x11] }
  0x1e   : > { %3600 = vmatpush3.bf16.msra.mxu0 %v3994_v18  ;;  %v232_v55 = vrot.slane %v231_v50, 4  ;;  %v269_v18 = vrot.slane %v267_v9, 4  ;;  %v4394_v40 = vld [vmem:[%s4277_s28 + $0x40] sm:$0xff]  ;;  %v298_v50 = vshll.u32 %v4397_v41, 16  ;;  %v4033_v6 = vld [vmem:[%s5155_s1 + $0x198] sm:$0xff]  }
  0x1f   : > { %3640 = vmatpush3.bf16.msra.mxu1 %v3995_v19  ;;  %3601 = vmatprep.subr.bf16.mxu0 %v3996_v20  ;;  %v272_v19 = vrot.slane %v270_v10, 5  ;;  %v4020_v20 = vld [vmem:[%s5155_s1 + $0x168] sm:$0xff]   ;;  %v281_v44 = vshrl.u32 %v4394_v40, 16  ;;  %v3050_v46 = vcombine.high %v4394_v40, %v4397_v41  ;;  %v3049_v47 = vcombine.low %v4394_v40, %v4397_v41  ;;  %v4035_v10 = vld [vmem:[%s5155_s1 + $0x1d0] sm:$0xff]   ;;  %v4143_v52 = vld [vmem:[%s5155_s1 + $0x400] sm:$0xff]  }
  0x20   : > { %3641 = vmatprep.subr.bf16.mxu1 %v3997_v21  ;;  %v237_v58 = vsel %vm4308_vm2, %v232_v55, %v236_v45  ;;  %v264_v21 = vrot.slane %v262_v8, 5  ;;  %v284_v45 = vshll.u32 %v4394_v40, 16  ;;  %v4030_v55 = vld [vmem:[%s5155_s1 + $0x158] sm:$0xff]   ;;  %v4034_v8 = vld [vmem:[%s5155_s1 + $0x150] sm:$0xff]  }
  0x21   : > { %v3021_v63 = vcombine.low %v237_v58, %v251_v61  ;;  %v3022_v0 = vcombine.high %v237_v58, %v251_v61  ;;  %v283_v53 = vrot.slane %v281_v44, 4 }
  0x22   : > { %3602 = vmatpush3.bf16.msra.mxu0 %v3998_v22  ;;  %v278_v22 = vrot.slane %v276_v13, 5  ;;  %v286_v54 = vrot.slane %v284_v45, 5 }
  0x23   : > { %3642 = vmatpush3.bf16.msra.mxu1 %v3999_v23  ;;  %3603 = vmatprep.subr.bf16.mxu0 %v4000_v24  ;;  %v259_v23 = vor.u32 %v258_v17, %v255_v12  ;;  %v273_v24 = vor.u32 %v272_v19, %v269_v18  ;;  %v4036_v12 = vld [vmem:[%s5155_s1 + $0x110] sm:$0xff]   ;;  %v3174_v18 = vcombine.high %v4287_v33, %v4335_v2  ;;  %v4458_v19 = vld [vmem:[%s4277_s28 + $0x68] sm:$0x11] }
  0x24   : > { %3643 = vmatprep.subr.bf16.mxu1 %v4001_v25  ;;  %529 = vmatprep.mubr.bf16.mxu0 %v3022_v0  ;;  %v4022_v25 = vld [vmem:[%s5155_s1 + $0x128] sm:$0xff]   ;;  %v287_v61 = vor.u32 %v286_v54, %v283_v53  ;;  %v4032_v0 = vld [vmem:[%s5155_s1 + $0x118] sm:$0xff]   ;;  %v4453_v17 = vld [vmem:[%s4277_s28 + $0x70] sm:$0xff] }
  0x25   : > { %v4044_v54 = vld [vmem:[%s5155_s1 + $0x140] sm:$0xff]  }
  0x26   : > { %3604 = vmatpush3.bf16.msra.mxu0 %v4002_v26  ;;  %v4023_v26 = vld [vmem:[%s5155_s1 + $0x1a8] sm:$0xff]  }
  0x27   : > { %3644 = vmatpush3.bf16.msra.mxu1 %v4003_v27  ;;  %3605 = vmatprep.subr.bf16.mxu0 %v4004_v28  ;;  %v4371_v27 = vrot.slane %v259_v23, 4  ;;  %v4373_v28 = vrot.slane %v273_v24, 4 }
  0x28   : > { %3645 = vmatprep.subr.bf16.mxu1 %v4005_v29  ;;  %v4024_v29 = vld [vmem:[%s5155_s1 + $0x160] sm:$0xff]  }
  0x29   : > { %v279_v32 = vsel %vm4308_vm2, %v4373_v28, %v278_v22 }
  0x2a   : > { %3606 = vmatpush3.bf16.msra.mxu0 %v4006_v30  ;;  %v4025_v30 = vld [vmem:[%s5155_s1 + $0x1e0] sm:$0xff]  }
  0x2b   : > { %3646 = vmatpush3.bf16.msra.mxu1 %v4007_v31  ;;  %3671 = vmatprep.subr.bf16.mxu0 %v4010_v48  ;;  %v265_v31 = vsel %vm4308_vm2, %v4371_v27, %v264_v21  ;;  %v290_v48 = vshll.u32 %v4400_v42, 16 }
  0x2c   : > { %3711 = vmatprep.subr.bf16.mxu1 %v4011_v49  ;;  %v3024_v37 = vcombine.high %v265_v31, %v279_v32  ;;  %v3023_v38 = vcombine.low %v265_v31, %v279_v32  ;;  %v295_v49 = vshrl.u32 %v4397_v41, 16 }
  0x2d   : > { %530 = vmatmul.mubr.bf16.vlgmr.msra.gmra.mxu0 %v3021_v63  ;;  %v292_v58 = vrot.slane %v290_v48, 5 }
  0x2e   : > { %731 = vmatmul.mubr.bf16.vlgmr.msra.gmra.mxu1 %v3045_v51  ;;  %3672 = vmatpush3.bf16.msra.mxu0 %v4012_v59  ;;  %v304_v51 = vshll.u32 %v4403_v43, 16  ;;  %v297_v59 = vrot.slane %v295_v49, 4  ;;  %v4042_v49 = vld [vmem:[%s5155_s1 + $0x108] sm:$0xff]  }
  0x2f   : > { %3712 = vmatpush3.bf16.msra.mxu1 %v4013_v56  ;;  %3673 = vmatprep.subr.bf16.mxu0 %v4014_v62  ;;  %v4031_v56 = vld [vmem:[%s5155_s1 + $0x1d8] sm:$0xff]  }
  0x30   : > { %3713 = vmatprep.subr.bf16.mxu1 %v4015_v60  ;;  %738 = vmatprep.mubr.bf16.mxu1 %v3048_v14  ;;  %v300_v60 = vrot.slane %v298_v50, 5  ;;  %v306_v63 = vrot.slane %v304_v51, 5  ;;  %v4043_v51 = vld [vmem:[%s5155_s1 + $0x188] sm:$0xff]  }
  0x31   : > { %537 = vmatprep.mubr.bf16.mxu0 %v3024_v37  ;;  %v4041_v37 = vld [vmem:[%s5155_s1 + $0x1c8] sm:$0xff]  }
  0x32   : > { %3674 = vmatpush3.bf16.msra.mxu0 %v4016_v11  ;;  %v301_v62 = vor.u32 %v300_v60, %v297_v59  ;;  %v796_v59 = vrot.slane %v4293_v35, 5 }
  0x33   : > { %3714 = vmatpush3.bf16.msra.mxu1 %v4017_v1  ;;  %3675 = vmatprep.subr.bf16.mxu0 %v4020_v20  ;;  %v4424_v1 = vrot.slane %v287_v61, 4  ;;  %v4461_v20 = vld [vmem:[%s4277_s28 + $0x78] sm:$0x11] }
  0x34   : > { %3715 = vmatprep.subr.bf16.mxu1 %v4021_v16  ;;  %v4429_v7 = vrot.slane %v301_v62, 4  ;;  %v4450_v16 = vld [vmem:[%s4277_s28 + $0x60] sm:$0xff] }
  0x35   : > { %538 = vmatmul.mubr.bf16.gmra.mxu0 %v3023_v38  ;;  %v293_v9 = vsel %vm4308_vm2, %v4424_v1, %v292_v58  ;;  %v309_v21 = vshrl.u32 %v4450_v16, 16  ;;  %v312_v22 = vshll.u32 %v4450_v16, 16  ;;  %v3052_v23 = vcombine.high %v4450_v16, %v4453_v17  ;;  %v4045_v58 = vld [vmem:[%s5155_s1 + $0x1c0] sm:$0xff]  }
  0x36   : > { %739 = vmatmul.mubr.bf16.gmra.mxu1 %v3047_v15  ;;  %3676 = vmatpush3.bf16.msra.mxu0 %v4022_v25  ;;  %v307_v11 = vsel %vm4308_vm2, %v4429_v7, %v306_v63  ;;  %v4037_v15 = vld [vmem:[%s5155_s1 + $0x190] sm:$0xff]   ;;  %v3051_v24 = vcombine.low %v4450_v16, %v4453_v17  ;;  %v318_v25 = vshll.u32 %v4458_v19, 16  ;;  %v4047_v63 = vld [vmem:[%s5155_s1 + $0x180] sm:$0xff]  }
  0x37   : > { %3716 = vmatpush3.bf16.msra.mxu1 %v4023_v26  ;;  %3677 = vmatprep.subr.bf16.mxu0 %v4024_v29  ;;  %v3026_v13 = vcombine.high %v293_v9, %v307_v11  ;;  %v3025_v14 = vcombine.low %v293_v9, %v307_v11  ;;  %v323_v26 = vshrl.u32 %v4453_v17, 16  ;;  %v326_v29 = vshll.u32 %v4453_v17, 16 }
  0x38   : > { %3717 = vmatprep.subr.bf16.mxu1 %v4025_v30  ;;  %746 = vmatprep.mubr.bf16.mxu1 %v3050_v46  ;;  %v332_v30 = vshll.u32 %v4461_v20, 16  ;;  %v311_v31 = vrot.slane %v309_v21, 4  ;;  %v314_v32 = vrot.slane %v312_v22, 5  ;;  %v320_v38 = vrot.slane %v318_v25, 5  ;;  %v4055_v21 = vld [vmem:[%s5155_s1 + $0x2f0] sm:$0xff]  }
  0x39   : > { %545 = vmatprep.mubr.bf16.mxu0 %v3026_v13  ;;  %v328_v44 = vrot.slane %v326_v29, 5  ;;  %v3173_v9 = vcombine.low %v4287_v33, %v4335_v2  ;;  %v3176_v11 = vcombine.high %v4338_v3, %v4394_v40  ;;  %v4051_v33 = vld [vmem:[%s5155_s1 + $0x2f8] sm:$0xff]   ;;  %v800_v22 = vrot.slane %v4341_v4, 5  ;;  %v4057_v25 = vld [vmem:[%s5155_s1 + $0x2b0] sm:$0xff]  }
  0x3a   : > { %3678 = vmatpush3.bf16.msra.mxu0 %v4026_v36  ;;  %v4040_v36 = vld [vmem:[%s5155_s1 + $0x148] sm:$0xff]   ;;  %v315_v46 = vor.u32 %v314_v32, %v311_v31  ;;  %v334_v48 = vrot.slane %v332_v30, 5  ;;  %v766_v29 = vld [vmem:[%s4277_s28 + $0x30] sm:$0xee]  ;;  %v3175_v30 = vcombine.low %v4338_v3, %v4394_v40  ;;  %v3178_v4 = vcombine.high %v4397_v41, %v4450_v16 }
  0x3b   : > { %3718 = vmatpush3.bf16.msra.mxu1 %v4027_v39  ;;  %3679 = vmatprep.subr.bf16.mxu0 %v4030_v55  ;;  %v325_v39 = vrot.slane %v323_v26, 4  ;;  %v792_v55 = vrot.slane %v4290_v34, 5  ;;  %v4046_v34 = vld [vmem:[%s5155_s1 + $0x100] sm:$0xff]   ;;  %v3072_v32 = vrot.slane %v766_v29, 9  ;;  %v4061_v3 = vld [vmem:[%s5155_s1 + $0x2e8] sm:$0xff]  }
  0x3c   : > { %3719 = vmatprep.subr.bf16.mxu1 %v4031_v56  ;;  %v4488_v50 = vrot.slane %v315_v46, 4  ;;  %v765_v26 = vld [vmem:[%s4277_s28 + $0x20] sm:$0xee]  ;;  %v4062_v46 = vld [vmem:[%s5155_s1 + $0x228] sm:$0xff]  }
  0x3d   : > { %546 = vmatmul.mubr.bf16.gmra.mxu0 %v3025_v14  ;;  %v4053_v14 = vld [vmem:[%s5155_s1 + $0x2b8] sm:$0xff]   ;;  %v3071_v31 = vrot.slane %v765_v26, 9  ;;  %v4084_v26 = vld [vmem:[%s5155_s1 + $0x240] sm:$0xff]  }
  0x3e   : > { %747 = vmatmul.mubr.bf16.gmra.mxu1 %v3049_v47  ;;  %3680 = vmatpush3.bf16.msra.mxu0 %v4032_v0  ;;  %v329_v47 = vor.u32 %v328_v44, %v325_v39  ;;  %v321_v56 = vsel %vm4308_vm2, %v4488_v50, %v320_v38  ;;  %v763_v0 = vld [vmem:[%s4277_s28] sm:$0xee]  ;;  %v4060_v38 = vld [vmem:[%s5155_s1 + $0x268] sm:$0xff]  }
  0x3f   : > { %3720 = vmatpush3.bf16.msra.mxu1 %v4033_v6  ;;  %3681 = vmatprep.subr.bf16.mxu0 %v4034_v8  ;;  %v764_v6 = vld [vmem:[%s4277_s28 + $0x10] sm:$0xee]  ;;  %v3069_v35 = vrot.slane %v763_v0, 9  ;;  %v4063_v39 = vld [vmem:[%s5155_s1 + $0x2a8] sm:$0xff]   ;;  %v4073_v0 = vld [vmem:[%s5155_s1 + $0x298] sm:$0xff]  }
  0x40   : > { %3721 = vmatprep.subr.bf16.mxu1 %v4035_v10  ;;  %754 = vmatprep.mubr.bf16.mxu1 %v3052_v23  ;;  %v4493_v53 = vrot.slane %v329_v47, 4  ;;  %v3070_v8 = vrot.slane %v764_v6, 9  ;;  %v4050_v10 = vld [vmem:[%s5155_s1 + $0x278] sm:$0xff]   ;;  %v4054_v23 = vld [vmem:[%s5155_s1 + $0x270] sm:$0xff]   ;;  %v4065_v47 = vld [vmem:[%s5155_s1 + $0x2e0] sm:$0xff]  }
  0x41   : > { %v4074_v6 = vld [vmem:[%s5155_s1 + $0x250] sm:$0xff]   ;;  %v4085_v29 = vld [vmem:[%s5155_s1 + $0x2c0] sm:$0xff]  }
  0x42   : > { %3682 = vmatpush3.bf16.msra.mxu0 %v4036_v12  ;;  %v335_v60 = vsel %vm4308_vm2, %v4493_v53, %v334_v48  ;;  %v793_v12 = vsel %vm4481_vm5, %v3069_v35, %v792_v55  ;;  %v797_v13 = vsel %vm4481_vm5, %v3070_v8, %v796_v59  ;;  %v808_v48 = vrot.slane %v4400_v42, 5  ;;  %v4066_v55 = vld [vmem:[%s5155_s1 + $0x220] sm:$0xff]   ;;  %v4075_v35 = vld [vmem:[%s5155_s1 + $0x2d0] sm:$0xff]  }
  0x43   : > { %3722 = vmatpush3.bf16.msra.mxu1 %v4037_v15  ;;  %3683 = vmatprep.subr.bf16.mxu0 %v4040_v36  ;;  %v3028_v61 = vcombine.high %v321_v56, %v335_v60  ;;  %v3027_v62 = vcombine.low %v321_v56, %v335_v60  ;;  %v3110_v2 = vcombine.high %v793_v12, %v797_v13  ;;  %v4052_v15 = vld [vmem:[%s5155_s1 + $0x238] sm:$0xff]   ;;  %v4067_v56 = vld [vmem:[%s5155_s1 + $0x2a0] sm:$0xff]   ;;  %v816_v8 = vrot.slane %v4458_v19, 5  ;;  %v4080_v19 = vld [vmem:[%s5155_s1 + $0x248] sm:$0xff]  }
  0x44   : > { %3723 = vmatprep.subr.bf16.mxu1 %v4041_v37  ;;  %v801_v36 = vsel %vm4481_vm5, %v3071_v31, %v800_v22  ;;  %v767_v42 = vld [vmem:[%s4277_s28 + $0x40] sm:$0xee]  ;;  %v4081_v22 = vld [vmem:[%s5155_s1 + $0x2c8] sm:$0xff]  }
  0x45   : > { %553 = vmatprep.mubr.bf16.mxu0 %v3028_v61  ;;  %v3073_v59 = vrot.slane %v767_v42, 9  ;;  %v4087_v31 = vld [vmem:[%s5155_s1 + $0x280] sm:$0xff]  }
  0x46   : > { %755 = vmatmul.mubr.bf16.gmra.mxu1 %v3051_v24  ;;  %3684 = vmatpush3.bf16.msra.mxu0 %v4042_v49  ;;  %v804_v24 = vrot.slane %v4344_v5, 5  ;;  %v4056_v5 = vld [vmem:[%s5155_s1 + $0x230] sm:$0xff]   ;;  %v4064_v49 = vld [vmem:[%s5155_s1 + $0x260] sm:$0xff]  }
  0x47   : > { %1266 = vmatprep.mubr.bf16.mxu1 %v3174_v18  ;;  %3724 = vmatpush3.bf16.msra.mxu1 %v4043_v51  ;;  %v3109_v18 = vcombine.low %v793_v12, %v797_v13  ;;  %v812_v51 = vrot.slane %v4403_v43, 5  ;;  %v809_v43 = vsel %vm4481_vm5, %v3073_v59, %v808_v48  ;;  %v769_v12 = vld [vmem:[%s4277_s28 + $0x60] sm:$0xee]  ;;  %v770_v13 = vld [vmem:[%s4277_s28 + $0x70] sm:$0xee]  ;;  %v4088_v48 = vld [vmem:[%s5155_s1 + $0x378] sm:$0xff]  }
  0x48   : > { %3685 = vmatprep.subr.bf16.mxu0 %v4044_v54  ;;  %3725 = vmatprep.subr.bf16.mxu1 %v4045_v58  ;;  %v805_v37 = vsel %vm4481_vm5, %v3072_v32, %v804_v24  ;;  %v3177_v54 = vcombine.low %v4397_v41, %v4450_v16  ;;  %v768_v58 = vld [vmem:[%s4277_s28 + $0x50] sm:$0xee]  ;;  %v4070_v41 = vld [vmem:[%s5155_s1 + $0x258] sm:$0xff]  }
  0x49   : > { %554 = vmatmul.mubr.bf16.gmra.mxu0 %v3027_v62  ;;  %v3112_v40 = vcombine.high %v801_v36, %v805_v37  ;;  %v3111_v44 = vcombine.low %v801_v36, %v805_v37  ;;  %v3074_v60 = vrot.slane %v768_v58, 9  ;;  %v4072_v62 = vld [vmem:[%s5155_s1 + $0x218] sm:$0xff]   ;;  %v3269_v37 = vld [vmem:[%s4277_s28 + $0x10] sm:$0xee] }
  0x4a   : > { %3686 = vmatpush3.bf16.msra.mxu0 %v4046_v34  ;;  %1015 = vmatprep.mubr.bf16.mxu0 %v3110_v2  ;;  %v4071_v34 = vld [vmem:[%s5155_s1 + $0x2d8] sm:$0xff]   ;;  %v3076_v2 = vrot.slane %v770_v13, 9 }
  0x4b   : > { %3726 = vmatpush3.bf16.msra.mxu1 %v4047_v63  ;;  %3751 = vmatprep.subr.bf16.mxu0 %v4050_v10  ;;  %v813_v16 = vsel %vm4481_vm5, %v3074_v60, %v812_v51  ;;  %v820_v10 = vrot.slane %v4461_v20, 5  ;;  %v3198_v32 = vld [vmem:[%s4277_s28 + $0x18] sm:$0x11] }
  0x4c   : > { %3791 = vmatprep.subr.bf16.mxu1 %v4051_v33  ;;  %v3114_v61 = vcombine.high %v809_v43, %v813_v16  ;;  %v3113_v63 = vcombine.low %v809_v43, %v813_v16  ;;  %v3075_v33 = vrot.slane %v769_v12, 9  ;;  %v4090_v59 = vld [vmem:[%s5155_s1 + $0x338] sm:$0xff]   ;;  %v4093_v43 = vld [vmem:[%s5155_s1 + $0x3f0] sm:$0xff]  }
  0x4d   : > { %v4094_v16 = vld [vmem:[%s5155_s1 + $0x330] sm:$0xff]  }
  0x4e   : > { %1267 = vmatmul.mubr.bf16.vlgmr.msra.gmra.mxu1 %v3173_v9  ;;  %v4076_v9 = vld [vmem:[%s5155_s1 + $0x210] sm:$0xff]  }
  0x4f   : > { %1274 = vmatprep.mubr.bf16.mxu1 %v3176_v11  ;;  %3792 = vmatpush3.bf16.msra.mxu1 %v4053_v14  ;;  %v4077_v11 = vld [vmem:[%s5155_s1 + $0x290] sm:$0xff]   ;;  %v4624_v14 = vld [vmem:[%s4277_s28 + $0x80] sm:$0xff] }
  0x50   : > { %3793 = vmatprep.subr.bf16.mxu1 %v4055_v21  ;;  %v3180_v20 = vcombine.high %v4453_v17, %v4624_v14  ;;  %v821_v21 = vsel %vm4481_vm5, %v3076_v2, %v820_v10 }
  0x51   : > { %1016 = vmatmul.mubr.bf16.vlgmr.msra.gmra.mxu0 %v3109_v18  ;;  %v817_v18 = vsel %vm4481_vm5, %v3075_v33, %v816_v8  ;;  %v3272_v8 = vld [vmem:[%s4277_s28 + $0x40] sm:$0xee] }
  0x52   : > { %3752 = vmatpush3.bf16.msra.mxu0 %v4052_v15  ;;  %1023 = vmatprep.mubr.bf16.mxu0 %v3112_v40  ;;  %v3179_v15 = vcombine.low %v4453_v17, %v4624_v14  ;;  %v3115_v24 = vcombine.low %v817_v18, %v821_v21  ;;  %v4083_v17 = vld [vmem:[%s5155_s1 + $0x288] sm:$0xff]   ;;  %v3277_v40 = vrot.slane %v3269_v37, 9  ;;  %v3280_v13 = vrot.slane %v3272_v8, 9  ;;  %v3273_v37 = vld [vmem:[%s4277_s28 + $0x50] sm:$0xee] }
  0x53   : > { %3794 = vmatpush3.bf16.msra.mxu1 %v4057_v25  ;;  %3753 = vmatprep.subr.bf16.mxu0 %v4054_v23  ;;  %v3116_v23 = vcombine.high %v817_v18, %v821_v21  ;;  %v4082_v25 = vld [vmem:[%s5155_s1 + $0x208] sm:$0xff]   ;;  %v1422_v21 = vshrl.u32 %v4624_v14, 16  ;;  %v3275_v8 = vld [vmem:[%s4277_s28 + $0x70] sm:$0xee] }
  0x54   : > { %3795 = vmatprep.subr.bf16.mxu1 %v4061_v3  ;;  %v3270_v3 = vld [vmem:[%s4277_s28 + $0x20] sm:$0xee]  ;;  %v4098_v18 = vld [vmem:[%s5155_s1 + $0x328] sm:$0xff]  }
  0x56   : > { %1275 = vmatmul.mubr.bf16.gmra.mxu1 %v3175_v30  ;;  %3754 = vmatpush3.bf16.msra.mxu0 %v4056_v5  ;;  %v4086_v30 = vld [vmem:[%s5155_s1 + $0x200] sm:$0xff]   ;;  %v1333_v5 = vshll.u32 %v3198_v32, 16 }
  0x57   : > { %1282 = vmatprep.mubr.bf16.mxu1 %v3178_v4  ;;  %3796 = vmatpush3.bf16.msra.mxu1 %v4063_v39  ;;  %v3200_v4 = vld [vmem:[%s4277_s28 + $0x28] sm:$0x11]  ;;  %v3278_v39 = vrot.slane %v3270_v3, 9 }
  0x58   : > { %3755 = vmatprep.subr.bf16.mxu0 %v4060_v38  ;;  %3797 = vmatprep.subr.bf16.mxu1 %v4065_v47  ;;  %v1347_v36 = vshll.u32 %v3200_v4, 16  ;;  %v1695_v38 = vrot.slane %v3198_v32, 5  ;;  %v4103_v32 = vld [vmem:[%s5155_s1 + $0x3a0] sm:$0xff]  }
  0x59   : > { %1024 = vmatmul.mubr.bf16.gmra.mxu0 %v3111_v44  ;;  %v1699_v44 = vrot.slane %v3200_v4, 5 }
  0x5a   : > { %3756 = vmatpush3.bf16.msra.mxu0 %v4062_v46  ;;  %1031 = vmatprep.mubr.bf16.mxu0 %v3114_v61  ;;  %v1335_v46 = vrot.slane %v1333_v5, 5  ;;  %v1349_v47 = vrot.slane %v1347_v36, 5  ;;  %v1696_v51 = vsel %vm4481_vm5, %v3277_v40, %v1695_v38  ;;  %v3202_v61 = vld [vmem:[%s4277_s28 + $0x38] sm:$0x11]  ;;  %v3208_v36 = vld [vmem:[%s4277_s28 + $0x68] sm:$0x11] }
  0x5b   : > { %3798 = vmatpush3.bf16.msra.mxu1 %v4067_v56  ;;  %3757 = vmatprep.subr.bf16.mxu0 %v4064_v49  ;;  %v4089_v49 = vld [vmem:[%s5155_s1 + $0x3f8] sm:$0xff]   ;;  %v1403_v40 = vshll.u32 %v3208_v36, 16  ;;  %v3274_v38 = vld [vmem:[%s4277_s28 + $0x60] sm:$0xee] }
  0x5c   : > { %3799 = vmatprep.subr.bf16.mxu1 %v4071_v34  ;;  %v1350_v56 = vsel %vm4308_vm2, %v4371_v27, %v1349_v47  ;;  %v4092_v27 = vld [vmem:[%s5155_s1 + $0x370] sm:$0xff]   ;;  %v3206_v5 = vld [vmem:[%s4277_s28 + $0x58] sm:$0x11]  ;;  %v1715_v47 = vrot.slane %v3208_v36, 5 }
  0x5d   : > { %v4095_v34 = vld [vmem:[%s5155_s1 + $0x3b0] sm:$0xff]   ;;  %v1389_v3 = vshll.u32 %v3206_v5, 16 }
  0x5e   : > { %1283 = vmatmul.mubr.bf16.gmra.mxu1 %v3177_v54  ;;  %3758 = vmatpush3.bf16.msra.mxu0 %v4066_v55  ;;  %v1700_v54 = vsel %vm4481_vm5, %v3278_v39, %v1699_v44  ;;  %v1336_v55 = vsel %vm4308_vm2, %v4315_v57, %v1335_v46  ;;  %v4091_v57 = vld [vmem:[%s5155_s1 + $0x3b8] sm:$0xff]   ;;  %v3281_v39 = vrot.slane %v3273_v37, 9  ;;  %v1711_v44 = vrot.slane %v3206_v5, 5 }
  0x5f   : > { %3759 = vmatprep.subr.bf16.mxu0 %v4070_v41  ;;  %3800 = vmatpush3.bf16.msra.mxu1 %v4073_v0  ;;  %v3317_v42 = vcombine.low %v1696_v51, %v1700_v54  ;;  %v3318_v58 = vcombine.high %v1696_v51, %v1700_v54  ;;  %v3245_v60 = vcombine.low %v1336_v55, %v1350_v56  ;;  %v3271_v0 = vld [vmem:[%s4277_s28 + $0x30] sm:$0xee]  ;;  %v3282_v46 = vrot.slane %v3274_v38, 9  ;;  %v4104_v54 = vld [vmem:[%s5155_s1 + $0x358] sm:$0xff]  }
  0x60   : > { %3801 = vmatprep.subr.bf16.mxu1 %v4075_v35  ;;  %1290 = vmatprep.mubr.bf16.mxu1 %v3180_v20  ;;  %v3246_v41 = vcombine.high %v1336_v55, %v1350_v56  ;;  %v1712_v51 = vsel %vm4481_vm5, %v3281_v39, %v1711_v44  ;;  %v4105_v55 = vld [vmem:[%s5155_s1 + $0x3d8] sm:$0xff]  }
  0x61   : > { %1032 = vmatmul.mubr.bf16.gmra.mxu0 %v3113_v63  ;;  %v1361_v63 = vshll.u32 %v3202_v61, 16  ;;  %v1716_v56 = vsel %vm4481_vm5, %v3282_v46, %v1715_v47  ;;  %v4820_v5 = vld [vmem:[%s4277_s28 + $0x38] sm:$0x11] }
  0x62   : > { %3760 = vmatpush3.bf16.msra.mxu0 %v4072_v62  ;;  %1039 = vmatprep.mubr.bf16.mxu0 %v3116_v23  ;;  %v3204_v62 = vld [vmem:[%s4277_s28 + $0x48] sm:$0x11]  ;;  %v2250_v47 = vshll.u32 %v4820_v5, 16 }
  0x63   : > { %3761 = vmatprep.subr.bf16.mxu0 %v4074_v6  ;;  %3802 = vmatpush3.bf16.msra.mxu1 %v4077_v11  ;;  %v1703_v6 = vrot.slane %v3202_v61, 5  ;;  %v1375_v35 = vshll.u32 %v3204_v62, 16  ;;  %v1707_v10 = vrot.slane %v3204_v62, 5  ;;  %v4096_v11 = vld [vmem:[%s5155_s1 + $0x368] sm:$0xff]   ;;  %v1363_v12 = vrot.slane %v1361_v63, 5  ;;  %v4111_v61 = vld [vmem:[%s5155_s1 + $0x390] sm:$0xff]  }
  0x64   : > { %3803 = vmatprep.subr.bf16.mxu1 %v4081_v22  ;;  %v3210_v62 = vld [vmem:[%s4277_s28 + $0x78] sm:$0x11]  ;;  %v3212_v63 = vld [vmem:[%s4277_s28 + $0x88] sm:$0x11] }
  0x65   : > { %v1377_v33 = vrot.slane %v1375_v35, 5  ;;  %v1364_v20 = vsel %vm4308_vm2, %v4373_v28, %v1363_v12  ;;  %v4099_v28 = vld [vmem:[%s5155_s1 + $0x3a8] sm:$0xff]   ;;  %v1431_v35 = vshll.u32 %v3212_v63, 16 }
  0x66   : > { %3762 = vmatpush3.bf16.msra.mxu0 %v4076_v9  ;;  %1291 = vmatmul.mubr.bf16.gmra.mxu1 %v3179_v15  ;;  %v3279_v9 = vrot.slane %v3271_v0, 9  ;;  %v1708_v15 = vsel %vm4481_vm5, %v3280_v13, %v1707_v10  ;;  %v3283_v10 = vrot.slane %v3275_v8, 9  ;;  %v1723_v13 = vrot.slane %v3212_v63, 5 }
  0x67   : > { %3763 = vmatprep.subr.bf16.mxu0 %v4080_v19  ;;  %3804 = vmatpush3.bf16.msra.mxu1 %v4083_v17  ;;  %v4097_v19 = vld [vmem:[%s5155_s1 + $0x3e8] sm:$0xff]   ;;  %v1378_v22 = vsel %vm4308_vm2, %v4424_v1, %v1377_v33  ;;  %v4101_v1 = vld [vmem:[%s5155_s1 + $0x3e0] sm:$0xff]  }
  0x68   : > { %3805 = vmatprep.subr.bf16.mxu1 %v4085_v29  ;;  %1918 = vmatprep.mubr.bf16.mxu1 %v3318_v58  ;;  %v1704_v2 = vsel %vm4481_vm5, %v3279_v9, %v1703_v6  ;;  %v3248_v17 = vcombine.high %v1364_v20, %v1378_v22  ;;  %v4100_v29 = vld [vmem:[%s5155_s1 + $0x360] sm:$0xff]   ;;  %v1417_v6 = vshll.u32 %v3210_v62, 16 }
  0x69   : > { %1040 = vmatmul.mubr.bf16.gmra.mxu0 %v3115_v24  ;;  %v3320_v23 = vcombine.high %v1704_v2, %v1708_v15  ;;  %v3319_v24 = vcombine.low %v1704_v2, %v1708_v15  ;;  %v3276_v9 = vld [vmem:[%s4277_s28 + $0x80] sm:$0xee]  ;;  %v1433_v2 = vrot.slane %v1431_v35, 5 }
  0x6a   : > { %3764 = vmatpush3.bf16.msra.mxu0 %v4082_v25  ;;  %1628 = vmatprep.mubr.bf16.mxu0 %v3246_v41  ;;  %v1425_v25 = vshll.u32 %v4624_v14, 16  ;;  %v4106_v41 = vld [vmem:[%s5155_s1 + $0x318] sm:$0xff]   ;;  %v3284_v12 = vrot.slane %v3276_v9, 9  ;;  %v1419_v33 = vrot.slane %v1417_v6, 5 }
  0x6b   : > { %3765 = vmatprep.subr.bf16.mxu0 %v4084_v26  ;;  %3806 = vmatpush3.bf16.msra.mxu1 %v4087_v31  ;;  %v3247_v26 = vcombine.low %v1364_v20, %v1378_v22  ;;  %v1424_v31 = vrot.slane %v1422_v21, 4  ;;  %v4113_v20 = vld [vmem:[%s5155_s1 + $0x3c8] sm:$0xff]  }
  0x6c   : > { %3871 = vmatprep.subr.bf16.mxu1 %v4089_v49  ;;  %v1427_v4 = vrot.slane %v1425_v25, 5  ;;  %v1405_v49 = vrot.slane %v1403_v40, 5  ;;  %v1420_v21 = vsel %vm4308_vm2, %v4493_v53, %v1419_v33  ;;  %v4115_v53 = vld [vmem:[%s5155_s1 + $0x388] sm:$0xff]  }
  0x6e   : > { %3766 = vmatpush3.bf16.msra.mxu0 %v4086_v30  ;;  %1919 = vmatmul.mubr.bf16.vlgmr.msra.gmra.mxu1 %v3317_v42  ;;  %v4102_v30 = vld [vmem:[%s5155_s1 + $0x320] sm:$0xff]   ;;  %v1406_v58 = vsel %vm4308_vm2, %v4488_v50, %v1405_v49  ;;  %v4108_v50 = vld [vmem:[%s5155_s1 + $0x350] sm:$0xff]  }
  0x6f   : > { %3831 = vmatprep.subr.bf16.mxu0 %v4088_v48  ;;  %3872 = vmatpush3.bf16.msra.mxu1 %v4091_v57  ;;  %v1391_v48 = vrot.slane %v1389_v3, 5 }
  0x70   : > { %3873 = vmatprep.subr.bf16.mxu1 %v4093_v43  ;;  %1926 = vmatprep.mubr.bf16.mxu1 %v3320_v23  ;;  %v1428_v43 = vor.u32 %v1427_v4, %v1424_v31  ;;  %v3341_v31 = vld [vmem:[%s4277_s28 + $0x20] sm:$0xff]  ;;  %v4817_v4 = vld [vmem:[%s4277_s28 + $0x28] sm:$0x11] }
  0x71   : > { %1629 = vmatmul.mubr.bf16.vlgmr.msra.gmra.mxu0 %v3245_v60  ;;  %v1392_v42 = vsel %vm4308_vm2, %v4429_v7, %v1391_v48  ;;  %v3321_v60 = vcombine.low %v1712_v51, %v1716_v56  ;;  %v4107_v7 = vld [vmem:[%s5155_s1 + $0x398] sm:$0xff]   ;;  %v2227_v36 = vshrl.u32 %v3341_v31, 16  ;;  %v2230_v40 = vshll.u32 %v3341_v31, 16 }
  0x72   : > { %3832 = vmatpush3.bf16.msra.mxu0 %v4090_v59  ;;  %1636 = vmatprep.mubr.bf16.mxu0 %v3248_v17  ;;  %v3322_v59 = vcombine.high %v1712_v51, %v1716_v56  ;;  %v3250_v57 = vcombine.high %v1392_v42, %v1406_v58  ;;  %v4776_v0 = vrot.slane %v1428_v43, 4  ;;  %v2236_v38 = vshll.u32 %v4817_v4, 16  ;;  %v4122_v48 = vld [vmem:[%s5155_s1 + $0x478] sm:$0xff]  }
  0x73   : > { %3833 = vmatprep.subr.bf16.mxu0 %v4092_v27  ;;  %3874 = vmatpush3.bf16.msra.mxu1 %v4095_v34  ;;  %v3249_v27 = vcombine.low %v1392_v42, %v1406_v58  ;;  %v4110_v34 = vld [vmem:[%s5155_s1 + $0x310] sm:$0xff]   ;;  %v2229_v39 = vrot.slane %v2227_v36, 4  ;;  %v2232_v49 = vrot.slane %v2230_v40, 5  ;;  %v4123_v51 = vld [vmem:[%s5155_s1 + $0x438] sm:$0xff]  }
  0x74   : > { %3875 = vmatprep.subr.bf16.mxu1 %v4097_v19  ;;  %v4112_v19 = vld [vmem:[%s5155_s1 + $0x348] sm:$0xff]   ;;  %v1434_v22 = vsel %vm4308_vm2, %v4776_v0, %v1433_v2  ;;  %v4124_v42 = vld [vmem:[%s5155_s1 + $0x470] sm:$0xff]  }
  0x75   : > { %v3252_v25 = vcombine.high %v1420_v21, %v1434_v22  ;;  %v3251_v17 = vcombine.low %v1420_v21, %v1434_v22  ;;  %v2233_v58 = vor.u32 %v2232_v49, %v2229_v39 }
  0x76   : > { %3834 = vmatpush3.bf16.msra.mxu0 %v4094_v16  ;;  %1927 = vmatmul.mubr.bf16.gmra.mxu1 %v3319_v24  ;;  %v4109_v16 = vld [vmem:[%s5155_s1 + $0x3d0] sm:$0xff]  }
  0x77   : > { %3835 = vmatprep.subr.bf16.mxu0 %v4096_v11  ;;  %3876 = vmatpush3.bf16.msra.mxu1 %v4099_v28  ;;  %v1719_v11 = vrot.slane %v3210_v62, 5  ;;  %v4114_v28 = vld [vmem:[%s5155_s1 + $0x308] sm:$0xff]  }
  0x78   : > { %3877 = vmatprep.subr.bf16.mxu1 %v4101_v1  ;;  %1934 = vmatprep.mubr.bf16.mxu1 %v3322_v59  ;;  %v4118_v1 = vld [vmem:[%s5155_s1 + $0x300] sm:$0xff]  }
  0x79   : > { %1637 = vmatmul.mubr.bf16.gmra.mxu0 %v3247_v26  ;;  %v1720_v15 = vsel %vm4481_vm5, %v3283_v10, %v1719_v11  ;;  %v4116_v26 = vld [vmem:[%s5155_s1 + $0x340] sm:$0xff]   ;;  %v4128_v11 = vld [vmem:[%s5155_s1 + $0x468] sm:$0xff]  }
  0x7a   : > { %3836 = vmatpush3.bf16.msra.mxu0 %v4098_v18  ;;  %1644 = vmatprep.mubr.bf16.mxu0 %v3250_v57  ;;  %v1724_v18 = vsel %vm4481_vm5, %v3284_v12, %v1723_v13  ;;  %v3343_v57 = vld [vmem:[%s4277_s28 + $0x40] sm:$0xff] }
  0x7b   : > { %3837 = vmatprep.subr.bf16.mxu0 %v4100_v29  ;;  %3878 = vmatpush3.bf16.msra.mxu1 %v4103_v32  ;;  %v3324_v23 = vcombine.high %v1720_v15, %v1724_v18  ;;  %v3323_v24 = vcombine.low %v1720_v15, %v1724_v18  ;;  %v4117_v29 = vld [vmem:[%s5155_s1 + $0x3c0] sm:$0xff]   ;;  %v3342_v32 = vld [vmem:[%s4277_s28 + $0x30] sm:$0xff]  ;;  %v2258_v62 = vshll.u32 %v3343_v57, 16  ;;  %v4859_v18 = vld [vmem:[%s5155_s1 + $0x428] sm:$0xff]  }
  0x7c   : > { %3879 = vmatprep.subr.bf16.mxu1 %v4105_v55  ;;  %v3381_v37 = vcombine.low %v3341_v31, %v3342_v32  ;;  %v3382_v3 = vcombine.high %v3341_v31, %v3342_v32  ;;  %v2241_v44 = vshrl.u32 %v3342_v32, 16  ;;  %v2244_v46 = vshll.u32 %v3342_v32, 16  ;;  %v4880_v32 = vld [vmem:[%s5155_s1 + $0x420] sm:$0xff]  }
  0x7d   : > { %v2260_v13 = vrot.slane %v2258_v62, 5 }
  0x7e   : > { %3838 = vmatpush3.bf16.msra.mxu0 %v4102_v30  ;;  %1935 = vmatmul.mubr.bf16.gmra.mxu1 %v3321_v60  ;;  %v4119_v30 = vld [vmem:[%s5155_s1 + $0x380] sm:$0xff]   ;;  %v2243_v55 = vrot.slane %v2241_v44, 4  ;;  %v2246_v56 = vrot.slane %v2244_v46, 5  ;;  %v2252_v60 = vrot.slane %v2250_v47, 5 }
  0x7f   : > { %3839 = vmatprep.subr.bf16.mxu0 %v4104_v54  ;;  %3880 = vmatpush3.bf16.msra.mxu1 %v4107_v7  ;;  %v2238_v54 = vrot.slane %v2236_v38, 5  ;;  %v2234_v7 = vrot.slane %v2233_v58, 4 }
  0x80   : > { %3881 = vmatprep.subr.bf16.mxu1 %v4109_v16  ;;  %1942 = vmatprep.mubr.bf16.mxu1 %v3324_v23  ;;  %v2247_v59 = vor.u32 %v2246_v56, %v2243_v55  ;;  %v4844_v16 = vld [vmem:[%s4277_s28 + $0x58] sm:$0x11]  ;;  %v4864_v23 = vld [vmem:[%s5155_s1 + $0x460] sm:$0xff]  }
  0x81   : > { %1645 = vmatmul.mubr.bf16.gmra.mxu0 %v3249_v27  ;;  %v3344_v27 = vld [vmem:[%s4277_s28 + $0x50] sm:$0xff]  ;;  %v2239_v35 = vsel %vm4308_vm2, %v2234_v7, %v2238_v54  ;;  %v2278_v10 = vshll.u32 %v4844_v16, 16 }
  0x82   : > { %3840 = vmatpush3.bf16.msra.mxu0 %v4106_v41  ;;  %1652 = vmatprep.mubr.bf16.mxu0 %v3252_v25  ;;  %v4836_v41 = vld [vmem:[%s5155_s1 + $0x430] sm:$0xff]   ;;  %v3384_v43 = vcombine.high %v3343_v57, %v3344_v27  ;;  %v2269_v6 = vshrl.u32 %v3344_v27, 16  ;;  %v2272_v9 = vshll.u32 %v3344_v27, 16  ;;  %v3383_v2 = vcombine.low %v3343_v57, %v3344_v27  ;;  %v3345_v25 = vld [vmem:[%s4277_s28 + $0x60] sm:$0xff] }
  0x83   : > { %3841 = vmatprep.subr.bf16.mxu0 %v4108_v50  ;;  %3882 = vmatpush3.bf16.msra.mxu1 %v4111_v61  ;;  %v4841_v50 = vld [vmem:[%s4277_s28 + $0x48] sm:$0x11]  ;;  %v2248_v61 = vrot.slane %v2247_v59, 4  ;;  %v4902_v7 = vld [vmem:[%s5155_s1 + $0x450] sm:$0xff]  }
  0x84   : > { %3883 = vmatprep.subr.bf16.mxu1 %v4113_v20  ;;  %v2264_v63 = vshll.u32 %v4841_v50, 16  ;;  %v2271_v33 = vrot.slane %v2269_v6, 4  ;;  %v2274_v15 = vrot.slane %v2272_v9, 5  ;;  %v4911_v6 = vld [vmem:[%s4277_s28 + $0x98] sm:$0x11] }
  0x85   : > { %v2253_v12 = vsel %vm4308_vm2, %v2248_v61, %v2252_v60 }
  0x86   : > { %3842 = vmatpush3.bf16.msra.mxu0 %v4110_v34  ;;  %1943 = vmatmul.mubr.bf16.gmra.mxu1 %v3323_v24  ;;  %v2255_v34 = vshrl.u32 %v3343_v57, 16  ;;  %v3454_v20 = vcombine.high %v2239_v35, %v2253_v12  ;;  %v2266_v22 = vrot.slane %v2264_v63, 5  ;;  %v2275_v24 = vor.u32 %v2274_v15, %v2271_v33  ;;  %v4908_v63 = vld [vmem:[%s4277_s28 + $0x88] sm:$0x11] }
  0x87   : > { %3843 = vmatprep.subr.bf16.mxu0 %v4112_v19  ;;  %3884 = vmatpush3.bf16.msra.mxu1 %v4115_v53  ;;  %v3453_v19 = vcombine.low %v2239_v35, %v2253_v12  ;;  %v2602_v53 = vrot.slane %v4820_v5, 5  ;;  %v2320_v9 = vshll.u32 %v4908_v63, 16 }
  0x88   : > { %3885 = vmatprep.subr.bf16.mxu1 %v4117_v29  ;;  %v2257_v8 = vrot.slane %v2255_v34, 4  ;;  %2531 = vmatprep.mubr.bf16.mxu1 %v3454_v20  ;;  %v3346_v29 = vld [vmem:[%s4277_s28 + $0x70] sm:$0xff]  ;;  %v2276_v31 = vrot.slane %v2275_v24, 4  ;;  %v2606_v34 = vrot.slane %v4841_v50, 5  ;;  %v4140_v20 = vld [vmem:[%s5155_s1 + $0x448] sm:$0xff]  }
  0x89   : > { %1653 = vmatmul.mubr.bf16.gmra.mxu0 %v3251_v17  ;;  %v2598_v17 = vrot.slane %v4817_v4, 5  ;;  %v3386_v36 = vcombine.high %v3345_v25, %v3346_v29  ;;  %v2297_v39 = vshrl.u32 %v3346_v29, 16  ;;  %v2300_v44 = vshll.u32 %v3346_v29, 16 }
  0x8a   : > { %3844 = vmatpush3.bf16.msra.mxu0 %v4114_v28  ;;  %2169 = vmatprep.mubr.bf16.mxu0 %v3382_v3  ;;  %v2261_v21 = vor.u32 %v2260_v13, %v2257_v8  ;;  %v2280_v28 = vrot.slane %v2278_v10, 5  ;;  %v2286_v3 = vshll.u32 %v3345_v25, 16  ;;  %v3385_v57 = vcombine.low %v3345_v25, %v3346_v29  ;;  %v4916_v8 = vld [vmem:[%s5155_s1 + $0x410] sm:$0xff]   ;;  %v4142_v29 = vld [vmem:[%s5155_s1 + $0x440] sm:$0xff]  }
  0x8b   : > { %3845 = vmatprep.subr.bf16.mxu0 %v4116_v26  ;;  %3886 = vmatpush3.bf16.msra.mxu1 %v4119_v30  ;;  %v4874_v30 = vld [vmem:[%s4277_s28 + $0x78] sm:$0x11]  ;;  %v2299_v56 = vrot.slane %v2297_v39, 4  ;;  %v2302_v60 = vrot.slane %v2300_v44, 5  ;;  %v3480_v44 = vld [vmem:[%s4277_s28 + $0x50] sm:$0xee] }
  0x8c   : > { %3951 = vmatprep.subr.bf16.mxu1 %v4122_v48  ;;  %v2262_v26 = vrot.slane %v2261_v21, 4  ;;  %v2281_v46 = vsel %vm4308_vm2, %v2276_v31, %v2280_v28  ;;  %v2306_v49 = vshll.u32 %v4874_v30, 16  ;;  %v3481_v31 = vld [vmem:[%s4277_s28 + $0x60] sm:$0xee]  ;;  %v3488_v4 = vrot.slane %v3480_v44, 9 }
  0x8d   : > { %v2303_v61 = vor.u32 %v2302_v60, %v2299_v56  ;;  %v3484_v56 = vld [vmem:[%s4277_s28 + $0x90] sm:$0xee]  ;;  %v2622_v60 = vrot.slane %v4908_v63, 5 }
  0x8e   : > { %3846 = vmatpush3.bf16.msra.mxu0 %v4118_v1  ;;  %2532 = vmatmul.mubr.bf16.vlgmr.msra.gmra.mxu1 %v3453_v19  ;;  %v4871_v1 = vld [vmem:[%s4277_s28 + $0x68] sm:$0x11]  ;;  %v2267_v40 = vsel %vm4308_vm2, %v2262_v26, %v2266_v22  ;;  %v2308_v27 = vrot.slane %v2306_v49, 5 }
  0x8f   : > { %3911 = vmatprep.subr.bf16.mxu0 %v4122_v48  ;;  %3959 = vmatpush3.bf16.msra.mxu1 %v4123_v51  ;;  %v2292_v38 = vshll.u32 %v4871_v1, 16  ;;  %v2288_v48 = vrot.slane %v2286_v3, 5  ;;  %v3456_v54 = vcombine.high %v2267_v40, %v2281_v46  ;;  %v3455_v55 = vcombine.low %v2267_v40, %v2281_v46  ;;  %v4141_v22 = vld [vmem:[%s5155_s1 + $0x408] sm:$0xff]   ;;  %v3482_v40 = vld [vmem:[%s4277_s28 + $0x70] sm:$0xee] }
  0x90   : > { %3952 = vmatprep.subr.bf16.mxu1 %v4124_v42  ;;  %v2304_v13 = vrot.slane %v2303_v61, 4  ;;  %v2614_v15 = vrot.slane %v4871_v1, 5  ;;  %v3477_v1 = vld [vmem:[%s4277_s28 + $0x20] sm:$0xee]  ;;  %v3490_v39 = vrot.slane %v3482_v40, 9  ;;  %v2610_v46 = vrot.slane %v4844_v16, 5 }
  0x91   : > { %2170 = vmatmul.mubr.bf16.vlgmr.msra.gmra.mxu0 %v3381_v37  ;;  %v2283_v37 = vshrl.u32 %v3345_v25, 16  ;;  %v2294_v59 = vrot.slane %v2292_v38, 5  ;;  %2539 = vmatprep.mubr.bf16.mxu1 %v3456_v54  ;;  %v3489_v38 = vrot.slane %v3481_v31, 9 }
  0x92   : > { %3912 = vmatpush3.bf16.msra.mxu0 %v4123_v51  ;;  %2177 = vmatprep.mubr.bf16.mxu0 %v3384_v43  ;;  %v4134_v51 = vld [vmem:[%s5155_s1 + $0x458] sm:$0xff]   ;;  %v3348_v43 = vld [vmem:[%s4277_s28 + $0x90] sm:$0xff]  ;;  %v2611_v54 = vsel %vm4481_vm5, %v3488_v4, %v2610_v46 }
  0x93   : > { %3913 = vmatprep.subr.bf16.mxu0 %v4124_v42  ;;  %v2285_v47 = vrot.slane %v2283_v37, 4  ;;  %v4895_v42 = vld [vmem:[%s5155_s1 + $0x418] sm:$0xff]   ;;  %3960 = vmatpush3.bf16.msra.mxu1 %v4836_v41  ;;  %v3388_v62 = vcombine.high %v4624_v14, %v3348_v43  ;;  %v2325_v35 = vshrl.u32 %v3348_v43, 16  ;;  %v2328_v10 = vshll.u32 %v3348_v43, 16 }
  0x94   : > { %3953 = vmatprep.subr.bf16.mxu1 %v4128_v11  ;;  %v3387_v21 = vcombine.low %v4624_v14, %v3348_v43  ;;  %v3485_v37 = vrot.slane %v3477_v1, 9  ;;  %v2615_v5 = vsel %vm4481_vm5, %v3489_v38, %v2614_v15 }
  0x95   : > { %v2289_v58 = vor.u32 %v2288_v48, %v2285_v47  ;;  %v2327_v33 = vrot.slane %v2325_v35, 4  ;;  %v2330_v19 = vrot.slane %v2328_v10, 5 }
  0x96   : > { %3914 = vmatpush3.bf16.msra.mxu0 %v4836_v41  ;;  %2540 = vmatmul.mubr.bf16.gmra.mxu1 %v3455_v55  ;;  %v2599_v47 = vsel %vm4481_vm5, %v3485_v37, %v2598_v17  ;;  %v3483_v55 = vld [vmem:[%s4277_s28 + $0x80] sm:$0xee] }
  0x97   : > { %3915 = vmatprep.subr.bf16.mxu0 %v4128_v11  ;;  %v2290_v41 = vrot.slane %v2289_v58, 4  ;;  %v2334_v11 = vshll.u32 %v4911_v6, 16  ;;  %3961 = vmatpush3.bf16.msra.mxu1 %v4859_v18  ;;  %v2331_v25 = vor.u32 %v2330_v19, %v2327_v33  ;;  %v3491_v50 = vrot.slane %v3483_v55, 9 }
  0x98   : > { %3954 = vmatprep.subr.bf16.mxu1 %v4864_v23 }
  0x99   : > { %2178 = vmatmul.mubr.bf16.gmra.mxu0 %v3383_v2  ;;  %v2295_v12 = vsel %vm4308_vm2, %v2290_v41, %v2294_v59  ;;  %v2322_v2 = vrot.slane %v2320_v9, 5  ;;  %v2336_v26 = vrot.slane %v2334_v11, 5  ;;  %v2623_v43 = vsel %vm4481_vm5, %v3491_v50, %v2622_v60 }
  0x9a   : > { %3916 = vmatpush3.bf16.msra.mxu0 %v4859_v18  ;;  %2185 = vmatprep.mubr.bf16.mxu0 %v3386_v36  ;;  %v2309_v18 = vsel %vm4308_vm2, %v2304_v13, %v2308_v27  ;;  %v2332_v36 = vrot.slane %v2331_v25, 4  ;;  %v3492_v27 = vrot.slane %v3484_v56, 9 }
  0x9b   : > { %3917 = vmatprep.subr.bf16.mxu0 %v4864_v23  ;;  %v2618_v23 = vrot.slane %v4874_v30, 5  ;;  %v3458_v24 = vcombine.high %v2295_v12, %v2309_v18  ;;  %v3457_v28 = vcombine.low %v2295_v12, %v2309_v18  ;;  %3962 = vmatpush3.bf16.msra.mxu1 %v4880_v32  ;;  %v2323_v14 = vsel %vm4308_vm2, %v4776_v0, %v2322_v2  ;;  %v3478_v30 = vld [vmem:[%s4277_s28 + $0x30] sm:$0xee] }
  0x9c   : > { %3955 = vmatprep.subr.bf16.mxu1 %v4134_v51  ;;  %v3486_v3 = vrot.slane %v3478_v30, 9  ;;  %v2337_v0 = vsel %vm4308_vm2, %v2332_v36, %v2336_v26 }
  0x9d   : > { %2547 = vmatprep.mubr.bf16.mxu1 %v3458_v24  ;;  %v3460_v16 = vcombine.high %v2323_v14, %v2337_v0 }
  0x9e   : > { %3918 = vmatpush3.bf16.msra.mxu0 %v4880_v32  ;;  %v3479_v32 = vld [vmem:[%s4277_s28 + $0x40] sm:$0xee]  ;;  %2548 = vmatmul.mubr.bf16.gmra.mxu1 %v3457_v28  ;;  %v2603_v48 = vsel %vm4481_vm5, %v3486_v3, %v2602_v53  ;;  %v2619_v53 = vsel %vm4481_vm5, %v3490_v39, %v2618_v23  ;;  %s2987_s28 = sshll.u32 %s4178_s13, 3 }
  0x9f   : > { %3919 = vmatprep.subr.bf16.mxu0 %v4134_v51  ;;  %v3487_v49 = vrot.slane %v3479_v32, 9  ;;  %3963 = vmatpush3.bf16.msra.mxu1 %v4895_v42  ;;  %v3526_v17 = vcombine.high %v2599_v47, %v2603_v48  ;;  %v3525_v58 = vcombine.low %v2599_v47, %v2603_v48  ;;  %v3530_v59 = vcombine.high %v2615_v5, %v2619_v53  ;;  %p5080_p4 = scmp.lt.s32.totalorder %s2987_s28, 15 }
  0xa0   : > { %3956 = vmatprep.subr.bf16.mxu1 %v4902_v7  ;;  %2555 = vmatprep.mubr.bf16.mxu1 %v3460_v16  ;;  %v3529_v41 = vcombine.low %v2615_v5, %v2619_v53 }
  0xa1   : > { %2186 = vmatmul.mubr.bf16.gmra.mxu0 %v3385_v57  ;;  %v2607_v51 = vsel %vm4481_vm5, %v3487_v49, %v2606_v34  ;;  %s5186_s28 = smov (!%p5080_p4, %s2987_s28), 15 }
  0xa2   : > { %3920 = vmatpush3.bf16.msra.mxu0 %v4895_v42  ;;  %2193 = vmatprep.mubr.bf16.mxu0 %v3388_v62  ;;  %v3459_v42 = vcombine.low %v2323_v14, %v2337_v0  ;;  %v3528_v57 = vcombine.high %v2607_v51, %v2611_v54  ;;  %v3527_v61 = vcombine.low %v2607_v51, %v2611_v54  ;;  %s2988_s13 = sshll.u32 %s5186_s28, 2 }
  0xa3   : > { %3921 = vmatprep.subr.bf16.mxu0 %v4902_v7  ;;  %3964 = vmatpush3.bf16.msra.mxu1 %v4916_v8  ;;  %v2626_v7 = vrot.slane %v4911_v6, 5  ;;  %s5133_s21 = scalar_lea.vmem %s5157_s3, %s2988_s13 }
  0xa4   : > { %3957 = vmatprep.subr.bf16.mxu1 %v4140_v20 }
  0xa5   : > { %v2627_v34 = vsel %vm4481_vm5, %v3492_v27, %v2626_v7 }
  0xa6   : > { %3922 = vmatpush3.bf16.msra.mxu0 %v4916_v8  ;;  %2556 = vmatmul.mubr.bf16.gmra.mxu1 %v3459_v42  ;;  %v3532_v62 = vcombine.high %v2623_v43, %v2627_v34  ;;  %v3531_v63 = vcombine.low %v2623_v43, %v2627_v34 }
  0xa7   : > { %3923 = vmatprep.subr.bf16.mxu0 %v4140_v20  ;;  %3965 = vmatpush3.bf16.msra.mxu1 %v4141_v22 }
  0xa8   : > { %2837 = vmatprep.mubr.bf16.mxu1 %v3530_v59  ;;  %3958 = vmatprep.subr.bf16.mxu1 %v4142_v29 }
  0xa9   : > { %2194 = vmatmul.mubr.bf16.gmra.mxu0 %v3387_v21 }
  0xaa   : > { %3924 = vmatpush3.bf16.msra.mxu0 %v4141_v22  ;;  %2821 = vmatprep.mubr.bf16.mxu0 %v3526_v17 }
  0xab   : > { %3925 = vmatprep.subr.bf16.mxu0 %v4142_v29  ;;  %3966 = vmatpush3.bf16.msra.mxu1 %v4143_v52 }
  0xae   : > { %3926 = vmatpush3.bf16.msra.mxu0 %v4143_v52  ;;  %2838 = vmatmul.mubr.bf16.vlgmr.msra.gmra.mxu1 %v3529_v41 }
  0xaf   : > { %2845 = vmatprep.mubr.bf16.mxu1 %v3532_v62 }
  0xb1   : > { %2822 = vmatmul.mubr.bf16.vlgmr.msra.gmra.mxu0 %v3525_v58 }
  0xb2   : > { %2829 = vmatprep.mubr.bf16.mxu0 %v3528_v57 }
  0xb6   : > { %2846 = vmatmul.mubr.bf16.gmra.mxu1 %v3531_v63 }
  0xb9   : > { %2830 = vmatmul.mubr.bf16.gmra.mxu0 %v3527_v61 }
  0xed   : > { %v3607_v11 = vpop.f32.mrf.mxu0 }
  0xee   : > { %v3647_v6 = vpop.f32.mrf.mxu1 }
  0xef   : > { %v3608_v13 = vpop.f32.mrf.mxu0 }
  0xf0   : > { %v3648_v35 = vpop.f32.mrf.mxu1  ;;  %v3609_v33 = vadd.f32 %v3608_v13, %v3607_v11 }
  0xf1   : > { %v3649_v8 = vadd.f32 %v3648_v35, %v3647_v6  ;;  %v3610_v2 = vpop.f32.mrf.mxu0 }
  0xf2   : > { %v3650_v9 = vpop.f32.mrf.mxu1 }
  0xf3   : > { %v733_v19 = vadd.f32 %v3649_v8, %v3609_v33  ;;  %v3611_v15 = vpop.f32.mrf.mxu0 }
  0xf4   : > { %v3651_v10 = vpop.f32.mrf.mxu1  ;;  %v3612_v21 = vadd.f32 %v3611_v15, %v3610_v2 }
  0xf5   : > { %v3652_v12 = vadd.f32 %v3651_v10, %v3650_v9  ;;  %v3613_v25 = vpop.f32.mrf.mxu0 }
  0xf6   : > { %v3653_v45 = vpop.f32.mrf.mxu1 }
  0xf7   : > { %v736_v23 = vadd.f32 %v3652_v12, %v3612_v21  ;;  %v3614_v26 = vpop.f32.mrf.mxu0 }
  0xf8   : > { %v3654_v20 = vpop.f32.mrf.mxu1  ;;  %v3615_v14 = vadd.f32 %v3614_v26, %v3613_v25 }
  0xf9   : > { %v3655_v18 = vadd.f32 %v3654_v20, %v3653_v45  ;;  %v3616_v1 = vpop.f32.mrf.mxu0 }
  0xfa   : > { %v3656_v22 = vpop.f32.mrf.mxu1 }
  0xfb   : > { %v741_v31 = vadd.f32 %v3655_v18, %v3615_v14  ;;  %v3617_v37 = vpop.f32.mrf.mxu0 }
  0xfc   : > { %v3657_v24 = vpop.f32.mrf.mxu1  ;;  %v3618_v40 = vadd.f32 %v3617_v37, %v3616_v1 }
  0xfd   : > { %v3658_v28 = vadd.f32 %v3657_v24, %v3656_v22  ;;  %v3619_v44 = vpop.f32.mrf.mxu0 }
  0xfe   : > { %v3659_v29 = vpop.f32.mrf.mxu1 }
  0xff   : > { %v744_v39 = vadd.f32 %v3658_v28, %v3618_v40  ;;  %v3620_v46 = vpop.f32.mrf.mxu0 }
 0x100   : > { %v3660_v30 = vpop.f32.mrf.mxu1  ;;  %v3621_v47 = vadd.f32 %v3620_v46, %v3619_v44 }
 0x101   : > { %v3661_v36 = vadd.f32 %v3660_v30, %v3659_v29  ;;  %v3622_v48 = vpop.f32.mrf.mxu0 }
 0x102   : > { %v3662_v3 = vpop.f32.mrf.mxu1 }
 0x103   : > { %v749_v16 = vadd.f32 %v3661_v36, %v3621_v47  ;;  %v3623_v4 = vpop.f32.mrf.mxu0 }
 0x104   : > { %v3663_v38 = vpop.f32.mrf.mxu1  ;;  %v3624_v5 = vadd.f32 %v3623_v4, %v3622_v48 }
 0x105   : > { %v3664_v32 = vadd.f32 %v3663_v38, %v3662_v3 }
 0x106   : > { %v3665_v0 = vpop.f32.mrf.mxu1 }
 0x107   : > { %v752_v51 = vadd.f32 %v3664_v32, %v3624_v5 }
 0x108   : > { %v3666_v49 = vpop.f32.mrf.mxu1 }
 0x109   : > { %v3667_v52 = vadd.f32 %v3666_v49, %v3665_v0  ;;  %v3625_v55 = vpop.f32.mrf.mxu0 }
 0x10a   : > { %v3668_v17 = vpop.f32.mrf.mxu1 }
 0x10b   : > { %v3626_v56 = vpop.f32.mrf.mxu0 }
 0x10c   : > { %v3669_v53 = vpop.f32.mrf.mxu1  ;;  %v3627_v58 = vadd.f32 %v3626_v56, %v3625_v55 }
 0x10d   : > { %v3670_v54 = vadd.f32 %v3669_v53, %v3668_v17  ;;  %v3628_v59 = vpop.f32.mrf.mxu0 }
 0x10e   : > { %v3727_v42 = vpop.f32.mrf.mxu1  ;;  %v757_v57 = vadd.f32 %v3667_v52, %v3627_v58 }
 0x10f   : > { %v3629_v27 = vpop.f32.mrf.mxu0 }
 0x110   : > { %v3728_v60 = vpop.f32.mrf.mxu1  ;;  %v3630_v43 = vadd.f32 %v3629_v27, %v3628_v59 }
 0x111   : > { %v3729_v50 = vadd.f32 %v3728_v60, %v3727_v42  ;;  %v3687_v34 = vpop.f32.mrf.mxu0 }
 0x112   : > { %v3730_v7 = vpop.f32.mrf.mxu1  ;;  %v760_v61 = vadd.f32 %v3670_v54, %v3630_v43 }
 0x113   : > { %v3688_v63 = vpop.f32.mrf.mxu0 }
 0x114   : > { %v3731_v41 = vpop.f32.mrf.mxu1  ;;  %v3689_v35 = vadd.f32 %v3688_v63, %v3687_v34 }
 0x115   : > { %v3732_v62 = vadd.f32 %v3731_v41, %v3730_v7  ;;  %v3690_v8 = vpop.f32.mrf.mxu0 }
 0x116   : > { %v3733_v6 = vpop.f32.mrf.mxu1  ;;  %v1048_v10 = vadd.f32 %v3689_v35, %v733_v19 }
 0x117   : > { %v3691_v12 = vpop.f32.mrf.mxu0 }
 0x118   : > { %v3734_v9 = vpop.f32.mrf.mxu1  ;;  %v4986_v33 = vadd.f32 %v3729_v50, %v1048_v10  ;;  %v3692_v45 = vadd.f32 %v3691_v12, %v3690_v8 }
 0x119   : > { %v3735_v11 = vadd.f32 %v3734_v9, %v3733_v6  ;;  %v3693_v2 = vpop.f32.mrf.mxu0 }
 0x11a   : > { %v3736_v13 = vpop.f32.mrf.mxu1  ;;  %v1049_v15 = vadd.f32 %v3692_v45, %v736_v23 }
 0x11b   : > { %v3694_v21 = vpop.f32.mrf.mxu0 }
 0x11c   : > { %v3737_v20 = vpop.f32.mrf.mxu1  ;;  %v4988_v24 = vadd.f32 %v3732_v62, %v1049_v15  ;;  %v3695_v28 = vadd.f32 %v3694_v21, %v3693_v2 }
 0x11d   : > { %v3738_v18 = vadd.f32 %v3737_v20, %v3736_v13  ;;  %v3696_v25 = vpop.f32.mrf.mxu0 }
 0x11e   : > { %v3739_v22 = vpop.f32.mrf.mxu1  ;;  %v1050_v29 = vadd.f32 %v3695_v28, %v741_v31 }
 0x11f   : > { %v3697_v19 = vpop.f32.mrf.mxu0 }
 0x120   : > { %v3740_v26 = vpop.f32.mrf.mxu1  ;;  %v4990_v30 = vadd.f32 %v3735_v11, %v1050_v29  ;;  %v3698_v36 = vadd.f32 %v3697_v19, %v3696_v25 }
 0x121   : > { %v3741_v14 = vadd.f32 %v3740_v26, %v3739_v22  ;;  %v3699_v37 = vpop.f32.mrf.mxu0 }
 0x122   : > { %v3742_v1 = vpop.f32.mrf.mxu1  ;;  %v1051_v40 = vadd.f32 %v3698_v36, %v744_v39 }
 0x123   : > { %v3700_v23 = vpop.f32.mrf.mxu0 }
 0x124   : > { %v3743_v3 = vpop.f32.mrf.mxu1  ;;  %v4992_v32 = vadd.f32 %v3738_v18, %v1051_v40  ;;  %v3701_v44 = vadd.f32 %v3700_v23, %v3699_v37 }
 0x125   : > { %v3744_v38 = vadd.f32 %v3743_v3, %v3742_v1  ;;  %v3702_v46 = vpop.f32.mrf.mxu0 }
 0x126   : > { %v1052_v0 = vadd.f32 %v3701_v44, %v749_v16  ;;  %v3745_v47 = vpop.f32.mrf.mxu1 }
 0x127   : > { %v3703_v48 = vpop.f32.mrf.mxu0 }
 0x128   : > { %v4994_v49 = vadd.f32 %v3741_v14, %v1052_v0  ;;  %v3704_v31 = vadd.f32 %v3703_v48, %v3702_v46  ;;  %v3746_v52 = vpop.f32.mrf.mxu1 }
 0x129   : > { %v3705_v4 = vpop.f32.mrf.mxu0  ;;  %v3747_v17 = vadd.f32 %v3746_v52, %v3745_v47 }
 0x12a   : > { %v1053_v5 = vadd.f32 %v3704_v31, %v752_v51  ;;  %v3748_v53 = vpop.f32.mrf.mxu1 }
 0x12b   : > { %v3706_v54 = vpop.f32.mrf.mxu0 }
 0x12c   : > { %v4996_v55 = vadd.f32 %v3744_v38, %v1053_v5  ;;  %v3707_v39 = vadd.f32 %v3706_v54, %v3705_v4  ;;  %v3749_v56 = vpop.f32.mrf.mxu1 }
 0x12d   : > { %v3708_v42 = vpop.f32.mrf.mxu0  ;;  %v3750_v58 = vadd.f32 %v3749_v56, %v3748_v53 }
 0x12e   : > { %v1054_v59 = vadd.f32 %v3707_v39, %v757_v57  ;;  %v3807_v7 = vpop.f32.mrf.mxu1 }
 0x12f   : > { %v3709_v60 = vpop.f32.mrf.mxu0 }
 0x130   : > { %v4998_v16 = vadd.f32 %v3747_v17, %v1054_v59  ;;  %v3710_v50 = vadd.f32 %v3709_v60, %v3708_v42  ;;  %v3808_v41 = vpop.f32.mrf.mxu1 }
 0x131   : > { %v3767_v43 = vpop.f32.mrf.mxu0 }
 0x132   : > { %v1055_v27 = vadd.f32 %v3710_v50, %v760_v61  ;;  %v5002_v62 = vpop.f32.mrf.mxu1 }
 0x133   : > { %v3768_v51 = vpop.f32.mrf.mxu0 }
 0x134   : > { %v5000_v34 = vadd.f32 %v3750_v58, %v1055_v27  ;;  %v5004_v6 = vpop.f32.mrf.mxu1  ;;  %v3769_v42 = vadd.f32 %v3768_v51, %v3767_v43 }
 0x135   : > { %v3770_v63 = vpop.f32.mrf.mxu0 }
 0x136   : > { %5162 = vst [vmem:[#allocation2_spill] sm:$0xff] %v5000_v34  ;;  %v5006_v8 = vpop.f32.mrf.mxu1  ;;  %v1661_v27 = vadd.f32 %v3769_v42, %v4986_v33 }
 0x137   : > { %v3771_v35 = vpop.f32.mrf.mxu0 }
 0x138   : > { %v5008_v9 = vpop.f32.mrf.mxu1 }
 0x139   : > { %v3773_v57 = vpop.f32.mrf.mxu0 }
 0x13a   : > { %v5010_v11 = vpop.f32.mrf.mxu1 }
 0x13b   : > { %v3774_v10 = vpop.f32.mrf.mxu0 }
 0x13c   : > { %v5012_v12 = vpop.f32.mrf.mxu1 }
 0x13d   : > { %v3776_v61 = vpop.f32.mrf.mxu0 }
 0x13e   : > { %v5014_v45 = vpop.f32.mrf.mxu1 }
 0x13f   : > { %v3777_v13 = vpop.f32.mrf.mxu0 }
 0x140   : > { %v5016_v20 = vpop.f32.mrf.mxu1 }
 0x141   : > { %v3779_v2 = vpop.f32.mrf.mxu0 }
 0x142   : > { %v5018_v18 = vpop.f32.mrf.mxu1 }
 0x143   : > { %v3780_v15 = vpop.f32.mrf.mxu0 }
 0x144   : > { %v5020_v28 = vpop.f32.mrf.mxu1 }
 0x145   : > { %v3782_v21 = vpop.f32.mrf.mxu0 }
 0x146   : > { %v5024_v26 = vpop.f32.mrf.mxu1 }
 0x147   : > { %v3783_v22 = vpop.f32.mrf.mxu0  ;;  %5163 = vst [vmem:[#allocation3_spill] sm:$0xff] %v5024_v26  ;;  %v3775_v26 = vadd.f32 %v3774_v10, %v3773_v57 }
 0x148   : > { %v5028_v14 = vpop.f32.mrf.mxu1 }
 0x149   : > { %v5022_v25 = vpop.f32.mrf.mxu0  ;;  %5164 = vst [vmem:[#allocation4_spill] sm:$0xff] %v5028_v14  ;;  %v1663_v10 = vadd.f32 %v3775_v26, %v4990_v30  ;;  %v3815_v30 = vadd.f32 %v5008_v9, %v5006_v8  ;;  %v3818_v8 = vadd.f32 %v5012_v12, %v5010_v11 }
 0x14a   : > { %v5034_v36 = vpop.f32.mrf.mxu1 }
 0x14b   : > { %v5026_v29 = vpop.f32.mrf.mxu0  ;;  %5165 = vst [vmem:[#allocation5_spill] sm:$0xff] %v5034_v36 }
 0x14c   : > { %v5036_v40 = vpop.f32.mrf.mxu1 }
 0x14d   : > { %v5030_v19 = vpop.f32.mrf.mxu0  ;;  %5166 = vst [vmem:[#allocation6_spill] sm:$0xff] %v5036_v40  ;;  %v3772_v40 = vadd.f32 %v3771_v35, %v3770_v63  ;;  %v3812_v63 = vadd.f32 %v5004_v6, %v5002_v62  ;;  %v3778_v35 = vadd.f32 %v3777_v13, %v3776_v61 }
 0x14e   : > { %v3887_v44 = vpop.f32.mrf.mxu1 }
 0x14f   : > { %v5032_v1 = vpop.f32.mrf.mxu0  ;;  %v1662_v51 = vadd.f32 %v3772_v40, %v4988_v24 }
 0x150   : > { %v3888_v0 = vpop.f32.mrf.mxu1  ;;  %v3790_v11 = vadd.f32 %v5032_v1, %v5030_v19 }
 0x151   : > { %v3847_v37 = vpop.f32.mrf.mxu0  ;;  %v3889_v57 = vadd.f32 %v3888_v0, %v3887_v44  ;;  %v1953_v0 = vadd.f32 %v3815_v30, %v1663_v10 }
 0x152   : > { %v3890_v48 = vpop.f32.mrf.mxu1 }
 0x153   : > { %v3848_v3 = vpop.f32.mrf.mxu0 }
 0x154   : > { %v3891_v52 = vpop.f32.mrf.mxu1  ;;  %v5182_v30 = vld [vmem:[#allocation6_spill] sm:$0xff] }
 0x155   : > { %v3850_v38 = vpop.f32.mrf.mxu0 }
 0x156   : > { %v5042_v17 = vpop.f32.mrf.mxu1 }
 0x157   : > { %v3851_v23 = vpop.f32.mrf.mxu0  ;;  %5167 = vst [vmem:[#allocation7_spill] sm:$0xff] %v5042_v17  ;;  %v3809_v17 = vadd.f32 %v3808_v41, %v3807_v7 }
 0x158   : > { %v5044_v53 = vpop.f32.mrf.mxu1  ;;  %v3852_v41 = vadd.f32 %v3851_v23, %v3850_v38  ;;  %v3824_v38 = vadd.f32 %v5020_v28, %v5018_v18  ;;  %v3892_v23 = vadd.f32 %v3891_v52, %v3890_v48 }
 0x159   : > { %v3853_v46 = vpop.f32.mrf.mxu0  ;;  %5168 = vst [vmem:[#allocation8_spill] sm:$0xff] %v5044_v53  ;;  %v3849_v53 = vadd.f32 %v3848_v3, %v3847_v37  ;;  %v1951_v43 = vadd.f32 %v3809_v17, %v1661_v27  ;;  %v1952_v17 = vadd.f32 %v3812_v63, %v1662_v51  ;;  %v5176_v27 = vld [vmem:[#allocation4_spill] sm:$0xff] }
 0x15a   : > { %v5046_v39 = vpop.f32.mrf.mxu1 }
 0x15b   : > { %v3854_v47 = vpop.f32.mrf.mxu0  ;;  %5169 = vst [vmem:[#allocation9_spill] sm:$0xff] %v5046_v39  ;;  %v2202_v7 = vadd.f32 %v3849_v53, %v1951_v43  ;;  %v2203_v13 = vadd.f32 %v3852_v41, %v1952_v17 }
 0x15c   : > { %v5048_v58 = vpop.f32.mrf.mxu1 }
 0x15d   : > { %v5038_v31 = vpop.f32.mrf.mxu0  ;;  %5170 = vst [vmem:[#allocation10_spill] sm:$0xff] %v5048_v58  ;;  %v3781_v58 = vadd.f32 %v3780_v15, %v3779_v2  ;;  %v3821_v2 = vadd.f32 %v5016_v20, %v5014_v45  ;;  %v2564_v61 = vadd.f32 %v3889_v57, %v2202_v7  ;;  %v3855_v45 = vadd.f32 %v3854_v47, %v3853_v46 }
 0x15e   : > { %v5050_v60 = vpop.f32.mrf.mxu1  ;;  %v2565_v47 = vadd.f32 %v3892_v23, %v2203_v13 }
 0x15f   : > { %v5040_v4 = vpop.f32.mrf.mxu0  ;;  %5171 = vst [vmem:[#allocation11_spill] sm:$0xff] %v5050_v60  ;;  %v3784_v60 = vadd.f32 %v3783_v22, %v3782_v21  ;;  %v1665_v24 = vadd.f32 %v3781_v58, %v4994_v49  ;;  %v1664_v49 = vadd.f32 %v3778_v35, %v4992_v32  ;;  %v2204_v12 = vadd.f32 %v3855_v45, %v1953_v0 }
 0x160   : > { %v3900_v36 = vpop.f32.mrf.mxu1  ;;  %v3858_v48 = vadd.f32 %v5040_v4, %v5038_v31  ;;  %v5178_v51 = vld [vmem:[#allocation8_spill] sm:$0xff] }
 0x161   : > { %v3859_v5 = vpop.f32.mrf.mxu0  ;;  %v1666_v15 = vadd.f32 %v3784_v60, %v4996_v55  ;;  %v3787_v55 = vadd.f32 %v5026_v29, %v5022_v25  ;;  %v1955_v40 = vadd.f32 %v3821_v2, %v1665_v24  ;;  %v5100_v25 = vld [vmem:[%s5156_s2] ss:$0 sm:$0xff]  ;;  %v5175_v60 = vld [vmem:[#allocation3_spill] sm:$0xff] }
 0x162   : > { %v5057_v14 = vpop.f32.mrf.mxu1  ;;  %v3827_v43 = vadd.f32 %v5176_v27, %v5175_v60  ;;  %v5180_v24 = vld [vmem:[#allocation2_spill] sm:$0xff] }
 0x163   : > { %v3860_v54 = vpop.f32.mrf.mxu0  ;;  %v1956_v46 = vadd.f32 %v3824_v38, %v1666_v15  ;;  %v1667_v28 = vadd.f32 %v3787_v55, %v4998_v16  ;;  %v5177_v16 = vld [vmem:[#allocation7_spill] sm:$0xff]  ;;  %v1668_v57 = vadd.f32 %v3790_v11, %v5180_v24  ;;  %v5183_v55 = vld [vmem:[#allocation9_spill] sm:$0xff] }
 0x164   : > { %v3861_v21 = vadd.f32 %v3860_v54, %v3859_v5  ;;  %v1954_v54 = vadd.f32 %v3818_v8, %v1664_v49  ;;  %v3895_v63 = vadd.f32 %v5178_v51, %v5177_v16  ;;  %v5184_v45 = vld [vmem:[#allocation10_spill] sm:$0xff] }
 0x165   : > { %v3862_v56 = vpop.f32.mrf.mxu0  ;;  %v1957_v17 = vadd.f32 %v3827_v43, %v1667_v28 }
 0x166   : > { %v2206_v5 = vadd.f32 %v3861_v21, %v1955_v40  ;;  %v2566_v10 = vadd.f32 %v3895_v63, %v2204_v12  ;;  %v2205_v2 = vadd.f32 %v3858_v48, %v1954_v54 }
 0x167   : > { %v3863_v59 = vpop.f32.mrf.mxu0 }
 0x168   : > { %v3864_v32 = vadd.f32 %v3863_v59, %v3862_v56  ;;  %v5174_v56 = vld [vmem:[#allocation11_spill] sm:$0xff] }
 0x169   : > { %v5052_v50 = vpop.f32.mrf.mxu0  ;;  %v3901_v42 = vadd.f32 %v3900_v36, %v5174_v56 }
 0x16a   : > { %5172 = vst [vmem:[#allocation12_spill] sm:$0xff] %v5052_v50  ;;  %v5062_v50 = vpop.f32.mrf.mxu1  ;;  %v2207_v19 = vadd.f32 %v3864_v32, %v1956_v46 }
 0x16b   : > { %v5055_v34 = vpop.f32.mrf.mxu0  ;;  %v2568_v4 = vadd.f32 %v3901_v42, %v2206_v5 }
 0x16c   : > { %v5068_v37 = vpop.f32.mrf.mxu1 }
 0x16d   : > { %v5059_v39 = vpop.f32.mrf.mxu0 }
 0x16e   : > { %v5076_v62 = vpop.f32.mrf.mxu1 }
 0x16f   : > { %v5064_v33 = vpop.f32.mrf.mxu0  ;;  %v3907_v5 = vadd.f32 %v5076_v62, %v5068_v37 }
 0x170   : > { %v5089_v20 = vpop.f32.mrf.mxu1 }
 0x171   : > { %v3927_v3 = vpop.f32.mrf.mxu0  ;;  %v5179_v1 = vld [vmem:[#allocation12_spill] sm:$0xff] }
 0x172   : > { %v5095_v9 = vpop.f32.mrf.mxu1  ;;  %v3867_v7 = vadd.f32 %v5055_v34, %v5179_v1 }
 0x173   : > { %v3928_v6 = vpop.f32.mrf.mxu0  ;;  %v3910_v37 = vadd.f32 %v5095_v9, %v5089_v20 }
 0x174   : > { %v3929_v22 = vadd.f32 %v3928_v6, %v3927_v3  ;;  %v3939_v52 = vpop.f32.mrf.mxu1  ;;  %v2208_v40 = vadd.f32 %v3867_v7, %v1957_v17 }
 0x175   : > { %v3930_v26 = vpop.f32.mrf.mxu0 }
 0x176   : > { %v2854_v44 = vadd.f32 %v3929_v22, %v2564_v61  ;;  %v3940_v41 = vpop.f32.mrf.mxu1  ;;  %v3904_v61 = vadd.f32 %v5062_v50, %v5057_v14  ;;  %v5181_v22 = vld [vmem:[#allocation5_spill] sm:$0xff]  ;;  %v3870_v50 = vadd.f32 %v5064_v33, %v5059_v39 }
 0x177   : > { %v3931_v29 = vpop.f32.mrf.mxu0  ;;  %v3941_v35 = vadd.f32 %v3940_v41, %v3939_v52  ;;  %v3830_v49 = vadd.f32 %v5182_v30, %v5181_v22  ;;  %v2570_v52 = vadd.f32 %v3907_v5, %v2208_v40 }
 0x178   : > { %v3932_v18 = vadd.f32 %v3931_v29, %v3930_v26  ;;  %v2869_v58 = vadd.f32 %v5100_v25, %v2854_v44  ;;  %v3942_v15 = vpop.f32.mrf.mxu1  ;;  %v3898_v26 = vadd.f32 %v5184_v45, %v5183_v55  ;;  %v2569_v14 = vadd.f32 %v3904_v61, %v2207_v19 }
 0x179   : > { %v3933_v53 = vpop.f32.mrf.mxu0  ;;  %v2858_v34 = vadd.f32 %v3941_v35, %v2568_v4 }
 0x17a   : > { %v2855_v59 = vadd.f32 %v3932_v18, %v2565_v47  ;;  %v2877_v13 = vmax.f32 %v2869_v58, 0.0  ;;  %v3943_v38 = vpop.f32.mrf.mxu1  ;;  %v2567_v32 = vadd.f32 %v3898_v26, %v2205_v2  ;;  %v1958_v47 = vadd.f32 %v3830_v49, %v1668_v57 }
 0x17b   : > { %v3934_v31 = vpop.f32.mrf.mxu0  ;;  %v3944_v8 = vadd.f32 %v3943_v38, %v3942_v15  ;;  %v2873_v18 = vadd.f32 %v5100_v25, %v2858_v34 }
 0x17c   : > { %v2870_v36 = vadd.f32 %v5100_v25, %v2855_v59  ;;  %v3935_v3 = vadd.f32 %v3934_v31, %v3933_v53  ;;  %v3945_v29 = vpop.f32.mrf.mxu1  ;;  %v2209_v53 = vadd.f32 %v3870_v50, %v1958_v47 }
 0x17d   : > { %v3936_v6 = vpop.f32.mrf.mxu0  ;;  %v2859_v28 = vadd.f32 %v3944_v8, %v2569_v14  ;;  %v2881_v62 = vmax.f32 %v2873_v18, 0.0 }
 0x17e   : > { %v2878_v21 = vmax.f32 %v2870_v36, 0.0  ;;  %v2856_v23 = vadd.f32 %v3935_v3, %v2566_v10  ;;  %v3946_v12 = vpop.f32.mrf.mxu1  ;;  %v2571_v43 = vadd.f32 %v3910_v37, %v2209_v53 }
 0x17f   : > { %v3937_v44 = vpop.f32.mrf.mxu0  ;;  %v2874_v39 = vadd.f32 %v5100_v25, %v2859_v28  ;;  %v3947_v33 = vadd.f32 %v3946_v12, %v3945_v29 }
 0x180   : > { %v3571_v0 = vpack.c.bf16 %v2878_v21, %v2877_v13  ;;  %v3938_v46 = vadd.f32 %v3937_v44, %v3936_v6  ;;  %v2871_v11 = vadd.f32 %v5100_v25, %v2856_v23  ;;  %v3948_v54 = vpop.f32.mrf.mxu1 }
 0x181   : > { %v2882_v42 = vmax.f32 %v2874_v39, 0.0  ;;  %v2860_v58 = vadd.f32 %v3947_v33, %v2570_v52 }
 0x182   : > { %3572 = vst [vmem:[%s5133_s21] sm:$0xff] %v3571_v0   ;;  %v2857_v48 = vadd.f32 %v3938_v46, %v2567_v32  ;;  %v2879_v59 = vmax.f32 %v2871_v11, 0.0  ;;  %v3949_v27 = vpop.f32.mrf.mxu1 }
 0x183   : > { %v3581_v16 = vpack.c.bf16 %v2882_v42, %v2881_v62  ;;  %v3950_v51 = vadd.f32 %v3949_v27, %v3948_v54  ;;  %v2875_v19 = vadd.f32 %v5100_v25, %v2860_v58 }
 0x184   : > { %v2872_v56 = vadd.f32 %v5100_v25, %v2857_v48 }
 0x185   : > { %3589 = vst [vmem:[%s5133_s21 + $0x10] sm:$0xff] %v3581_v16   ;;  %v2861_v1 = vadd.f32 %v3950_v51, %v2571_v43  ;;  %v2883_v41 = vmax.f32 %v2875_v19, 0.0 }
 0x186   : > { %v2880_v60 = vmax.f32 %v2872_v56, 0.0 }
 0x187   : > { %v2876_v7 = vadd.f32 %v5100_v25, %v2861_v1 }
 0x188   : > { %v3576_v63 = vpack.c.bf16 %v2880_v60, %v2879_v59 }
 0x189   : > { %v2884_v20 = vmax.f32 %v2876_v7, 0.0 }
 0x18a   : > { %3588 = vst [vmem:[%s5133_s21 + $0x8] sm:$0xff] %v3576_v63  }
 0x18b   : > { %v3586_v9 = vpack.c.bf16 %v2884_v20, %v2883_v41 }
 0x18d   : > { %3590 = vst [vmem:[%s5133_s21 + $0x18] sm:$0xff] %v3586_v9  }
 0x18e PF: > { %s13_s12 = sadd.s32 1, %s4150_s12  }
 0x18f   : > { %p10_p5 = scmp.ge.s32.totalorder %s13_s12, 4  }
 0x191   :  { %12 = sbr.rel (!%p10_p5) target bundleno = 1 (0x1), region = 72 }

// kernel: net_forward.7
= control target key start
LH: loop header
LB: loop body
LE: loop exit
PB: predicated region body
PF: predicated region fallthrough
CT: control target
= control target key end

     0   :  { %s2240_s18 = smov 0   ;;  %s2242_s19 = smov 0   ;;  %s2530_s0 = inlined_call_operand.vmem [shape: bf16[8,4096], index: 0, kind: input, shape index: {}]   ;;  %s2531_s1 = inlined_call_operand.vmem [shape: bf16[4096,512], index: 1, kind: input, shape index: {}]   ;;  %s2532_s2 = inlined_call_operand.vmem [shape: f32[1,512], index: 2, kind: input, shape index: {}]   ;;  %s2533_s3 = inlined_call_operand.vmem [shape: bf16[512,128], index: 3, kind: input, shape index: {}]   ;;  %s2534_s4 = inlined_call_operand.vmem [shape: f32[1,128], index: 4, kind: input, shape index: {}]   ;;  %s2535_s5 = inlined_call_operand.vmem [shape: f32[8,128], index: 5, kind: output, shape index: {}]  }
   0x1   :  { %s2244_s20 = smov 0  }
   0x2 LB: > { %s24_s21 = sadd.s32 1, %s2203_s19  ;;  %p1711_p0 = scmp.ge.s32.totalorder %s2207_s20, 1  ;;  %s2207_s20 = sphi %s2244_s20, %s15_s20   ;;  %s2203_s19 = sphi %s2242_s19, %s2537_s19   ;;  %s2199_s18 = sphi %s2240_s18, %s2536_s18  }
   0x3   : > { %p25_p1 = scmp.ge.s32.totalorder %s24_s21, 8  ;;  %p218_p2 = scmp.lt.s32.totalorder %s2207_s20, 9 }
   0x5   : > { %s2539_s21 = smov (%p25_p1, %s24_s21), 0  ;;  %p219_p3 = pnand %p1711_p0, %p218_p2 }
   0x6   : > { %s1712_s22 = sshll.u32 (!%p219_p3), %s2199_s18, 2  ;;  %s1714_s23 = sshll.u32 (!%p219_p3), %s2199_s18, 6 }
   0x7   : > { %222 = sbr.rel (%p219_p3) target bundleno = 589 (0x24d), region = 40  ;;  %p258_p4 = scmp.lt.s32.totalorder (!%p219_p3), %s1712_s22, 31 }
   0x8   : > { %p266_p5 = scmp.lt.s32.totalorder (!%p219_p3), %s1714_s23, 511  ;;  %p1717_p6 = scmp.ne.s32.totalorder (!%p219_p3), %s2199_s18, 0 }
   0xc   : > { %s2541_s22 = smov (!%p258_p4, %s1712_s22), 31  ;;  %s2543_s23 = smov (!%p266_p5, %s1714_s23), 511 }
   0xd   : > { %s1713_s24 = sshll.u32 %s2541_s22, 2  ;;  %s1887_s28 = sshll.u32 %s2543_s23, 4 }
   0xe   : > { %s2265_s27 = scalar_lea.vmem %s2530_s0, %s1713_s24  ;;  %s2270_s6 = scalar_lea.vmem %s2531_s1, %s1887_s28 }
   0xf   : > { %280 = sbr.rel (%p1717_p6) target bundleno = 23 (0x17), region = 44 }
  0x14   : > { %v2209_v0 = vmov 0.0  }
  0x15   : > { %281 = vst [vmem:[#allocation2 + $0x10] sm:$0xff] %v2209_v0  ;;  %282 = vst [vmem:[#allocation2] sm:$0xff] %v2209_v0 }
  0x16   : > { %283 = vst [vmem:[#allocation2 + $0x18] sm:$0xff] %v2209_v0  ;;  %284 = vst [vmem:[#allocation2 + $0x8] sm:$0xff] %v2209_v0 }
  0x17 PF: > { %v1957_v1 = vld [vmem:[%s2270_s6 + $0xe4] ss:$16 sps:$4 sm:$0xff]   ;;  %v1961_v3 = vld [vmem:[%s2270_s6 + $0xe0] ss:$16 sps:$4 sm:$0xff]   ;;  %v290_v49 = vld [vmem:[%s2265_s27 + $0x8] sm:$0xff]  ;;  %p1850_p7 = scmp.ne.s32.totalorder %s2199_s18, 7 }
  0x18   : > { %v1959_v2 = vld [vmem:[%s2270_s6 + $0x2e4] ss:$16 sps:$4 sm:$0xff]   ;;  %1073 = vmatprep.subr.bf16.mxu0 %v1957_v1  ;;  %v1962_v4 = vld [vmem:[%s2270_s6 + $0x2e0] ss:$16 sps:$4 sm:$0xff]   ;;  %v1721_v52 = vcombine.high %v290_v49, %v290_v49 }
  0x19   : > { %1114 = vmatprep.subr.bf16.mxu1 %v1959_v2  ;;  %v1963_v5 = vld [vmem:[%s2270_s6 + $0xc4] ss:$16 sps:$4 sm:$0xff]   ;;  %1074 = vmatpush1.bf16.msra.mxu0 %v1961_v3  ;;  %v1967_v7 = vld [vmem:[%s2270_s6 + $0xc0] ss:$16 sps:$4 sm:$0xff]  }
  0x1a   : > { %1115 = vmatpush1.bf16.msra.mxu1 %v1962_v4  ;;  %v1965_v6 = vld [vmem:[%s2270_s6 + $0x2c4] ss:$16 sps:$4 sm:$0xff]   ;;  %1075 = vmatprep.subr.bf16.mxu0 %v1963_v5  ;;  %v1968_v8 = vld [vmem:[%s2270_s6 + $0x2c0] ss:$16 sps:$4 sm:$0xff]   ;;  %v2059_v5 = vld [vmem:[%s2270_s6 + $0xec] ss:$16 sps:$4 sm:$0xff]  }
  0x1b   : > { %1116 = vmatprep.subr.bf16.mxu1 %v1965_v6  ;;  %v1969_v9 = vld [vmem:[%s2270_s6 + $0xa4] ss:$16 sps:$4 sm:$0xff]   ;;  %v1973_v11 = vld [vmem:[%s2270_s6 + $0xa0] ss:$16 sps:$4 sm:$0xff]   ;;  %1146 = vmatprep.mubr.bf16.mxu1 %v1721_v52  ;;  %v2062_v6 = vld [vmem:[%s2270_s6 + $0x2ec] ss:$16 sps:$4 sm:$0xff]  }
  0x1c   : > { %v1971_v10 = vld [vmem:[%s2270_s6 + $0x2a4] ss:$16 sps:$4 sm:$0xff]   ;;  %v1974_v12 = vld [vmem:[%s2270_s6 + $0x2a0] ss:$16 sps:$4 sm:$0xff]  }
  0x1d   : > { %1076 = vmatpush1.bf16.msra.mxu0 %v1967_v7  ;;  %v1975_v13 = vld [vmem:[%s2270_s6 + $0x84] ss:$16 sps:$4 sm:$0xff]   ;;  %v1979_v15 = vld [vmem:[%s2270_s6 + $0x80] ss:$16 sps:$4 sm:$0xff]  }
  0x1e   : > { %1117 = vmatpush1.bf16.msra.mxu1 %v1968_v8  ;;  %1077 = vmatprep.subr.bf16.mxu0 %v1969_v9  ;;  %v1977_v14 = vld [vmem:[%s2270_s6 + $0x284] ss:$16 sps:$4 sm:$0xff]   ;;  %v1980_v16 = vld [vmem:[%s2270_s6 + $0x280] ss:$16 sps:$4 sm:$0xff]   ;;  %v2346_v8 = vcombine.low %v290_v49, %v290_v49  ;;  %v2057_v9 = vld [vmem:[%s2270_s6 + $0xe8] ss:$16 sps:$4 sm:$0xff]  }
  0x1f   : > { %1118 = vmatprep.subr.bf16.mxu1 %v1971_v10  ;;  %v1981_v17 = vld [vmem:[%s2270_s6 + $0x64] ss:$16 sps:$4 sm:$0xff]   ;;  %v1985_v19 = vld [vmem:[%s2270_s6 + $0x60] ss:$16 sps:$4 sm:$0xff]   ;;  %v2060_v10 = vld [vmem:[%s2270_s6 + $0x2e8] ss:$16 sps:$4 sm:$0xff]  }
  0x20   : > { %v1983_v18 = vld [vmem:[%s2270_s6 + $0x264] ss:$16 sps:$4 sm:$0xff]   ;;  %v1986_v20 = vld [vmem:[%s2270_s6 + $0x260] ss:$16 sps:$4 sm:$0xff]   ;;  %v2117_v49 = vld [vmem:[%s2270_s6 + $0x1a8] ss:$16 sps:$4 sm:$0xff]  }
  0x21   : > { %1078 = vmatpush1.bf16.msra.mxu0 %v1973_v11  ;;  %v1987_v21 = vld [vmem:[%s2270_s6 + $0x44] ss:$16 sps:$4 sm:$0xff]   ;;  %v1991_v23 = vld [vmem:[%s2270_s6 + $0x40] ss:$16 sps:$4 sm:$0xff]   ;;  %v2065_v11 = vld [vmem:[%s2270_s6 + $0xcc] ss:$16 sps:$4 sm:$0xff]  }
  0x22   : > { %1119 = vmatpush1.bf16.msra.mxu1 %v1974_v12  ;;  %1079 = vmatprep.subr.bf16.mxu0 %v1975_v13  ;;  %v1989_v22 = vld [vmem:[%s2270_s6 + $0x244] ss:$16 sps:$4 sm:$0xff]   ;;  %v1992_v24 = vld [vmem:[%s2270_s6 + $0x240] ss:$16 sps:$4 sm:$0xff]   ;;  %v2068_v12 = vld [vmem:[%s2270_s6 + $0x2cc] ss:$16 sps:$4 sm:$0xff]  }
  0x23   : > { %1120 = vmatprep.subr.bf16.mxu1 %v1977_v14  ;;  %v1993_v25 = vld [vmem:[%s2270_s6 + $0x24] ss:$16 sps:$4 sm:$0xff]   ;;  %v1997_v27 = vld [vmem:[%s2270_s6 + $0x20] ss:$16 sps:$4 sm:$0xff]   ;;  %v2063_v13 = vld [vmem:[%s2270_s6 + $0xc8] ss:$16 sps:$4 sm:$0xff]  }
  0x24   : > { %v1995_v26 = vld [vmem:[%s2270_s6 + $0x224] ss:$16 sps:$4 sm:$0xff]   ;;  %v1998_v28 = vld [vmem:[%s2270_s6 + $0x220] ss:$16 sps:$4 sm:$0xff]   ;;  %v2066_v14 = vld [vmem:[%s2270_s6 + $0x2c8] ss:$16 sps:$4 sm:$0xff]  }
  0x25   : > { %1080 = vmatpush1.bf16.msra.mxu0 %v1979_v15  ;;  %v1999_v29 = vld [vmem:[%s2270_s6 + $0x4] ss:$16 sps:$4 sm:$0xff]   ;;  %v2003_v31 = vld [vmem:[%s2270_s6] ss:$16 sps:$4 sm:$0xff]   ;;  %v2071_v15 = vld [vmem:[%s2270_s6 + $0xac] ss:$16 sps:$4 sm:$0xff]  }
  0x26   : > { %1121 = vmatpush1.bf16.msra.mxu1 %v1980_v16  ;;  %1081 = vmatprep.subr.bf16.mxu0 %v1981_v17  ;;  %v2001_v30 = vld [vmem:[%s2270_s6 + $0x204] ss:$16 sps:$4 sm:$0xff]   ;;  %v2004_v32 = vld [vmem:[%s2270_s6 + $0x200] ss:$16 sps:$4 sm:$0xff]   ;;  %v2074_v16 = vld [vmem:[%s2270_s6 + $0x2ac] ss:$16 sps:$4 sm:$0xff]  }
  0x27   : > { %1122 = vmatprep.subr.bf16.mxu1 %v1983_v18  ;;  %v2005_v33 = vld [vmem:[%s2270_s6 + $0x1e4] ss:$16 sps:$4 sm:$0xff]   ;;  %v2009_v35 = vld [vmem:[%s2270_s6 + $0x1e0] ss:$16 sps:$4 sm:$0xff]   ;;  %v2069_v17 = vld [vmem:[%s2270_s6 + $0xa8] ss:$16 sps:$4 sm:$0xff]  }
  0x28   : > { %v2007_v34 = vld [vmem:[%s2270_s6 + $0x3e4] ss:$16 sps:$4 sm:$0xff]   ;;  %v2010_v36 = vld [vmem:[%s2270_s6 + $0x3e0] ss:$16 sps:$4 sm:$0xff]   ;;  %v2072_v18 = vld [vmem:[%s2270_s6 + $0x2a8] ss:$16 sps:$4 sm:$0xff]  }
  0x29   : > { %1082 = vmatpush1.bf16.msra.mxu0 %v1985_v19  ;;  %v2011_v37 = vld [vmem:[%s2270_s6 + $0x1c4] ss:$16 sps:$4 sm:$0xff]   ;;  %v2015_v39 = vld [vmem:[%s2270_s6 + $0x1c0] ss:$16 sps:$4 sm:$0xff]   ;;  %v2077_v19 = vld [vmem:[%s2270_s6 + $0x8c] ss:$16 sps:$4 sm:$0xff]  }
  0x2a   : > { %1123 = vmatpush1.bf16.msra.mxu1 %v1986_v20  ;;  %1083 = vmatprep.subr.bf16.mxu0 %v1987_v21  ;;  %v2013_v38 = vld [vmem:[%s2270_s6 + $0x3c4] ss:$16 sps:$4 sm:$0xff]   ;;  %v2016_v40 = vld [vmem:[%s2270_s6 + $0x3c0] ss:$16 sps:$4 sm:$0xff]   ;;  %v2080_v20 = vld [vmem:[%s2270_s6 + $0x28c] ss:$16 sps:$4 sm:$0xff]  }
  0x2b   : > { %1124 = vmatprep.subr.bf16.mxu1 %v1989_v22  ;;  %v2017_v41 = vld [vmem:[%s2270_s6 + $0x1a4] ss:$16 sps:$4 sm:$0xff]   ;;  %v2021_v43 = vld [vmem:[%s2270_s6 + $0x1a0] ss:$16 sps:$4 sm:$0xff]   ;;  %v2075_v21 = vld [vmem:[%s2270_s6 + $0x88] ss:$16 sps:$4 sm:$0xff]  }
  0x2c   : > { %v2019_v42 = vld [vmem:[%s2270_s6 + $0x3a4] ss:$16 sps:$4 sm:$0xff]   ;;  %v2022_v44 = vld [vmem:[%s2270_s6 + $0x3a0] ss:$16 sps:$4 sm:$0xff]   ;;  %v2078_v22 = vld [vmem:[%s2270_s6 + $0x288] ss:$16 sps:$4 sm:$0xff]  }
  0x2d   : > { %1084 = vmatpush1.bf16.msra.mxu0 %v1991_v23  ;;  %v2023_v45 = vld [vmem:[%s2270_s6 + $0x184] ss:$16 sps:$4 sm:$0xff]   ;;  %v2027_v50 = vld [vmem:[%s2270_s6 + $0x180] ss:$16 sps:$4 sm:$0xff]   ;;  %v2083_v23 = vld [vmem:[%s2270_s6 + $0x6c] ss:$16 sps:$4 sm:$0xff]  }
  0x2e   : > { %1125 = vmatpush1.bf16.msra.mxu1 %v1992_v24  ;;  %1085 = vmatprep.subr.bf16.mxu0 %v1993_v25  ;;  %v2025_v46 = vld [vmem:[%s2270_s6 + $0x384] ss:$16 sps:$4 sm:$0xff]   ;;  %v2028_v51 = vld [vmem:[%s2270_s6 + $0x380] ss:$16 sps:$4 sm:$0xff]   ;;  %v2086_v24 = vld [vmem:[%s2270_s6 + $0x26c] ss:$16 sps:$4 sm:$0xff]  }
  0x2f   : > { %1126 = vmatprep.subr.bf16.mxu1 %v1995_v26  ;;  %v289_v47 = vld [vmem:[%s2265_s27] sm:$0xff]  ;;  %v2081_v25 = vld [vmem:[%s2270_s6 + $0x68] ss:$16 sps:$4 sm:$0xff]  }
  0x30   : > { %v2320_v48 = vcombine.high %v289_v47, %v289_v47  ;;  %v2029_v53 = vld [vmem:[%s2270_s6 + $0x164] ss:$16 sps:$4 sm:$0xff]   ;;  %v2033_v55 = vld [vmem:[%s2270_s6 + $0x160] ss:$16 sps:$4 sm:$0xff]   ;;  %v2344_v7 = vcombine.low %v289_v47, %v289_v47  ;;  %v2084_v26 = vld [vmem:[%s2270_s6 + $0x268] ss:$16 sps:$4 sm:$0xff]  }
  0x31   : > { %1086 = vmatpush1.bf16.msra.mxu0 %v1997_v27  ;;  %v2031_v54 = vld [vmem:[%s2270_s6 + $0x364] ss:$16 sps:$4 sm:$0xff]   ;;  %v2034_v56 = vld [vmem:[%s2270_s6 + $0x360] ss:$16 sps:$4 sm:$0xff]   ;;  %v2089_v27 = vld [vmem:[%s2270_s6 + $0x4c] ss:$16 sps:$4 sm:$0xff]  }
  0x32   : > { %1127 = vmatpush1.bf16.msra.mxu1 %v1998_v28  ;;  %1087 = vmatprep.subr.bf16.mxu0 %v1999_v29  ;;  %v2035_v57 = vld [vmem:[%s2270_s6 + $0x144] ss:$16 sps:$4 sm:$0xff]   ;;  %v2039_v59 = vld [vmem:[%s2270_s6 + $0x140] ss:$16 sps:$4 sm:$0xff]   ;;  %v2092_v28 = vld [vmem:[%s2270_s6 + $0x24c] ss:$16 sps:$4 sm:$0xff]  }
  0x33   : > { %1128 = vmatprep.subr.bf16.mxu1 %v2001_v30  ;;  %1105 = vmatprep.mubr.bf16.mxu0 %v2320_v48  ;;  %v2037_v58 = vld [vmem:[%s2270_s6 + $0x344] ss:$16 sps:$4 sm:$0xff]   ;;  %v2040_v60 = vld [vmem:[%s2270_s6 + $0x340] ss:$16 sps:$4 sm:$0xff]   ;;  %v2087_v29 = vld [vmem:[%s2270_s6 + $0x48] ss:$16 sps:$4 sm:$0xff]  }
  0x34   : > { %v2041_v61 = vld [vmem:[%s2270_s6 + $0x124] ss:$16 sps:$4 sm:$0xff]   ;;  %v2045_v63 = vld [vmem:[%s2270_s6 + $0x120] ss:$16 sps:$4 sm:$0xff]   ;;  %v2090_v30 = vld [vmem:[%s2270_s6 + $0x248] ss:$16 sps:$4 sm:$0xff]  }
  0x35   : > { %1088 = vmatpush1.bf16.msra.mxu0 %v2003_v31  ;;  %v2043_v62 = vld [vmem:[%s2270_s6 + $0x324] ss:$16 sps:$4 sm:$0xff]   ;;  %v2046_v0 = vld [vmem:[%s2270_s6 + $0x320] ss:$16 sps:$4 sm:$0xff]   ;;  %v2095_v31 = vld [vmem:[%s2270_s6 + $0x2c] ss:$16 sps:$4 sm:$0xff]  }
  0x36   : > { %1129 = vmatpush1.bf16.msra.mxu1 %v2004_v32  ;;  %1089 = vmatprep.subr.bf16.mxu0 %v2005_v33  ;;  %v2047_v1 = vld [vmem:[%s2270_s6 + $0x104] ss:$16 sps:$4 sm:$0xff]   ;;  %v2051_v3 = vld [vmem:[%s2270_s6 + $0x100] ss:$16 sps:$4 sm:$0xff]   ;;  %v2098_v32 = vld [vmem:[%s2270_s6 + $0x22c] ss:$16 sps:$4 sm:$0xff]  }
  0x37   : > { %1130 = vmatprep.subr.bf16.mxu1 %v2007_v34  ;;  %v2049_v2 = vld [vmem:[%s2270_s6 + $0x304] ss:$16 sps:$4 sm:$0xff]   ;;  %v2052_v4 = vld [vmem:[%s2270_s6 + $0x300] ss:$16 sps:$4 sm:$0xff]   ;;  %v2093_v33 = vld [vmem:[%s2270_s6 + $0x28] ss:$16 sps:$4 sm:$0xff]  }
  0x38   : > { %v2096_v34 = vld [vmem:[%s2270_s6 + $0x228] ss:$16 sps:$4 sm:$0xff]   ;;  %v2119_v47 = vld [vmem:[%s2270_s6 + $0x1ac] ss:$16 sps:$4 sm:$0xff]  }
  0x39   : > { %1090 = vmatpush2.bf16.msra.mxu0 %v2009_v35  ;;  %v2101_v35 = vld [vmem:[%s2270_s6 + $0xc] ss:$16 sps:$4 sm:$0xff]  }
  0x3a   : > { %1131 = vmatpush2.bf16.msra.mxu1 %v2010_v36  ;;  %1091 = vmatprep.subr.bf16.mxu0 %v2011_v37  ;;  %v2104_v36 = vld [vmem:[%s2270_s6 + $0x20c] ss:$16 sps:$4 sm:$0xff]   ;;  %v2099_v37 = vld [vmem:[%s2270_s6 + $0x8] ss:$16 sps:$4 sm:$0xff]  }
  0x3b   : > { %1132 = vmatprep.subr.bf16.mxu1 %v2013_v38  ;;  %v2102_v38 = vld [vmem:[%s2270_s6 + $0x208] ss:$16 sps:$4 sm:$0xff]  }
  0x3d   : > { %1092 = vmatpush2.bf16.msra.mxu0 %v2015_v39  ;;  %v2107_v39 = vld [vmem:[%s2270_s6 + $0x1ec] ss:$16 sps:$4 sm:$0xff]  }
  0x3e   : > { %1133 = vmatpush2.bf16.msra.mxu1 %v2016_v40  ;;  %1093 = vmatprep.subr.bf16.mxu0 %v2017_v41  ;;  %v2110_v40 = vld [vmem:[%s2270_s6 + $0x3ec] ss:$16 sps:$4 sm:$0xff]   ;;  %v2105_v41 = vld [vmem:[%s2270_s6 + $0x1e8] ss:$16 sps:$4 sm:$0xff]  }
  0x3f   : > { %1134 = vmatprep.subr.bf16.mxu1 %v2019_v42  ;;  %v2108_v42 = vld [vmem:[%s2270_s6 + $0x3e8] ss:$16 sps:$4 sm:$0xff]  }
  0x41   : > { %1094 = vmatpush2.bf16.msra.mxu0 %v2021_v43  ;;  %v2113_v43 = vld [vmem:[%s2270_s6 + $0x1cc] ss:$16 sps:$4 sm:$0xff]  }
  0x42   : > { %1135 = vmatpush2.bf16.msra.mxu1 %v2022_v44  ;;  %1095 = vmatprep.subr.bf16.mxu0 %v2023_v45  ;;  %v2116_v44 = vld [vmem:[%s2270_s6 + $0x3cc] ss:$16 sps:$4 sm:$0xff]   ;;  %v2111_v45 = vld [vmem:[%s2270_s6 + $0x1c8] ss:$16 sps:$4 sm:$0xff]  }
  0x43   : > { %1136 = vmatprep.subr.bf16.mxu1 %v2025_v46  ;;  %v2114_v46 = vld [vmem:[%s2270_s6 + $0x3c8] ss:$16 sps:$4 sm:$0xff]  }
  0x45   : > { %1096 = vmatpush2.bf16.msra.mxu0 %v2027_v50  ;;  %v2120_v50 = vld [vmem:[%s2270_s6 + $0x3a8] ss:$16 sps:$4 sm:$0xff]  }
  0x46   : > { %1137 = vmatpush2.bf16.msra.mxu1 %v2028_v51  ;;  %1097 = vmatprep.subr.bf16.mxu0 %v2029_v53  ;;  %v2125_v51 = vld [vmem:[%s2270_s6 + $0x18c] ss:$16 sps:$4 sm:$0xff]   ;;  %v2123_v53 = vld [vmem:[%s2270_s6 + $0x188] ss:$16 sps:$4 sm:$0xff]  }
  0x47   : > { %1138 = vmatprep.subr.bf16.mxu1 %v2031_v54  ;;  %v2126_v54 = vld [vmem:[%s2270_s6 + $0x388] ss:$16 sps:$4 sm:$0xff]  }
  0x49   : > { %1098 = vmatpush2.bf16.msra.mxu0 %v2033_v55  ;;  %v2131_v55 = vld [vmem:[%s2270_s6 + $0x16c] ss:$16 sps:$4 sm:$0xff]  }
  0x4a   : > { %1139 = vmatpush2.bf16.msra.mxu1 %v2034_v56  ;;  %1099 = vmatprep.subr.bf16.mxu0 %v2035_v57  ;;  %v2134_v56 = vld [vmem:[%s2270_s6 + $0x36c] ss:$16 sps:$4 sm:$0xff]   ;;  %v2129_v57 = vld [vmem:[%s2270_s6 + $0x168] ss:$16 sps:$4 sm:$0xff]  }
  0x4b   : > { %1140 = vmatprep.subr.bf16.mxu1 %v2037_v58  ;;  %v2132_v58 = vld [vmem:[%s2270_s6 + $0x368] ss:$16 sps:$4 sm:$0xff]  }
  0x4d   : > { %1100 = vmatpush2.bf16.msra.mxu0 %v2039_v59  ;;  %v2137_v59 = vld [vmem:[%s2270_s6 + $0x14c] ss:$16 sps:$4 sm:$0xff]  }
  0x4e   : > { %1141 = vmatpush2.bf16.msra.mxu1 %v2040_v60  ;;  %1101 = vmatprep.subr.bf16.mxu0 %v2041_v61  ;;  %v2140_v60 = vld [vmem:[%s2270_s6 + $0x34c] ss:$16 sps:$4 sm:$0xff]   ;;  %v2135_v61 = vld [vmem:[%s2270_s6 + $0x148] ss:$16 sps:$4 sm:$0xff]  }
  0x4f   : > { %1142 = vmatprep.subr.bf16.mxu1 %v2043_v62  ;;  %v2138_v62 = vld [vmem:[%s2270_s6 + $0x348] ss:$16 sps:$4 sm:$0xff]  }
  0x51   : > { %1102 = vmatpush2.bf16.msra.mxu0 %v2045_v63  ;;  %v2143_v63 = vld [vmem:[%s2270_s6 + $0x12c] ss:$16 sps:$4 sm:$0xff]  }
  0x52   : > { %1143 = vmatpush2.bf16.msra.mxu1 %v2046_v0  ;;  %1103 = vmatprep.subr.bf16.mxu0 %v2047_v1  ;;  %v2146_v0 = vld [vmem:[%s2270_s6 + $0x32c] ss:$16 sps:$4 sm:$0xff]   ;;  %v2141_v1 = vld [vmem:[%s2270_s6 + $0x128] ss:$16 sps:$4 sm:$0xff]  }
  0x53   : > { %1144 = vmatprep.subr.bf16.mxu1 %v2049_v2  ;;  %v2144_v2 = vld [vmem:[%s2270_s6 + $0x328] ss:$16 sps:$4 sm:$0xff]  }
  0x55   : > { %1104 = vmatpush2.bf16.msra.mxu0 %v2051_v3  ;;  %v2149_v3 = vld [vmem:[%s2270_s6 + $0x10c] ss:$16 sps:$4 sm:$0xff]  }
  0x56   : > { %1145 = vmatpush2.bf16.msra.mxu1 %v2052_v4  ;;  %1155 = vmatprep.subr.bf16.mxu0 %v2059_v5  ;;  %v2152_v4 = vld [vmem:[%s2270_s6 + $0x30c] ss:$16 sps:$4 sm:$0xff]   ;;  %v2147_v5 = vld [vmem:[%s2270_s6 + $0x108] ss:$16 sps:$4 sm:$0xff]  }
  0x57   : > { %1196 = vmatprep.subr.bf16.mxu1 %v2062_v6  ;;  %v2150_v6 = vld [vmem:[%s2270_s6 + $0x308] ss:$16 sps:$4 sm:$0xff]  }
  0x58   : > { %1106 = vmatmul.mubr.bf16.vlgmr.msra.gmra.mxu0 %v2344_v7 }
  0x59   : > { %1147 = vmatmul.mubr.bf16.vlgmr.msra.gmra.mxu1 %v2346_v8  ;;  %1156 = vmatpush1.bf16.msra.mxu0 %v2057_v9 }
  0x5a   : > { %1197 = vmatpush1.bf16.msra.mxu1 %v2060_v10  ;;  %1157 = vmatprep.subr.bf16.mxu0 %v2065_v11  ;;  %v285_v10 = vld [vmem:[#allocation2 + $0x10] sm:$0xff] }
  0x5b   : > { %1198 = vmatprep.subr.bf16.mxu1 %v2068_v12  ;;  %1187 = vmatprep.mubr.bf16.mxu0 %v2320_v48  ;;  %v2122_v48 = vld [vmem:[%s2270_s6 + $0x3ac] ss:$16 sps:$4 sm:$0xff]  }
  0x5c   : > { %1228 = vmatprep.mubr.bf16.mxu1 %v1721_v52  ;;  %v2128_v52 = vld [vmem:[%s2270_s6 + $0x38c] ss:$16 sps:$4 sm:$0xff]  }
  0x5d   : > { %1158 = vmatpush1.bf16.msra.mxu0 %v2063_v13 }
  0x5e   : > { %1199 = vmatpush1.bf16.msra.mxu1 %v2066_v14  ;;  %1159 = vmatprep.subr.bf16.mxu0 %v2071_v15  ;;  %v286_v14 = vld [vmem:[#allocation2] sm:$0xff] }
  0x5f   : > { %1200 = vmatprep.subr.bf16.mxu1 %v2074_v16 }
  0x61   : > { %1160 = vmatpush1.bf16.msra.mxu0 %v2069_v17 }
  0x62   : > { %1201 = vmatpush1.bf16.msra.mxu1 %v2072_v18  ;;  %1161 = vmatprep.subr.bf16.mxu0 %v2077_v19 }
  0x63   : > { %1202 = vmatprep.subr.bf16.mxu1 %v2080_v20 }
  0x65   : > { %1162 = vmatpush1.bf16.msra.mxu0 %v2075_v21 }
  0x66   : > { %1203 = vmatpush1.bf16.msra.mxu1 %v2078_v22  ;;  %1163 = vmatprep.subr.bf16.mxu0 %v2083_v23 }
  0x67   : > { %1204 = vmatprep.subr.bf16.mxu1 %v2086_v24 }
  0x69   : > { %1164 = vmatpush1.bf16.msra.mxu0 %v2081_v25 }
  0x6a   : > { %1205 = vmatpush1.bf16.msra.mxu1 %v2084_v26  ;;  %1165 = vmatprep.subr.bf16.mxu0 %v2089_v27  ;;  %v288_v26 = vld [vmem:[#allocation2 + $0x8] sm:$0xff] }
  0x6b   : > { %1206 = vmatprep.subr.bf16.mxu1 %v2092_v28 }
  0x6d   : > { %1166 = vmatpush1.bf16.msra.mxu0 %v2087_v29 }
  0x6e   : > { %1207 = vmatpush1.bf16.msra.mxu1 %v2090_v30  ;;  %1167 = vmatprep.subr.bf16.mxu0 %v2095_v31 }
  0x6f   : > { %1208 = vmatprep.subr.bf16.mxu1 %v2098_v32 }
  0x71   : > { %1168 = vmatpush1.bf16.msra.mxu0 %v2093_v33 }
  0x72   : > { %1209 = vmatpush1.bf16.msra.mxu1 %v2096_v34  ;;  %1169 = vmatprep.subr.bf16.mxu0 %v2101_v35 }
  0x73   : > { %1210 = vmatprep.subr.bf16.mxu1 %v2104_v36 }
  0x75   : > { %1170 = vmatpush1.bf16.msra.mxu0 %v2099_v37 }
  0x76   : > { %1211 = vmatpush1.bf16.msra.mxu1 %v2102_v38  ;;  %1171 = vmatprep.subr.bf16.mxu0 %v2107_v39 }
  0x77   : > { %1212 = vmatprep.subr.bf16.mxu1 %v2110_v40 }
  0x79   : > { %1172 = vmatpush2.bf16.msra.mxu0 %v2105_v41 }
  0x7a   : > { %1213 = vmatpush2.bf16.msra.mxu1 %v2108_v42  ;;  %1173 = vmatprep.subr.bf16.mxu0 %v2113_v43 }
  0x7b   : > { %1214 = vmatprep.subr.bf16.mxu1 %v2116_v44 }
  0x7d   : > { %1174 = vmatpush2.bf16.msra.mxu0 %v2111_v45 }
  0x7e   : > { %1215 = vmatpush2.bf16.msra.mxu1 %v2114_v46  ;;  %1175 = vmatprep.subr.bf16.mxu0 %v2119_v47 }
  0x7f   : > { %1216 = vmatprep.subr.bf16.mxu1 %v2122_v48 }
  0x81   : > { %1176 = vmatpush2.bf16.msra.mxu0 %v2117_v49 }
  0x82   : > { %1217 = vmatpush2.bf16.msra.mxu1 %v2120_v50  ;;  %1177 = vmatprep.subr.bf16.mxu0 %v2125_v51 }
  0x83   : > { %1218 = vmatprep.subr.bf16.mxu1 %v2128_v52 }
  0x85   : > { %1178 = vmatpush2.bf16.msra.mxu0 %v2123_v53 }
  0x86   : > { %1219 = vmatpush2.bf16.msra.mxu1 %v2126_v54  ;;  %1179 = vmatprep.subr.bf16.mxu0 %v2131_v55 }
  0x87   : > { %1220 = vmatprep.subr.bf16.mxu1 %v2134_v56 }
  0x89   : > { %1180 = vmatpush2.bf16.msra.mxu0 %v2129_v57 }
  0x8a   : > { %1221 = vmatpush2.bf16.msra.mxu1 %v2132_v58  ;;  %1181 = vmatprep.subr.bf16.mxu0 %v2137_v59 }
  0x8b   : > { %1222 = vmatprep.subr.bf16.mxu1 %v2140_v60 }
  0x8d   : > { %1182 = vmatpush2.bf16.msra.mxu0 %v2135_v61 }
  0x8e   : > { %1223 = vmatpush2.bf16.msra.mxu1 %v2138_v62  ;;  %1183 = vmatprep.subr.bf16.mxu0 %v2143_v63 }
  0x8f   : > { %1224 = vmatprep.subr.bf16.mxu1 %v2146_v0 }
  0x91   : > { %1184 = vmatpush2.bf16.msra.mxu0 %v2141_v1 }
  0x92   : > { %1225 = vmatpush2.bf16.msra.mxu1 %v2144_v2  ;;  %1185 = vmatprep.subr.bf16.mxu0 %v2149_v3 }
  0x93   : > { %1226 = vmatprep.subr.bf16.mxu1 %v2152_v4 }
  0x95   : > { %1186 = vmatpush2.bf16.msra.mxu0 %v2147_v5 }
  0x96   : > { %1227 = vmatpush2.bf16.msra.mxu1 %v2150_v6 }
  0x98   : > { %1188 = vmatmul.mubr.bf16.vlgmr.msra.gmra.mxu0 %v2344_v7  ;;  %v287_v7 = vld [vmem:[#allocation2 + $0x18] sm:$0xff] }
  0x99   : > { %1229 = vmatmul.mubr.bf16.vlgmr.msra.gmra.mxu1 %v2346_v8 }
 0x118   : > { %v1107_v9 = vpop.f32.mrf.mxu0 }
 0x119   : > { %v1148_v11 = vpop.f32.mrf.mxu1 }
 0x11a   : > { %v1149_v12 = vadd.f32 %v1148_v11, %v1107_v9  ;;  %v1109_v13 = vpop.f32.mrf.mxu0 }
 0x11b   : > { %v1150_v15 = vpop.f32.mrf.mxu1 }
 0x11c   : > { %v1237_v16 = vadd.f32 %v1149_v12, %v285_v10  ;;  %v1151_v17 = vadd.f32 %v1150_v15, %v1109_v13  ;;  %v1111_v18 = vpop.f32.mrf.mxu0 }
 0x11d   : > { %v1152_v19 = vpop.f32.mrf.mxu1 }
 0x11e   : > { %1241 = vst [vmem:[#allocation2 + $0x10] sm:$0xff] %v1237_v16  ;;  %v1238_v20 = vadd.f32 %v1151_v17, %v286_v14  ;;  %v1112_v21 = vpop.f32.mrf.mxu0 }
 0x11f   : > { %v1153_v22 = vpop.f32.mrf.mxu1 }
 0x120   : > { %1242 = vst [vmem:[#allocation2] sm:$0xff] %v1238_v20 }
 0x158   : > { %v1189_v23 = vpop.f32.mrf.mxu0 }
 0x159   : > { %v1230_v24 = vpop.f32.mrf.mxu1 }
 0x15a   : > { %v1231_v8 = vadd.f32 %v1230_v24, %v1189_v23  ;;  %v1191_v25 = vpop.f32.mrf.mxu0 }
 0x15b   : > { %v1232_v27 = vpop.f32.mrf.mxu1 }
 0x15c   : > { %v1239_v28 = vadd.f32 %v1231_v8, %v287_v7  ;;  %v1233_v29 = vadd.f32 %v1232_v27, %v1191_v25  ;;  %v1193_v30 = vpop.f32.mrf.mxu0  ;;  %1248 = sbr.rel (%p1850_p7) target bundleno = 589 (0x24d), region = 48 }
 0x15d   : > { %v1234_v31 = vpop.f32.mrf.mxu1 }
 0x15e   : > { %1243 = vst [vmem:[#allocation2 + $0x18] sm:$0xff] %v1239_v28  ;;  %v1240_v32 = vadd.f32 %v1233_v29, %v288_v26  ;;  %v1194_v33 = vpop.f32.mrf.mxu0 }
 0x15f   : > { %v1235_v34 = vpop.f32.mrf.mxu1 }
 0x160   : > { %1244 = vst [vmem:[#allocation2 + $0x8] sm:$0xff] %v1240_v32 }
 0x161   : > { %v2153_v35 = vld [vmem:[%s2533_s3 + $0x78] sm:$0xff]   ;;  %v2157_v39 = vld [vmem:[%s2533_s3 + $0x70] sm:$0xff]   ;;  %v2161_v43 = vld [vmem:[%s2533_s3 + $0x68] sm:$0xff]   ;;  %v1255_v54 = vlaneseq }
 0x162   : > { %v2154_v36 = vld [vmem:[%s2533_s3 + $0xf8] sm:$0xff]   ;;  %1888 = vmatprep.subr.bf16.mxu0 %v2153_v35  ;;  %v2158_v40 = vld [vmem:[%s2533_s3 + $0xf0] sm:$0xff]   ;;  %v2162_v44 = vld [vmem:[%s2533_s3 + $0xe8] sm:$0xff]  }
 0x163   : > { %v2155_v37 = vld [vmem:[%s2533_s3 + $0x38] sm:$0xff]   ;;  %1910 = vmatprep.subr.bf16.mxu1 %v2154_v36  ;;  %v2159_v41 = vld [vmem:[%s2533_s3 + $0x30] sm:$0xff]   ;;  %v2163_v45 = vld [vmem:[%s2533_s3 + $0x28] sm:$0xff]   ;;  %v1256_v59 = vshrl.u32 %v1255_v54, 7 }
 0x164   : > { %v2156_v38 = vld [vmem:[%s2533_s3 + $0xb8] sm:$0xff]   ;;  %1889 = vmatpush3.bf16.msra.mxu0 %v2155_v37  ;;  %v2160_v42 = vld [vmem:[%s2533_s3 + $0xb0] sm:$0xff]   ;;  %v2164_v46 = vld [vmem:[%s2533_s3 + $0xa8] sm:$0xff]  }
 0x165   : > { %1911 = vmatpush3.bf16.msra.mxu1 %v2156_v38  ;;  %1890 = vmatprep.subr.bf16.mxu0 %v2157_v39  ;;  %v2165_v47 = vld [vmem:[%s2533_s3 + $0x60] sm:$0xff]   ;;  %v2169_v51 = vld [vmem:[%s2533_s3 + $0x58] sm:$0xff]   ;;  %v2173_v56 = vld [vmem:[%s2533_s3 + $0x50] sm:$0xff]   ;;  %v1261_v0 = vsub.s32 1, %v1256_v59  ;;  %v1269_v2 = vsub.s32 3, %v1256_v59  ;;  %v1257_v4 = vsub.s32 0, %v1256_v59 }
 0x166   : > { %1912 = vmatprep.subr.bf16.mxu1 %v2158_v40  ;;  %v2166_v48 = vld [vmem:[%s2533_s3 + $0xe0] sm:$0xff]   ;;  %v2170_v52 = vld [vmem:[%s2533_s3 + $0xd8] sm:$0xff]   ;;  %v2174_v57 = vld [vmem:[%s2533_s3 + $0xd0] sm:$0xff]   ;;  %v1265_v6 = vsub.s32 2, %v1256_v59 }
 0x167   : > { %v2167_v49 = vld [vmem:[%s2533_s3 + $0x20] sm:$0xff]   ;;  %v2171_v53 = vld [vmem:[%s2533_s3 + $0x18] sm:$0xff]   ;;  %v2175_v58 = vld [vmem:[%s2533_s3 + $0x10] sm:$0xff]  }
 0x168   : > { %1891 = vmatpush3.bf16.msra.mxu0 %v2159_v41  ;;  %v2168_v50 = vld [vmem:[%s2533_s3 + $0xa0] sm:$0xff]   ;;  %v2172_v55 = vld [vmem:[%s2533_s3 + $0x98] sm:$0xff]   ;;  %v2176_v60 = vld [vmem:[%s2533_s3 + $0x90] sm:$0xff]  }
 0x169   : > { %1913 = vmatpush3.bf16.msra.mxu1 %v2160_v42  ;;  %1892 = vmatprep.subr.bf16.mxu0 %v2161_v43  ;;  %v2177_v61 = vld [vmem:[%s2533_s3 + $0x48] sm:$0xff]   ;;  %v2181_v3 = vld [vmem:[%s2533_s3 + $0x40] sm:$0xff]   ;;  %v1249_v16 = vld [vmem:[#allocation2 + $0x10] sm:$0xff] }
 0x16a   : > { %1914 = vmatprep.subr.bf16.mxu1 %v2162_v44  ;;  %v2178_v62 = vld [vmem:[%s2533_s3 + $0xc8] sm:$0xff]   ;;  %v2182_v5 = vld [vmem:[%s2533_s3 + $0xc0] sm:$0xff]   ;;  %v1251_v18 = vld [vmem:[#allocation2 + $0x18] sm:$0xff] }
 0x16b   : > { %v2179_v63 = vld [vmem:[%s2533_s3 + $0x8] sm:$0xff]   ;;  %v2183_v9 = vld [vmem:[%s2533_s3] sm:$0xff]  }
 0x16c   : > { %1893 = vmatpush3.bf16.msra.mxu0 %v2163_v45  ;;  %v2180_v1 = vld [vmem:[%s2533_s3 + $0x88] sm:$0xff]   ;;  %v2184_v10 = vld [vmem:[%s2533_s3 + $0x80] sm:$0xff]  }
 0x16d   : > { %1915 = vmatpush3.bf16.msra.mxu1 %v2164_v46  ;;  %1894 = vmatprep.subr.bf16.mxu0 %v2165_v47  ;;  %v1250_v11 = vld [vmem:[#allocation2] sm:$0xff]  ;;  %v1252_v13 = vld [vmem:[#allocation2 + $0x8] sm:$0xff] }
 0x16e   : > { %1916 = vmatprep.subr.bf16.mxu1 %v2166_v48  ;;  %v1253_v12 = vld [vmem:[%s2532_s2] sm:$0xf] }
 0x16f   : > { %v1262_v14 = vrot.slane %v1253_v12, %v1261_v0  ;;  %v1270_v15 = vrot.slane %v1253_v12, %v1269_v2  ;;  %v1258_v17 = vrot.slane %v1253_v12, %v1257_v4  ;;  %v1266_v19 = vrot.slane %v1253_v12, %v1265_v6  ;;  %v1851_v32 = vld [vmem:[%s2534_s4] ss:$0 sm:$0xff] }
 0x170   : > { %1895 = vmatpush3.bf16.msra.mxu0 %v2167_v49 }
 0x171   : > { %1917 = vmatpush3.bf16.msra.mxu1 %v2168_v50  ;;  %1896 = vmatprep.subr.bf16.mxu0 %v2169_v51  ;;  %v1276_v20 = vadd.f32 %v1262_v14, %v1250_v11  ;;  %v1278_v21 = vadd.f32 %v1270_v15, %v1252_v13  ;;  %v1275_v22 = vadd.f32 %v1258_v17, %v1249_v16 }
 0x172   : > { %1918 = vmatprep.subr.bf16.mxu1 %v2170_v52  ;;  %v1277_v23 = vadd.f32 %v1266_v19, %v1251_v18 }
 0x173   : > { %v1280_v7 = vmax.f32 %v1276_v20, 0.0  ;;  %v1282_v24 = vmax.f32 %v1278_v21, 0.0  ;;  %v1279_v8 = vmax.f32 %v1275_v22, 0.0 }
 0x174   : > { %1897 = vmatpush3.bf16.msra.mxu0 %v2171_v53  ;;  %v1281_v25 = vmax.f32 %v1277_v23, 0.0 }
 0x175   : > { %1919 = vmatpush3.bf16.msra.mxu1 %v2172_v55  ;;  %1898 = vmatprep.subr.bf16.mxu0 %v2173_v56  ;;  %v1284_v26 = vpack.c.bf16 %v1280_v7, %v1280_v7  ;;  %v1286_v27 = vpack.c.bf16 %v1282_v24, %v1282_v24  ;;  %v1283_v28 = vpack.c.bf16 %v1279_v8, %v1279_v8 }
 0x176   : > { %1920 = vmatprep.subr.bf16.mxu1 %v2174_v57  ;;  %v1285_v29 = vpack.c.bf16 %v1281_v25, %v1281_v25 }
 0x177   : > { %1582 = vmatprep.mubr.bf16.mxu0 %v1284_v26  ;;  %1622 = vmatprep.mubr.bf16.mxu1 %v1286_v27 }
 0x178   : > { %1899 = vmatpush3.bf16.msra.mxu0 %v2175_v58 }
 0x179   : > { %1921 = vmatpush3.bf16.msra.mxu1 %v2176_v60  ;;  %1900 = vmatprep.subr.bf16.mxu0 %v2177_v61 }
 0x17a   : > { %1922 = vmatprep.subr.bf16.mxu1 %v2178_v62 }
 0x17c   : > { %1901 = vmatpush3.bf16.msra.mxu0 %v2179_v63 }
 0x17d   : > { %1923 = vmatpush3.bf16.msra.mxu1 %v2180_v1  ;;  %1902 = vmatprep.subr.bf16.mxu0 %v2181_v3 }
 0x17e   : > { %1924 = vmatprep.subr.bf16.mxu1 %v2182_v5 }
 0x180   : > { %1903 = vmatpush3.bf16.msra.mxu0 %v2183_v9 }
 0x181   : > { %1925 = vmatpush3.bf16.msra.mxu1 %v2184_v10 }
 0x183   : > { %1583 = vmatmul.mubr.bf16.vlgmr.msra.gmra.mxu0 %v1283_v28 }
 0x184   : > { %1623 = vmatmul.mubr.bf16.vlgmr.msra.gmra.mxu1 %v1285_v29 }
 0x243   : > { %v1904_v30 = vpop.f32.mrf.mxu0 }
 0x244   : > { %v1926_v31 = vpop.f32.mrf.mxu1 }
 0x245   : > { %v1905_v33 = vpop.f32.mrf.mxu0 }
 0x246   : > { %v1927_v34 = vpop.f32.mrf.mxu1  ;;  %v1906_v35 = vadd.f32 %v1905_v33, %v1904_v30 }
 0x247   : > { %v1907_v36 = vpop.f32.mrf.mxu0  ;;  %v1928_v39 = vadd.f32 %v1927_v34, %v1926_v31 }
 0x248   : > { %v1929_v37 = vpop.f32.mrf.mxu1  ;;  %v1585_v38 = vadd.f32 %v1906_v35, %v1851_v32 }
 0x249   : > { %v1908_v40 = vpop.f32.mrf.mxu0 }
 0x24a   : > { %v1930_v41 = vpop.f32.mrf.mxu1  ;;  %v1625_v42 = vadd.f32 %v1928_v39, %v1585_v38 }
 0x24c   : > { %1630 = vst [vmem:[%s2535_s5] sm:$0xff] %v1625_v42 }
 0x24d PF: > { %s15_s20 = sadd.s32 1, %s2207_s20   ;;  %s2536_s18 = smov %s2203_s19 }
 0x24e   : > { %p12_p8 = scmp.ge.s32.totalorder %s15_s20, 10   ;;  %s2537_s19 = smov %s2539_s21 }
 0x250   :  { %14 = sbr.rel (!%p12_p8) target bundleno = 2 (0x2), region = 81 }

// kernel: net_forward.6
= control target key start
LH: loop header
LB: loop body
LE: loop exit
PB: predicated region body
PF: predicated region fallthrough
CT: control target
= control target key end

     0   :  { %s7819_s12 = smov 0   ;;  %s10394_s0 = inlined_call_operand.vmem [shape: bf16[2,6,10,512], index: 0, kind: input, shape index: {}]   ;;  %s10395_s1 = inlined_call_operand.vmem [shape: bf16[9,512,256], index: 1, kind: input, shape index: {}]   ;;  %s10396_s2 = inlined_call_operand.vmem [shape: f32[1,256], index: 2, kind: input, shape index: {}]   ;;  %s10397_s3 = inlined_call_operand.vmem [shape: bf16[64,256], index: 3, kind: output, shape index: {}]  }
   0x1 LB: > { %s7825_s13 = sadd.s32 4294967295, %s7797_s12   ;;  %p5654_p0 = scmp.ge.s32.totalorder %s7797_s12, 1  ;;  %s7797_s12 = sphi %s7819_s12, %s13_s12  }
   0x2   : > { %p137_p1 = scmp.lt.s32.totalorder %s7797_s12, 3 }
   0x4   : > { %p138_p2 = pnand %p5654_p0, %p137_p1 }
   0x6   : > { %141 = sbr.rel (%p138_p2) target bundleno = 807 (0x327), region = 32 }
   0xb   : > { %v6927_v0 = vld [vmem:[%s10395_s1 + $0x274] ss:$8 sps:$4 sm:$0xff]   ;;  %v6931_v2 = vld [vmem:[%s10395_s1 + $0x270] ss:$8 sps:$4 sm:$0xff]   ;;  %v6933_v4 = vld [vmem:[%s10395_s1 + $0x264] ss:$8 sps:$4 sm:$0xff]  }
   0xc   : > { %v6929_v1 = vld [vmem:[%s10395_s1 + $0x374] ss:$8 sps:$4 sm:$0xff]   ;;  %786 = vmatprep.subr.bf16.mxu0 %v6927_v0  ;;  %v6932_v3 = vld [vmem:[%s10395_s1 + $0x370] ss:$8 sps:$4 sm:$0xff]   ;;  %v6935_v5 = vld [vmem:[%s10395_s1 + $0x364] ss:$8 sps:$4 sm:$0xff]  }
   0xd   : > { %839 = vmatprep.subr.bf16.mxu1 %v6929_v1  ;;  %787 = vmatpush1.bf16.msra.mxu0 %v6931_v2  ;;  %v6937_v6 = vld [vmem:[%s10395_s1 + $0x260] ss:$8 sps:$4 sm:$0xff]   ;;  %v6939_v8 = vld [vmem:[%s10395_s1 + $0x254] ss:$8 sps:$4 sm:$0xff]   ;;  %v6943_v10 = vld [vmem:[%s10395_s1 + $0x250] ss:$8 sps:$4 sm:$0xff]  }
   0xe   : > { %840 = vmatpush1.bf16.msra.mxu1 %v6932_v3  ;;  %788 = vmatprep.subr.bf16.mxu0 %v6933_v4  ;;  %v6938_v7 = vld [vmem:[%s10395_s1 + $0x360] ss:$8 sps:$4 sm:$0xff]   ;;  %v6941_v9 = vld [vmem:[%s10395_s1 + $0x354] ss:$8 sps:$4 sm:$0xff]   ;;  %v6944_v11 = vld [vmem:[%s10395_s1 + $0x350] ss:$8 sps:$4 sm:$0xff]  }
   0xf   : > { %841 = vmatprep.subr.bf16.mxu1 %v6935_v5  ;;  %v6945_v12 = vld [vmem:[%s10395_s1 + $0x244] ss:$8 sps:$4 sm:$0xff]   ;;  %v6949_v14 = vld [vmem:[%s10395_s1 + $0x240] ss:$8 sps:$4 sm:$0xff]   ;;  %v6951_v16 = vld [vmem:[%s10395_s1 + $0x234] ss:$8 sps:$4 sm:$0xff]  }
  0x10   : > { %v6947_v13 = vld [vmem:[%s10395_s1 + $0x344] ss:$8 sps:$4 sm:$0xff]   ;;  %v6950_v15 = vld [vmem:[%s10395_s1 + $0x340] ss:$8 sps:$4 sm:$0xff]   ;;  %v6953_v17 = vld [vmem:[%s10395_s1 + $0x334] ss:$8 sps:$4 sm:$0xff]  }
  0x11   : > { %789 = vmatpush1.bf16.msra.mxu0 %v6937_v6  ;;  %v6955_v18 = vld [vmem:[%s10395_s1 + $0x230] ss:$8 sps:$4 sm:$0xff]   ;;  %v6957_v20 = vld [vmem:[%s10395_s1 + $0x224] ss:$8 sps:$4 sm:$0xff]   ;;  %v6961_v22 = vld [vmem:[%s10395_s1 + $0x220] ss:$8 sps:$4 sm:$0xff]  }
  0x12   : > { %842 = vmatpush1.bf16.msra.mxu1 %v6938_v7  ;;  %790 = vmatprep.subr.bf16.mxu0 %v6939_v8  ;;  %v6956_v19 = vld [vmem:[%s10395_s1 + $0x330] ss:$8 sps:$4 sm:$0xff]   ;;  %v6959_v21 = vld [vmem:[%s10395_s1 + $0x324] ss:$8 sps:$4 sm:$0xff]   ;;  %v6962_v23 = vld [vmem:[%s10395_s1 + $0x320] ss:$8 sps:$4 sm:$0xff]  }
  0x13   : > { %843 = vmatprep.subr.bf16.mxu1 %v6941_v9  ;;  %v6963_v24 = vld [vmem:[%s10395_s1 + $0x214] ss:$8 sps:$4 sm:$0xff]   ;;  %v6967_v26 = vld [vmem:[%s10395_s1 + $0x210] ss:$8 sps:$4 sm:$0xff]   ;;  %v6969_v28 = vld [vmem:[%s10395_s1 + $0x204] ss:$8 sps:$4 sm:$0xff]  }
  0x14   : > { %v6965_v25 = vld [vmem:[%s10395_s1 + $0x314] ss:$8 sps:$4 sm:$0xff]   ;;  %v6968_v27 = vld [vmem:[%s10395_s1 + $0x310] ss:$8 sps:$4 sm:$0xff]   ;;  %v6971_v29 = vld [vmem:[%s10395_s1 + $0x304] ss:$8 sps:$4 sm:$0xff]  }
  0x15   : > { %791 = vmatpush1.bf16.msra.mxu0 %v6943_v10  ;;  %v6973_v30 = vld [vmem:[%s10395_s1 + $0x200] ss:$8 sps:$4 sm:$0xff]   ;;  %p162_p3 = scmp.lt.s32.totalorder %s7825_s13, 1  ;;  %v6975_v32 = vld [vmem:[%s10395_s1 + $0x2f4] ss:$8 sps:$4 sm:$0xff]   ;;  %vm1382_vm3 = vcmask 1042432  }
  0x16   : > { %844 = vmatpush1.bf16.msra.mxu1 %v6944_v11  ;;  %792 = vmatprep.subr.bf16.mxu0 %v6945_v12  ;;  %v6974_v31 = vld [vmem:[%s10395_s1 + $0x300] ss:$8 sps:$4 sm:$0xff]   ;;  %v6977_v33 = vld [vmem:[%s10395_s1 + $0x3f4] ss:$8 sps:$4 sm:$0xff]   ;;  %v6979_v34 = vld [vmem:[%s10395_s1 + $0x2f0] ss:$8 sps:$4 sm:$0xff]  }
  0x17   : > { %845 = vmatprep.subr.bf16.mxu1 %v6947_v13  ;;  %v6980_v35 = vld [vmem:[%s10395_s1 + $0x3f0] ss:$8 sps:$4 sm:$0xff]   ;;  %s163_s9 = scalar_select %p162_p3, %s7825_s13, 1  ;;  %v6981_v36 = vld [vmem:[%s10395_s1 + $0x2e4] ss:$8 sps:$4 sm:$0xff]   ;;  %vm1383_vm4 = vcmask 1046532  }
  0x18   : > { %v6983_v37 = vld [vmem:[%s10395_s1 + $0x3e4] ss:$8 sps:$4 sm:$0xff]   ;;  %v6985_v38 = vld [vmem:[%s10395_s1 + $0x2e0] ss:$8 sps:$4 sm:$0xff]   ;;  %v6987_v40 = vld [vmem:[%s10395_s1 + $0x2d4] ss:$8 sps:$4 sm:$0xff]  }
  0x19   : > { %793 = vmatpush1.bf16.msra.mxu0 %v6949_v14  ;;  %s6918_s18 = smul.u32 192, %s163_s9  ;;  %v6986_v39 = vld [vmem:[%s10395_s1 + $0x3e0] ss:$8 sps:$4 sm:$0xff]   ;;  %v6989_v41 = vld [vmem:[%s10395_s1 + $0x3d4] ss:$8 sps:$4 sm:$0xff]   ;;  %vm8362_vm5 = vmor %vm1382_vm3, %vm1383_vm4  ;;  %s5656_s8 = sshll.u32 %s7825_s13, 2 }
  0x1a   : > { %846 = vmatpush1.bf16.msra.mxu1 %v6950_v15  ;;  %794 = vmatprep.subr.bf16.mxu0 %v6951_v16  ;;  %v6991_v42 = vld [vmem:[%s10395_s1 + $0x2d0] ss:$8 sps:$4 sm:$0xff]   ;;  %v6993_v44 = vld [vmem:[%s10395_s1 + $0x2c4] ss:$8 sps:$4 sm:$0xff]   ;;  %vm254_vm0 = vsmask.f32 3328 }
  0x1b   : > { %847 = vmatprep.subr.bf16.mxu1 %v6953_v17  ;;  %v6992_v43 = vld [vmem:[%s10395_s1 + $0x3d0] ss:$8 sps:$4 sm:$0xff]   ;;  %s7966_s4 = scalar_lea.vmem %s10394_s0, %s6918_s18  ;;  %v6995_v45 = vld [vmem:[%s10395_s1 + $0x3c4] ss:$8 sps:$4 sm:$0xff]   ;;  %vm255_vm1 = vsmask.f32 7440 }
  0x1c   : > { %v6997_v46 = vld [vmem:[%s10395_s1 + $0x2c0] ss:$8 sps:$4 sm:$0xff]   ;;  %v6999_v49 = vld [vmem:[%s10395_s1 + $0x2b4] ss:$8 sps:$4 sm:$0xff]   ;;  %v7003_v0 = vld [vmem:[%s10395_s1 + $0x2b0] ss:$8 sps:$4 sm:$0xff]  }
  0x1d   : > { %795 = vmatpush1.bf16.msra.mxu0 %v6955_v18  ;;  %v6998_v47 = vld [vmem:[%s10395_s1 + $0x3c0] ss:$8 sps:$4 sm:$0xff]   ;;  %v7001_v50 = vld [vmem:[%s10395_s1 + $0x3b4] ss:$8 sps:$4 sm:$0xff]   ;;  %v7004_v1 = vld [vmem:[%s10395_s1 + $0x3b0] ss:$8 sps:$4 sm:$0xff]  }
  0x1e   : > { %848 = vmatpush1.bf16.msra.mxu1 %v6956_v19  ;;  %796 = vmatprep.subr.bf16.mxu0 %v6957_v20  ;;  %v7981_v48 = vld [vmem:[%s7966_s4] sm:$0xff]  ;;  %v7993_v52 = vld [vmem:[%s7966_s4 + $0x10] sm:$0x11]  ;;  %v8004_v59 = vld [vmem:[%s7966_s4 + $0x8] sm:$0xff]  ;;  %p10334_p4 = scmp.lt.s32.totalorder %s5656_s8, 7 }
  0x1f   : > { %849 = vmatprep.subr.bf16.mxu1 %v6959_v21  ;;  %v7990_v51 = vld [vmem:[%s7966_s4 + $0x20] sm:$0xff]  ;;  %v7996_v53 = vld [vmem:[%s7966_s4 + $0x30] sm:$0x11]  ;;  %v258_v54 = vshrl.u32 %v7981_v48, 16  ;;  %v261_v55 = vshll.u32 %v7981_v48, 16  ;;  %v267_v56 = vshll.u32 %v7993_v52, 16  ;;  %vm8035_vm2 = vmor %vm254_vm0, %vm255_vm1 }
  0x20   : > { %v286_v57 = vshrl.u32 %v7990_v51, 16  ;;  %v289_v58 = vshll.u32 %v7990_v51, 16  ;;  %v295_v61 = vshll.u32 %v7996_v53, 16  ;;  %v8008_v62 = vld [vmem:[%s7966_s4 + $0x28] sm:$0xff]  ;;  %v8011_v63 = vld [vmem:[%s7966_s4 + $0x18] sm:$0x11] }
  0x21   : > { %797 = vmatpush1.bf16.msra.mxu0 %v6961_v22  ;;  %v260_v60 = vrot.slane %v258_v54, 4  ;;  %v263_v2 = vrot.slane %v261_v55, 5  ;;  %v269_v3 = vrot.slane %v267_v56, 5  ;;  %v8020_v6 = vld [vmem:[%s7966_s4 + $0x38] sm:$0x11]  ;;  %v272_v8 = vshrl.u32 %v8004_v59, 16 }
  0x22   : > { %850 = vmatpush1.bf16.msra.mxu1 %v6962_v23  ;;  %798 = vmatprep.subr.bf16.mxu0 %v6963_v24  ;;  %v288_v4 = vrot.slane %v286_v57, 4  ;;  %v291_v5 = vrot.slane %v289_v58, 5  ;;  %v297_v7 = vrot.slane %v295_v61, 5  ;;  %v275_v9 = vshll.u32 %v8004_v59, 16  ;;  %v7005_v11 = vld [vmem:[%s10395_s1 + $0x2a4] ss:$8 sps:$4 sm:$0xff]  }
  0x23   : > { %851 = vmatprep.subr.bf16.mxu1 %v6965_v25  ;;  %v281_v10 = vshll.u32 %v8011_v63, 16  ;;  %v7007_v12 = vld [vmem:[%s10395_s1 + $0x3a4] ss:$8 sps:$4 sm:$0xff]   ;;  %v264_v13 = vor.u32 %v263_v2, %v260_v60  ;;  %v300_v15 = vshrl.u32 %v8008_v62, 16  ;;  %v303_v16 = vshll.u32 %v8008_v62, 16  ;;  %s10438_s8 = smov (!%p10334_p4, %s5656_s8), 7 }
  0x24   : > { %v292_v14 = vor.u32 %v291_v5, %v288_v4  ;;  %v274_v18 = vrot.slane %v272_v8, 4  ;;  %v277_v19 = vrot.slane %v275_v9, 5  ;;  %v309_v20 = vshll.u32 %v8020_v6, 16  ;;  %v7009_v25 = vld [vmem:[%s10395_s1 + $0x2a0] ss:$8 sps:$4 sm:$0xff]   ;;  %s6913_s13 = sshll.u32 %s10438_s8, 3 }
  0x25   : > { %799 = vmatpush1.bf16.msra.mxu0 %v6967_v26  ;;  %v265_v21 = vrot.slane %v264_v13, 4  ;;  %v302_v23 = vrot.slane %v300_v15, 4  ;;  %v305_v24 = vrot.slane %v303_v16, 5  ;;  %v7028_v54 = vld [vmem:[%s10395_s1 + $0x174] ss:$8 sps:$4 sm:$0xff]   ;;  %s10378_s16 = scalar_lea.vmem %s10397_s3, %s6913_s13 }
  0x26   : > { %852 = vmatpush1.bf16.msra.mxu1 %v6968_v27  ;;  %800 = vmatprep.subr.bf16.mxu0 %v6969_v28  ;;  %v293_v22 = vrot.slane %v292_v14, 4  ;;  %v278_v26 = vor.u32 %v277_v19, %v274_v18  ;;  %v283_v27 = vrot.slane %v281_v10, 5  ;;  %v7010_v28 = vld [vmem:[%s10395_s1 + $0x3a0] ss:$8 sps:$4 sm:$0xff]   ;;  %v7023_v57 = vld [vmem:[%s10395_s1 + $0x70] ss:$8 sps:$4 sm:$0xff]  }
  0x27   : > { %853 = vmatprep.subr.bf16.mxu1 %v6971_v29  ;;  %v7011_v29 = vld [vmem:[%s10395_s1 + $0x294] ss:$8 sps:$4 sm:$0xff]   ;;  %v7026_v58 = vld [vmem:[%s10395_s1 + $0x170] ss:$8 sps:$4 sm:$0xff]   ;;  %v7031_v60 = vld [vmem:[%s10395_s1 + $0x64] ss:$8 sps:$4 sm:$0xff]  }
  0x28   : > { %v7034_v61 = vld [vmem:[%s10395_s1 + $0x164] ss:$8 sps:$4 sm:$0xff]   ;;  %v7037_v2 = vld [vmem:[%s10395_s1 + $0x54] ss:$8 sps:$4 sm:$0xff]   ;;  %v7035_v4 = vld [vmem:[%s10395_s1 + $0x50] ss:$8 sps:$4 sm:$0xff]  }
  0x29   : > { %801 = vmatpush1.bf16.msra.mxu0 %v6973_v30  ;;  %v270_v30 = vsel %vm8035_vm2, %v265_v21, %v269_v3  ;;  %v7040_v3 = vld [vmem:[%s10395_s1 + $0x154] ss:$8 sps:$4 sm:$0xff]   ;;  %v7038_v5 = vld [vmem:[%s10395_s1 + $0x150] ss:$8 sps:$4 sm:$0xff]   ;;  %v7046_v8 = vld [vmem:[%s10395_s1 + $0x144] ss:$8 sps:$4 sm:$0xff]  }
  0x2a   : > { %854 = vmatpush1.bf16.msra.mxu1 %v6974_v31  ;;  %802 = vmatprep.subr.bf16.mxu0 %v6975_v32  ;;  %v298_v31 = vsel %vm8035_vm2, %v293_v22, %v297_v7  ;;  %v306_v32 = vor.u32 %v305_v24, %v302_v23  ;;  %v7043_v7 = vld [vmem:[%s10395_s1 + $0x44] ss:$8 sps:$4 sm:$0xff]   ;;  %v7041_v9 = vld [vmem:[%s10395_s1 + $0x40] ss:$8 sps:$4 sm:$0xff]   ;;  %v7047_v13 = vld [vmem:[%s10395_s1 + $0x30] ss:$8 sps:$4 sm:$0xff]  }
  0x2b   : > { %855 = vmatprep.subr.bf16.mxu1 %v6977_v33  ;;  %v311_v33 = vrot.slane %v309_v20, 5  ;;  %v5723_v55 = vcombine.low %v270_v30, %v298_v31  ;;  %v7044_v10 = vld [vmem:[%s10395_s1 + $0x140] ss:$8 sps:$4 sm:$0xff]   ;;  %v7050_v14 = vld [vmem:[%s10395_s1 + $0x130] ss:$8 sps:$4 sm:$0xff]  }
  0x2c   : > { %v7055_v15 = vld [vmem:[%s10395_s1 + $0x24] ss:$8 sps:$4 sm:$0xff]   ;;  %v7053_v18 = vld [vmem:[%s10395_s1 + $0x20] ss:$8 sps:$4 sm:$0xff]   ;;  %v7061_v20 = vld [vmem:[%s10395_s1 + $0x14] ss:$8 sps:$4 sm:$0xff]  }
  0x2d   : > { %803 = vmatpush2.bf16.msra.mxu0 %v6979_v34  ;;  %v7013_v34 = vld [vmem:[%s10395_s1 + $0x394] ss:$8 sps:$4 sm:$0xff]   ;;  %v7058_v16 = vld [vmem:[%s10395_s1 + $0x124] ss:$8 sps:$4 sm:$0xff]   ;;  %v7056_v19 = vld [vmem:[%s10395_s1 + $0x120] ss:$8 sps:$4 sm:$0xff]  }
  0x2e   : > { %856 = vmatpush2.bf16.msra.mxu1 %v6980_v35  ;;  %804 = vmatprep.subr.bf16.mxu0 %v6981_v36  ;;  %v5724_v35 = vcombine.high %v270_v30, %v298_v31  ;;  %v279_v36 = vrot.slane %v278_v26, 4  ;;  %v7064_v21 = vld [vmem:[%s10395_s1 + $0x114] ss:$8 sps:$4 sm:$0xff]   ;;  %v8161_v22 = vld [vmem:[%s7966_s4 + $0x40] sm:$0xff]  ;;  %v8178_v31 = vld [vmem:[%s7966_s4 + $0x48] sm:$0xff] }
  0x2f   : > { %857 = vmatprep.subr.bf16.mxu1 %v6983_v37  ;;  %v307_v37 = vrot.slane %v306_v32, 4  ;;  %v8164_v23 = vld [vmem:[%s7966_s4 + $0x60] sm:$0xff]  ;;  %v8167_v24 = vld [vmem:[%s7966_s4 + $0x50] sm:$0x11]  ;;  %v314_v26 = vshrl.u32 %v8161_v22, 16  ;;  %v8181_v32 = vld [vmem:[%s7966_s4 + $0x68] sm:$0xff] }
  0x30   : > { %818 = vmatprep.mubr.bf16.mxu0 %v5724_v35  ;;  %v345_v30 = vshll.u32 %v8164_v23, 16  ;;  %v6756_v17 = vld [vmem:[%s7966_s4 + $0x48] sm:$0xee] }
  0x31   : > { %805 = vmatpush2.bf16.msra.mxu0 %v6985_v38  ;;  %v5795_v38 = vcombine.low %v7981_v48, %v7990_v51  ;;  %v316_v35 = vrot.slane %v314_v26, 4 }
  0x32   : > { %858 = vmatpush2.bf16.msra.mxu1 %v6986_v39  ;;  %806 = vmatprep.subr.bf16.mxu0 %v6987_v40  ;;  %v5797_v39 = vcombine.low %v8004_v59, %v8008_v62  ;;  %v7015_v40 = vld [vmem:[%s10395_s1 + $0x290] ss:$8 sps:$4 sm:$0xff]  }
  0x33   : > { %859 = vmatprep.subr.bf16.mxu1 %v6989_v41  ;;  %v284_v41 = vsel %vm8035_vm2, %v279_v36, %v283_v27  ;;  %v317_v27 = vshll.u32 %v8161_v22, 16 }
  0x35   : > { %807 = vmatpush2.bf16.msra.mxu0 %v6991_v42  ;;  %v7016_v42 = vld [vmem:[%s10395_s1 + $0x390] ss:$8 sps:$4 sm:$0xff]  }
  0x36   : > { %860 = vmatpush2.bf16.msra.mxu1 %v6992_v43  ;;  %808 = vmatprep.subr.bf16.mxu0 %v6993_v44  ;;  %v7017_v43 = vld [vmem:[%s10395_s1 + $0x284] ss:$8 sps:$4 sm:$0xff]   ;;  %v312_v44 = vsel %vm8035_vm2, %v307_v37, %v311_v33  ;;  %v7059_v33 = vld [vmem:[%s10395_s1 + $0x10] ss:$8 sps:$4 sm:$0xff]  }
  0x37   : > { %861 = vmatprep.subr.bf16.mxu1 %v6995_v45  ;;  %v7019_v45 = vld [vmem:[%s10395_s1 + $0x384] ss:$8 sps:$4 sm:$0xff]   ;;  %v5725_v56 = vcombine.low %v284_v41, %v312_v44  ;;  %v8191_v37 = vld [vmem:[%s7966_s4 + $0x58] sm:$0x11] }
  0x39   : > { %809 = vmatpush2.bf16.msra.mxu0 %v6997_v46  ;;  %v5726_v46 = vcombine.high %v284_v41, %v312_v44  ;;  %v319_v41 = vrot.slane %v317_v27, 5  ;;  %v347_v44 = vrot.slane %v345_v30, 5  ;;  %v7079_v27 = vld [vmem:[%s10395_s1 + $0xe4] ss:$8 sps:$4 sm:$0xff]  }
  0x3a   : > { %862 = vmatpush2.bf16.msra.mxu1 %v6998_v47  ;;  %810 = vmatprep.subr.bf16.mxu0 %v6999_v49  ;;  %v7021_v47 = vld [vmem:[%s10395_s1 + $0x280] ss:$8 sps:$4 sm:$0xff]  }
  0x3b   : > { %863 = vmatprep.subr.bf16.mxu1 %v7001_v50  ;;  %871 = vmatprep.mubr.bf16.mxu1 %v5726_v46  ;;  %v7022_v49 = vld [vmem:[%s10395_s1 + $0x380] ss:$8 sps:$4 sm:$0xff]   ;;  %v7025_v50 = vld [vmem:[%s10395_s1 + $0x74] ss:$8 sps:$4 sm:$0xff]  }
  0x3d   : > { %811 = vmatpush2.bf16.msra.mxu0 %v7003_v0  ;;  %v7029_v0 = vld [vmem:[%s10395_s1 + $0x60] ss:$8 sps:$4 sm:$0xff]  }
  0x3e   : > { %864 = vmatpush2.bf16.msra.mxu1 %v7004_v1  ;;  %812 = vmatprep.subr.bf16.mxu0 %v7005_v11  ;;  %v7032_v1 = vld [vmem:[%s10395_s1 + $0x160] ss:$8 sps:$4 sm:$0xff]   ;;  %v7049_v11 = vld [vmem:[%s10395_s1 + $0x34] ss:$8 sps:$4 sm:$0xff]  }
  0x3f   : > { %865 = vmatprep.subr.bf16.mxu1 %v7007_v12  ;;  %v7052_v12 = vld [vmem:[%s10395_s1 + $0x134] ss:$8 sps:$4 sm:$0xff]  }
  0x41   : > { %813 = vmatpush2.bf16.msra.mxu0 %v7009_v25  ;;  %v8170_v25 = vld [vmem:[%s7966_s4 + $0x70] sm:$0x11] }
  0x42   : > { %866 = vmatpush2.bf16.msra.mxu1 %v7010_v28  ;;  %814 = vmatprep.subr.bf16.mxu0 %v7011_v29  ;;  %v323_v28 = vshll.u32 %v8167_v24, 16  ;;  %v342_v29 = vshrl.u32 %v8164_v23, 16  ;;  %v351_v36 = vshll.u32 %v8170_v25, 16 }
  0x43   : > { %867 = vmatprep.subr.bf16.mxu1 %v7013_v34  ;;  %v7062_v34 = vld [vmem:[%s10395_s1 + $0x110] ss:$8 sps:$4 sm:$0xff]  }
  0x44   : > { %v353_v46 = vrot.slane %v351_v36, 5  ;;  %v7080_v36 = vld [vmem:[%s10395_s1 + $0x1e0] ss:$8 sps:$4 sm:$0xff]  }
  0x45   : > { %815 = vmatpush2.bf16.msra.mxu0 %v7015_v40  ;;  %v8194_v40 = vld [vmem:[%s7966_s4 + $0x78] sm:$0x11] }
  0x46   : > { %868 = vmatpush2.bf16.msra.mxu1 %v7016_v42  ;;  %816 = vmatprep.subr.bf16.mxu0 %v7017_v43  ;;  %v325_v42 = vrot.slane %v323_v28, 5  ;;  %v344_v43 = vrot.slane %v342_v29, 4  ;;  %v7082_v29 = vld [vmem:[%s10395_s1 + $0x1e4] ss:$8 sps:$4 sm:$0xff]  }
  0x47   : > { %869 = vmatprep.subr.bf16.mxu1 %v7019_v45  ;;  %v7067_v45 = vld [vmem:[%s10395_s1 + $0x4] ss:$8 sps:$4 sm:$0xff]  }
  0x49   : > { %817 = vmatpush2.bf16.msra.mxu0 %v7021_v47  ;;  %v328_v47 = vshrl.u32 %v8178_v31, 16 }
  0x4a   : > { %870 = vmatpush2.bf16.msra.mxu1 %v7022_v49  ;;  %1252 = vmatprep.subr.bf16.mxu0 %v7025_v50  ;;  %v331_v49 = vshll.u32 %v8178_v31, 16  ;;  %v337_v50 = vshll.u32 %v8191_v37, 16 }
  0x4b   : > { %1305 = vmatprep.subr.bf16.mxu1 %v7028_v54  ;;  %v7070_v54 = vld [vmem:[%s10395_s1 + $0x104] ss:$8 sps:$4 sm:$0xff]  }
  0x4c   : > { %819 = vmatmul.mubr.bf16.vlgmr.msra.gmra.mxu0 %v5723_v55  ;;  %v320_v55 = vor.u32 %v319_v41, %v316_v35  ;;  %v7077_v35 = vld [vmem:[%s10395_s1 + $0xe0] ss:$8 sps:$4 sm:$0xff]  }
  0x4d   : > { %872 = vmatmul.mubr.bf16.vlgmr.msra.gmra.mxu1 %v5725_v56  ;;  %1253 = vmatpush1.bf16.msra.mxu0 %v7023_v57  ;;  %v348_v56 = vor.u32 %v347_v44, %v344_v43  ;;  %v356_v57 = vshrl.u32 %v8181_v32, 16  ;;  %v7088_v43 = vld [vmem:[%s10395_s1 + $0x1d4] ss:$8 sps:$4 sm:$0xff]   ;;  %v5798_v44 = vcombine.high %v8004_v59, %v8008_v62  ;;  %v5799_v62 = vcombine.low %v8161_v22, %v8164_v23  ;;  %v7718_v59 = vld [vmem:[%s10395_s1 + $0x1144] ss:$8 sps:$4 sm:$0xff]  }
  0x4e   : > { %1306 = vmatpush1.bf16.msra.mxu1 %v7026_v58  ;;  %1254 = vmatprep.subr.bf16.mxu0 %v7031_v60  ;;  %v359_v58 = vshll.u32 %v8181_v32, 16  ;;  %v7065_v60 = vld [vmem:[%s10395_s1] ss:$8 sps:$4 sm:$0xff]  }
  0x4f   : > { %1307 = vmatprep.subr.bf16.mxu1 %v7034_v61  ;;  %v330_v61 = vrot.slane %v328_v47, 4  ;;  %v7091_v47 = vld [vmem:[%s10395_s1 + $0xc4] ss:$8 sps:$4 sm:$0xff]  }
  0x51   : > { %1255 = vmatpush1.bf16.msra.mxu0 %v7029_v0  ;;  %v333_v0 = vrot.slane %v331_v49, 5  ;;  %v7094_v49 = vld [vmem:[%s10395_s1 + $0x1c4] ss:$8 sps:$4 sm:$0xff]  }
  0x52   : > { %1308 = vmatpush1.bf16.msra.mxu1 %v7032_v1  ;;  %1256 = vmatprep.subr.bf16.mxu0 %v7037_v2  ;;  %v365_v1 = vshll.u32 %v8194_v40, 16  ;;  %v7068_v2 = vld [vmem:[%s10395_s1 + $0x100] ss:$8 sps:$4 sm:$0xff]  }
  0x53   : > { %1309 = vmatprep.subr.bf16.mxu1 %v7040_v3  ;;  %v321_v3 = vrot.slane %v320_v55, 4  ;;  %v7097_v55 = vld [vmem:[%s10395_s1 + $0xb4] ss:$8 sps:$4 sm:$0xff]  }
  0x55   : > { %1257 = vmatpush1.bf16.msra.mxu0 %v7035_v4  ;;  %v349_v4 = vrot.slane %v348_v56, 4  ;;  %v7100_v56 = vld [vmem:[%s10395_s1 + $0x1b4] ss:$8 sps:$4 sm:$0xff]  }
  0x56   : > { %1310 = vmatpush1.bf16.msra.mxu1 %v7038_v5  ;;  %1258 = vmatprep.subr.bf16.mxu0 %v7043_v7  ;;  %v358_v5 = vrot.slane %v356_v57, 4  ;;  %v361_v7 = vrot.slane %v359_v58, 5  ;;  %v7095_v57 = vld [vmem:[%s10395_s1 + $0xb0] ss:$8 sps:$4 sm:$0xff]  }
  0x57   : > { %1311 = vmatprep.subr.bf16.mxu1 %v7046_v8  ;;  %v7073_v8 = vld [vmem:[%s10395_s1 + $0xf4] ss:$8 sps:$4 sm:$0xff]   ;;  %v7098_v58 = vld [vmem:[%s10395_s1 + $0x1b0] ss:$8 sps:$4 sm:$0xff]  }
  0x59   : > { %1259 = vmatpush1.bf16.msra.mxu0 %v7041_v9  ;;  %v334_v9 = vor.u32 %v333_v0, %v330_v61  ;;  %v7106_v61 = vld [vmem:[%s10395_s1 + $0x1a4] ss:$8 sps:$4 sm:$0xff]   ;;  %v7101_v0 = vld [vmem:[%s10395_s1 + $0xa0] ss:$8 sps:$4 sm:$0xff]  }
  0x5a   : > { %1312 = vmatpush1.bf16.msra.mxu1 %v7044_v10  ;;  %1260 = vmatprep.subr.bf16.mxu0 %v7049_v11  ;;  %v339_v10 = vrot.slane %v337_v50, 5  ;;  %v7076_v11 = vld [vmem:[%s10395_s1 + $0x1f4] ss:$8 sps:$4 sm:$0xff]   ;;  %v7089_v50 = vld [vmem:[%s10395_s1 + $0xc0] ss:$8 sps:$4 sm:$0xff]  }
  0x5b   : > { %1313 = vmatprep.subr.bf16.mxu1 %v7052_v12  ;;  %v326_v12 = vsel %vm8035_vm2, %v321_v3, %v325_v42  ;;  %v7085_v42 = vld [vmem:[%s10395_s1 + $0xd4] ss:$8 sps:$4 sm:$0xff]  }
  0x5c   : > { %v7112_v3 = vld [vmem:[%s10395_s1 + $0x194] ss:$8 sps:$4 sm:$0xff]  }
  0x5d   : > { %1261 = vmatpush1.bf16.msra.mxu0 %v7047_v13  ;;  %v354_v13 = vsel %vm8035_vm2, %v349_v4, %v353_v46  ;;  %v7086_v46 = vld [vmem:[%s10395_s1 + $0x1d0] ss:$8 sps:$4 sm:$0xff]  }
  0x5e   : > { %1314 = vmatpush1.bf16.msra.mxu1 %v7050_v14  ;;  %1262 = vmatprep.subr.bf16.mxu0 %v7055_v15  ;;  %v362_v14 = vor.u32 %v361_v7, %v358_v5  ;;  %v367_v15 = vrot.slane %v365_v1, 5  ;;  %v5727_v26 = vcombine.low %v326_v12, %v354_v13  ;;  %v7104_v1 = vld [vmem:[%s10395_s1 + $0x1a0] ss:$8 sps:$4 sm:$0xff]   ;;  %v7107_v4 = vld [vmem:[%s10395_s1 + $0x90] ss:$8 sps:$4 sm:$0xff]  }
  0x5f   : > { %1315 = vmatprep.subr.bf16.mxu1 %v7058_v16  ;;  %v5728_v16 = vcombine.high %v326_v12, %v354_v13  ;;  %v7110_v5 = vld [vmem:[%s10395_s1 + $0x190] ss:$8 sps:$4 sm:$0xff]   ;;  %v7115_v7 = vld [vmem:[%s10395_s1 + $0x84] ss:$8 sps:$4 sm:$0xff]   ;;  %v7124_v12 = vld [vmem:[%s10395_s1 + $0x574] ss:$8 sps:$4 sm:$0xff]  }
  0x60   : > { %v7119_v13 = vld [vmem:[%s10395_s1 + $0x470] ss:$8 sps:$4 sm:$0xff]  }
  0x61   : > { %1263 = vmatpush1.bf16.msra.mxu0 %v7053_v18  ;;  %v335_v18 = vrot.slane %v334_v9, 4  ;;  %828 = vmatprep.mubr.bf16.mxu0 %v5728_v16  ;;  %v7113_v9 = vld [vmem:[%s10395_s1 + $0x80] ss:$8 sps:$4 sm:$0xff]   ;;  %v7130_v16 = vld [vmem:[%s10395_s1 + $0x564] ss:$8 sps:$4 sm:$0xff]  }
  0x62   : > { %1316 = vmatpush1.bf16.msra.mxu1 %v7056_v19  ;;  %1264 = vmatprep.subr.bf16.mxu0 %v7061_v20  ;;  %v7071_v19 = vld [vmem:[%s10395_s1 + $0xf0] ss:$8 sps:$4 sm:$0xff]  }
  0x63   : > { %1317 = vmatprep.subr.bf16.mxu1 %v7064_v21  ;;  %v7074_v20 = vld [vmem:[%s10395_s1 + $0x1f0] ss:$8 sps:$4 sm:$0xff]   ;;  %v363_v21 = vrot.slane %v362_v14, 4  ;;  %v340_v28 = vsel %vm8035_vm2, %v335_v18, %v339_v10  ;;  %829 = vmatmul.mubr.bf16.gmra.mxu0 %v5727_v26  ;;  %v7116_v10 = vld [vmem:[%s10395_s1 + $0x180] ss:$8 sps:$4 sm:$0xff]   ;;  %v5800_v18 = vcombine.high %v8161_v22, %v8164_v23  ;;  %v5801_v26 = vcombine.low %v8178_v31, %v8181_v32 }
  0x64   : > { %v7122_v14 = vld [vmem:[%s10395_s1 + $0x570] ss:$8 sps:$4 sm:$0xff]   ;;  %v1387_v22 = vrot.slane %v7993_v52, 5  ;;  %v1395_v23 = vrot.slane %v7996_v53, 5  ;;  %v7140_v52 = vld [vmem:[%s10395_s1 + $0x540] ss:$8 sps:$4 sm:$0xff]  }
  0x65   : > { %1265 = vmatpush1.bf16.msra.mxu0 %v7059_v33  ;;  %v368_v30 = vsel %vm8035_vm2, %v363_v21, %v367_v15  ;;  %v7127_v15 = vld [vmem:[%s10395_s1 + $0x464] ss:$8 sps:$4 sm:$0xff]   ;;  %v7128_v21 = vld [vmem:[%s10395_s1 + $0x560] ss:$8 sps:$4 sm:$0xff]   ;;  %v1399_v53 = vrot.slane %v8020_v6, 5 }
  0x66   : > { %1318 = vmatpush1.bf16.msra.mxu1 %v7062_v34  ;;  %1266 = vmatprep.subr.bf16.mxu0 %v7067_v45  ;;  %v5730_v33 = vcombine.high %v340_v28, %v368_v30  ;;  %v5796_v34 = vcombine.high %v7981_v48, %v7990_v51  ;;  %v5729_v41 = vcombine.low %v340_v28, %v368_v30  ;;  %v7083_v45 = vld [vmem:[%s10395_s1 + $0xd0] ss:$8 sps:$4 sm:$0xff]   ;;  %v7133_v48 = vld [vmem:[%s10395_s1 + $0x454] ss:$8 sps:$4 sm:$0xff]   ;;  %v7142_v28 = vld [vmem:[%s10395_s1 + $0x544] ss:$8 sps:$4 sm:$0xff]  }
  0x67   : > { %1319 = vmatprep.subr.bf16.mxu1 %v7070_v54  ;;  %v7092_v54 = vld [vmem:[%s10395_s1 + $0x1c0] ss:$8 sps:$4 sm:$0xff]   ;;  %v7136_v51 = vld [vmem:[%s10395_s1 + $0x554] ss:$8 sps:$4 sm:$0xff]  }
  0x68   : > { %881 = vmatprep.mubr.bf16.mxu1 %v5730_v33  ;;  %1284 = vmatprep.mubr.bf16.mxu0 %v5796_v34  ;;  %v1358_v30 = vld [vmem:[%s7966_s4] sm:$0xee]  ;;  %v1359_v34 = vld [vmem:[%s7966_s4 + $0x8] sm:$0xee] }
  0x69   : > { %1267 = vmatpush1.bf16.msra.mxu0 %v7065_v60  ;;  %882 = vmatmul.mubr.bf16.gmra.mxu1 %v5729_v41  ;;  %v7103_v60 = vld [vmem:[%s10395_s1 + $0xa4] ss:$8 sps:$4 sm:$0xff]   ;;  %v5868_v41 = vrot.slane %v1359_v34, 9  ;;  %v7185_v34 = vld [vmem:[%s10395_s1 + $0x4c0] ss:$8 sps:$4 sm:$0xff]  }
  0x6a   : > { %1320 = vmatpush1.bf16.msra.mxu1 %v7068_v2  ;;  %1268 = vmatprep.subr.bf16.mxu0 %v7073_v8  ;;  %v7109_v2 = vld [vmem:[%s10395_s1 + $0x94] ss:$8 sps:$4 sm:$0xff]   ;;  %v7118_v8 = vld [vmem:[%s10395_s1 + $0x184] ss:$8 sps:$4 sm:$0xff]  }
  0x6b   : > { %1321 = vmatprep.subr.bf16.mxu1 %v7076_v11  ;;  %1337 = vmatprep.mubr.bf16.mxu1 %v5798_v44  ;;  %v7121_v11 = vld [vmem:[%s10395_s1 + $0x474] ss:$8 sps:$4 sm:$0xff]   ;;  %v1360_v33 = vld [vmem:[%s7966_s4 + $0x20] sm:$0xee]  ;;  %v1361_v6 = vld [vmem:[%s7966_s4 + $0x28] sm:$0xee] }
  0x6d   : > { %1269 = vmatpush2.bf16.msra.mxu0 %v7071_v19  ;;  %v5802_v19 = vcombine.high %v8178_v31, %v8181_v32  ;;  %v1391_v31 = vrot.slane %v8011_v63, 5  ;;  %v7137_v32 = vld [vmem:[%s10395_s1 + $0x440] ss:$8 sps:$4 sm:$0xff]   ;;  %v7148_v63 = vld [vmem:[%s10395_s1 + $0x534] ss:$8 sps:$4 sm:$0xff]  }
  0x6e   : > { %1322 = vmatpush2.bf16.msra.mxu1 %v7074_v20  ;;  %1270 = vmatprep.subr.bf16.mxu0 %v7079_v27  ;;  %v7125_v20 = vld [vmem:[%s10395_s1 + $0x460] ss:$8 sps:$4 sm:$0xff]   ;;  %v7139_v27 = vld [vmem:[%s10395_s1 + $0x444] ss:$8 sps:$4 sm:$0xff]  }
  0x6f   : > { %1323 = vmatprep.subr.bf16.mxu1 %v7082_v29  ;;  %v7145_v29 = vld [vmem:[%s10395_s1 + $0x434] ss:$8 sps:$4 sm:$0xff]  }
  0x71   : > { %1271 = vmatpush2.bf16.msra.mxu0 %v7077_v35  ;;  %v5867_v35 = vrot.slane %v1358_v30, 9  ;;  %v7187_v30 = vld [vmem:[%s10395_s1 + $0x4c4] ss:$8 sps:$4 sm:$0xff]  }
  0x72   : > { %1324 = vmatpush2.bf16.msra.mxu1 %v7080_v36  ;;  %1272 = vmatprep.subr.bf16.mxu0 %v7085_v42  ;;  %v5869_v36 = vrot.slane %v1360_v33, 9  ;;  %v5870_v42 = vrot.slane %v1361_v6, 9  ;;  %v7190_v33 = vld [vmem:[%s10395_s1 + $0x5c4] ss:$8 sps:$4 sm:$0xff]   ;;  %v7196_v6 = vld [vmem:[%s10395_s1 + $0x5b4] ss:$8 sps:$4 sm:$0xff]  }
  0x73   : > { %1325 = vmatprep.subr.bf16.mxu1 %v7088_v43  ;;  %v7143_v43 = vld [vmem:[%s10395_s1 + $0x430] ss:$8 sps:$4 sm:$0xff]   ;;  %v8407_v44 = vsel %vm8362_vm5, %v5867_v35, %v1387_v22  ;;  %v7188_v35 = vld [vmem:[%s10395_s1 + $0x5c0] ss:$8 sps:$4 sm:$0xff]  }
  0x74   : > { %v7170_v22 = vld [vmem:[%s10395_s1 + $0x5f0] ss:$8 sps:$4 sm:$0xff]  }
  0x75   : > { %1273 = vmatpush2.bf16.msra.mxu0 %v7083_v45  ;;  %v8411_v45 = vsel %vm8362_vm5, %v5869_v36, %v1395_v23  ;;  %v7175_v23 = vld [vmem:[%s10395_s1 + $0x4e4] ss:$8 sps:$4 sm:$0xff]   ;;  %v7193_v36 = vld [vmem:[%s10395_s1 + $0x4b4] ss:$8 sps:$4 sm:$0xff]  }
  0x76   : > { %1326 = vmatpush2.bf16.msra.mxu1 %v7086_v46  ;;  %1274 = vmatprep.subr.bf16.mxu0 %v7091_v47  ;;  %v8415_v46 = vsel %vm8362_vm5, %v5868_v41, %v1391_v31  ;;  %v1403_v47 = vrot.slane %v8167_v24, 5  ;;  %v1411_v24 = vrot.slane %v8170_v25, 5  ;;  %v7149_v25 = vld [vmem:[%s10395_s1 + $0x420] ss:$8 sps:$4 sm:$0xff]   ;;  %v7191_v41 = vld [vmem:[%s10395_s1 + $0x4b0] ss:$8 sps:$4 sm:$0xff]  }
  0x77   : > { %1327 = vmatprep.subr.bf16.mxu1 %v7094_v49  ;;  %v7146_v49 = vld [vmem:[%s10395_s1 + $0x530] ss:$8 sps:$4 sm:$0xff]   ;;  %v7173_v31 = vld [vmem:[%s10395_s1 + $0x4e0] ss:$8 sps:$4 sm:$0xff]  }
  0x79   : > { %1275 = vmatpush2.bf16.msra.mxu0 %v7089_v50  ;;  %v5939_v50 = vcombine.low %v8407_v44, %v8411_v45 }
  0x7a   : > { %1328 = vmatpush2.bf16.msra.mxu1 %v7092_v54  ;;  %1276 = vmatprep.subr.bf16.mxu0 %v7097_v55  ;;  %v5940_v54 = vcombine.high %v8407_v44, %v8411_v45  ;;  %v8427_v55 = vsel %vm8362_vm5, %v5870_v42, %v1399_v53  ;;  %v7184_v53 = vld [vmem:[%s10395_s1 + $0x5d4] ss:$8 sps:$4 sm:$0xff]   ;;  %v7194_v42 = vld [vmem:[%s10395_s1 + $0x5b0] ss:$8 sps:$4 sm:$0xff]   ;;  %v8633_v44 = vld [vmem:[%s7966_s4 + $0x20] sm:$0xff] }
  0x7b   : > { %1329 = vmatprep.subr.bf16.mxu1 %v7100_v56  ;;  %v7151_v56 = vld [vmem:[%s10395_s1 + $0x424] ss:$8 sps:$4 sm:$0xff]  }
  0x7c   : > { %v8636_v45 = vld [vmem:[%s7966_s4 + $0x40] sm:$0xff] }
  0x7d   : > { %1277 = vmatpush2.bf16.msra.mxu0 %v7095_v57  ;;  %v7154_v57 = vld [vmem:[%s10395_s1 + $0x524] ss:$8 sps:$4 sm:$0xff]  }
  0x7e   : > { %1330 = vmatpush2.bf16.msra.mxu1 %v7098_v58  ;;  %1278 = vmatprep.subr.bf16.mxu0 %v7103_v60  ;;  %v5941_v58 = vcombine.low %v8415_v46, %v8427_v55  ;;  %v5942_v60 = vcombine.high %v8415_v46, %v8427_v55  ;;  %v8645_v46 = vld [vmem:[%s7966_s4 + $0x28] sm:$0xff]  ;;  %v7227_v55 = vld [vmem:[%s10395_s1 + $0x650] ss:$8 sps:$4 sm:$0xff]  }
  0x7f   : > { %1331 = vmatprep.subr.bf16.mxu1 %v7106_v61  ;;  %v1407_v61 = vrot.slane %v8191_v37, 5  ;;  %v1365_v37 = vld [vmem:[%s7966_s4 + $0x68] sm:$0xee] }
  0x81   : > { %1279 = vmatpush2.bf16.msra.mxu0 %v7101_v0  ;;  %v7152_v0 = vld [vmem:[%s10395_s1 + $0x520] ss:$8 sps:$4 sm:$0xff]  }
  0x82   : > { %1332 = vmatpush2.bf16.msra.mxu1 %v7104_v1  ;;  %1280 = vmatprep.subr.bf16.mxu0 %v7109_v2  ;;  %v1415_v1 = vrot.slane %v8194_v40, 5  ;;  %v1362_v2 = vld [vmem:[%s7966_s4 + $0x40] sm:$0xee]  ;;  %v7160_v40 = vld [vmem:[%s10395_s1 + $0x514] ss:$8 sps:$4 sm:$0xff]  }
  0x83   : > { %1333 = vmatprep.subr.bf16.mxu1 %v7112_v3  ;;  %v1364_v3 = vld [vmem:[%s7966_s4 + $0x60] sm:$0xee] }
  0x85   : > { %1281 = vmatpush2.bf16.msra.mxu0 %v7107_v4  ;;  %v1363_v4 = vld [vmem:[%s7966_s4 + $0x48] sm:$0xee] }
  0x86   : > { %1334 = vmatpush2.bf16.msra.mxu1 %v7110_v5  ;;  %1282 = vmatprep.subr.bf16.mxu0 %v7115_v7  ;;  %v5871_v5 = vrot.slane %v1362_v2, 9  ;;  %v5873_v7 = vrot.slane %v1364_v3, 9  ;;  %v7217_v2 = vld [vmem:[%s10395_s1 + $0x674] ss:$8 sps:$4 sm:$0xff]  }
  0x87   : > { %1335 = vmatprep.subr.bf16.mxu1 %v7118_v8  ;;  %v5872_v8 = vrot.slane %v1363_v4, 9  ;;  %v7220_v3 = vld [vmem:[%s10395_s1 + $0x774] ss:$8 sps:$4 sm:$0xff]   ;;  %v7215_v4 = vld [vmem:[%s10395_s1 + $0x670] ss:$8 sps:$4 sm:$0xff]  }
  0x89   : > { %1283 = vmatpush2.bf16.msra.mxu0 %v7113_v9  ;;  %v7157_v9 = vld [vmem:[%s10395_s1 + $0x414] ss:$8 sps:$4 sm:$0xff]  }
  0x8a   : > { %1336 = vmatpush2.bf16.msra.mxu1 %v7116_v10  ;;  %1834 = vmatprep.subr.bf16.mxu0 %v7121_v11  ;;  %v5874_v10 = vrot.slane %v1365_v37, 9  ;;  %v8460_v11 = vsel %vm8362_vm5, %v5871_v5, %v1403_v47  ;;  %v7202_v47 = vld [vmem:[%s10395_s1 + $0x5a4] ss:$8 sps:$4 sm:$0xff]   ;;  %v7218_v5 = vld [vmem:[%s10395_s1 + $0x770] ss:$8 sps:$4 sm:$0xff]  }
  0x8b   : > { %1887 = vmatprep.subr.bf16.mxu1 %v7124_v12  ;;  %v8464_v12 = vsel %vm8362_vm5, %v5873_v7, %v1411_v24  ;;  %v7205_v24 = vld [vmem:[%s10395_s1 + $0x494] ss:$8 sps:$4 sm:$0xff]   ;;  %v7223_v7 = vld [vmem:[%s10395_s1 + $0x664] ss:$8 sps:$4 sm:$0xff]  }
  0x8c   : > { %1285 = vmatmul.mubr.bf16.vlgmr.msra.gmra.mxu0 %v5795_v38  ;;  %v7131_v38 = vld [vmem:[%s10395_s1 + $0x450] ss:$8 sps:$4 sm:$0xff]   ;;  %v7226_v37 = vld [vmem:[%s10395_s1 + $0x764] ss:$8 sps:$4 sm:$0xff]  }
  0x8d   : > { %1338 = vmatmul.mubr.bf16.vlgmr.msra.gmra.mxu1 %v5797_v39  ;;  %1835 = vmatpush1.bf16.msra.mxu0 %v7119_v13  ;;  %v7134_v39 = vld [vmem:[%s10395_s1 + $0x550] ss:$8 sps:$4 sm:$0xff]   ;;  %v8468_v13 = vsel %vm8362_vm5, %v5872_v8, %v1407_v61  ;;  %v7211_v61 = vld [vmem:[%s10395_s1 + $0x484] ss:$8 sps:$4 sm:$0xff]   ;;  %v7221_v8 = vld [vmem:[%s10395_s1 + $0x660] ss:$8 sps:$4 sm:$0xff]  }
  0x8e   : > { %1888 = vmatpush1.bf16.msra.mxu1 %v7122_v14  ;;  %1836 = vmatprep.subr.bf16.mxu0 %v7127_v15  ;;  %v5944_v14 = vcombine.high %v8460_v11, %v8464_v12  ;;  %v8474_v15 = vsel %vm8362_vm5, %v5874_v10, %v1415_v1  ;;  %v7212_v1 = vld [vmem:[%s10395_s1 + $0x580] ss:$8 sps:$4 sm:$0xff]   ;;  %v7232_v10 = vld [vmem:[%s10395_s1 + $0x754] ss:$8 sps:$4 sm:$0xff]  }
  0x8f   : > { %1889 = vmatprep.subr.bf16.mxu1 %v7130_v16  ;;  %1294 = vmatprep.mubr.bf16.mxu0 %v5800_v18  ;;  %v5943_v16 = vcombine.low %v8460_v11, %v8464_v12  ;;  %v7155_v18 = vld [vmem:[%s10395_s1 + $0x410] ss:$8 sps:$4 sm:$0xff]   ;;  %v7241_v11 = vld [vmem:[%s10395_s1 + $0x634] ss:$8 sps:$4 sm:$0xff]  }
  0x90   : > { %1347 = vmatprep.mubr.bf16.mxu1 %v5802_v19  ;;  %v7158_v19 = vld [vmem:[%s10395_s1 + $0x510] ss:$8 sps:$4 sm:$0xff]   ;;  %v7244_v12 = vld [vmem:[%s10395_s1 + $0x734] ss:$8 sps:$4 sm:$0xff]  }
  0x91   : > { %1837 = vmatpush1.bf16.msra.mxu0 %v7125_v20  ;;  %v5946_v20 = vcombine.high %v8468_v13, %v8474_v15 }
  0x92   : > { %1890 = vmatpush1.bf16.msra.mxu1 %v7128_v21  ;;  %1838 = vmatprep.subr.bf16.mxu0 %v7133_v48  ;;  %v5945_v21 = vcombine.low %v8468_v13, %v8474_v15  ;;  %v7163_v48 = vld [vmem:[%s10395_s1 + $0x404] ss:$8 sps:$4 sm:$0xff]   ;;  %v7239_v13 = vld [vmem:[%s10395_s1 + $0x630] ss:$8 sps:$4 sm:$0xff]  }
  0x93   : > { %1891 = vmatprep.subr.bf16.mxu1 %v7136_v51  ;;  %v7166_v51 = vld [vmem:[%s10395_s1 + $0x504] ss:$8 sps:$4 sm:$0xff]   ;;  %v7242_v15 = vld [vmem:[%s10395_s1 + $0x730] ss:$8 sps:$4 sm:$0xff]  }
  0x94   : > { %1295 = vmatmul.mubr.bf16.gmra.mxu0 %v5799_v62  ;;  %v7161_v62 = vld [vmem:[%s10395_s1 + $0x400] ss:$8 sps:$4 sm:$0xff]  }
  0x95   : > { %1348 = vmatmul.mubr.bf16.gmra.mxu1 %v5801_v26  ;;  %1839 = vmatpush1.bf16.msra.mxu0 %v7131_v38  ;;  %v7164_v38 = vld [vmem:[%s10395_s1 + $0x500] ss:$8 sps:$4 sm:$0xff]   ;;  %v7172_v26 = vld [vmem:[%s10395_s1 + $0x5f4] ss:$8 sps:$4 sm:$0xff]  }
  0x96   : > { %1892 = vmatpush1.bf16.msra.mxu1 %v7134_v39  ;;  %1840 = vmatprep.subr.bf16.mxu0 %v7139_v27  ;;  %v7169_v39 = vld [vmem:[%s10395_s1 + $0x4f4] ss:$8 sps:$4 sm:$0xff]   ;;  %v7167_v27 = vld [vmem:[%s10395_s1 + $0x4f0] ss:$8 sps:$4 sm:$0xff]  }
  0x97   : > { %1893 = vmatprep.subr.bf16.mxu1 %v7142_v28  ;;  %1866 = vmatprep.mubr.bf16.mxu0 %v5940_v54  ;;  %v7178_v28 = vld [vmem:[%s10395_s1 + $0x5e4] ss:$8 sps:$4 sm:$0xff]   ;;  %v7200_v54 = vld [vmem:[%s10395_s1 + $0x5a0] ss:$8 sps:$4 sm:$0xff]  }
  0x98   : > { %1919 = vmatprep.mubr.bf16.mxu1 %v5942_v60  ;;  %v7206_v60 = vld [vmem:[%s10395_s1 + $0x590] ss:$8 sps:$4 sm:$0xff]  }
  0x99   : > { %1841 = vmatpush1.bf16.msra.mxu0 %v7137_v32  ;;  %v7176_v32 = vld [vmem:[%s10395_s1 + $0x5e0] ss:$8 sps:$4 sm:$0xff]  }
  0x9a   : > { %1894 = vmatpush1.bf16.msra.mxu1 %v7140_v52  ;;  %1842 = vmatprep.subr.bf16.mxu0 %v7145_v29  ;;  %v7181_v52 = vld [vmem:[%s10395_s1 + $0x4d4] ss:$8 sps:$4 sm:$0xff]   ;;  %v7179_v29 = vld [vmem:[%s10395_s1 + $0x4d0] ss:$8 sps:$4 sm:$0xff]  }
  0x9b   : > { %1895 = vmatprep.subr.bf16.mxu1 %v7148_v63  ;;  %v7182_v63 = vld [vmem:[%s10395_s1 + $0x5d0] ss:$8 sps:$4 sm:$0xff]  }
  0x9d   : > { %1843 = vmatpush1.bf16.msra.mxu0 %v7143_v43  ;;  %v7199_v43 = vld [vmem:[%s10395_s1 + $0x4a4] ss:$8 sps:$4 sm:$0xff]  }
  0x9e   : > { %1896 = vmatpush1.bf16.msra.mxu1 %v7146_v49  ;;  %1844 = vmatprep.subr.bf16.mxu0 %v7151_v56  ;;  %v7197_v49 = vld [vmem:[%s10395_s1 + $0x4a0] ss:$8 sps:$4 sm:$0xff]   ;;  %v7208_v56 = vld [vmem:[%s10395_s1 + $0x594] ss:$8 sps:$4 sm:$0xff]  }
  0x9f   : > { %1897 = vmatprep.subr.bf16.mxu1 %v7154_v57  ;;  %v7203_v57 = vld [vmem:[%s10395_s1 + $0x490] ss:$8 sps:$4 sm:$0xff]  }
  0xa1   : > { %1845 = vmatpush1.bf16.msra.mxu0 %v7149_v25  ;;  %v7214_v25 = vld [vmem:[%s10395_s1 + $0x584] ss:$8 sps:$4 sm:$0xff]  }
  0xa2   : > { %1898 = vmatpush1.bf16.msra.mxu1 %v7152_v0  ;;  %1846 = vmatprep.subr.bf16.mxu0 %v7157_v9  ;;  %v7209_v0 = vld [vmem:[%s10395_s1 + $0x480] ss:$8 sps:$4 sm:$0xff]  }
  0xa3   : > { %1899 = vmatprep.subr.bf16.mxu1 %v7160_v40  ;;  %v7224_v9 = vld [vmem:[%s10395_s1 + $0x760] ss:$8 sps:$4 sm:$0xff]   ;;  %v7229_v40 = vld [vmem:[%s10395_s1 + $0x654] ss:$8 sps:$4 sm:$0xff]  }
  0xa5   : > { %1847 = vmatpush1.bf16.msra.mxu0 %v7155_v18  ;;  %v7238_v18 = vld [vmem:[%s10395_s1 + $0x744] ss:$8 sps:$4 sm:$0xff]  }
  0xa6   : > { %1900 = vmatpush1.bf16.msra.mxu1 %v7158_v19  ;;  %1848 = vmatprep.subr.bf16.mxu0 %v7163_v48  ;;  %v6084_v19 = vcombine.high %v8633_v44, %v8636_v45  ;;  %v7233_v48 = vld [vmem:[%s10395_s1 + $0x640] ss:$8 sps:$4 sm:$0xff]  }
  0xa7   : > { %1901 = vmatprep.subr.bf16.mxu1 %v7166_v51  ;;  %v7236_v51 = vld [vmem:[%s10395_s1 + $0x740] ss:$8 sps:$4 sm:$0xff]  }
  0xa9   : > { %1849 = vmatpush1.bf16.msra.mxu0 %v7161_v62  ;;  %v7245_v62 = vld [vmem:[%s10395_s1 + $0x620] ss:$8 sps:$4 sm:$0xff]  }
  0xaa   : > { %1902 = vmatpush1.bf16.msra.mxu1 %v7164_v38  ;;  %1850 = vmatprep.subr.bf16.mxu0 %v7169_v39  ;;  %v7248_v38 = vld [vmem:[%s10395_s1 + $0x720] ss:$8 sps:$4 sm:$0xff]   ;;  %v7253_v39 = vld [vmem:[%s10395_s1 + $0x614] ss:$8 sps:$4 sm:$0xff]  }
  0xab   : > { %1903 = vmatprep.subr.bf16.mxu1 %v7172_v26  ;;  %v7256_v26 = vld [vmem:[%s10395_s1 + $0x714] ss:$8 sps:$4 sm:$0xff]  }
  0xad   : > { %1851 = vmatpush2.bf16.msra.mxu0 %v7167_v27  ;;  %v7251_v27 = vld [vmem:[%s10395_s1 + $0x610] ss:$8 sps:$4 sm:$0xff]  }
  0xae   : > { %1904 = vmatpush2.bf16.msra.mxu1 %v7170_v22  ;;  %1852 = vmatprep.subr.bf16.mxu0 %v7175_v23  ;;  %v7254_v22 = vld [vmem:[%s10395_s1 + $0x710] ss:$8 sps:$4 sm:$0xff]   ;;  %v7259_v23 = vld [vmem:[%s10395_s1 + $0x604] ss:$8 sps:$4 sm:$0xff]  }
  0xaf   : > { %1905 = vmatprep.subr.bf16.mxu1 %v7178_v28  ;;  %v7262_v28 = vld [vmem:[%s10395_s1 + $0x704] ss:$8 sps:$4 sm:$0xff]  }
  0xb1   : > { %1853 = vmatpush2.bf16.msra.mxu0 %v7173_v31  ;;  %v7257_v31 = vld [vmem:[%s10395_s1 + $0x600] ss:$8 sps:$4 sm:$0xff]  }
  0xb2   : > { %1906 = vmatpush2.bf16.msra.mxu1 %v7176_v32  ;;  %1854 = vmatprep.subr.bf16.mxu0 %v7181_v52  ;;  %v7260_v32 = vld [vmem:[%s10395_s1 + $0x700] ss:$8 sps:$4 sm:$0xff]   ;;  %v7265_v52 = vld [vmem:[%s10395_s1 + $0x6f4] ss:$8 sps:$4 sm:$0xff]  }
  0xb3   : > { %1907 = vmatprep.subr.bf16.mxu1 %v7184_v53  ;;  %v7268_v53 = vld [vmem:[%s10395_s1 + $0x7f4] ss:$8 sps:$4 sm:$0xff]  }
  0xb5   : > { %1855 = vmatpush2.bf16.msra.mxu0 %v7179_v29  ;;  %v7263_v29 = vld [vmem:[%s10395_s1 + $0x6f0] ss:$8 sps:$4 sm:$0xff]  }
  0xb6   : > { %1908 = vmatpush2.bf16.msra.mxu1 %v7182_v63  ;;  %1856 = vmatprep.subr.bf16.mxu0 %v7187_v30  ;;  %v7266_v63 = vld [vmem:[%s10395_s1 + $0x7f0] ss:$8 sps:$4 sm:$0xff]   ;;  %v7271_v30 = vld [vmem:[%s10395_s1 + $0x6e4] ss:$8 sps:$4 sm:$0xff]  }
  0xb7   : > { %1909 = vmatprep.subr.bf16.mxu1 %v7190_v33  ;;  %v7274_v33 = vld [vmem:[%s10395_s1 + $0x7e4] ss:$8 sps:$4 sm:$0xff]  }
  0xb9   : > { %1857 = vmatpush2.bf16.msra.mxu0 %v7185_v34  ;;  %v7269_v34 = vld [vmem:[%s10395_s1 + $0x6e0] ss:$8 sps:$4 sm:$0xff]  }
  0xba   : > { %1910 = vmatpush2.bf16.msra.mxu1 %v7188_v35  ;;  %1858 = vmatprep.subr.bf16.mxu0 %v7193_v36  ;;  %v7272_v35 = vld [vmem:[%s10395_s1 + $0x7e0] ss:$8 sps:$4 sm:$0xff]   ;;  %v7277_v36 = vld [vmem:[%s10395_s1 + $0x6d4] ss:$8 sps:$4 sm:$0xff]  }
  0xbb   : > { %1911 = vmatprep.subr.bf16.mxu1 %v7196_v6  ;;  %v7280_v6 = vld [vmem:[%s10395_s1 + $0x7d4] ss:$8 sps:$4 sm:$0xff]  }
  0xbd   : > { %1859 = vmatpush2.bf16.msra.mxu0 %v7191_v41  ;;  %v7275_v41 = vld [vmem:[%s10395_s1 + $0x6d0] ss:$8 sps:$4 sm:$0xff]  }
  0xbe   : > { %1912 = vmatpush2.bf16.msra.mxu1 %v7194_v42  ;;  %1860 = vmatprep.subr.bf16.mxu0 %v7199_v43  ;;  %v7278_v42 = vld [vmem:[%s10395_s1 + $0x7d0] ss:$8 sps:$4 sm:$0xff]   ;;  %v7283_v43 = vld [vmem:[%s10395_s1 + $0x6c4] ss:$8 sps:$4 sm:$0xff]  }
  0xbf   : > { %1913 = vmatprep.subr.bf16.mxu1 %v7202_v47  ;;  %v7286_v47 = vld [vmem:[%s10395_s1 + $0x7c4] ss:$8 sps:$4 sm:$0xff]  }
  0xc1   : > { %1861 = vmatpush2.bf16.msra.mxu0 %v7197_v49  ;;  %v7281_v49 = vld [vmem:[%s10395_s1 + $0x6c0] ss:$8 sps:$4 sm:$0xff]  }
  0xc2   : > { %1914 = vmatpush2.bf16.msra.mxu1 %v7200_v54  ;;  %1862 = vmatprep.subr.bf16.mxu0 %v7205_v24  ;;  %v7284_v54 = vld [vmem:[%s10395_s1 + $0x7c0] ss:$8 sps:$4 sm:$0xff]   ;;  %v7289_v24 = vld [vmem:[%s10395_s1 + $0x6b4] ss:$8 sps:$4 sm:$0xff]  }
  0xc3   : > { %1915 = vmatprep.subr.bf16.mxu1 %v7208_v56  ;;  %v7292_v56 = vld [vmem:[%s10395_s1 + $0x7b4] ss:$8 sps:$4 sm:$0xff]  }
  0xc5   : > { %1863 = vmatpush2.bf16.msra.mxu0 %v7203_v57  ;;  %v7287_v57 = vld [vmem:[%s10395_s1 + $0x6b0] ss:$8 sps:$4 sm:$0xff]  }
  0xc6   : > { %1916 = vmatpush2.bf16.msra.mxu1 %v7206_v60  ;;  %1864 = vmatprep.subr.bf16.mxu0 %v7211_v61  ;;  %v7290_v60 = vld [vmem:[%s10395_s1 + $0x7b0] ss:$8 sps:$4 sm:$0xff]   ;;  %v7295_v61 = vld [vmem:[%s10395_s1 + $0x6a4] ss:$8 sps:$4 sm:$0xff]  }
  0xc7   : > { %1917 = vmatprep.subr.bf16.mxu1 %v7214_v25  ;;  %v7298_v25 = vld [vmem:[%s10395_s1 + $0x7a4] ss:$8 sps:$4 sm:$0xff]  }
  0xc9   : > { %1865 = vmatpush2.bf16.msra.mxu0 %v7209_v0  ;;  %v7293_v0 = vld [vmem:[%s10395_s1 + $0x6a0] ss:$8 sps:$4 sm:$0xff]  }
  0xca   : > { %1918 = vmatpush2.bf16.msra.mxu1 %v7212_v1  ;;  %2382 = vmatprep.subr.bf16.mxu0 %v7217_v2  ;;  %v7296_v1 = vld [vmem:[%s10395_s1 + $0x7a0] ss:$8 sps:$4 sm:$0xff]   ;;  %v7301_v2 = vld [vmem:[%s10395_s1 + $0x694] ss:$8 sps:$4 sm:$0xff]  }
  0xcb   : > { %2435 = vmatprep.subr.bf16.mxu1 %v7220_v3  ;;  %v7304_v3 = vld [vmem:[%s10395_s1 + $0x794] ss:$8 sps:$4 sm:$0xff]  }
  0xcc   : > { %1867 = vmatmul.mubr.bf16.vlgmr.msra.gmra.mxu0 %v5939_v50  ;;  %v8648_v50 = vld [vmem:[%s7966_s4 + $0x48] sm:$0xff] }
  0xcd   : > { %1920 = vmatmul.mubr.bf16.vlgmr.msra.gmra.mxu1 %v5941_v58  ;;  %2383 = vmatpush1.bf16.msra.mxu0 %v7215_v4  ;;  %v7230_v58 = vld [vmem:[%s10395_s1 + $0x750] ss:$8 sps:$4 sm:$0xff]   ;;  %v2513_v4 = vshrl.u32 %v8633_v44, 16 }
  0xce   : > { %2436 = vmatpush1.bf16.msra.mxu1 %v7218_v5  ;;  %2384 = vmatprep.subr.bf16.mxu0 %v7223_v7  ;;  %v2516_v5 = vshll.u32 %v8633_v44, 16  ;;  %v2541_v7 = vshrl.u32 %v8636_v45, 16 }
  0xcf   : > { %2437 = vmatprep.subr.bf16.mxu1 %v7226_v37  ;;  %1876 = vmatprep.mubr.bf16.mxu0 %v5944_v14  ;;  %v7235_v14 = vld [vmem:[%s10395_s1 + $0x644] ss:$8 sps:$4 sm:$0xff]   ;;  %v2544_v37 = vshll.u32 %v8636_v45, 16 }
  0xd0   : > { %1929 = vmatprep.mubr.bf16.mxu1 %v5946_v20  ;;  %v6086_v20 = vcombine.high %v8645_v46, %v8648_v50 }
  0xd1   : > { %2385 = vmatpush1.bf16.msra.mxu0 %v7221_v8  ;;  %v2527_v8 = vshrl.u32 %v8645_v46, 16 }
  0xd2   : > { %2438 = vmatpush1.bf16.msra.mxu1 %v7224_v9  ;;  %2386 = vmatprep.subr.bf16.mxu0 %v7229_v40  ;;  %v2530_v9 = vshll.u32 %v8645_v46, 16  ;;  %v2555_v40 = vshrl.u32 %v8648_v50, 16 }
  0xd3   : > { %2439 = vmatprep.subr.bf16.mxu1 %v7232_v10  ;;  %v7299_v10 = vld [vmem:[%s10395_s1 + $0x690] ss:$8 sps:$4 sm:$0xff]  }
  0xd4   : > { %1877 = vmatmul.mubr.bf16.gmra.mxu0 %v5943_v16  ;;  %v7247_v16 = vld [vmem:[%s10395_s1 + $0x624] ss:$8 sps:$4 sm:$0xff]  }
  0xd5   : > { %1930 = vmatmul.mubr.bf16.gmra.mxu1 %v5945_v21  ;;  %2387 = vmatpush1.bf16.msra.mxu0 %v7227_v55  ;;  %v7250_v21 = vld [vmem:[%s10395_s1 + $0x724] ss:$8 sps:$4 sm:$0xff]   ;;  %v7302_v55 = vld [vmem:[%s10395_s1 + $0x790] ss:$8 sps:$4 sm:$0xff]  }
  0xd6   : > { %2440 = vmatpush1.bf16.msra.mxu1 %v7230_v58  ;;  %2388 = vmatprep.subr.bf16.mxu0 %v7235_v14  ;;  %v2558_v58 = vshll.u32 %v8648_v50, 16  ;;  %v7307_v14 = vld [vmem:[%s10395_s1 + $0x684] ss:$8 sps:$4 sm:$0xff]  }
  0xd7   : > { %2441 = vmatprep.subr.bf16.mxu1 %v7238_v18  ;;  %2414 = vmatprep.mubr.bf16.mxu0 %v6084_v19  ;;  %v7310_v18 = vld [vmem:[%s10395_s1 + $0x784] ss:$8 sps:$4 sm:$0xff]   ;;  %v2515_v19 = vrot.slane %v2513_v4, 4 }
  0xd8   : > { %2467 = vmatprep.mubr.bf16.mxu1 %v6086_v20  ;;  %v2518_v20 = vrot.slane %v2516_v5, 5  ;;  %v7325_v5 = vld [vmem:[%s10395_s1 + $0x854] ss:$8 sps:$4 sm:$0xff]  }
  0xd9   : > { %2389 = vmatpush1.bf16.msra.mxu0 %v7233_v48  ;;  %v2543_v48 = vrot.slane %v2541_v7, 4  ;;  %v7328_v7 = vld [vmem:[%s10395_s1 + $0x954] ss:$8 sps:$4 sm:$0xff]  }
  0xda   : > { %2442 = vmatpush1.bf16.msra.mxu1 %v7236_v51  ;;  %2390 = vmatprep.subr.bf16.mxu0 %v7241_v11  ;;  %v2546_v51 = vrot.slane %v2544_v37, 5  ;;  %v2529_v11 = vrot.slane %v2527_v8, 4 }
  0xdb   : > { %2443 = vmatprep.subr.bf16.mxu1 %v7244_v12  ;;  %v2532_v12 = vrot.slane %v2530_v9, 5 }
  0xdd   : > { %2391 = vmatpush1.bf16.msra.mxu0 %v7239_v13  ;;  %v2557_v13 = vrot.slane %v2555_v40, 4 }
  0xde   : > { %2444 = vmatpush1.bf16.msra.mxu1 %v7242_v15  ;;  %2392 = vmatprep.subr.bf16.mxu0 %v7247_v16  ;;  %v7305_v15 = vld [vmem:[%s10395_s1 + $0x680] ss:$8 sps:$4 sm:$0xff]  }
  0xdf   : > { %2445 = vmatprep.subr.bf16.mxu1 %v7250_v21  ;;  %v7308_v16 = vld [vmem:[%s10395_s1 + $0x780] ss:$8 sps:$4 sm:$0xff]   ;;  %v8831_v21 = vld [vmem:[%s7966_s4 + $0x30] sm:$0x11] }
  0xe1   : > { %2393 = vmatpush1.bf16.msra.mxu0 %v7245_v62  ;;  %v8834_v62 = vld [vmem:[%s7966_s4 + $0x50] sm:$0x11] }
  0xe2   : > { %2446 = vmatpush1.bf16.msra.mxu1 %v7248_v38  ;;  %2394 = vmatprep.subr.bf16.mxu0 %v7253_v39  ;;  %v2560_v38 = vrot.slane %v2558_v58, 5  ;;  %v7313_v39 = vld [vmem:[%s10395_s1 + $0x874] ss:$8 sps:$4 sm:$0xff]  }
  0xe3   : > { %2447 = vmatprep.subr.bf16.mxu1 %v7256_v26  ;;  %v7316_v26 = vld [vmem:[%s10395_s1 + $0x974] ss:$8 sps:$4 sm:$0xff]  }
  0xe5   : > { %2395 = vmatpush1.bf16.msra.mxu0 %v7251_v27  ;;  %v8843_v27 = vld [vmem:[%s7966_s4 + $0x38] sm:$0x11] }
  0xe6   : > { %2448 = vmatpush1.bf16.msra.mxu1 %v7254_v22  ;;  %2396 = vmatprep.subr.bf16.mxu0 %v7259_v23  ;;  %v8846_v22 = vld [vmem:[%s7966_s4 + $0x58] sm:$0x11]  ;;  %v6083_v23 = vcombine.low %v8633_v44, %v8636_v45  ;;  %v2522_v44 = vshll.u32 %v8831_v21, 16  ;;  %v2550_v45 = vshll.u32 %v8834_v62, 16 }
  0xe7   : > { %2449 = vmatprep.subr.bf16.mxu1 %v7262_v28  ;;  %v6085_v28 = vcombine.low %v8645_v46, %v8648_v50  ;;  %v2536_v46 = vshll.u32 %v8843_v27, 16  ;;  %v2564_v50 = vshll.u32 %v8846_v22, 16 }
  0xe9   : > { %2397 = vmatpush1.bf16.msra.mxu0 %v7257_v31  ;;  %v8853_v31 = vld [vmem:[%s7966_s4 + $0x60] sm:$0xff] }
  0xea   : > { %2450 = vmatpush1.bf16.msra.mxu1 %v7260_v32  ;;  %2398 = vmatprep.subr.bf16.mxu0 %v7265_v52  ;;  %v8856_v32 = vld [vmem:[%s7966_s4 + $0x80] sm:$0xff]  ;;  %v7311_v52 = vld [vmem:[%s10395_s1 + $0x870] ss:$8 sps:$4 sm:$0xff]  }
  0xeb   : > { %2451 = vmatprep.subr.bf16.mxu1 %v7268_v53  ;;  %v8862_v53 = vld [vmem:[%s7966_s4 + $0x68] sm:$0xff]  ;;  %v6087_v8 = vcombine.low %v8853_v31, %v8856_v32 }
  0xed   : > { %2399 = vmatpush2.bf16.msra.mxu0 %v7263_v29  ;;  %v8865_v29 = vld [vmem:[%s7966_s4 + $0x88] sm:$0xff] }
  0xee   : > { %2452 = vmatpush2.bf16.msra.mxu1 %v7266_v63  ;;  %2400 = vmatprep.subr.bf16.mxu0 %v7271_v30  ;;  %v2519_v63 = vor.u32 %v2518_v20, %v2515_v19  ;;  %v2547_v30 = vor.u32 %v2546_v51, %v2543_v48  ;;  %v6089_v9 = vcombine.low %v8862_v53, %v8865_v29  ;;  %v7326_v48 = vld [vmem:[%s10395_s1 + $0x950] ss:$8 sps:$4 sm:$0xff]  }
  0xef   : > { %2453 = vmatprep.subr.bf16.mxu1 %v7274_v33  ;;  %v2533_v33 = vor.u32 %v2532_v12, %v2529_v11  ;;  %v7331_v12 = vld [vmem:[%s10395_s1 + $0x844] ss:$8 sps:$4 sm:$0xff]  }
  0xf1   : > { %2401 = vmatpush2.bf16.msra.mxu0 %v7269_v34  ;;  %v2561_v34 = vor.u32 %v2560_v38, %v2557_v13  ;;  %v7334_v13 = vld [vmem:[%s10395_s1 + $0x944] ss:$8 sps:$4 sm:$0xff]  }
  0xf2   : > { %2454 = vmatpush2.bf16.msra.mxu1 %v7272_v35  ;;  %2402 = vmatprep.subr.bf16.mxu0 %v7277_v36  ;;  %v7314_v35 = vld [vmem:[%s10395_s1 + $0x970] ss:$8 sps:$4 sm:$0xff]   ;;  %v7319_v36 = vld [vmem:[%s10395_s1 + $0x864] ss:$8 sps:$4 sm:$0xff]  }
  0xf3   : > { %2455 = vmatprep.subr.bf16.mxu1 %v7280_v6  ;;  %v7322_v6 = vld [vmem:[%s10395_s1 + $0x964] ss:$8 sps:$4 sm:$0xff]  }
  0xf5   : > { %2403 = vmatpush2.bf16.msra.mxu0 %v7275_v41  ;;  %v6088_v41 = vcombine.high %v8853_v31, %v8856_v32 }
  0xf6   : > { %2456 = vmatpush2.bf16.msra.mxu1 %v7278_v42  ;;  %2404 = vmatprep.subr.bf16.mxu0 %v7283_v43  ;;  %v6090_v42 = vcombine.high %v8862_v53, %v8865_v29  ;;  %v7317_v43 = vld [vmem:[%s10395_s1 + $0x860] ss:$8 sps:$4 sm:$0xff]  }
  0xf7   : > { %2457 = vmatprep.subr.bf16.mxu1 %v7286_v47  ;;  %v2520_v47 = vrot.slane %v2519_v63, 4  ;;  %v7338_v63 = vld [vmem:[%s10395_s1 + $0x930] ss:$8 sps:$4 sm:$0xff]  }
  0xf9   : > { %2405 = vmatpush2.bf16.msra.mxu0 %v7281_v49  ;;  %v2548_v49 = vrot.slane %v2547_v30, 4  ;;  %v7343_v30 = vld [vmem:[%s10395_s1 + $0x824] ss:$8 sps:$4 sm:$0xff]  }
  0xfa   : > { %2458 = vmatpush2.bf16.msra.mxu1 %v7284_v54  ;;  %2406 = vmatprep.subr.bf16.mxu0 %v7289_v24  ;;  %v2534_v54 = vrot.slane %v2533_v33, 4  ;;  %v2562_v24 = vrot.slane %v2561_v34, 4  ;;  %v7346_v33 = vld [vmem:[%s10395_s1 + $0x924] ss:$8 sps:$4 sm:$0xff]   ;;  %v7341_v34 = vld [vmem:[%s10395_s1 + $0x820] ss:$8 sps:$4 sm:$0xff]  }
  0xfb   : > { %2459 = vmatprep.subr.bf16.mxu1 %v7292_v56 }
  0xfd   : > { %2407 = vmatpush2.bf16.msra.mxu0 %v7287_v57 }
  0xfe   : > { %2460 = vmatpush2.bf16.msra.mxu1 %v7290_v60  ;;  %2408 = vmatprep.subr.bf16.mxu0 %v7295_v61  ;;  %v2524_v60 = vrot.slane %v2522_v44, 5  ;;  %v2552_v61 = vrot.slane %v2550_v45, 5  ;;  %v7344_v44 = vld [vmem:[%s10395_s1 + $0x920] ss:$8 sps:$4 sm:$0xff]   ;;  %v7349_v45 = vld [vmem:[%s10395_s1 + $0x814] ss:$8 sps:$4 sm:$0xff]  }
  0xff   : > { %2461 = vmatprep.subr.bf16.mxu1 %v7298_v25  ;;  %v2538_v25 = vrot.slane %v2536_v46, 5  ;;  %v7352_v46 = vld [vmem:[%s10395_s1 + $0x914] ss:$8 sps:$4 sm:$0xff]  }
 0x100   : > { %v8909_v58 = vsel %vm8035_vm2, %v2520_v47, %v2524_v60  ;;  %v9001_v60 = vld [vmem:[%s7966_s4 + $0x70] sm:$0x11] }
 0x101   : > { %2409 = vmatpush2.bf16.msra.mxu0 %v7293_v0  ;;  %v2566_v0 = vrot.slane %v2564_v50, 5  ;;  %v3181_v50 = vrot.slane %v8831_v21, 5 }
 0x102   : > { %2462 = vmatpush2.bf16.msra.mxu1 %v7296_v1  ;;  %2410 = vmatprep.subr.bf16.mxu0 %v7301_v2  ;;  %v7320_v2 = vld [vmem:[%s10395_s1 + $0x960] ss:$8 sps:$4 sm:$0xff]  }
 0x103   : > { %2463 = vmatprep.subr.bf16.mxu1 %v7304_v3  ;;  %v8921_v19 = vsel %vm8035_vm2, %v2562_v24, %v2566_v0  ;;  %v6310_v24 = vld [vmem:[%s7966_s4 + $0x48] sm:$0xee] }
 0x104   : > { %v7353_v0 = vld [vmem:[%s10395_s1 + $0x800] ss:$8 sps:$4 sm:$0xff]  }
 0x105   : > { %2411 = vmatpush2.bf16.msra.mxu0 %v7299_v10 }
 0x106   : > { %2464 = vmatpush2.bf16.msra.mxu1 %v7302_v55  ;;  %2412 = vmatprep.subr.bf16.mxu0 %v7307_v14  ;;  %v7323_v55 = vld [vmem:[%s10395_s1 + $0x850] ss:$8 sps:$4 sm:$0xff]   ;;  %v8913_v14 = vsel %vm8035_vm2, %v2548_v49, %v2552_v61  ;;  %v6308_v49 = vld [vmem:[%s7966_s4 + $0x28] sm:$0xee] }
 0x107   : > { %2465 = vmatprep.subr.bf16.mxu1 %v7310_v18  ;;  %v8917_v18 = vsel %vm8035_vm2, %v2534_v54, %v2538_v25  ;;  %v6316_v21 = vrot.slane %v6308_v49, 9  ;;  %v7368_v49 = vld [vmem:[%s10395_s1 + $0x9e0] ss:$8 sps:$4 sm:$0xff]  }
 0x108   : > { %v6238_v38 = vcombine.high %v8917_v18, %v8921_v19 }
 0x109   : > { %2413 = vmatpush2.bf16.msra.mxu0 %v7305_v15 }
 0x10a   : > { %2466 = vmatpush2.bf16.msra.mxu1 %v7308_v16  ;;  %3041 = vmatprep.subr.bf16.mxu0 %v7313_v39  ;;  %v6236_v16 = vcombine.high %v8909_v58, %v8913_v14  ;;  %v7329_v39 = vld [vmem:[%s10395_s1 + $0x840] ss:$8 sps:$4 sm:$0xff]  }
 0x10b   : > { %3094 = vmatprep.subr.bf16.mxu1 %v7316_v26  ;;  %v7332_v26 = vld [vmem:[%s10395_s1 + $0x940] ss:$8 sps:$4 sm:$0xff]  }
 0x10c   : > { %v820_v56 = vpop.f32.mrf.mxu0  ;;  %2415 = vmatmul.mubr.bf16.vlgmr.msra.gmra.mxu0 %v6083_v23  ;;  %v7337_v23 = vld [vmem:[%s10395_s1 + $0x834] ss:$8 sps:$4 sm:$0xff]  }
 0x10d   : > { %v873_v57 = vpop.f32.mrf.mxu1  ;;  %2468 = vmatmul.mubr.bf16.vlgmr.msra.gmra.mxu1 %v6085_v28  ;;  %3042 = vmatpush1.bf16.msra.mxu0 %v7311_v52  ;;  %v7340_v28 = vld [vmem:[%s10395_s1 + $0x934] ss:$8 sps:$4 sm:$0xff]   ;;  %v7335_v52 = vld [vmem:[%s10395_s1 + $0x830] ss:$8 sps:$4 sm:$0xff]  }
 0x10e   : > { %v8887_v1 = vadd.f32 %v873_v57, %v820_v56  ;;  %3095 = vmatpush1.bf16.msra.mxu1 %v7314_v35  ;;  %v822_v3 = vpop.f32.mrf.mxu0  ;;  %3043 = vmatprep.subr.bf16.mxu0 %v7319_v36  ;;  %v6307_v35 = vld [vmem:[%s7966_s4 + $0x20] sm:$0xee]  ;;  %v3189_v36 = vrot.slane %v8834_v62, 5  ;;  %v7350_v62 = vld [vmem:[%s10395_s1 + $0x910] ss:$8 sps:$4 sm:$0xff]   ;;  %v6318_v56 = vrot.slane %v6310_v24, 9 }
 0x10f   : > { %v875_v4 = vpop.f32.mrf.mxu1  ;;  %3096 = vmatprep.subr.bf16.mxu1 %v7322_v6  ;;  %2424 = vmatprep.mubr.bf16.mxu0 %v6088_v41  ;;  %v3185_v6 = vrot.slane %v8843_v27, 5  ;;  %v3193_v41 = vrot.slane %v8846_v22, 5  ;;  %v6315_v47 = vrot.slane %v6307_v35, 9  ;;  %v7355_v27 = vld [vmem:[%s10395_s1 + $0x804] ss:$8 sps:$4 sm:$0xff]  }
 0x110   : > { %v8898_v37 = vadd.f32 %v875_v4, %v822_v3  ;;  %2477 = vmatprep.mubr.bf16.mxu1 %v6090_v42  ;;  %v824_v40 = vpop.f32.mrf.mxu0  ;;  %v7347_v42 = vld [vmem:[%s10395_s1 + $0x810] ss:$8 sps:$4 sm:$0xff]   ;;  %v7358_v57 = vld [vmem:[%s10395_s1 + $0x904] ss:$8 sps:$4 sm:$0xff]   ;;  %v7376_v24 = vld [vmem:[%s10395_s1 + $0x9d4] ss:$8 sps:$4 sm:$0xff]  }
 0x111   : > { %v877_v10 = vpop.f32.mrf.mxu1  ;;  %3044 = vmatpush1.bf16.msra.mxu0 %v7317_v43  ;;  %v6309_v43 = vld [vmem:[%s7966_s4 + $0x40] sm:$0xee]  ;;  %v8995_v22 = vsel %vm8362_vm5, %v6315_v47, %v3181_v50  ;;  %v9009_v25 = vsel %vm8362_vm5, %v6316_v21, %v3185_v6  ;;  %v9018_v3 = vld [vmem:[%s7966_s4 + $0x90] sm:$0x11]  ;;  %v9021_v4 = vld [vmem:[%s7966_s4 + $0x78] sm:$0x11] }
 0x112   : > { %v8923_v20 = vadd.f32 %v877_v10, %v824_v40  ;;  %3097 = vmatpush1.bf16.msra.mxu1 %v7320_v2  ;;  %v826_v51 = vpop.f32.mrf.mxu0  ;;  %3045 = vmatprep.subr.bf16.mxu0 %v7325_v5  ;;  %v6317_v54 = vrot.slane %v6309_v43, 9  ;;  %v7356_v2 = vld [vmem:[%s10395_s1 + $0x900] ss:$8 sps:$4 sm:$0xff]   ;;  %v7364_v40 = vld [vmem:[%s10395_s1 + $0x9f4] ss:$8 sps:$4 sm:$0xff]  }
 0x113   : > { %v879_v11 = vpop.f32.mrf.mxu1  ;;  %3098 = vmatprep.subr.bf16.mxu1 %v7328_v7  ;;  %v9038_v10 = vld [vmem:[%s7966_s4 + $0x98] sm:$0x11]  ;;  %v7367_v35 = vld [vmem:[%s10395_s1 + $0x8e4] ss:$8 sps:$4 sm:$0xff]   ;;  %v7365_v47 = vld [vmem:[%s10395_s1 + $0x8e0] ss:$8 sps:$4 sm:$0xff]  }
 0x114   : > { %v8934_v15 = vadd.f32 %v879_v11, %v826_v51  ;;  %2425 = vmatmul.mubr.bf16.gmra.mxu0 %v6087_v8  ;;  %v9005_v61 = vsel %vm8362_vm5, %v6317_v54, %v3189_v36  ;;  %v9029_v8 = vsel %vm8362_vm5, %v6318_v56, %v3193_v41  ;;  %v3197_v51 = vrot.slane %v9001_v60, 5  ;;  %v7370_v36 = vld [vmem:[%s10395_s1 + $0x9e4] ss:$8 sps:$4 sm:$0xff]   ;;  %v7373_v54 = vld [vmem:[%s10395_s1 + $0x8d4] ss:$8 sps:$4 sm:$0xff]  }
 0x115   : > { %2478 = vmatmul.mubr.bf16.gmra.mxu1 %v6089_v9  ;;  %3046 = vmatpush1.bf16.msra.mxu0 %v7323_v55  ;;  %v6387_v5 = vcombine.low %v8995_v22, %v9005_v61  ;;  %v6388_v7 = vcombine.high %v8995_v22, %v9005_v61  ;;  %v7361_v9 = vld [vmem:[%s10395_s1 + $0x8f4] ss:$8 sps:$4 sm:$0xff]   ;;  %v6389_v55 = vcombine.low %v9009_v25, %v9029_v8  ;;  %v3205_v11 = vrot.slane %v9018_v3, 5  ;;  %v7371_v56 = vld [vmem:[%s10395_s1 + $0x8d0] ss:$8 sps:$4 sm:$0xff]  }
 0x116   : > { %3099 = vmatpush1.bf16.msra.mxu1 %v7326_v48  ;;  %3047 = vmatprep.subr.bf16.mxu0 %v7331_v12  ;;  %v6390_v48 = vcombine.high %v9009_v25, %v9029_v8  ;;  %v6311_v12 = vld [vmem:[%s7966_s4 + $0x60] sm:$0xee]  ;;  %v7517_v25 = vld [vmem:[%s10395_s1 + $0xc54] ss:$8 sps:$4 sm:$0xff]  }
 0x117   : > { %3100 = vmatprep.subr.bf16.mxu1 %v7334_v13  ;;  %3073 = vmatprep.mubr.bf16.mxu0 %v6236_v16  ;;  %v6313_v13 = vld [vmem:[%s7966_s4 + $0x80] sm:$0xee]  ;;  %v3201_v16 = vrot.slane %v9021_v4, 5 }
 0x118   : > { %3126 = vmatprep.mubr.bf16.mxu1 %v6238_v38  ;;  %v3209_v38 = vrot.slane %v9038_v10, 5 }
 0x119   : > { %3048 = vmatpush1.bf16.msra.mxu0 %v7329_v39  ;;  %v6319_v39 = vrot.slane %v6311_v12, 9 }
 0x11a   : > { %3101 = vmatpush1.bf16.msra.mxu1 %v7332_v26  ;;  %3049 = vmatprep.subr.bf16.mxu0 %v7337_v23  ;;  %v6321_v26 = vrot.slane %v6313_v13, 9  ;;  %v6312_v23 = vld [vmem:[%s7966_s4 + $0x68] sm:$0xee]  ;;  %v2569_v13 = vshrl.u32 %v8853_v31, 16 }
 0x11b   : > { %3102 = vmatprep.subr.bf16.mxu1 %v7340_v28  ;;  %v6314_v28 = vld [vmem:[%s7966_s4 + $0x88] sm:$0xee] }
 0x11d   : > { %3050 = vmatpush1.bf16.msra.mxu0 %v7335_v52  ;;  %v6320_v52 = vrot.slane %v6312_v23, 9 }
 0x11e   : > { %3103 = vmatpush1.bf16.msra.mxu1 %v7338_v63  ;;  %3051 = vmatprep.subr.bf16.mxu0 %v7343_v30  ;;  %v6322_v63 = vrot.slane %v6314_v28, 9  ;;  %v9054_v30 = vsel %vm8362_vm5, %v6319_v39, %v3197_v51  ;;  %v7377_v39 = vld [vmem:[%s10395_s1 + $0x8c0] ss:$8 sps:$4 sm:$0xff]   ;;  %v2600_v28 = vshll.u32 %v8856_v32, 16 }
 0x11f   : > { %3104 = vmatprep.subr.bf16.mxu1 %v7346_v33  ;;  %v9058_v33 = vsel %vm8362_vm5, %v6321_v26, %v3205_v11  ;;  %v7380_v26 = vld [vmem:[%s10395_s1 + $0x9c0] ss:$8 sps:$4 sm:$0xff]  }
 0x120   : > { %v9074_v50 = vsel %vm8362_vm5, %v6322_v63, %v3209_v38  ;;  %v6391_v41 = vcombine.low %v9054_v30, %v9058_v33  ;;  %v2597_v38 = vshrl.u32 %v8856_v32, 16  ;;  %v2614_v32 = vshll.u32 %v8865_v29, 16 }
 0x121   : > { %3052 = vmatpush1.bf16.msra.mxu0 %v7341_v34  ;;  %v7359_v34 = vld [vmem:[%s10395_s1 + $0x8f0] ss:$8 sps:$4 sm:$0xff]  }
 0x122   : > { %3105 = vmatpush1.bf16.msra.mxu1 %v7344_v44  ;;  %3053 = vmatprep.subr.bf16.mxu0 %v7349_v45  ;;  %v7362_v44 = vld [vmem:[%s10395_s1 + $0x9f0] ss:$8 sps:$4 sm:$0xff]   ;;  %v6392_v45 = vcombine.high %v9054_v30, %v9058_v33  ;;  %v7532_v30 = vld [vmem:[%s10395_s1 + $0xd34] ss:$8 sps:$4 sm:$0xff]  }
 0x123   : > { %3106 = vmatprep.subr.bf16.mxu1 %v7352_v46  ;;  %v9070_v46 = vsel %vm8362_vm5, %v6320_v52, %v3201_v16  ;;  %v830_v43 = vpop.f32.mrf.mxu0  ;;  %v2572_v16 = vshll.u32 %v8853_v31, 16  ;;  %v7385_v31 = vld [vmem:[%s10395_s1 + $0x8b4] ss:$8 sps:$4 sm:$0xff]  }
 0x124   : > { %v6394_v6 = vcombine.high %v9070_v46, %v9074_v50  ;;  %v7388_v52 = vld [vmem:[%s10395_s1 + $0x9b4] ss:$8 sps:$4 sm:$0xff]  }
 0x125   : > { %3054 = vmatpush1.bf16.msra.mxu0 %v7347_v42  ;;  %v6393_v42 = vcombine.low %v9070_v46, %v9074_v50  ;;  %v832_v21 = vpop.f32.mrf.mxu0  ;;  %v7527_v50 = vld [vmem:[%s10395_s1 + $0xc30] ss:$8 sps:$4 sm:$0xff]  }
 0x126   : > { %3107 = vmatpush1.bf16.msra.mxu1 %v7350_v62  ;;  %3055 = vmatprep.subr.bf16.mxu0 %v7355_v27 }
 0x127   : > { %3108 = vmatprep.subr.bf16.mxu1 %v7358_v57  ;;  %v834_v27 = vpop.f32.mrf.mxu0  ;;  %v7374_v57 = vld [vmem:[%s10395_s1 + $0x9d0] ss:$8 sps:$4 sm:$0xff]  }
 0x129   : > { %3056 = vmatpush1.bf16.msra.mxu0 %v7353_v0  ;;  %v883_v62 = vpop.f32.mrf.mxu1  ;;  %v836_v12 = vpop.f32.mrf.mxu0 }
 0x12a   : > { %3109 = vmatpush1.bf16.msra.mxu1 %v7356_v2  ;;  %3057 = vmatprep.subr.bf16.mxu0 %v7361_v9  ;;  %v9106_v0 = vadd.f32 %v883_v62, %v830_v43  ;;  %v7379_v2 = vld [vmem:[%s10395_s1 + $0x8c4] ss:$8 sps:$4 sm:$0xff]   ;;  %v2571_v43 = vrot.slane %v2569_v13, 4 }
 0x12b   : > { %3110 = vmatprep.subr.bf16.mxu1 %v7364_v40  ;;  %v7382_v9 = vld [vmem:[%s10395_s1 + $0x9c4] ss:$8 sps:$4 sm:$0xff]   ;;  %v885_v40 = vpop.f32.mrf.mxu1 }
 0x12c   : > { %v9114_v51 = vadd.f32 %v885_v40, %v832_v21  ;;  %v2602_v21 = vrot.slane %v2600_v28, 5  ;;  %v7397_v40 = vld [vmem:[%s10395_s1 + $0x894] ss:$8 sps:$4 sm:$0xff]   ;;  %v2592_v28 = vshll.u32 %v9021_v4, 16 }
 0x12d   : > { %3058 = vmatpush2.bf16.msra.mxu0 %v7359_v34  ;;  %v887_v11 = vpop.f32.mrf.mxu1  ;;  %v2583_v34 = vshrl.u32 %v8862_v53, 16 }
 0x12e   : > { %3111 = vmatpush2.bf16.msra.mxu1 %v7362_v44  ;;  %3059 = vmatprep.subr.bf16.mxu0 %v7367_v35  ;;  %v9125_v23 = vadd.f32 %v887_v11, %v834_v27  ;;  %v2586_v35 = vshll.u32 %v8862_v53, 16  ;;  %v7391_v53 = vld [vmem:[%s10395_s1 + $0x8a4] ss:$8 sps:$4 sm:$0xff]   ;;  %v7400_v11 = vld [vmem:[%s10395_s1 + $0x994] ss:$8 sps:$4 sm:$0xff]  }
 0x12f   : > { %3112 = vmatprep.subr.bf16.mxu1 %v7370_v36  ;;  %v889_v63 = vpop.f32.mrf.mxu1  ;;  %v2611_v36 = vshrl.u32 %v8865_v29, 16  ;;  %v7394_v29 = vld [vmem:[%s10395_s1 + $0x9a4] ss:$8 sps:$4 sm:$0xff]   ;;  %v2585_v62 = vrot.slane %v2583_v34, 4 }
 0x130   : > { %v9135_v44 = vadd.f32 %v889_v63, %v836_v12  ;;  %v2588_v27 = vrot.slane %v2586_v35, 5  ;;  %v7398_v63 = vld [vmem:[%s10395_s1 + $0x990] ss:$8 sps:$4 sm:$0xff]  }
 0x131   : > { %3060 = vmatpush2.bf16.msra.mxu0 %v7365_v47  ;;  %v2574_v47 = vrot.slane %v2572_v16, 5 }
 0x132   : > { %3113 = vmatpush2.bf16.msra.mxu1 %v7368_v49  ;;  %3061 = vmatprep.subr.bf16.mxu0 %v7373_v54  ;;  %v7383_v49 = vld [vmem:[%s10395_s1 + $0x8b0] ss:$8 sps:$4 sm:$0xff]   ;;  %v2589_v16 = vor.u32 %v2588_v27, %v2585_v62 }
 0x133   : > { %3114 = vmatprep.subr.bf16.mxu1 %v7376_v24  ;;  %v7386_v54 = vld [vmem:[%s10395_s1 + $0x9b0] ss:$8 sps:$4 sm:$0xff]   ;;  %v2599_v24 = vrot.slane %v2597_v38, 4  ;;  %v2575_v12 = vor.u32 %v2574_v47, %v2571_v43  ;;  %v2594_v43 = vrot.slane %v2592_v28, 5 }
 0x134   : > { %v2590_v34 = vrot.slane %v2589_v16, 4  ;;  %v7416_v16 = vld [vmem:[%s10395_s1 + $0xb60] ss:$8 sps:$4 sm:$0xff]  }
 0x135   : > { %3062 = vmatpush2.bf16.msra.mxu0 %v7371_v56  ;;  %v2613_v56 = vrot.slane %v2611_v36, 4  ;;  %v2603_v13 = vor.u32 %v2602_v21, %v2599_v24  ;;  %v2576_v4 = vrot.slane %v2575_v12, 4  ;;  %v7409_v24 = vld [vmem:[%s10395_s1 + $0xa74] ss:$8 sps:$4 sm:$0xff]   ;;  %v6237_v21 = vcombine.low %v8917_v18, %v8921_v19  ;;  %v7415_v18 = vld [vmem:[%s10395_s1 + $0xa64] ss:$8 sps:$4 sm:$0xff]  }
 0x136   : > { %3115 = vmatpush2.bf16.msra.mxu1 %v7374_v57  ;;  %3063 = vmatprep.subr.bf16.mxu0 %v7379_v2  ;;  %v2616_v57 = vrot.slane %v2614_v32, 5  ;;  %v7389_v2 = vld [vmem:[%s10395_s1 + $0x8a0] ss:$8 sps:$4 sm:$0xff]   ;;  %v7418_v19 = vld [vmem:[%s10395_s1 + $0xb64] ss:$8 sps:$4 sm:$0xff]  }
 0x137   : > { %3116 = vmatprep.subr.bf16.mxu1 %v7382_v9  ;;  %v7392_v9 = vld [vmem:[%s10395_s1 + $0x9a0] ss:$8 sps:$4 sm:$0xff]  }
 0x138   : > { %v2617_v38 = vor.u32 %v2616_v57, %v2613_v56  ;;  %v2595_v56 = vsel %vm8035_vm2, %v2590_v34, %v2594_v43  ;;  %v7419_v34 = vld [vmem:[%s10395_s1 + $0xa50] ss:$8 sps:$4 sm:$0xff]  }
 0x139   : > { %3064 = vmatpush2.bf16.msra.mxu0 %v7377_v39  ;;  %v2578_v39 = vshll.u32 %v9001_v60, 16  ;;  %v7403_v60 = vld [vmem:[%s10395_s1 + $0x884] ss:$8 sps:$4 sm:$0xff]  }
 0x13a   : > { %3117 = vmatpush2.bf16.msra.mxu1 %v7380_v26  ;;  %3065 = vmatprep.subr.bf16.mxu0 %v7385_v31  ;;  %v2606_v26 = vshll.u32 %v9018_v3, 16  ;;  %v2620_v31 = vshll.u32 %v9038_v10, 16  ;;  %v7406_v3 = vld [vmem:[%s10395_s1 + $0x984] ss:$8 sps:$4 sm:$0xff]   ;;  %v2604_v10 = vrot.slane %v2603_v13, 4  ;;  %v2618_v35 = vrot.slane %v2617_v38, 4 }
 0x13b   : > { %3118 = vmatprep.subr.bf16.mxu1 %v7388_v52  ;;  %v7395_v52 = vld [vmem:[%s10395_s1 + $0x890] ss:$8 sps:$4 sm:$0xff]   ;;  %v2580_v36 = vrot.slane %v2578_v39, 5  ;;  %v7413_v13 = vld [vmem:[%s10395_s1 + $0xa60] ss:$8 sps:$4 sm:$0xff]  }
 0x13c   : > { %v2608_v32 = vrot.slane %v2606_v26, 5  ;;  %v2622_v47 = vrot.slane %v2620_v31, 5  ;;  %v7421_v26 = vld [vmem:[%s10395_s1 + $0xa54] ss:$8 sps:$4 sm:$0xff]  }
 0x13d   : > { %3066 = vmatpush2.bf16.msra.mxu0 %v7383_v49  ;;  %v7401_v49 = vld [vmem:[%s10395_s1 + $0x880] ss:$8 sps:$4 sm:$0xff]   ;;  %v2581_v62 = vsel %vm8035_vm2, %v2576_v4, %v2580_v36 }
 0x13e   : > { %3119 = vmatpush2.bf16.msra.mxu1 %v7386_v54  ;;  %3067 = vmatprep.subr.bf16.mxu0 %v7391_v53  ;;  %v7404_v54 = vld [vmem:[%s10395_s1 + $0x980] ss:$8 sps:$4 sm:$0xff]   ;;  %v7412_v53 = vld [vmem:[%s10395_s1 + $0xb74] ss:$8 sps:$4 sm:$0xff]   ;;  %v2609_v27 = vsel %vm8035_vm2, %v2604_v10, %v2608_v32  ;;  %v2623_v57 = vsel %vm8035_vm2, %v2618_v35, %v2622_v47  ;;  %v7427_v32 = vld [vmem:[%s10395_s1 + $0xa44] ss:$8 sps:$4 sm:$0xff]  }
 0x13f   : > { %3120 = vmatprep.subr.bf16.mxu1 %v7394_v29  ;;  %v6235_v29 = vcombine.low %v8909_v58, %v8913_v14  ;;  %v7407_v58 = vld [vmem:[%s10395_s1 + $0xa70] ss:$8 sps:$4 sm:$0xff]  }
 0x140   : > { %v7410_v14 = vld [vmem:[%s10395_s1 + $0xb70] ss:$8 sps:$4 sm:$0xff]  }
 0x141   : > { %3068 = vmatpush2.bf16.msra.mxu0 %v7389_v2  ;;  %v6240_v2 = vcombine.high %v2581_v62, %v2609_v27 }
 0x142   : > { %3121 = vmatpush2.bf16.msra.mxu1 %v7392_v9  ;;  %3069 = vmatprep.subr.bf16.mxu0 %v7397_v40  ;;  %v6242_v9 = vcombine.high %v2595_v56, %v2623_v57 }
 0x143   : > { %3122 = vmatprep.subr.bf16.mxu1 %v7400_v11 }
 0x145   : > { %3070 = vmatpush2.bf16.msra.mxu0 %v7395_v52 }
 0x146   : > { %3123 = vmatpush2.bf16.msra.mxu1 %v7398_v63  ;;  %3071 = vmatprep.subr.bf16.mxu0 %v7403_v60  ;;  %v6239_v60 = vcombine.low %v2581_v62, %v2609_v27  ;;  %v7433_v27 = vld [vmem:[%s10395_s1 + $0xa34] ss:$8 sps:$4 sm:$0xff]  }
 0x147   : > { %3124 = vmatprep.subr.bf16.mxu1 %v7406_v3  ;;  %v6241_v3 = vcombine.low %v2595_v56, %v2623_v57 }
 0x149   : > { %3072 = vmatpush2.bf16.msra.mxu0 %v7401_v49 }
 0x14a   : > { %3125 = vmatpush2.bf16.msra.mxu1 %v7404_v54  ;;  %3628 = vmatprep.subr.bf16.mxu0 %v7409_v24 }
 0x14b   : > { %3681 = vmatprep.subr.bf16.mxu1 %v7412_v53 }
 0x14c   : > { %v1286_v40 = vpop.f32.mrf.mxu0  ;;  %3074 = vmatmul.mubr.bf16.vlgmr.msra.gmra.mxu0 %v6235_v29  ;;  %v7425_v29 = vld [vmem:[%s10395_s1 + $0xa40] ss:$8 sps:$4 sm:$0xff]  }
 0x14d   : > { %v1339_v11 = vpop.f32.mrf.mxu1  ;;  %3127 = vmatmul.mubr.bf16.vlgmr.msra.gmra.mxu1 %v6237_v21  ;;  %v1287_v12 = vadd.f32 %v1286_v40, %v8887_v1  ;;  %3629 = vmatpush1.bf16.msra.mxu0 %v7407_v58  ;;  %v7424_v1 = vld [vmem:[%s10395_s1 + $0xb54] ss:$8 sps:$4 sm:$0xff]   ;;  %v7428_v21 = vld [vmem:[%s10395_s1 + $0xb40] ss:$8 sps:$4 sm:$0xff]  }
 0x14e   : > { %3682 = vmatpush1.bf16.msra.mxu1 %v7410_v14  ;;  %v1288_v38 = vpop.f32.mrf.mxu0  ;;  %3630 = vmatprep.subr.bf16.mxu0 %v7415_v18  ;;  %v7431_v18 = vld [vmem:[%s10395_s1 + $0xa30] ss:$8 sps:$4 sm:$0xff]  }
 0x14f   : > { %v1341_v39 = vpop.f32.mrf.mxu1  ;;  %3683 = vmatprep.subr.bf16.mxu1 %v7418_v19  ;;  %v9229_v28 = vadd.f32 %v1339_v11, %v1287_v12  ;;  %v1289_v31 = vadd.f32 %v1288_v38, %v8898_v37  ;;  %3083 = vmatprep.mubr.bf16.mxu0 %v6240_v2  ;;  %v7422_v37 = vld [vmem:[%s10395_s1 + $0xb50] ss:$8 sps:$4 sm:$0xff]   ;;  %v7448_v38 = vld [vmem:[%s10395_s1 + $0xb14] ss:$8 sps:$4 sm:$0xff]  }
 0x150   : > { %3136 = vmatprep.mubr.bf16.mxu1 %v6242_v9  ;;  %v1290_v52 = vpop.f32.mrf.mxu0 }
 0x151   : > { %v1343_v63 = vpop.f32.mrf.mxu1  ;;  %v9232_v4 = vadd.f32 %v1341_v39, %v1289_v31  ;;  %v1291_v10 = vadd.f32 %v1290_v52, %v8923_v20  ;;  %3631 = vmatpush1.bf16.msra.mxu0 %v7413_v13  ;;  %v7430_v20 = vld [vmem:[%s10395_s1 + $0xb44] ss:$8 sps:$4 sm:$0xff]   ;;  %v7437_v13 = vld [vmem:[%s10395_s1 + $0xa20] ss:$8 sps:$4 sm:$0xff]   ;;  %v7443_v39 = vld [vmem:[%s10395_s1 + $0xa10] ss:$8 sps:$4 sm:$0xff]  }
 0x152   : > { %3684 = vmatpush1.bf16.msra.mxu1 %v7416_v16  ;;  %v1292_v35 = vpop.f32.mrf.mxu0  ;;  %3632 = vmatprep.subr.bf16.mxu0 %v7421_v26  ;;  %v7440_v16 = vld [vmem:[%s10395_s1 + $0xb20] ss:$8 sps:$4 sm:$0xff]   ;;  %v7446_v26 = vld [vmem:[%s10395_s1 + $0xb10] ss:$8 sps:$4 sm:$0xff]   ;;  %v7454_v31 = vld [vmem:[%s10395_s1 + $0xb04] ss:$8 sps:$4 sm:$0xff]  }
 0x153   : > { %v1345_v36 = vpop.f32.mrf.mxu1  ;;  %3685 = vmatprep.subr.bf16.mxu1 %v7424_v1  ;;  %v9247_v43 = vadd.f32 %v1343_v63, %v1291_v10  ;;  %v1293_v47 = vadd.f32 %v1292_v35, %v8934_v15  ;;  %v7451_v1 = vld [vmem:[%s10395_s1 + $0xa04] ss:$8 sps:$4 sm:$0xff]   ;;  %v7449_v52 = vld [vmem:[%s10395_s1 + $0xa00] ss:$8 sps:$4 sm:$0xff]   ;;  %v7455_v10 = vld [vmem:[%s10395_s1 + $0xaf0] ss:$8 sps:$4 sm:$0xff]  }
 0x154   : > { %v1296_v49 = vpop.f32.mrf.mxu0  ;;  %3084 = vmatmul.mubr.bf16.gmra.mxu0 %v6239_v60  ;;  %v7452_v63 = vld [vmem:[%s10395_s1 + $0xb00] ss:$8 sps:$4 sm:$0xff]   ;;  %v7457_v60 = vld [vmem:[%s10395_s1 + $0xaf4] ss:$8 sps:$4 sm:$0xff]   ;;  %v7466_v35 = vld [vmem:[%s10395_s1 + $0xbe4] ss:$8 sps:$4 sm:$0xff]  }
 0x155   : > { %3137 = vmatmul.mubr.bf16.gmra.mxu1 %v6241_v3  ;;  %v1349_v54 = vpop.f32.mrf.mxu1  ;;  %v9250_v24 = vadd.f32 %v1345_v36, %v1293_v47  ;;  %v1297_v53 = vadd.f32 %v1296_v49, %v9106_v0  ;;  %3633 = vmatpush1.bf16.msra.mxu0 %v7419_v34  ;;  %v7436_v0 = vld [vmem:[%s10395_s1 + $0xb34] ss:$8 sps:$4 sm:$0xff]   ;;  %v7458_v34 = vld [vmem:[%s10395_s1 + $0xbf0] ss:$8 sps:$4 sm:$0xff]   ;;  %v7461_v36 = vld [vmem:[%s10395_s1 + $0xae0] ss:$8 sps:$4 sm:$0xff]  }
 0x156   : > { %3686 = vmatpush1.bf16.msra.mxu1 %v7422_v37  ;;  %v1298_v62 = vpop.f32.mrf.mxu0  ;;  %3634 = vmatprep.subr.bf16.mxu0 %v7427_v32  ;;  %v7460_v3 = vld [vmem:[%s10395_s1 + $0xbf4] ss:$8 sps:$4 sm:$0xff]   ;;  %v7463_v37 = vld [vmem:[%s10395_s1 + $0xae4] ss:$8 sps:$4 sm:$0xff]   ;;  %v7464_v32 = vld [vmem:[%s10395_s1 + $0xbe0] ss:$8 sps:$4 sm:$0xff]  }
 0x157   : > { %v1351_v15 = vpop.f32.mrf.mxu1  ;;  %3687 = vmatprep.subr.bf16.mxu1 %v7430_v20  ;;  %v1299_v56 = vadd.f32 %v1298_v62, %v9114_v51  ;;  %v9266_v57 = vadd.f32 %v1349_v54, %v1297_v53  ;;  %3660 = vmatprep.mubr.bf16.mxu0 %v6388_v7  ;;  %v7434_v7 = vld [vmem:[%s10395_s1 + $0xb30] ss:$8 sps:$4 sm:$0xff]   ;;  %v7469_v20 = vld [vmem:[%s10395_s1 + $0xad4] ss:$8 sps:$4 sm:$0xff]   ;;  %v7475_v53 = vld [vmem:[%s10395_s1 + $0xac4] ss:$8 sps:$4 sm:$0xff]  }
 0x158   : > { %3713 = vmatprep.mubr.bf16.mxu1 %v6390_v48  ;;  %v1300_v58 = vpop.f32.mrf.mxu0  ;;  %v7439_v48 = vld [vmem:[%s10395_s1 + $0xa24] ss:$8 sps:$4 sm:$0xff]   ;;  %v7472_v47 = vld [vmem:[%s10395_s1 + $0xbd4] ss:$8 sps:$4 sm:$0xff]   ;;  %v7467_v49 = vld [vmem:[%s10395_s1 + $0xad0] ss:$8 sps:$4 sm:$0xff]  }
 0x159   : > { %v1353_v14 = vpop.f32.mrf.mxu1  ;;  %v1301_v19 = vadd.f32 %v1300_v58, %v9125_v23  ;;  %v9278_v2 = vadd.f32 %v1351_v15, %v1299_v56  ;;  %3635 = vmatpush1.bf16.msra.mxu0 %v7425_v29  ;;  %v7442_v23 = vld [vmem:[%s10395_s1 + $0xb24] ss:$8 sps:$4 sm:$0xff]   ;;  %v7470_v54 = vld [vmem:[%s10395_s1 + $0xbd0] ss:$8 sps:$4 sm:$0xff]   ;;  %v7476_v62 = vld [vmem:[%s10395_s1 + $0xbc0] ss:$8 sps:$4 sm:$0xff]  }
 0x15a   : > { %3688 = vmatpush1.bf16.msra.mxu1 %v7428_v21  ;;  %v1302_v51 = vpop.f32.mrf.mxu0  ;;  %3636 = vmatprep.subr.bf16.mxu0 %v7433_v27  ;;  %v7478_v29 = vld [vmem:[%s10395_s1 + $0xbc4] ss:$8 sps:$4 sm:$0xff]   ;;  %v7473_v21 = vld [vmem:[%s10395_s1 + $0xac0] ss:$8 sps:$4 sm:$0xff]   ;;  %v7481_v15 = vld [vmem:[%s10395_s1 + $0xab4] ss:$8 sps:$4 sm:$0xff]  }
 0x15b   : > { %v1355_v9 = vpop.f32.mrf.mxu1  ;;  %3689 = vmatprep.subr.bf16.mxu1 %v7436_v0  ;;  %v1303_v40 = vadd.f32 %v1302_v51, %v9135_v44  ;;  %v9290_v11 = vadd.f32 %v1353_v14, %v1301_v19  ;;  %v7445_v44 = vld [vmem:[%s10395_s1 + $0xa14] ss:$8 sps:$4 sm:$0xff]   ;;  %v7479_v0 = vld [vmem:[%s10395_s1 + $0xab0] ss:$8 sps:$4 sm:$0xff]   ;;  %v7487_v58 = vld [vmem:[%s10395_s1 + $0xaa4] ss:$8 sps:$4 sm:$0xff]  }
 0x15c   : > { %v7484_v27 = vld [vmem:[%s10395_s1 + $0xbb4] ss:$8 sps:$4 sm:$0xff]   ;;  %v7482_v56 = vld [vmem:[%s10395_s1 + $0xbb0] ss:$8 sps:$4 sm:$0xff]   ;;  %v7490_v14 = vld [vmem:[%s10395_s1 + $0xba4] ss:$8 sps:$4 sm:$0xff]  }
 0x15d   : > { %v9292_v12 = vadd.f32 %v1355_v9, %v1303_v40  ;;  %3637 = vmatpush1.bf16.msra.mxu0 %v7431_v18  ;;  %v7485_v18 = vld [vmem:[%s10395_s1 + $0xaa0] ss:$8 sps:$4 sm:$0xff]   ;;  %v7491_v51 = vld [vmem:[%s10395_s1 + $0xa90] ss:$8 sps:$4 sm:$0xff]   ;;  %v7502_v40 = vld [vmem:[%s10395_s1 + $0xb84] ss:$8 sps:$4 sm:$0xff]  }
 0x15e   : > { %3690 = vmatpush1.bf16.msra.mxu1 %v7434_v7  ;;  %3638 = vmatprep.subr.bf16.mxu0 %v7439_v48  ;;  %v7488_v19 = vld [vmem:[%s10395_s1 + $0xba0] ss:$8 sps:$4 sm:$0xff]   ;;  %v7493_v7 = vld [vmem:[%s10395_s1 + $0xa94] ss:$8 sps:$4 sm:$0xff]   ;;  %v7494_v9 = vld [vmem:[%s10395_s1 + $0xb90] ss:$8 sps:$4 sm:$0xff]  }
 0x15f   : > { %3691 = vmatprep.subr.bf16.mxu1 %v7442_v23  ;;  %v7496_v48 = vld [vmem:[%s10395_s1 + $0xb94] ss:$8 sps:$4 sm:$0xff]   ;;  %v7499_v23 = vld [vmem:[%s10395_s1 + $0xa84] ss:$8 sps:$4 sm:$0xff]  }
 0x161   : > { %3639 = vmatpush1.bf16.msra.mxu0 %v7437_v13  ;;  %v7497_v13 = vld [vmem:[%s10395_s1 + $0xa80] ss:$8 sps:$4 sm:$0xff]  }
 0x162   : > { %3692 = vmatpush1.bf16.msra.mxu1 %v7440_v16  ;;  %3640 = vmatprep.subr.bf16.mxu0 %v7445_v44  ;;  %v7500_v16 = vld [vmem:[%s10395_s1 + $0xb80] ss:$8 sps:$4 sm:$0xff]   ;;  %v7505_v44 = vld [vmem:[%s10395_s1 + $0xc74] ss:$8 sps:$4 sm:$0xff]  }
 0x163   : > { %3693 = vmatprep.subr.bf16.mxu1 %v7448_v38  ;;  %v7508_v38 = vld [vmem:[%s10395_s1 + $0xd74] ss:$8 sps:$4 sm:$0xff]  }
 0x165   : > { %3641 = vmatpush1.bf16.msra.mxu0 %v7443_v39  ;;  %v7503_v39 = vld [vmem:[%s10395_s1 + $0xc70] ss:$8 sps:$4 sm:$0xff]  }
 0x166   : > { %3694 = vmatpush1.bf16.msra.mxu1 %v7446_v26  ;;  %3642 = vmatprep.subr.bf16.mxu0 %v7451_v1  ;;  %v7506_v26 = vld [vmem:[%s10395_s1 + $0xd70] ss:$8 sps:$4 sm:$0xff]   ;;  %v7511_v1 = vld [vmem:[%s10395_s1 + $0xc64] ss:$8 sps:$4 sm:$0xff]  }
 0x167   : > { %3695 = vmatprep.subr.bf16.mxu1 %v7454_v31  ;;  %v7514_v31 = vld [vmem:[%s10395_s1 + $0xd64] ss:$8 sps:$4 sm:$0xff]  }
 0x169   : > { %3643 = vmatpush1.bf16.msra.mxu0 %v7449_v52 }
 0x16a   : > { %3696 = vmatpush1.bf16.msra.mxu1 %v7452_v63  ;;  %3644 = vmatprep.subr.bf16.mxu0 %v7457_v60 }
 0x16b   : > { %3697 = vmatprep.subr.bf16.mxu1 %v7460_v3  ;;  %v7509_v3 = vld [vmem:[%s10395_s1 + $0xc60] ss:$8 sps:$4 sm:$0xff]  }
 0x16d   : > { %3645 = vmatpush2.bf16.msra.mxu0 %v7455_v10  ;;  %v7512_v10 = vld [vmem:[%s10395_s1 + $0xd60] ss:$8 sps:$4 sm:$0xff]  }
 0x16e   : > { %3698 = vmatpush2.bf16.msra.mxu1 %v7458_v34  ;;  %3646 = vmatprep.subr.bf16.mxu0 %v7463_v37  ;;  %v7515_v34 = vld [vmem:[%s10395_s1 + $0xc50] ss:$8 sps:$4 sm:$0xff]  }
 0x16f   : > { %3699 = vmatprep.subr.bf16.mxu1 %v7466_v35  ;;  %v7518_v37 = vld [vmem:[%s10395_s1 + $0xd50] ss:$8 sps:$4 sm:$0xff]   ;;  %v9472_v35 = vld [vmem:[%s7966_s4 + $0x40] sm:$0xff] }
 0x171   : > { %3647 = vmatpush2.bf16.msra.mxu0 %v7461_v36  ;;  %v9478_v36 = vld [vmem:[%s7966_s4 + $0x48] sm:$0xff] }
 0x172   : > { %3700 = vmatpush2.bf16.msra.mxu1 %v7464_v32  ;;  %3648 = vmatprep.subr.bf16.mxu0 %v7469_v20  ;;  %v9481_v20 = vld [vmem:[%s7966_s4 + $0x68] sm:$0xff] }
 0x173   : > { %3701 = vmatprep.subr.bf16.mxu1 %v7472_v47 }
 0x175   : > { %3649 = vmatpush2.bf16.msra.mxu0 %v7467_v49 }
 0x176   : > { %3702 = vmatpush2.bf16.msra.mxu1 %v7470_v54  ;;  %3650 = vmatprep.subr.bf16.mxu0 %v7475_v53  ;;  %v7523_v53 = vld [vmem:[%s10395_s1 + $0xc44] ss:$8 sps:$4 sm:$0xff]  }
 0x177   : > { %3703 = vmatprep.subr.bf16.mxu1 %v7478_v29  ;;  %v7526_v29 = vld [vmem:[%s10395_s1 + $0xd44] ss:$8 sps:$4 sm:$0xff]  }
 0x179   : > { %3651 = vmatpush2.bf16.msra.mxu0 %v7473_v21 }
 0x17a   : > { %3704 = vmatpush2.bf16.msra.mxu1 %v7476_v62  ;;  %3652 = vmatprep.subr.bf16.mxu0 %v7481_v15  ;;  %v7521_v62 = vld [vmem:[%s10395_s1 + $0xc40] ss:$8 sps:$4 sm:$0xff]  }
 0x17b   : > { %3705 = vmatprep.subr.bf16.mxu1 %v7484_v27  ;;  %v7524_v15 = vld [vmem:[%s10395_s1 + $0xd40] ss:$8 sps:$4 sm:$0xff]  }
 0x17d   : > { %3653 = vmatpush2.bf16.msra.mxu0 %v7479_v0  ;;  %v6534_v0 = vcombine.high %v9478_v36, %v9481_v20 }
 0x17e   : > { %3706 = vmatpush2.bf16.msra.mxu1 %v7482_v56  ;;  %3654 = vmatprep.subr.bf16.mxu0 %v7487_v58 }
 0x17f   : > { %3707 = vmatprep.subr.bf16.mxu1 %v7490_v14 }
 0x181   : > { %3655 = vmatpush2.bf16.msra.mxu0 %v7485_v18 }
 0x182   : > { %3708 = vmatpush2.bf16.msra.mxu1 %v7488_v19  ;;  %3656 = vmatprep.subr.bf16.mxu0 %v7493_v7  ;;  %v7529_v7 = vld [vmem:[%s10395_s1 + $0xc34] ss:$8 sps:$4 sm:$0xff]  }
 0x183   : > { %3709 = vmatprep.subr.bf16.mxu1 %v7496_v48 }
 0x185   : > { %3657 = vmatpush2.bf16.msra.mxu0 %v7491_v51 }
 0x186   : > { %3710 = vmatpush2.bf16.msra.mxu1 %v7494_v9  ;;  %3658 = vmatprep.subr.bf16.mxu0 %v7499_v23  ;;  %v7535_v23 = vld [vmem:[%s10395_s1 + $0xc24] ss:$8 sps:$4 sm:$0xff]  }
 0x187   : > { %3711 = vmatprep.subr.bf16.mxu1 %v7502_v40  ;;  %v7538_v40 = vld [vmem:[%s10395_s1 + $0xd24] ss:$8 sps:$4 sm:$0xff]  }
 0x189   : > { %3659 = vmatpush2.bf16.msra.mxu0 %v7497_v13 }
 0x18a   : > { %3712 = vmatpush2.bf16.msra.mxu1 %v7500_v16  ;;  %4176 = vmatprep.subr.bf16.mxu0 %v7505_v44  ;;  %v7533_v44 = vld [vmem:[%s10395_s1 + $0xc20] ss:$8 sps:$4 sm:$0xff]  }
 0x18b   : > { %4229 = vmatprep.subr.bf16.mxu1 %v7508_v38  ;;  %v7536_v38 = vld [vmem:[%s10395_s1 + $0xd20] ss:$8 sps:$4 sm:$0xff]  }
 0x18c   : > { %v1868_v52 = vpop.f32.mrf.mxu0  ;;  %3661 = vmatmul.mubr.bf16.vlgmr.msra.gmra.mxu0 %v6387_v5  ;;  %v7520_v5 = vld [vmem:[%s10395_s1 + $0xd54] ss:$8 sps:$4 sm:$0xff]  }
 0x18d   : > { %v1921_v63 = vpop.f32.mrf.mxu1  ;;  %3714 = vmatmul.mubr.bf16.vlgmr.msra.gmra.mxu1 %v6389_v55  ;;  %4177 = vmatpush1.bf16.msra.mxu0 %v7503_v39  ;;  %v7539_v39 = vld [vmem:[%s10395_s1 + $0xc10] ss:$8 sps:$4 sm:$0xff]  }
 0x18e   : > { %v1922_v60 = vadd.f32 %v1921_v63, %v1868_v52  ;;  %4230 = vmatpush1.bf16.msra.mxu1 %v7506_v26  ;;  %v1870_v22 = vpop.f32.mrf.mxu0  ;;  %4178 = vmatprep.subr.bf16.mxu0 %v7511_v1  ;;  %v7542_v26 = vld [vmem:[%s10395_s1 + $0xd10] ss:$8 sps:$4 sm:$0xff]   ;;  %v7547_v1 = vld [vmem:[%s10395_s1 + $0xc04] ss:$8 sps:$4 sm:$0xff]   ;;  %v7545_v52 = vld [vmem:[%s10395_s1 + $0xc00] ss:$8 sps:$4 sm:$0xff]  }
 0x18f   : > { %v1923_v61 = vpop.f32.mrf.mxu1  ;;  %4231 = vmatprep.subr.bf16.mxu1 %v7514_v31  ;;  %3670 = vmatprep.mubr.bf16.mxu0 %v6392_v45  ;;  %v7550_v31 = vld [vmem:[%s10395_s1 + $0xd04] ss:$8 sps:$4 sm:$0xff]   ;;  %v7548_v63 = vld [vmem:[%s10395_s1 + $0xd00] ss:$8 sps:$4 sm:$0xff]  }
 0x190   : > { %v9457_v8 = vadd.f32 %v1922_v60, %v9229_v28  ;;  %v1924_v55 = vadd.f32 %v1923_v61, %v1870_v22  ;;  %3723 = vmatprep.mubr.bf16.mxu1 %v6394_v6  ;;  %v9475_v28 = vld [vmem:[%s7966_s4 + $0x60] sm:$0xff]  ;;  %v1872_v32 = vpop.f32.mrf.mxu0  ;;  %v7553_v60 = vld [vmem:[%s10395_s1 + $0xcf4] ss:$8 sps:$4 sm:$0xff]   ;;  %v7554_v22 = vld [vmem:[%s10395_s1 + $0xdf0] ss:$8 sps:$4 sm:$0xff]  }
 0x191   : > { %v1925_v45 = vpop.f32.mrf.mxu1  ;;  %4179 = vmatpush1.bf16.msra.mxu0 %v7509_v3  ;;  %v6532_v27 = vcombine.high %v9472_v35, %v9475_v28  ;;  %v7556_v3 = vld [vmem:[%s10395_s1 + $0xdf4] ss:$8 sps:$4 sm:$0xff]   ;;  %v7559_v61 = vld [vmem:[%s10395_s1 + $0xce4] ss:$8 sps:$4 sm:$0xff]  }
 0x192   : > { %v9484_v6 = vadd.f32 %v1924_v55, %v9232_v4  ;;  %v1926_v47 = vadd.f32 %v1925_v45, %v1872_v32  ;;  %4232 = vmatpush1.bf16.msra.mxu1 %v7512_v10  ;;  %v1874_v49 = vpop.f32.mrf.mxu0  ;;  %4180 = vmatprep.subr.bf16.mxu0 %v7517_v25  ;;  %v7551_v10 = vld [vmem:[%s10395_s1 + $0xcf0] ss:$8 sps:$4 sm:$0xff]   ;;  %v7562_v25 = vld [vmem:[%s10395_s1 + $0xde4] ss:$8 sps:$4 sm:$0xff]   ;;  %v7560_v55 = vld [vmem:[%s10395_s1 + $0xde0] ss:$8 sps:$4 sm:$0xff]  }
 0x193   : > { %v1927_v54 = vpop.f32.mrf.mxu1  ;;  %4233 = vmatprep.subr.bf16.mxu1 %v7520_v5  ;;  %v7557_v5 = vld [vmem:[%s10395_s1 + $0xce0] ss:$8 sps:$4 sm:$0xff]   ;;  %v7563_v32 = vld [vmem:[%s10395_s1 + $0xcd0] ss:$8 sps:$4 sm:$0xff]  }
 0x194   : > { %v9493_v21 = vadd.f32 %v1926_v47, %v9247_v43  ;;  %v1928_v4 = vadd.f32 %v1927_v54, %v1874_v49  ;;  %v1878_v56 = vpop.f32.mrf.mxu0  ;;  %3671 = vmatmul.mubr.bf16.gmra.mxu0 %v6391_v41  ;;  %v7530_v41 = vld [vmem:[%s10395_s1 + $0xd30] ss:$8 sps:$4 sm:$0xff]   ;;  %v7571_v47 = vld [vmem:[%s10395_s1 + $0xcc4] ss:$8 sps:$4 sm:$0xff]   ;;  %v7569_v54 = vld [vmem:[%s10395_s1 + $0xcc0] ss:$8 sps:$4 sm:$0xff]  }
 0x195   : > { %v1931_v58 = vpop.f32.mrf.mxu1  ;;  %3724 = vmatmul.mubr.bf16.gmra.mxu1 %v6393_v42  ;;  %4181 = vmatpush1.bf16.msra.mxu0 %v7515_v34  ;;  %v7565_v34 = vld [vmem:[%s10395_s1 + $0xcd4] ss:$8 sps:$4 sm:$0xff]   ;;  %v7566_v45 = vld [vmem:[%s10395_s1 + $0xdd0] ss:$8 sps:$4 sm:$0xff]   ;;  %v7574_v49 = vld [vmem:[%s10395_s1 + $0xdc4] ss:$8 sps:$4 sm:$0xff]  }
 0x196   : > { %v9512_v43 = vadd.f32 %v1928_v4, %v9250_v24  ;;  %v1932_v14 = vadd.f32 %v1931_v58, %v1878_v56  ;;  %4234 = vmatpush1.bf16.msra.mxu1 %v7518_v37  ;;  %v1880_v18 = vpop.f32.mrf.mxu0  ;;  %4182 = vmatprep.subr.bf16.mxu0 %v7523_v53  ;;  %v7568_v37 = vld [vmem:[%s10395_s1 + $0xdd4] ss:$8 sps:$4 sm:$0xff]   ;;  %v7572_v53 = vld [vmem:[%s10395_s1 + $0xdc0] ss:$8 sps:$4 sm:$0xff]   ;;  %v4310_v56 = vshll.u32 %v9472_v35, 16  ;;  %v4335_v58 = vshrl.u32 %v9475_v28, 16 }
 0x197   : > { %v1933_v19 = vpop.f32.mrf.mxu1  ;;  %4235 = vmatprep.subr.bf16.mxu1 %v7526_v29  ;;  %4208 = vmatprep.mubr.bf16.mxu0 %v6532_v27  ;;  %v7577_v29 = vld [vmem:[%s10395_s1 + $0xcb4] ss:$8 sps:$4 sm:$0xff]   ;;  %v7583_v27 = vld [vmem:[%s10395_s1 + $0xca4] ss:$8 sps:$4 sm:$0xff]  }
 0x198   : > { %v9521_v33 = vadd.f32 %v1932_v14, %v9266_v57  ;;  %v1934_v46 = vadd.f32 %v1933_v19, %v1880_v18  ;;  %4261 = vmatprep.mubr.bf16.mxu1 %v6534_v0  ;;  %v1882_v42 = vpop.f32.mrf.mxu0  ;;  %v7580_v4 = vld [vmem:[%s10395_s1 + $0xdb4] ss:$8 sps:$4 sm:$0xff]   ;;  %v4307_v0 = vshrl.u32 %v9472_v35, 16  ;;  %v4338_v14 = vshll.u32 %v9475_v28, 16  ;;  %v7586_v18 = vld [vmem:[%s10395_s1 + $0xda4] ss:$8 sps:$4 sm:$0xff]  }
 0x199   : > { %v1935_v24 = vpop.f32.mrf.mxu1  ;;  %4183 = vmatpush1.bf16.msra.mxu0 %v7521_v62  ;;  %v7575_v62 = vld [vmem:[%s10395_s1 + $0xcb0] ss:$8 sps:$4 sm:$0xff]   ;;  %v4321_v19 = vshrl.u32 %v9478_v36, 16 }
 0x19a   : > { %v9530_v48 = vadd.f32 %v1934_v46, %v9278_v2  ;;  %v1936_v51 = vadd.f32 %v1935_v24, %v1882_v42  ;;  %4236 = vmatpush1.bf16.msra.mxu1 %v7524_v15  ;;  %v1884_v57 = vpop.f32.mrf.mxu0  ;;  %4184 = vmatprep.subr.bf16.mxu0 %v7529_v7  ;;  %v7578_v15 = vld [vmem:[%s10395_s1 + $0xdb0] ss:$8 sps:$4 sm:$0xff]   ;;  %v4324_v7 = vshll.u32 %v9478_v36, 16  ;;  %v4352_v46 = vshll.u32 %v9481_v20, 16  ;;  %v7589_v42 = vld [vmem:[%s10395_s1 + $0xc94] ss:$8 sps:$4 sm:$0xff]  }
 0x19b   : > { %v1937_v9 = vpop.f32.mrf.mxu1  ;;  %4237 = vmatprep.subr.bf16.mxu1 %v7532_v30  ;;  %v4349_v30 = vshrl.u32 %v9481_v20, 16  ;;  %v7592_v24 = vld [vmem:[%s10395_s1 + $0xd94] ss:$8 sps:$4 sm:$0xff]  }
 0x19c   : > { %v9539_v13 = vadd.f32 %v1936_v51, %v9290_v11  ;;  %v1938_v2 = vadd.f32 %v1937_v9, %v1884_v57  ;;  %v7541_v11 = vld [vmem:[%s10395_s1 + $0xc14] ss:$8 sps:$4 sm:$0xff]   ;;  %v4309_v57 = vrot.slane %v4307_v0, 4  ;;  %v4312_v9 = vrot.slane %v4310_v56, 5 }
 0x19d   : > { %4185 = vmatpush1.bf16.msra.mxu0 %v7527_v50  ;;  %v7581_v50 = vld [vmem:[%s10395_s1 + $0xca0] ss:$8 sps:$4 sm:$0xff]   ;;  %v9661_v51 = vld [vmem:[%s7966_s4 + $0x50] sm:$0x11]  ;;  %v6531_v0 = vcombine.low %v9472_v35, %v9475_v28  ;;  %v6533_v56 = vcombine.low %v9478_v36, %v9481_v20  ;;  %v7607_v28 = vld [vmem:[%s10395_s1 + $0xe64] ss:$8 sps:$4 sm:$0xff]  }
 0x19e   : > { %v9542_v16 = vadd.f32 %v1938_v2, %v9292_v12  ;;  %4238 = vmatpush1.bf16.msra.mxu1 %v7530_v41  ;;  %4186 = vmatprep.subr.bf16.mxu0 %v7535_v23  ;;  %v7544_v12 = vld [vmem:[%s10395_s1 + $0xd14] ss:$8 sps:$4 sm:$0xff]   ;;  %v7584_v41 = vld [vmem:[%s10395_s1 + $0xda0] ss:$8 sps:$4 sm:$0xff]   ;;  %v4337_v23 = vrot.slane %v4335_v58, 4 }
 0x19f   : > { %4239 = vmatprep.subr.bf16.mxu1 %v7538_v40  ;;  %v4340_v40 = vrot.slane %v4338_v14, 5  ;;  %v9664_v2 = vld [vmem:[%s7966_s4 + $0x70] sm:$0x11]  ;;  %v9708_v58 = vld [vmem:[%s7966_s4 + $0xa0] sm:$0xff]  ;;  %v9711_v14 = vld [vmem:[%s7966_s4 + $0x88] sm:$0xff] }
 0x1a0   : > { %v7610_v36 = vld [vmem:[%s10395_s1 + $0xf64] ss:$8 sps:$4 sm:$0xff]  }
 0x1a1   : > { %4187 = vmatpush1.bf16.msra.mxu0 %v7533_v44  ;;  %v4323_v44 = vrot.slane %v4321_v19, 4  ;;  %v7599_v19 = vld [vmem:[%s10395_s1 + $0xe70] ss:$8 sps:$4 sm:$0xff]  }
 0x1a2   : > { %4240 = vmatpush1.bf16.msra.mxu1 %v7536_v38  ;;  %4188 = vmatprep.subr.bf16.mxu0 %v7541_v11  ;;  %v4326_v38 = vrot.slane %v4324_v7, 5  ;;  %v4351_v11 = vrot.slane %v4349_v30, 4  ;;  %v7602_v7 = vld [vmem:[%s10395_s1 + $0xf70] ss:$8 sps:$4 sm:$0xff]  }
 0x1a3   : > { %4241 = vmatprep.subr.bf16.mxu1 %v7544_v12  ;;  %v4354_v12 = vrot.slane %v4352_v46, 5 }
 0x1a5   : > { %4189 = vmatpush1.bf16.msra.mxu0 %v7539_v39  ;;  %v9667_v39 = vld [vmem:[%s7966_s4 + $0x58] sm:$0x11] }
 0x1a6   : > { %4242 = vmatpush1.bf16.msra.mxu1 %v7542_v26  ;;  %4190 = vmatprep.subr.bf16.mxu0 %v7547_v1  ;;  %v9670_v26 = vld [vmem:[%s7966_s4 + $0x78] sm:$0x11] }
 0x1a7   : > { %4243 = vmatprep.subr.bf16.mxu1 %v7550_v31  ;;  %v7587_v1 = vld [vmem:[%s10395_s1 + $0xc90] ss:$8 sps:$4 sm:$0xff]  }
 0x1a8   : > { %v7590_v31 = vld [vmem:[%s10395_s1 + $0xd90] ss:$8 sps:$4 sm:$0xff]  }
 0x1a9   : > { %4191 = vmatpush1.bf16.msra.mxu0 %v7545_v52  ;;  %v4313_v52 = vor.u32 %v4312_v9, %v4309_v57 }
 0x1aa   : > { %4244 = vmatpush1.bf16.msra.mxu1 %v7548_v63  ;;  %4192 = vmatprep.subr.bf16.mxu0 %v7553_v60  ;;  %v4316_v63 = vshll.u32 %v9661_v51, 16  ;;  %v4341_v60 = vor.u32 %v4340_v40, %v4337_v23 }
 0x1ab   : > { %4245 = vmatprep.subr.bf16.mxu1 %v7556_v3  ;;  %v4344_v3 = vshll.u32 %v9664_v2, 16 }
 0x1ad   : > { %4193 = vmatpush2.bf16.msra.mxu0 %v7551_v10  ;;  %v7595_v10 = vld [vmem:[%s10395_s1 + $0xc84] ss:$8 sps:$4 sm:$0xff]  }
 0x1ae   : > { %4246 = vmatpush2.bf16.msra.mxu1 %v7554_v22  ;;  %4194 = vmatprep.subr.bf16.mxu0 %v7559_v61  ;;  %v7598_v22 = vld [vmem:[%s10395_s1 + $0xd84] ss:$8 sps:$4 sm:$0xff]   ;;  %v4327_v61 = vor.u32 %v4326_v38, %v4323_v44  ;;  %v7613_v44 = vld [vmem:[%s10395_s1 + $0xe54] ss:$8 sps:$4 sm:$0xff]  }
 0x1af   : > { %4247 = vmatprep.subr.bf16.mxu1 %v7562_v25  ;;  %v4330_v25 = vshll.u32 %v9667_v39, 16  ;;  %v7616_v38 = vld [vmem:[%s10395_s1 + $0xf54] ss:$8 sps:$4 sm:$0xff]  }
 0x1b1   : > { %4195 = vmatpush2.bf16.msra.mxu0 %v7557_v5  ;;  %v4355_v5 = vor.u32 %v4354_v12, %v4351_v11  ;;  %v9765_v11 = vld [vmem:[%s7966_s4 + $0x90] sm:$0x11] }
 0x1b2   : > { %4248 = vmatpush2.bf16.msra.mxu1 %v7560_v55  ;;  %4196 = vmatprep.subr.bf16.mxu0 %v7565_v34  ;;  %v4358_v55 = vshll.u32 %v9670_v26, 16  ;;  %v7593_v34 = vld [vmem:[%s10395_s1 + $0xc80] ss:$8 sps:$4 sm:$0xff]   ;;  %v9768_v12 = vld [vmem:[%s7966_s4 + $0xb0] sm:$0x11] }
 0x1b3   : > { %4249 = vmatprep.subr.bf16.mxu1 %v7568_v37  ;;  %v7596_v37 = vld [vmem:[%s10395_s1 + $0xd80] ss:$8 sps:$4 sm:$0xff]  }
 0x1b5   : > { %4197 = vmatpush2.bf16.msra.mxu0 %v7563_v32  ;;  %v7601_v32 = vld [vmem:[%s10395_s1 + $0xe74] ss:$8 sps:$4 sm:$0xff]  }
 0x1b6   : > { %4250 = vmatpush2.bf16.msra.mxu1 %v7566_v45  ;;  %4198 = vmatprep.subr.bf16.mxu0 %v7571_v47  ;;  %v4314_v45 = vrot.slane %v4313_v52, 4  ;;  %v4318_v47 = vrot.slane %v4316_v63, 5 }
 0x1b7   : > { %4251 = vmatprep.subr.bf16.mxu1 %v7574_v49  ;;  %v4342_v49 = vrot.slane %v4341_v60, 4  ;;  %v6759_v60 = vld [vmem:[%s7966_s4 + $0x80] sm:$0xee] }
 0x1b8   : > { %v9724_v35 = vsel %vm8035_vm2, %v4314_v45, %v4318_v47  ;;  %v9787_v47 = vld [vmem:[%s7966_s4 + $0xb8] sm:$0x11] }
 0x1b9   : > { %4199 = vmatpush2.bf16.msra.mxu0 %v7569_v54  ;;  %v4346_v54 = vrot.slane %v4344_v3, 5  ;;  %v6761_v3 = vld [vmem:[%s7966_s4 + $0xa0] sm:$0xee] }
 0x1ba   : > { %4252 = vmatpush2.bf16.msra.mxu1 %v7572_v53  ;;  %4200 = vmatprep.subr.bf16.mxu0 %v7577_v29  ;;  %v7604_v53 = vld [vmem:[%s10395_s1 + $0xf74] ss:$8 sps:$4 sm:$0xff]   ;;  %v4328_v29 = vrot.slane %v4327_v61, 4 }
 0x1bb   : > { %4253 = vmatprep.subr.bf16.mxu1 %v7580_v4  ;;  %v4332_v4 = vrot.slane %v4330_v25, 5  ;;  %v9734_v20 = vsel %vm8035_vm2, %v4342_v49, %v4346_v54  ;;  %v6767_v25 = vrot.slane %v6759_v60, 9 }
 0x1bc   : > { %v6684_v52 = vcombine.high %v9724_v35, %v9734_v20 }
 0x1bd   : > { %4201 = vmatpush2.bf16.msra.mxu0 %v7575_v62  ;;  %v4356_v62 = vrot.slane %v4355_v5, 4  ;;  %v9738_v30 = vsel %vm8035_vm2, %v4328_v29, %v4332_v4  ;;  %v4991_v5 = vrot.slane %v9765_v11, 5 }
 0x1be   : > { %4254 = vmatpush2.bf16.msra.mxu1 %v7578_v15  ;;  %4202 = vmatprep.subr.bf16.mxu0 %v7583_v27  ;;  %v4360_v15 = vrot.slane %v4358_v55, 5  ;;  %v9701_v27 = vld [vmem:[%s7966_s4 + $0x80] sm:$0xff]  ;;  %v6769_v55 = vrot.slane %v6761_v3, 9 }
 0x1bf   : > { %4255 = vmatprep.subr.bf16.mxu1 %v7586_v18  ;;  %v9714_v18 = vld [vmem:[%s7966_s4 + $0xa8] sm:$0xff]  ;;  %v6535_v23 = vcombine.low %v9701_v27, %v9708_v58  ;;  %v9792_v4 = vsel %vm8362_vm5, %v6767_v25, %v4991_v5 }
 0x1c0   : > { %v9742_v46 = vsel %vm8035_vm2, %v4356_v62, %v4360_v15  ;;  %v6537_v40 = vcombine.low %v9711_v14, %v9714_v18  ;;  %v5003_v15 = vrot.slane %v9787_v47, 5 }
 0x1c1   : > { %4203 = vmatpush2.bf16.msra.mxu0 %v7581_v50  ;;  %v7605_v50 = vld [vmem:[%s10395_s1 + $0xe60] ss:$8 sps:$4 sm:$0xff]   ;;  %v6686_v63 = vcombine.high %v9738_v30, %v9742_v46 }
 0x1c2   : > { %4256 = vmatpush2.bf16.msra.mxu1 %v7584_v41  ;;  %4204 = vmatprep.subr.bf16.mxu0 %v7589_v42  ;;  %v7608_v41 = vld [vmem:[%s10395_s1 + $0xf60] ss:$8 sps:$4 sm:$0xff]   ;;  %v6536_v42 = vcombine.high %v9701_v27, %v9708_v58 }
 0x1c3   : > { %4257 = vmatprep.subr.bf16.mxu1 %v7592_v24  ;;  %v6538_v24 = vcombine.high %v9711_v14, %v9714_v18 }
 0x1c5   : > { %4205 = vmatpush2.bf16.msra.mxu0 %v7587_v1  ;;  %v9771_v1 = vld [vmem:[%s7966_s4 + $0x98] sm:$0x11] }
 0x1c6   : > { %4258 = vmatpush2.bf16.msra.mxu1 %v7590_v31  ;;  %4206 = vmatprep.subr.bf16.mxu0 %v7595_v10  ;;  %v6760_v10 = vld [vmem:[%s7966_s4 + $0x88] sm:$0xee]  ;;  %v4995_v54 = vrot.slane %v9771_v1, 5 }
 0x1c7   : > { %4259 = vmatprep.subr.bf16.mxu1 %v7598_v22  ;;  %v6768_v49 = vrot.slane %v6760_v10, 9 }
 0x1c9   : > { %4207 = vmatpush2.bf16.msra.mxu0 %v7593_v34  ;;  %v4999_v34 = vrot.slane %v9768_v12, 5 }
 0x1ca   : > { %4260 = vmatpush2.bf16.msra.mxu1 %v7596_v37  ;;  %4835 = vmatprep.subr.bf16.mxu0 %v7601_v32  ;;  %v6762_v37 = vld [vmem:[%s7966_s4 + $0xa8] sm:$0xee] }
 0x1cb   : > { %4888 = vmatprep.subr.bf16.mxu1 %v7604_v53  ;;  %v9796_v62 = vsel %vm8362_vm5, %v6769_v55, %v4999_v34 }
 0x1cc   : > { %v2416_v57 = vpop.f32.mrf.mxu0  ;;  %4209 = vmatmul.mubr.bf16.vlgmr.msra.gmra.mxu0 %v6531_v0 }
 0x1cd   : > { %v2469_v9 = vpop.f32.mrf.mxu1  ;;  %4262 = vmatmul.mubr.bf16.vlgmr.msra.gmra.mxu1 %v6533_v56  ;;  %4836 = vmatpush1.bf16.msra.mxu0 %v7599_v19  ;;  %v7611_v19 = vld [vmem:[%s10395_s1 + $0xe50] ss:$8 sps:$4 sm:$0xff]  }
 0x1ce   : > { %v2470_v31 = vadd.f32 %v2469_v9, %v2416_v57  ;;  %4889 = vmatpush1.bf16.msra.mxu1 %v7602_v7  ;;  %v2418_v22 = vpop.f32.mrf.mxu0  ;;  %4837 = vmatprep.subr.bf16.mxu0 %v7607_v28  ;;  %v7614_v7 = vld [vmem:[%s10395_s1 + $0xf50] ss:$8 sps:$4 sm:$0xff]   ;;  %v6840_v28 = vcombine.high %v9792_v4, %v9796_v62  ;;  %v6839_v57 = vcombine.low %v9792_v4, %v9796_v62 }
 0x1cf   : > { %v2471_v61 = vpop.f32.mrf.mxu1  ;;  %4890 = vmatprep.subr.bf16.mxu1 %v7610_v36  ;;  %4218 = vmatprep.mubr.bf16.mxu0 %v6536_v42 }
 0x1d0   : > { %v9784_v32 = vadd.f32 %v2470_v31, %v9457_v8  ;;  %v2472_v45 = vadd.f32 %v2471_v61, %v2418_v22  ;;  %4271 = vmatprep.mubr.bf16.mxu1 %v6538_v24  ;;  %v2420_v53 = vpop.f32.mrf.mxu0  ;;  %v6770_v8 = vrot.slane %v6762_v37, 9  ;;  %v7620_v61 = vld [vmem:[%s10395_s1 + $0xf40] ss:$8 sps:$4 sm:$0xff]  }
 0x1d1   : > { %v2473_v29 = vpop.f32.mrf.mxu1  ;;  %4838 = vmatpush1.bf16.msra.mxu0 %v7605_v50  ;;  %v7622_v50 = vld [vmem:[%s10395_s1 + $0xf44] ss:$8 sps:$4 sm:$0xff]  }
 0x1d2   : > { %v9800_v0 = vadd.f32 %v2472_v45, %v9484_v6  ;;  %v2474_v56 = vadd.f32 %v2473_v29, %v2420_v53  ;;  %4891 = vmatpush1.bf16.msra.mxu1 %v7608_v41  ;;  %v2422_v36 = vpop.f32.mrf.mxu0  ;;  %4839 = vmatprep.subr.bf16.mxu0 %v7613_v44  ;;  %v7619_v6 = vld [vmem:[%s10395_s1 + $0xe44] ss:$8 sps:$4 sm:$0xff]   ;;  %v9818_v41 = vsel %vm8362_vm5, %v6768_v49, %v4995_v54 }
 0x1d3   : > { %v2475_v42 = vpop.f32.mrf.mxu1  ;;  %4892 = vmatprep.subr.bf16.mxu1 %v7616_v38  ;;  %v9822_v24 = vsel %vm8362_vm5, %v6770_v8, %v5003_v15 }
 0x1d4   : > { %v9827_v9 = vadd.f32 %v2474_v56, %v9493_v21  ;;  %v2476_v44 = vadd.f32 %v2475_v42, %v2422_v36  ;;  %v6842_v38 = vcombine.high %v9818_v41, %v9822_v24  ;;  %v6841_v31 = vcombine.low %v9818_v41, %v9822_v24  ;;  %v2426_v60 = vpop.f32.mrf.mxu0  ;;  %4219 = vmatmul.mubr.bf16.gmra.mxu0 %v6535_v23  ;;  %v7617_v21 = vld [vmem:[%s10395_s1 + $0xe40] ss:$8 sps:$4 sm:$0xff]   ;;  %v7628_v23 = vld [vmem:[%s10395_s1 + $0xf34] ss:$8 sps:$4 sm:$0xff]   ;;  %v7638_v36 = vld [vmem:[%s10395_s1 + $0xf10] ss:$8 sps:$4 sm:$0xff]  }
 0x1d5   : > { %v2479_v3 = vpop.f32.mrf.mxu1  ;;  %4272 = vmatmul.mubr.bf16.gmra.mxu1 %v6537_v40  ;;  %4840 = vmatpush1.bf16.msra.mxu0 %v7611_v19  ;;  %v7629_v56 = vld [vmem:[%s10395_s1 + $0xe20] ss:$8 sps:$4 sm:$0xff]   ;;  %v7643_v42 = vld [vmem:[%s10395_s1 + $0xe04] ss:$8 sps:$4 sm:$0xff]  }
 0x1d6   : > { %v9834_v10 = vadd.f32 %v2476_v44, %v9512_v43  ;;  %v2480_v22 = vadd.f32 %v2479_v3, %v2426_v60  ;;  %4893 = vmatpush1.bf16.msra.mxu1 %v7614_v7  ;;  %v2428_v25 = vpop.f32.mrf.mxu0  ;;  %4841 = vmatprep.subr.bf16.mxu0 %v7619_v6  ;;  %v7625_v43 = vld [vmem:[%s10395_s1 + $0xe34] ss:$8 sps:$4 sm:$0xff]   ;;  %v7632_v19 = vld [vmem:[%s10395_s1 + $0xf20] ss:$8 sps:$4 sm:$0xff]   ;;  %v7635_v7 = vld [vmem:[%s10395_s1 + $0xe10] ss:$8 sps:$4 sm:$0xff]  }
 0x1d7   : > { %v2481_v5 = vpop.f32.mrf.mxu1  ;;  %4894 = vmatprep.subr.bf16.mxu1 %v7622_v50  ;;  %4867 = vmatprep.mubr.bf16.mxu0 %v6684_v52  ;;  %v7626_v52 = vld [vmem:[%s10395_s1 + $0xf30] ss:$8 sps:$4 sm:$0xff]   ;;  %v7646_v6 = vld [vmem:[%s10395_s1 + $0xf04] ss:$8 sps:$4 sm:$0xff]   ;;  %v7641_v50 = vld [vmem:[%s10395_s1 + $0xe00] ss:$8 sps:$4 sm:$0xff]  }
 0x1d8   : > { %v9849_v40 = vadd.f32 %v2480_v22, %v9521_v33  ;;  %v2482_v55 = vadd.f32 %v2481_v5, %v2428_v25  ;;  %4920 = vmatprep.mubr.bf16.mxu1 %v6686_v63  ;;  %v2430_v34 = vpop.f32.mrf.mxu0  ;;  %v7623_v33 = vld [vmem:[%s10395_s1 + $0xe30] ss:$8 sps:$4 sm:$0xff]   ;;  %v7634_v63 = vld [vmem:[%s10395_s1 + $0xf24] ss:$8 sps:$4 sm:$0xff]   ;;  %v7644_v44 = vld [vmem:[%s10395_s1 + $0xf00] ss:$8 sps:$4 sm:$0xff]  }
 0x1d9   : > { %v2483_v37 = vpop.f32.mrf.mxu1  ;;  %4842 = vmatpush1.bf16.msra.mxu0 %v7617_v21  ;;  %v7649_v60 = vld [vmem:[%s10395_s1 + $0xef4] ss:$8 sps:$4 sm:$0xff]   ;;  %v7647_v22 = vld [vmem:[%s10395_s1 + $0xef0] ss:$8 sps:$4 sm:$0xff]   ;;  %v7658_v25 = vld [vmem:[%s10395_s1 + $0xfe4] ss:$8 sps:$4 sm:$0xff]  }
 0x1da   : > { %v9858_v45 = vadd.f32 %v2482_v55, %v9530_v48  ;;  %v2484_v49 = vadd.f32 %v2483_v37, %v2430_v34  ;;  %4895 = vmatpush1.bf16.msra.mxu1 %v7620_v61  ;;  %v2432_v54 = vpop.f32.mrf.mxu0  ;;  %4843 = vmatprep.subr.bf16.mxu0 %v7625_v43  ;;  %v7631_v48 = vld [vmem:[%s10395_s1 + $0xe24] ss:$8 sps:$4 sm:$0xff]   ;;  %v7652_v3 = vld [vmem:[%s10395_s1 + $0xff4] ss:$8 sps:$4 sm:$0xff]   ;;  %v7650_v21 = vld [vmem:[%s10395_s1 + $0xff0] ss:$8 sps:$4 sm:$0xff]  }
 0x1db   : > { %v2485_v53 = vpop.f32.mrf.mxu1  ;;  %4896 = vmatprep.subr.bf16.mxu1 %v7628_v23  ;;  %v7655_v61 = vld [vmem:[%s10395_s1 + $0xee4] ss:$8 sps:$4 sm:$0xff]   ;;  %v7653_v5 = vld [vmem:[%s10395_s1 + $0xee0] ss:$8 sps:$4 sm:$0xff]   ;;  %v7661_v23 = vld [vmem:[%s10395_s1 + $0xed4] ss:$8 sps:$4 sm:$0xff]  }
 0x1dc   : > { %v9873_v29 = vadd.f32 %v2484_v49, %v9539_v13  ;;  %v2486_v8 = vadd.f32 %v2485_v53, %v2432_v54  ;;  %v7637_v13 = vld [vmem:[%s10395_s1 + $0xe14] ss:$8 sps:$4 sm:$0xff]   ;;  %v7656_v43 = vld [vmem:[%s10395_s1 + $0xfe0] ss:$8 sps:$4 sm:$0xff]   ;;  %v7659_v34 = vld [vmem:[%s10395_s1 + $0xed0] ss:$8 sps:$4 sm:$0xff]  }
 0x1dd   : > { %4844 = vmatpush1.bf16.msra.mxu0 %v7623_v33  ;;  %v7664_v55 = vld [vmem:[%s10395_s1 + $0xfd4] ss:$8 sps:$4 sm:$0xff]   ;;  %v7662_v37 = vld [vmem:[%s10395_s1 + $0xfd0] ss:$8 sps:$4 sm:$0xff]   ;;  %v7667_v49 = vld [vmem:[%s10395_s1 + $0xec4] ss:$8 sps:$4 sm:$0xff]  }
 0x1de   : > { %v9876_v15 = vadd.f32 %v2486_v8, %v9542_v16  ;;  %4897 = vmatpush1.bf16.msra.mxu1 %v7626_v52  ;;  %4845 = vmatprep.subr.bf16.mxu0 %v7631_v48  ;;  %v7640_v16 = vld [vmem:[%s10395_s1 + $0xf14] ss:$8 sps:$4 sm:$0xff]   ;;  %v7670_v33 = vld [vmem:[%s10395_s1 + $0xfc4] ss:$8 sps:$4 sm:$0xff]   ;;  %v7665_v52 = vld [vmem:[%s10395_s1 + $0xec0] ss:$8 sps:$4 sm:$0xff]  }
 0x1df   : > { %4898 = vmatprep.subr.bf16.mxu1 %v7634_v63  ;;  %v7668_v54 = vld [vmem:[%s10395_s1 + $0xfc0] ss:$8 sps:$4 sm:$0xff]   ;;  %v7673_v53 = vld [vmem:[%s10395_s1 + $0xeb4] ss:$8 sps:$4 sm:$0xff]   ;;  %v4363_v63 = vshrl.u32 %v9701_v27, 16  ;;  %v4366_v8 = vshll.u32 %v9701_v27, 16 }
 0x1e0   : > { %v7676_v48 = vld [vmem:[%s10395_s1 + $0xfb4] ss:$8 sps:$4 sm:$0xff]   ;;  %v7674_v27 = vld [vmem:[%s10395_s1 + $0xfb0] ss:$8 sps:$4 sm:$0xff]  }
 0x1e1   : > { %4846 = vmatpush1.bf16.msra.mxu0 %v7629_v56  ;;  %v4391_v56 = vshrl.u32 %v9708_v58, 16 }
 0x1e2   : > { %4899 = vmatpush1.bf16.msra.mxu1 %v7632_v19  ;;  %4847 = vmatprep.subr.bf16.mxu0 %v7637_v13  ;;  %v4394_v19 = vshll.u32 %v9708_v58, 16  ;;  %v4377_v13 = vshrl.u32 %v9711_v14, 16  ;;  %v7679_v58 = vld [vmem:[%s10395_s1 + $0xea4] ss:$8 sps:$4 sm:$0xff]  }
 0x1e3   : > { %4900 = vmatprep.subr.bf16.mxu1 %v7640_v16  ;;  %v4380_v16 = vshll.u32 %v9711_v14, 16  ;;  %v7682_v14 = vld [vmem:[%s10395_s1 + $0xfa4] ss:$8 sps:$4 sm:$0xff]  }
 0x1e5   : > { %4848 = vmatpush1.bf16.msra.mxu0 %v7635_v7  ;;  %v4405_v7 = vshrl.u32 %v9714_v18, 16 }
 0x1e6   : > { %4901 = vmatpush1.bf16.msra.mxu1 %v7638_v36  ;;  %4849 = vmatprep.subr.bf16.mxu0 %v7643_v42  ;;  %v4408_v36 = vshll.u32 %v9714_v18, 16  ;;  %v7671_v42 = vld [vmem:[%s10395_s1 + $0xeb0] ss:$8 sps:$4 sm:$0xff]   ;;  %v4365_v18 = vrot.slane %v4363_v63, 4 }
 0x1e7   : > { %4902 = vmatprep.subr.bf16.mxu1 %v7646_v6  ;;  %v4368_v6 = vrot.slane %v4366_v8, 5 }
 0x1e9   : > { %4850 = vmatpush1.bf16.msra.mxu0 %v7641_v50  ;;  %v4393_v50 = vrot.slane %v4391_v56, 4 }
 0x1ea   : > { %4903 = vmatpush1.bf16.msra.mxu1 %v7644_v44  ;;  %4851 = vmatprep.subr.bf16.mxu0 %v7649_v60  ;;  %v4396_v44 = vrot.slane %v4394_v19, 5  ;;  %v4379_v60 = vrot.slane %v4377_v13, 4 }
 0x1eb   : > { %4904 = vmatprep.subr.bf16.mxu1 %v7652_v3  ;;  %v4382_v3 = vrot.slane %v4380_v16, 5 }
 0x1ed   : > { %4852 = vmatpush2.bf16.msra.mxu0 %v7647_v22  ;;  %v4407_v22 = vrot.slane %v4405_v7, 4  ;;  %v7689_v7 = vld [vmem:[%s10395_s1 + $0xe80] ss:$8 sps:$4 sm:$0xff]  }
 0x1ee   : > { %4905 = vmatpush2.bf16.msra.mxu1 %v7650_v21  ;;  %4853 = vmatprep.subr.bf16.mxu0 %v7655_v61  ;;  %v4410_v21 = vrot.slane %v4408_v36, 5  ;;  %v7677_v61 = vld [vmem:[%s10395_s1 + $0xea0] ss:$8 sps:$4 sm:$0xff]  }
 0x1ef   : > { %4906 = vmatprep.subr.bf16.mxu1 %v7658_v25  ;;  %v7680_v25 = vld [vmem:[%s10395_s1 + $0xfa0] ss:$8 sps:$4 sm:$0xff]  }
 0x1f0   : > { %v7692_v36 = vld [vmem:[%s10395_s1 + $0xf80] ss:$8 sps:$4 sm:$0xff]  }
 0x1f1   : > { %4854 = vmatpush2.bf16.msra.mxu0 %v7653_v5  ;;  %v7685_v5 = vld [vmem:[%s10395_s1 + $0xe94] ss:$8 sps:$4 sm:$0xff]  }
 0x1f2   : > { %4907 = vmatpush2.bf16.msra.mxu1 %v7656_v43  ;;  %4855 = vmatprep.subr.bf16.mxu0 %v7661_v23  ;;  %v7688_v43 = vld [vmem:[%s10395_s1 + $0xf94] ss:$8 sps:$4 sm:$0xff]   ;;  %v4369_v23 = vor.u32 %v4368_v6, %v4365_v18 }
 0x1f3   : > { %4908 = vmatprep.subr.bf16.mxu1 %v7664_v55  ;;  %v4372_v55 = vshll.u32 %v9765_v11, 16  ;;  %v7691_v11 = vld [vmem:[%s10395_s1 + $0xe84] ss:$8 sps:$4 sm:$0xff]  }
 0x1f5   : > { %4856 = vmatpush2.bf16.msra.mxu0 %v7659_v34  ;;  %v4397_v34 = vor.u32 %v4396_v44, %v4393_v50  ;;  %v6683_v50 = vcombine.low %v9724_v35, %v9734_v20  ;;  %v6685_v44 = vcombine.low %v9738_v30, %v9742_v46  ;;  %v7703_v35 = vld [vmem:[%s10395_s1 + $0x1064] ss:$8 sps:$4 sm:$0xff]  }
 0x1f6   : > { %4909 = vmatpush2.bf16.msra.mxu1 %v7662_v37  ;;  %4857 = vmatprep.subr.bf16.mxu0 %v7667_v49  ;;  %v4400_v37 = vshll.u32 %v9768_v12, 16  ;;  %v4383_v49 = vor.u32 %v4382_v3, %v4379_v60  ;;  %v7694_v12 = vld [vmem:[%s10395_s1 + $0xf84] ss:$8 sps:$4 sm:$0xff]   ;;  %v7695_v60 = vld [vmem:[%s10395_s1 + $0x1070] ss:$8 sps:$4 sm:$0xff]  }
 0x1f7   : > { %4910 = vmatprep.subr.bf16.mxu1 %v7670_v33  ;;  %v4386_v33 = vshll.u32 %v9771_v1, 16  ;;  %v4370_v1 = vrot.slane %v4369_v23, 4  ;;  %v4398_v63 = vrot.slane %v4397_v34, 4  ;;  %v6755_v3 = vld [vmem:[%s7966_s4 + $0x40] sm:$0xee]  ;;  %v4983_v23 = vrot.slane %v9664_v2, 5 }
 0x1f8   : > { %v4402_v8 = vrot.slane %v4400_v37, 5  ;;  %v4384_v56 = vrot.slane %v4383_v49, 4  ;;  %v7706_v20 = vld [vmem:[%s10395_s1 + $0x1164] ss:$8 sps:$4 sm:$0xff]   ;;  %v4979_v34 = vrot.slane %v9667_v39, 5  ;;  %v4987_v49 = vrot.slane %v9670_v26, 5 }
 0x1f9   : > { %4858 = vmatpush2.bf16.msra.mxu0 %v7665_v52  ;;  %v4411_v52 = vor.u32 %v4410_v21, %v4407_v22  ;;  %v4388_v19 = vrot.slane %v4386_v33, 5  ;;  %v6757_v22 = vld [vmem:[%s7966_s4 + $0x60] sm:$0xee]  ;;  %v7698_v21 = vld [vmem:[%s10395_s1 + $0x1170] ss:$8 sps:$4 sm:$0xff]  }
 0x1fa   : > { %4911 = vmatpush2.bf16.msra.mxu1 %v7668_v54  ;;  %4859 = vmatprep.subr.bf16.mxu0 %v7673_v53  ;;  %v4414_v54 = vshll.u32 %v9787_v47, 16  ;;  %v7683_v53 = vld [vmem:[%s10395_s1 + $0xe90] ss:$8 sps:$4 sm:$0xff]   ;;  %v4374_v47 = vrot.slane %v4372_v55, 5  ;;  %v6764_v55 = vrot.slane %v6756_v17, 9 }
 0x1fb   : > { %4912 = vmatprep.subr.bf16.mxu1 %v7676_v48  ;;  %v7686_v48 = vld [vmem:[%s10395_s1 + $0xf90] ss:$8 sps:$4 sm:$0xff]   ;;  %v4412_v13 = vrot.slane %v4411_v52, 4  ;;  %v4389_v18 = vsel %vm8035_vm2, %v4384_v56, %v4388_v19  ;;  %v7701_v33 = vld [vmem:[%s10395_s1 + $0x1060] ss:$8 sps:$4 sm:$0xff]  }
 0x1fc   : > { %v4416_v16 = vrot.slane %v4414_v54, 5  ;;  %v7709_v2 = vld [vmem:[%s10395_s1 + $0x1054] ss:$8 sps:$4 sm:$0xff]   ;;  %v7713_v56 = vld [vmem:[%s10395_s1 + $0x1040] ss:$8 sps:$4 sm:$0xff]  }
 0x1fd   : > { %4860 = vmatpush2.bf16.msra.mxu0 %v7671_v42  ;;  %v7697_v42 = vld [vmem:[%s10395_s1 + $0x1074] ss:$8 sps:$4 sm:$0xff]   ;;  %v7716_v19 = vld [vmem:[%s10395_s1 + $0x1140] ss:$8 sps:$4 sm:$0xff]  }
 0x1fe   : > { %4913 = vmatpush2.bf16.msra.mxu1 %v7674_v27  ;;  %4861 = vmatprep.subr.bf16.mxu0 %v7679_v58  ;;  %v7700_v27 = vld [vmem:[%s10395_s1 + $0x1174] ss:$8 sps:$4 sm:$0xff]   ;;  %v4375_v58 = vsel %vm8035_vm2, %v4370_v1, %v4374_v47  ;;  %v4417_v6 = vsel %vm8035_vm2, %v4412_v13, %v4416_v16  ;;  %v7710_v1 = vld [vmem:[%s10395_s1 + $0x1150] ss:$8 sps:$4 sm:$0xff]   ;;  %v7715_v47 = vld [vmem:[%s10395_s1 + $0x1044] ss:$8 sps:$4 sm:$0xff]  }
 0x1ff   : > { %4914 = vmatprep.subr.bf16.mxu1 %v7682_v14  ;;  %v4403_v14 = vsel %vm8035_vm2, %v4398_v63, %v4402_v8  ;;  %v6690_v46 = vcombine.high %v4389_v18, %v4417_v6  ;;  %v7712_v39 = vld [vmem:[%s10395_s1 + $0x1154] ss:$8 sps:$4 sm:$0xff]   ;;  %v6689_v52 = vcombine.low %v4389_v18, %v4417_v6 }
 0x200   : > { %v6688_v30 = vcombine.high %v4375_v58, %v4403_v14  ;;  %v6687_v26 = vcombine.low %v4375_v58, %v4403_v14  ;;  %v7721_v13 = vld [vmem:[%s10395_s1 + $0x1034] ss:$8 sps:$4 sm:$0xff]   ;;  %v7725_v58 = vld [vmem:[%s10395_s1 + $0x1020] ss:$8 sps:$4 sm:$0xff]  }
 0x201   : > { %4862 = vmatpush2.bf16.msra.mxu0 %v7677_v61  ;;  %v6758_v61 = vld [vmem:[%s7966_s4 + $0x68] sm:$0xee]  ;;  %v7724_v16 = vld [vmem:[%s10395_s1 + $0x1134] ss:$8 sps:$4 sm:$0xff]  }
 0x202   : > { %4915 = vmatpush2.bf16.msra.mxu1 %v7680_v25  ;;  %4863 = vmatprep.subr.bf16.mxu0 %v7685_v5  ;;  %v6763_v25 = vrot.slane %v6755_v3, 9  ;;  %v4975_v5 = vrot.slane %v9661_v51, 5  ;;  %v6766_v37 = vrot.slane %v6758_v61, 9  ;;  %v7704_v51 = vld [vmem:[%s10395_s1 + $0x1160] ss:$8 sps:$4 sm:$0xff]  }
 0x203   : > { %4916 = vmatprep.subr.bf16.mxu1 %v7688_v43  ;;  %v6765_v43 = vrot.slane %v6757_v22, 9  ;;  %v7728_v14 = vld [vmem:[%s10395_s1 + $0x1120] ss:$8 sps:$4 sm:$0xff]   ;;  %v7733_v18 = vld [vmem:[%s10395_s1 + $0x1014] ss:$8 sps:$4 sm:$0xff]  }
 0x204   : > { %v10068_v54 = vsel %vm8362_vm5, %v6763_v25, %v4975_v5  ;;  %v7736_v6 = vld [vmem:[%s10395_s1 + $0x1114] ss:$8 sps:$4 sm:$0xff]   ;;  %v7742_v3 = vld [vmem:[%s10395_s1 + $0x1104] ss:$8 sps:$4 sm:$0xff]   ;;  %v7737_v22 = vld [vmem:[%s10395_s1 + $0x1000] ss:$8 sps:$4 sm:$0xff]  }
 0x205   : > { %4864 = vmatpush2.bf16.msra.mxu0 %v7683_v53  ;;  %v10072_v53 = vsel %vm8362_vm5, %v6765_v43, %v4983_v23  ;;  %v7745_v17 = vld [vmem:[%s10395_s1 + $0x10f4] ss:$8 sps:$4 sm:$0xff]   ;;  %v7749_v25 = vld [vmem:[%s10395_s1 + $0x10e0] ss:$8 sps:$4 sm:$0xff]  }
 0x206   : > { %4917 = vmatpush2.bf16.msra.mxu1 %v7686_v48  ;;  %4865 = vmatprep.subr.bf16.mxu0 %v7691_v11  ;;  %v10076_v48 = vsel %vm8362_vm5, %v6764_v55, %v4979_v34  ;;  %v10080_v11 = vsel %vm8362_vm5, %v6766_v37, %v4987_v49  ;;  %v6836_v63 = vcombine.high %v10068_v54, %v10072_v53  ;;  %v7748_v61 = vld [vmem:[%s10395_s1 + $0x11f4] ss:$8 sps:$4 sm:$0xff]   ;;  %v7752_v5 = vld [vmem:[%s10395_s1 + $0x11e0] ss:$8 sps:$4 sm:$0xff]   ;;  %v7755_v55 = vld [vmem:[%s10395_s1 + $0x10d0] ss:$8 sps:$4 sm:$0xff]  }
 0x207   : > { %4918 = vmatprep.subr.bf16.mxu1 %v7694_v12  ;;  %v7707_v12 = vld [vmem:[%s10395_s1 + $0x1050] ss:$8 sps:$4 sm:$0xff]   ;;  %v6838_v8 = vcombine.high %v10076_v48, %v10080_v11  ;;  %v7757_v43 = vld [vmem:[%s10395_s1 + $0x10d4] ss:$8 sps:$4 sm:$0xff]   ;;  %v7763_v37 = vld [vmem:[%s10395_s1 + $0x10c4] ss:$8 sps:$4 sm:$0xff]  }
 0x208   : > { %v7760_v23 = vld [vmem:[%s10395_s1 + $0x11d4] ss:$8 sps:$4 sm:$0xff]   ;;  %v7758_v34 = vld [vmem:[%s10395_s1 + $0x11d0] ss:$8 sps:$4 sm:$0xff]   ;;  %v7766_v49 = vld [vmem:[%s10395_s1 + $0x11c4] ss:$8 sps:$4 sm:$0xff]  }
 0x209   : > { %4866 = vmatpush2.bf16.msra.mxu0 %v7689_v7  ;;  %v7719_v7 = vld [vmem:[%s10395_s1 + $0x1030] ss:$8 sps:$4 sm:$0xff]  }
 0x20a   : > { %4919 = vmatpush2.bf16.msra.mxu1 %v7692_v36  ;;  %5422 = vmatprep.subr.bf16.mxu0 %v7697_v42  ;;  %v7722_v36 = vld [vmem:[%s10395_s1 + $0x1130] ss:$8 sps:$4 sm:$0xff]   ;;  %v7727_v42 = vld [vmem:[%s10395_s1 + $0x1024] ss:$8 sps:$4 sm:$0xff]  }
 0x20b   : > { %5475 = vmatprep.subr.bf16.mxu1 %v7700_v27  ;;  %v7730_v27 = vld [vmem:[%s10395_s1 + $0x1124] ss:$8 sps:$4 sm:$0xff]  }
 0x20c   : > { %4868 = vmatmul.mubr.bf16.vlgmr.msra.gmra.mxu0 %v6683_v50  ;;  %v7731_v50 = vld [vmem:[%s10395_s1 + $0x1010] ss:$8 sps:$4 sm:$0xff]  }
 0x20d   : > { %4921 = vmatmul.mubr.bf16.vlgmr.msra.gmra.mxu1 %v6685_v44  ;;  %5423 = vmatpush1.bf16.msra.mxu0 %v7695_v60  ;;  %v7734_v44 = vld [vmem:[%s10395_s1 + $0x1110] ss:$8 sps:$4 sm:$0xff]   ;;  %v7739_v60 = vld [vmem:[%s10395_s1 + $0x1004] ss:$8 sps:$4 sm:$0xff]  }
 0x20e   : > { %5476 = vmatpush1.bf16.msra.mxu1 %v7698_v21  ;;  %5424 = vmatprep.subr.bf16.mxu0 %v7703_v35  ;;  %v7740_v21 = vld [vmem:[%s10395_s1 + $0x1100] ss:$8 sps:$4 sm:$0xff]   ;;  %v7743_v35 = vld [vmem:[%s10395_s1 + $0x10f0] ss:$8 sps:$4 sm:$0xff]  }
 0x20f   : > { %5477 = vmatprep.subr.bf16.mxu1 %v7706_v20  ;;  %4877 = vmatprep.mubr.bf16.mxu0 %v6688_v30  ;;  %v7746_v20 = vld [vmem:[%s10395_s1 + $0x11f0] ss:$8 sps:$4 sm:$0xff]   ;;  %v7751_v30 = vld [vmem:[%s10395_s1 + $0x10e4] ss:$8 sps:$4 sm:$0xff]  }
 0x210   : > { %4930 = vmatprep.mubr.bf16.mxu1 %v6690_v46  ;;  %v7754_v46 = vld [vmem:[%s10395_s1 + $0x11e4] ss:$8 sps:$4 sm:$0xff]  }
 0x211   : > { %5425 = vmatpush1.bf16.msra.mxu0 %v7701_v33  ;;  %v7761_v33 = vld [vmem:[%s10395_s1 + $0x10c0] ss:$8 sps:$4 sm:$0xff]  }
 0x212   : > { %5478 = vmatpush1.bf16.msra.mxu1 %v7704_v51  ;;  %5426 = vmatprep.subr.bf16.mxu0 %v7709_v2  ;;  %v7764_v51 = vld [vmem:[%s10395_s1 + $0x11c0] ss:$8 sps:$4 sm:$0xff]   ;;  %v7769_v2 = vld [vmem:[%s10395_s1 + $0x10b4] ss:$8 sps:$4 sm:$0xff]  }
 0x213   : > { %5479 = vmatprep.subr.bf16.mxu1 %v7712_v39  ;;  %v7772_v39 = vld [vmem:[%s10395_s1 + $0x11b4] ss:$8 sps:$4 sm:$0xff]  }
 0x214   : > { %4878 = vmatmul.mubr.bf16.gmra.mxu0 %v6687_v26  ;;  %v7767_v26 = vld [vmem:[%s10395_s1 + $0x10b0] ss:$8 sps:$4 sm:$0xff]  }
 0x215   : > { %4931 = vmatmul.mubr.bf16.gmra.mxu1 %v6689_v52  ;;  %5427 = vmatpush1.bf16.msra.mxu0 %v7707_v12  ;;  %v7770_v52 = vld [vmem:[%s10395_s1 + $0x11b0] ss:$8 sps:$4 sm:$0xff]   ;;  %v7775_v12 = vld [vmem:[%s10395_s1 + $0x10a4] ss:$8 sps:$4 sm:$0xff]  }
 0x216   : > { %5480 = vmatpush1.bf16.msra.mxu1 %v7710_v1  ;;  %5428 = vmatprep.subr.bf16.mxu0 %v7715_v47  ;;  %v7778_v1 = vld [vmem:[%s10395_s1 + $0x11a4] ss:$8 sps:$4 sm:$0xff]   ;;  %v7773_v47 = vld [vmem:[%s10395_s1 + $0x10a0] ss:$8 sps:$4 sm:$0xff]  }
 0x217   : > { %5481 = vmatprep.subr.bf16.mxu1 %v7718_v59  ;;  %5454 = vmatprep.mubr.bf16.mxu0 %v6836_v63  ;;  %v7776_v59 = vld [vmem:[%s10395_s1 + $0x11a0] ss:$8 sps:$4 sm:$0xff]   ;;  %v7781_v63 = vld [vmem:[%s10395_s1 + $0x1094] ss:$8 sps:$4 sm:$0xff]  }
 0x218   : > { %5507 = vmatprep.mubr.bf16.mxu1 %v6838_v8  ;;  %v7784_v8 = vld [vmem:[%s10395_s1 + $0x1194] ss:$8 sps:$4 sm:$0xff]  }
 0x219   : > { %5429 = vmatpush1.bf16.msra.mxu0 %v7713_v56  ;;  %v7779_v56 = vld [vmem:[%s10395_s1 + $0x1090] ss:$8 sps:$4 sm:$0xff]  }
 0x21a   : > { %5482 = vmatpush1.bf16.msra.mxu1 %v7716_v19  ;;  %5430 = vmatprep.subr.bf16.mxu0 %v7721_v13  ;;  %v7782_v19 = vld [vmem:[%s10395_s1 + $0x1190] ss:$8 sps:$4 sm:$0xff]   ;;  %v7787_v13 = vld [vmem:[%s10395_s1 + $0x1084] ss:$8 sps:$4 sm:$0xff]  }
 0x21b   : > { %5483 = vmatprep.subr.bf16.mxu1 %v7724_v16  ;;  %v7790_v16 = vld [vmem:[%s10395_s1 + $0x1184] ss:$8 sps:$4 sm:$0xff]  }
 0x21d   : > { %5431 = vmatpush1.bf16.msra.mxu0 %v7719_v7  ;;  %v7785_v7 = vld [vmem:[%s10395_s1 + $0x1080] ss:$8 sps:$4 sm:$0xff]  }
 0x21e   : > { %5484 = vmatpush1.bf16.msra.mxu1 %v7722_v36  ;;  %5432 = vmatprep.subr.bf16.mxu0 %v7727_v42  ;;  %v7788_v36 = vld [vmem:[%s10395_s1 + $0x1180] ss:$8 sps:$4 sm:$0xff]   ;;  %v6835_v42 = vcombine.low %v10068_v54, %v10072_v53  ;;  %v3075_v54 = vpop.f32.mrf.mxu0  ;;  %v3128_v53 = vpop.f32.mrf.mxu1 }
 0x21f   : > { %5485 = vmatprep.subr.bf16.mxu1 %v7730_v27  ;;  %v6837_v27 = vcombine.low %v10076_v48, %v10080_v11 }
 0x220   : > { %v3077_v48 = vpop.f32.mrf.mxu0  ;;  %v3130_v11 = vpop.f32.mrf.mxu1 }
 0x221   : > { %5433 = vmatpush1.bf16.msra.mxu0 %v7725_v58 }
 0x222   : > { %5486 = vmatpush1.bf16.msra.mxu1 %v7728_v14  ;;  %5434 = vmatprep.subr.bf16.mxu0 %v7733_v18  ;;  %v3079_v58 = vpop.f32.mrf.mxu0  ;;  %v3132_v14 = vpop.f32.mrf.mxu1 }
 0x223   : > { %5487 = vmatprep.subr.bf16.mxu1 %v7736_v6 }
 0x224   : > { %v3081_v18 = vpop.f32.mrf.mxu0 }
 0x225   : > { %5435 = vmatpush1.bf16.msra.mxu0 %v7731_v50 }
 0x226   : > { %5488 = vmatpush1.bf16.msra.mxu1 %v7734_v44  ;;  %5436 = vmatprep.subr.bf16.mxu0 %v7739_v60  ;;  %v3085_v6 = vpop.f32.mrf.mxu0 }
 0x227   : > { %5489 = vmatprep.subr.bf16.mxu1 %v7742_v3 }
 0x228   : > { %v3087_v44 = vpop.f32.mrf.mxu0 }
 0x229   : > { %5437 = vmatpush1.bf16.msra.mxu0 %v7737_v22 }
 0x22a   : > { %5490 = vmatpush1.bf16.msra.mxu1 %v7740_v21  ;;  %5438 = vmatprep.subr.bf16.mxu0 %v7745_v17  ;;  %v3089_v60 = vpop.f32.mrf.mxu0 }
 0x22b   : > { %5491 = vmatprep.subr.bf16.mxu1 %v7748_v61 }
 0x22c   : > { %v3091_v4 = vpop.f32.mrf.mxu0 }
 0x22d   : > { %5439 = vmatpush2.bf16.msra.mxu0 %v7743_v35 }
 0x22e   : > { %5492 = vmatpush2.bf16.msra.mxu1 %v7746_v20  ;;  %5440 = vmatprep.subr.bf16.mxu0 %v7751_v30 }
 0x22f   : > { %5493 = vmatprep.subr.bf16.mxu1 %v7754_v46 }
 0x231   : > { %5441 = vmatpush2.bf16.msra.mxu0 %v7749_v25 }
 0x232   : > { %5494 = vmatpush2.bf16.msra.mxu1 %v7752_v5  ;;  %5442 = vmatprep.subr.bf16.mxu0 %v7757_v43 }
 0x233   : > { %5495 = vmatprep.subr.bf16.mxu1 %v7760_v23 }
 0x235   : > { %5443 = vmatpush2.bf16.msra.mxu0 %v7755_v55 }
 0x236   : > { %5496 = vmatpush2.bf16.msra.mxu1 %v7758_v34  ;;  %5444 = vmatprep.subr.bf16.mxu0 %v7763_v37 }
 0x237   : > { %5497 = vmatprep.subr.bf16.mxu1 %v7766_v49 }
 0x239   : > { %5445 = vmatpush2.bf16.msra.mxu0 %v7761_v33 }
 0x23a   : > { %5498 = vmatpush2.bf16.msra.mxu1 %v7764_v51  ;;  %5446 = vmatprep.subr.bf16.mxu0 %v7769_v2 }
 0x23b   : > { %5499 = vmatprep.subr.bf16.mxu1 %v7772_v39 }
 0x23d   : > { %5447 = vmatpush2.bf16.msra.mxu0 %v7767_v26 }
 0x23e   : > { %5500 = vmatpush2.bf16.msra.mxu1 %v7770_v52  ;;  %5448 = vmatprep.subr.bf16.mxu0 %v7775_v12 }
 0x23f   : > { %5501 = vmatprep.subr.bf16.mxu1 %v7778_v1 }
 0x241   : > { %5449 = vmatpush2.bf16.msra.mxu0 %v7773_v47 }
 0x242   : > { %5502 = vmatpush2.bf16.msra.mxu1 %v7776_v59  ;;  %5450 = vmatprep.subr.bf16.mxu0 %v7781_v63 }
 0x243   : > { %5503 = vmatprep.subr.bf16.mxu1 %v7784_v8 }
 0x245   : > { %5451 = vmatpush2.bf16.msra.mxu0 %v7779_v56 }
 0x246   : > { %5504 = vmatpush2.bf16.msra.mxu1 %v7782_v19  ;;  %5452 = vmatprep.subr.bf16.mxu0 %v7787_v13 }
 0x247   : > { %5505 = vmatprep.subr.bf16.mxu1 %v7790_v16 }
 0x249   : > { %5453 = vmatpush2.bf16.msra.mxu0 %v7785_v7 }
 0x24a   : > { %5506 = vmatpush2.bf16.msra.mxu1 %v7788_v36 }
 0x24c   : > { %5455 = vmatmul.mubr.bf16.vlgmr.msra.gmra.mxu0 %v6835_v42 }
 0x24d   : > { %5508 = vmatmul.mubr.bf16.vlgmr.msra.gmra.mxu1 %v6837_v27  ;;  %5464 = vmatprep.mubr.bf16.mxu0 %v6840_v28  ;;  %v3134_v28 = vpop.f32.mrf.mxu1 }
 0x24e   : > { %5517 = vmatprep.mubr.bf16.mxu1 %v6842_v38 }
 0x24f   : > { %v3138_v50 = vpop.f32.mrf.mxu1 }
 0x251   : > { %v3140_v38 = vpop.f32.mrf.mxu1 }
 0x253   : > { %v3142_v3 = vpop.f32.mrf.mxu1 }
 0x254   : > { %5465 = vmatmul.mubr.bf16.gmra.mxu0 %v6839_v57  ;;  %v3662_v57 = vpop.f32.mrf.mxu0 }
 0x255   : > { %5518 = vmatmul.mubr.bf16.gmra.mxu1 %v6841_v31  ;;  %v3144_v62 = vpop.f32.mrf.mxu1 }
 0x256   : > { %v3664_v41 = vpop.f32.mrf.mxu0 }
 0x257   : > { %v3715_v22 = vpop.f32.mrf.mxu1 }
 0x258   : > { %v3666_v31 = vpop.f32.mrf.mxu0 }
 0x259   : > { %v3717_v24 = vpop.f32.mrf.mxu1 }
 0x25a   : > { %v3668_v17 = vpop.f32.mrf.mxu0 }
 0x25b   : > { %v3719_v21 = vpop.f32.mrf.mxu1 }
 0x25c   : > { %v3672_v35 = vpop.f32.mrf.mxu0 }
 0x25d   : > { %v3721_v61 = vpop.f32.mrf.mxu1 }
 0x25e   : > { %v10264_v30 = vpop.f32.mrf.mxu0 }
 0x25f   : > { %v3725_v20 = vpop.f32.mrf.mxu1 }
 0x260   : > { %v10268_v25 = vpop.f32.mrf.mxu0 }
 0x261   : > { %v10266_v46 = vpop.f32.mrf.mxu1 }
 0x262   : > { %v10272_v43 = vpop.f32.mrf.mxu0 }
 0x263   : > { %v10270_v5 = vpop.f32.mrf.mxu1  ;;  %10403 = vst [vmem:[#allocation3_spill] sm:$0xff] %v10272_v43  ;;  %v3135_v43 = vadd.f32 %v3134_v28, %v3081_v18  ;;  %v3720_v18 = vadd.f32 %v3719_v21, %v3666_v31  ;;  %v3722_v28 = vadd.f32 %v3721_v61, %v3668_v17 }
 0x264   : > { %10402 = vst [vmem:[#allocation2_spill] sm:$0xff] %v10270_v5 }
 0x265   : > { %v10274_v23 = vpop.f32.mrf.mxu1 }
 0x266   : > { %10404 = vst [vmem:[#allocation4_spill] sm:$0xff] %v10274_v23  ;;  %v3131_v23 = vadd.f32 %v3130_v11, %v3077_v48  ;;  %v3718_v48 = vadd.f32 %v3717_v24, %v3664_v41 }
 0x26b   : > { %v10420_v21 = vld [vmem:[#allocation2_spill] sm:$0xff] }
 0x26c   : > { %v3730_v17 = vadd.f32 %v10420_v21, %v10268_v25 }
 0x28c   : > { %v4210_v55 = vpop.f32.mrf.mxu0 }
 0x28d   : > { %v4263_v34 = vpop.f32.mrf.mxu1 }
 0x28e   : > { %v4212_v37 = vpop.f32.mrf.mxu0 }
 0x28f   : > { %v4265_v49 = vpop.f32.mrf.mxu1 }
 0x290   : > { %v4214_v33 = vpop.f32.mrf.mxu0 }
 0x291   : > { %v4267_v51 = vpop.f32.mrf.mxu1 }
 0x292   : > { %v10276_v2 = vpop.f32.mrf.mxu0 }
 0x293   : > { %10405 = vst [vmem:[#allocation5_spill] sm:$0xff] %v10276_v2  ;;  %v10278_v39 = vpop.f32.mrf.mxu1  ;;  %v3143_v2 = vadd.f32 %v3142_v3, %v3089_v60 }
 0x294   : > { %10406 = vst [vmem:[#allocation6_spill] sm:$0xff] %v10278_v39  ;;  %v10280_v26 = vpop.f32.mrf.mxu0  ;;  %v3141_v39 = vadd.f32 %v3140_v38, %v3087_v44  ;;  %v3726_v44 = vadd.f32 %v3725_v20, %v3672_v35  ;;  %v4266_v38 = vadd.f32 %v4265_v49, %v4212_v37 }
 0x295   : > { %10407 = vst [vmem:[#allocation7_spill] sm:$0xff] %v10280_v26  ;;  %v10282_v52 = vpop.f32.mrf.mxu1  ;;  %v3139_v26 = vadd.f32 %v3138_v50, %v3085_v6  ;;  %v4264_v6 = vadd.f32 %v4263_v34, %v4210_v55  ;;  %v3153_v50 = vadd.f32 %v3143_v2, %v9873_v29 }
 0x296   : > { %10408 = vst [vmem:[#allocation8_spill] sm:$0xff] %v10282_v52  ;;  %v10284_v12 = vpop.f32.mrf.mxu0 }
 0x297   : > { %10409 = vst [vmem:[#allocation9_spill] sm:$0xff] %v10284_v12  ;;  %v10286_v1 = vpop.f32.mrf.mxu1 }
 0x298   : > { %10410 = vst [vmem:[#allocation10_spill] sm:$0xff] %v10286_v1  ;;  %v10288_v47 = vpop.f32.mrf.mxu0 }
 0x299   : > { %10411 = vst [vmem:[#allocation11_spill] sm:$0xff] %v10288_v47  ;;  %v10290_v59 = vpop.f32.mrf.mxu1  ;;  %v5538_v47 = vlaneseq }
 0x29a   : > { %10412 = vst [vmem:[#allocation12_spill] sm:$0xff] %v10290_v59  ;;  %v10292_v63 = vpop.f32.mrf.mxu0  ;;  %v3129_v59 = vadd.f32 %v3128_v53, %v3075_v54  ;;  %v3150_v53 = vadd.f32 %v3135_v43, %v9834_v10  ;;  %v10421_v61 = vld [vmem:[#allocation5_spill] sm:$0xff] }
 0x29b   : > { %10413 = vst [vmem:[#allocation13_spill] sm:$0xff] %v10292_v63  ;;  %v10294_v8 = vpop.f32.mrf.mxu1  ;;  %v3133_v63 = vadd.f32 %v3132_v14, %v3079_v58  ;;  %v5539_v5 = vshrl.u32 %v5538_v47, 7  ;;  %v3151_v14 = vadd.f32 %v3139_v26, %v9849_v40  ;;  %v5536_v40 = vld [vmem:[%s10396_s2] sm:$0x3] }
 0x29c   : > { %10414 = vst [vmem:[#allocation14_spill] sm:$0xff] %v10294_v8  ;;  %v10422_v35 = vld [vmem:[#allocation6_spill] sm:$0xff] }
 0x29d   : > { %v3149_v54 = vadd.f32 %v3133_v63, %v9827_v9  ;;  %v3738_v31 = vadd.f32 %v3726_v44, %v3151_v14  ;;  %v4270_v20 = vadd.f32 %v10422_v35, %v10421_v61 }
 0x29e   : > { %v10431_v44 = vld [vmem:[#allocation9_spill] sm:$0xff] }
 0x2cc   : > { %v4869_v56 = vpop.f32.mrf.mxu0 }
 0x2cd   : > { %v4922_v19 = vpop.f32.mrf.mxu1 }
 0x2ce   : > { %v4871_v13 = vpop.f32.mrf.mxu0  ;;  %v4923_v60 = vadd.f32 %v4922_v19, %v4869_v56  ;;  %v3740_v19 = vadd.f32 %v3730_v17, %v3153_v50  ;;  %v10433_v50 = vld [vmem:[#allocation11_spill] sm:$0xff] }
 0x2cf   : > { %v4924_v16 = vpop.f32.mrf.mxu1 }
 0x2d0   : > { %v4873_v7 = vpop.f32.mrf.mxu0  ;;  %v4925_v24 = vadd.f32 %v4924_v16, %v4871_v13  ;;  %v10427_v13 = vld [vmem:[#allocation3_spill] sm:$0xff]  ;;  %v10428_v16 = vld [vmem:[#allocation4_spill] sm:$0xff] }
 0x2d1   : > { %v4926_v36 = vpop.f32.mrf.mxu1 }
 0x2d2   : > { %v10296_v42 = vpop.f32.mrf.mxu0  ;;  %v4927_v55 = vadd.f32 %v4926_v36, %v4873_v7  ;;  %v3732_v7 = vadd.f32 %v10428_v16, %v10427_v13 }
 0x2d3   : > { %10415 = vst [vmem:[#allocation15_spill] sm:$0xff] %v10296_v42  ;;  %v10298_v27 = vpop.f32.mrf.mxu1  ;;  %v3147_v42 = vadd.f32 %v3129_v59, %v9784_v32  ;;  %v3152_v32 = vadd.f32 %v3141_v39, %v9858_v45  ;;  %v3728_v45 = vadd.f32 %v10266_v46, %v10264_v30 }
 0x2d4   : > { %10416 = vst [vmem:[#allocation16_spill] sm:$0xff] %v10298_v27  ;;  %v10300_v12 = vpop.f32.mrf.mxu0  ;;  %v3145_v27 = vadd.f32 %v3144_v62, %v3091_v4  ;;  %v4268_v4 = vadd.f32 %v4267_v51, %v4214_v33  ;;  %v10423_v33 = vld [vmem:[#allocation7_spill] sm:$0xff]  ;;  %v10424_v51 = vld [vmem:[#allocation8_spill] sm:$0xff] }
 0x2d5   : > { %10417 = vst [vmem:[#allocation17_spill] sm:$0xff] %v10300_v12  ;;  %v10302_v1 = vpop.f32.mrf.mxu1  ;;  %v3716_v12 = vadd.f32 %v3715_v22, %v3662_v57  ;;  %v5544_v57 = vsub.s32 1, %v5539_v5  ;;  %v3736_v22 = vadd.f32 %v3720_v18, %v3149_v54  ;;  %v3739_v37 = vadd.f32 %v3728_v45, %v3152_v32 }
 0x2d6   : > { %10418 = vst [vmem:[#allocation18_spill] sm:$0xff] %v10302_v1  ;;  %v10304_v8 = vpop.f32.mrf.mxu0  ;;  %v3148_v1 = vadd.f32 %v3131_v23, %v9800_v0  ;;  %v5540_v0 = vsub.s32 0, %v5539_v5  ;;  %v10321_v9 = vadd.f32 %v3145_v27, %v9876_v15  ;;  %v3737_v15 = vadd.f32 %v3722_v28, %v3150_v53 }
 0x2d7   : > { %v10306_v52 = vpop.f32.mrf.mxu1  ;;  %v3734_v10 = vadd.f32 %v3716_v12, %v3147_v42  ;;  %v4284_v49 = vadd.f32 %v4268_v4, %v3736_v22  ;;  %v4274_v2 = vadd.f32 %v10424_v51, %v10423_v33  ;;  %v10346_v26 = vrot.slane %v5536_v40, %v5544_v57 }
 0x2d8   : > { %v10312_v11 = vpop.f32.mrf.mxu0  ;;  %v3735_v3 = vadd.f32 %v3718_v48, %v3148_v1  ;;  %v10342_v5 = vrot.slane %v5536_v40, %v5540_v0  ;;  %v4285_v36 = vadd.f32 %v4270_v20, %v3737_v15  ;;  %v10432_v0 = vld [vmem:[#allocation10_spill] sm:$0xff]  ;;  %v10435_v40 = vld [vmem:[#allocation13_spill] sm:$0xff] }
 0x2d9   : > { %v10314_v58 = vpop.f32.mrf.mxu1  ;;  %v4282_v41 = vadd.f32 %v4264_v6, %v3734_v10  ;;  %v4943_v14 = vadd.f32 %v4927_v55, %v4284_v49  ;;  %v4286_v32 = vadd.f32 %v4274_v2, %v3738_v31  ;;  %v4276_v10 = vadd.f32 %v10432_v0, %v10431_v44 }
 0x2da   : > { %v10328_v29 = vpop.f32.mrf.mxu0  ;;  %v4283_v43 = vadd.f32 %v4266_v38, %v3735_v3  ;;  %v10425_v1 = vld [vmem:[#allocation15_spill] sm:$0xff]  ;;  %v10434_v38 = vld [vmem:[#allocation12_spill] sm:$0xff]  ;;  %v10436_v3 = vld [vmem:[#allocation14_spill] sm:$0xff]  ;;  %v4935_v31 = vadd.f32 %v10306_v52, %v10304_v8  ;;  %v4937_v17 = vadd.f32 %v10314_v58, %v10312_v11  ;;  %v3741_v55 = vadd.f32 %v3732_v7, %v10321_v9 }
 0x2db   : > { %v10330_v62 = vpop.f32.mrf.mxu1  ;;  %v4941_v23 = vadd.f32 %v4923_v60, %v4282_v41  ;;  %v10426_v47 = vld [vmem:[#allocation16_spill] sm:$0xff]  ;;  %v4278_v60 = vadd.f32 %v10434_v38, %v10433_v50  ;;  %v4280_v45 = vadd.f32 %v10436_v3, %v10435_v40 }
 0x2dc   : > { %v4942_v12 = vadd.f32 %v4925_v24, %v4283_v43  ;;  %v4929_v59 = vadd.f32 %v10426_v47, %v10425_v1  ;;  %v10429_v42 = vld [vmem:[#allocation17_spill] sm:$0xff]  ;;  %v4939_v11 = vadd.f32 %v10330_v62, %v10328_v29 }
 0x2dd   : > { %v10430_v27 = vld [vmem:[#allocation18_spill] sm:$0xff]  ;;  %v4288_v49 = vadd.f32 %v4278_v60, %v3740_v19  ;;  %v4289_v2 = vadd.f32 %v4280_v45, %v3741_v55 }
 0x2de   : > { %v4933_v54 = vadd.f32 %v10430_v27, %v10429_v42  ;;  %v4944_v22 = vadd.f32 %v4929_v59, %v4285_v36 }
 0x2df   : > { %v4948_v62 = vadd.f32 %v4939_v11, %v4289_v2 }
 0x2e0   : > { %v4945_v21 = vadd.f32 %v4933_v54, %v4286_v32 }
 0x30c   : > { %v5456_v30 = vpop.f32.mrf.mxu0 }
 0x30d   : > { %v5509_v46 = vpop.f32.mrf.mxu1 }
 0x30e   : > { %v5510_v34 = vadd.f32 %v5509_v46, %v5456_v30  ;;  %v5458_v39 = vpop.f32.mrf.mxu0 }
 0x30f   : > { %v5511_v25 = vpop.f32.mrf.mxu1 }
 0x310   : > { %v5528_v63 = vadd.f32 %v5510_v34, %v4941_v23  ;;  %v5512_v56 = vadd.f32 %v5511_v25, %v5458_v39  ;;  %v5460_v53 = vpop.f32.mrf.mxu0  ;;  %v4287_v34 = vadd.f32 %v4276_v10, %v3739_v37 }
 0x311   : > { %v5513_v48 = vpop.f32.mrf.mxu1 }
 0x312   : > { %v5548_v18 = vadd.f32 %v10342_v5, %v5528_v63  ;;  %v5529_v28 = vadd.f32 %v5512_v56, %v4942_v12  ;;  %v5514_v6 = vadd.f32 %v5513_v48, %v5460_v53  ;;  %v5462_v4 = vpop.f32.mrf.mxu0  ;;  %v4946_v39 = vadd.f32 %v4935_v31, %v4287_v34 }
 0x313   : > { %v5515_v57 = vpop.f32.mrf.mxu1  ;;  %v4947_v12 = vadd.f32 %v4937_v17, %v4288_v49 }
 0x314   : > { %v5549_v15 = vadd.f32 %v10346_v26, %v5529_v28  ;;  %v5530_v41 = vadd.f32 %v5514_v6, %v4943_v14  ;;  %v5516_v24 = vadd.f32 %v5515_v57, %v5462_v4  ;;  %v5556_v61 = vmax.f32 %v5548_v18, 0.0  ;;  %v5466_v35 = vpop.f32.mrf.mxu0 }
 0x315   : > { %v5519_v20 = vpop.f32.mrf.mxu1 }
 0x316   : > { %v5557_v30 = vmax.f32 %v5549_v15, 0.0  ;;  %v5550_v46 = vadd.f32 %v10342_v5, %v5530_v41  ;;  %v5531_v43 = vadd.f32 %v5516_v24, %v4944_v22  ;;  %v5520_v23 = vadd.f32 %v5519_v20, %v5466_v35  ;;  %v5468_v52 = vpop.f32.mrf.mxu0 }
 0x317   : > { %v5521_v8 = vpop.f32.mrf.mxu1 }
 0x318   : > { %v6914_v58 = vpack.c.bf16 %v5557_v30, %v5556_v61  ;;  %v5551_v33 = vadd.f32 %v10346_v26, %v5531_v43  ;;  %v5532_v51 = vadd.f32 %v5520_v23, %v4945_v21  ;;  %v5522_v9 = vadd.f32 %v5521_v8, %v5468_v52  ;;  %v5470_v37 = vpop.f32.mrf.mxu0 }
 0x319   : > { %v5523_v25 = vpop.f32.mrf.mxu1  ;;  %v5558_v1 = vmax.f32 %v5550_v46, 0.0 }
 0x31a   : > { %5588 = vst [vmem:[%s10378_s16] sm:$0xff] %v6914_v58  ;;  %v5559_v47 = vmax.f32 %v5551_v33, 0.0  ;;  %v5524_v59 = vadd.f32 %v5523_v25, %v5470_v37  ;;  %v5552_v63 = vadd.f32 %v10342_v5, %v5532_v51  ;;  %v5533_v56 = vadd.f32 %v5522_v9, %v4946_v39  ;;  %v5472_v19 = vpop.f32.mrf.mxu0 }
 0x31b   : > { %v5525_v29 = vpop.f32.mrf.mxu1 }
 0x31c   : > { %v6915_v13 = vpack.c.bf16 %v5559_v47, %v5558_v1  ;;  %v5534_v16 = vadd.f32 %v5524_v59, %v4947_v12  ;;  %v5526_v7 = vadd.f32 %v5525_v29, %v5472_v19  ;;  %v5553_v36 = vadd.f32 %v10346_v26, %v5533_v56 }
 0x31d   : > { %v5560_v54 = vmax.f32 %v5552_v63, 0.0 }
 0x31e   : > { %5589 = vst [vmem:[%s10378_s16 + $0x8] sm:$0xff] %v6915_v13  ;;  %v5554_v42 = vadd.f32 %v10342_v5, %v5534_v16  ;;  %v5535_v27 = vadd.f32 %v5526_v7, %v4948_v62  ;;  %v5561_v53 = vmax.f32 %v5553_v36, 0.0 }
 0x320   : > { %v5555_v48 = vadd.f32 %v10346_v26, %v5535_v27  ;;  %v6916_v14 = vpack.c.bf16 %v5561_v53, %v5560_v54  ;;  %v5562_v18 = vmax.f32 %v5554_v42, 0.0 }
 0x322   : > { %v5563_v28 = vmax.f32 %v5555_v48, 0.0  ;;  %5590 = vst [vmem:[%s10378_s16 + $0x10] sm:$0xff] %v6916_v14 }
 0x324   : > { %v6917_v6 = vpack.c.bf16 %v5563_v28, %v5562_v18 }
 0x326   : > { %5591 = vst [vmem:[%s10378_s16 + $0x18] sm:$0xff] %v6917_v6 }
 0x327 PF: > { %s13_s12 = sadd.s32 1, %s7797_s12  }
 0x328   : > { %p10_p5 = scmp.ge.s32.totalorder %s13_s12, 4  }
 0x32a   :  { %12 = sbr.rel (!%p10_p5) target bundleno = 1 (0x1), region = 72 }

</bundles_post_ra>
